<compile_context>
chip_gen: v7x
topology: tpu7x:2x2x1
jax: 0.10.0
libtpu: 0.0.40
codegen_flags: <defaults>
</compile_context>

<pallas_src>
import jax
import jax.numpy as jnp
from jax.experimental import pallas as pl
from jax.experimental.pallas import tpu as pltpu

NUM_CLASSES = 100
_CONV_B = 8                      # images per conv-kernel grid step


# ----------------------------- Pallas kernels -------------------------------

def _conv_stack_kernel(xcol_ref, w1_ref, b1_ref, w2m_ref, w2t_ref, b2_ref,
                       out_ref, y1s, pooled):
    """Block of B images: conv1(5x5)+ReLU -> maxpool(2x2,2) -> conv2(5x5)+ReLU.

    xcol_ref : (B, 784, 128) bf16  conv1 im2col, row = oh*28+ow,
                                   lane = (kh*5+kw)*3 + cin (75 real, rest 0)
    w1_ref   : (128, 128)  bf16    conv1 weights [patch_lane, cout_pad]
    b1_ref   : (1, 128)    f32
    w2m_ref  : (5, 128, 128) bf16  conv2 kw=0..3 packed: [kh, 32*kw+cin, cout]
    w2t_ref  : (5, 32, 128)  bf16  conv2 kw=4 tap:       [kh, cin, cout]
    b2_ref   : (1, 128)    f32
    out_ref  : (B, 140, 128) bf16  conv2+ReLU, row p = oh*14+ow (ow<10 valid)
    y1s      : (784, 128) f32      per-image conv1+ReLU map (reused per image)
    pooled   : (208, 128) f32      per-image pooled map with 4 lane-packed
                                   kw-shifts: pooled[p, 32*t+c] = pool[p+t, c]
    """
    B = xcol_ref.shape[0]

    # Only the never-written tail cells that conv2's shifted reads can touch
    # are cleared (instead of a full zero-fill); they stay 0 for every image.
    pooled[pl.ds(192, 16), :] = jnp.zeros((16, 128), jnp.float32)

    @pl.loop(0, B)
    def _(b):
        # ---- conv1 + ReLU: single lane-dense K=128 MXU matmul -------------
        y1s[...] = jnp.maximum(
            jnp.dot(xcol_ref[b], w1_ref[...],
                    preferred_element_type=jnp.float32) + b1_ref[...], 0.0)

        # ---- 2x2 / stride-2 max pool, written as 4 lane-shifted copies ----
        # (so conv2 can consume 4 kw-taps per 128-lane matmul operand)
        for i in range(14):
            r = 56 * i
            q = jnp.maximum(
                jnp.maximum(y1s[pl.ds(r, 14, stride=2), :],
                            y1s[pl.ds(r + 1, 14, stride=2), :]),
                jnp.maximum(y1s[pl.ds(r + 28, 14, stride=2), :],
                            y1s[pl.ds(r + 29, 14, stride=2), :]))
            q = q[:, :32]                       # channels 30,31 are exactly 0
            base = 14 * i
            for t in range(4):
                if i == 0:                       # rows p-t < 0 don't exist
                    pooled[pl.ds(0, 14 - t), pl.ds(32 * t, 32)] = q[t:, :]
                else:
                    pooled[pl.ds(base - t, 14), pl.ds(32 * t, 32)] = q

        # ---- conv2 + ReLU: per kh one K=128 (packed kw 0..3) + one K=32 ----
        # (kw=4) matmul, chained f32 register accumulation (no VMEM RMW).
        acc = jnp.dot(pooled[pl.ds(0, 140), :].astype(jnp.bfloat16),
                      w2m_ref[0], preferred_element_type=jnp.float32)
        acc = acc + jnp.dot(
            pooled[pl.ds(4, 140), pl.ds(0, 32)].astype(jnp.bfloat16),
            w2t_ref[0], preferred_element_type=jnp.float32)
        for kh in range(1, 5):
            acc = acc + jnp.dot(
                pooled[pl.ds(14 * kh, 140), :].astype(jnp.bfloat16),
                w2m_ref[kh], preferred_element_type=jnp.float32)
            acc = acc + jnp.dot(
                pooled[pl.ds(14 * kh + 4, 140), pl.ds(0, 32)].astype(jnp.bfloat16),
                w2t_ref[kh], preferred_element_type=jnp.float32)

        out_ref[b] = jnp.maximum(acc + b2_ref[...], 0.0).astype(out_ref.dtype)


def _fc_stack_kernel(h_ref, fw1_ref, fb1_ref, fw2_ref, fb2_ref, out_ref):
    """fc1 + ReLU + fc2 for one batch tile; 128-lane (zero-padded) outputs."""
    a = jnp.dot(h_ref[...], fw1_ref[...], preferred_element_type=jnp.float32)
    a = jnp.maximum(a + fb1_ref[...], 0.0)
    out_ref[...] = jnp.dot(a.astype(jnp.bfloat16), fw2_ref[...],
                           preferred_element_type=jnp.float32) + fb2_ref[...]


# ------------------------------ call wrappers --------------------------------

def _conv_stack(xcol, w1, b1, w2m, w2t, b2):
    n = xcol.shape[0]
    assert n % _CONV_B == 0
    return pl.pallas_call(
        _conv_stack_kernel,
        out_shape=jax.ShapeDtypeStruct((n, 140, 128), jnp.bfloat16),
        grid=(n // _CONV_B,),
        in_specs=[
            pl.BlockSpec((_CONV_B, 784, 128), lambda i: (i, 0, 0)),
            pl.BlockSpec((128, 128), lambda i: (0, 0)),
            pl.BlockSpec((1, 128), lambda i: (0, 0)),
            pl.BlockSpec((5, 128, 128), lambda i: (0, 0, 0)),
            pl.BlockSpec((5, 32, 128), lambda i: (0, 0, 0)),
            pl.BlockSpec((1, 128), lambda i: (0, 0)),
        ],
        out_specs=pl.BlockSpec((_CONV_B, 140, 128), lambda i: (i, 0, 0)),
        scratch_shapes=[
            pltpu.VMEM((784, 128), jnp.float32),   # conv1+ReLU map (per image)
            pltpu.VMEM((208, 128), jnp.float32),   # lane-packed pooled map
        ],
        compiler_params=pltpu.CompilerParams(
            dimension_semantics=("parallel",),      # batch blocks across TCs
            vmem_limit_bytes=32 * 1024 * 1024,      # ~4.6 MB actual footprint
        ),
    )(xcol, w1, b1, w2m, w2t, b2)


def _fc_stack(h, fw1, fb1, fw2, fb2, nb):
    n = h.shape[0]
    assert n % nb == 0
    return pl.pallas_call(
        _fc_stack_kernel,
        out_shape=jax.ShapeDtypeStruct((n, 128), jnp.float32),
        grid=(n // nb,),
        in_specs=[
            pl.BlockSpec((nb, 140 * 128), lambda i: (i, 0)),
            pl.BlockSpec((140 * 128, 128), lambda i: (0, 0)),
            pl.BlockSpec((1, 128), lambda i: (0, 0)),
            pl.BlockSpec((128, 128), lambda i: (0, 0)),
            pl.BlockSpec((1, 128), lambda i: (0, 0)),
        ],
        out_specs=pl.BlockSpec((nb, 128), lambda i: (i, 0)),
        compiler_params=pltpu.CompilerParams(
            dimension_semantics=("parallel",),      # batch tiles across TCs
            vmem_limit_bytes=32 * 1024 * 1024,      # ~19 MB at nb=128 (v7x-safe)
        ),
    )(h, fw1, fb1, fw2, fb2)


# ------------------------------ params / packing -----------------------------

def init_params(key, num_classes=NUM_CLASSES):
    """PyTorch-default-style uniform init, stored in PyTorch layouts."""
    ks = jax.random.split(key, 8)

    def u(k, shape, fan_in):
        bound = 1.0 / float(fan_in) ** 0.5
        return jax.random.uniform(k, shape, jnp.float32, -bound, bound)

    return {
        "conv1_w": u(ks[0], (30, 3, 5, 5), 3 * 5 * 5),
        "conv1_b": u(ks[1], (30,), 3 * 5 * 5),
        "conv2_w": u(ks[2], (80, 30, 5, 5), 30 * 5 * 5),
        "conv2_b": u(ks[3], (80,), 30 * 5 * 5),
        "fc1_w": u(ks[4], (120, 80 * 10 * 10), 80 * 10 * 10),
        "fc1_b": u(ks[5], (120,), 80 * 10 * 10),
        "fc2_w": u(ks[6], (num_classes, 120), 120),
        "fc2_b": u(ks[7], (num_classes,), 120),
    }


def pack_params(p, num_classes=NUM_CLASSES):
    """One-time packing into lane-dense, 128-lane-padded bf16 MXU operands.

    Padded weight columns / bias entries are zero, so padded lanes stay exactly
    zero through every ReLU; dead fc1 rows (ow>=10, c>=80) are zero so the conv
    output can be consumed without a strided slice."""
    f32, bf16 = jnp.float32, jnp.bfloat16

    # conv1 -> (128, 128): row = (kh*5 + kw)*3 + cin, col = cout_pad
    w1 = jnp.transpose(p["conv1_w"], (2, 3, 1, 0)).reshape(75, 30)
    w1p = jnp.zeros((128, 128), f32).at[:75, :30].set(w1)
    b1 = jnp.zeros((1, 128), f32).at[0, :30].set(p["conv1_b"])

    # conv2 -> main (5, 128, 128): [kh, 32*kw + cin, cout] for kw = 0..3
    #          tail (5, 32, 128) : [kh, cin, cout]          for kw = 4
    w2 = jnp.transpose(p["conv2_w"], (2, 3, 1, 0))          # (kh, kw, cin, cout)
    w2m = jnp.zeros((5, 4, 32, 128), f32).at[:, :, :30, :80].set(w2[:, :4])
    w2m = w2m.reshape(5, 128, 128)
    w2t = jnp.zeros((5, 32, 128), f32).at[:, :30, :80].set(w2[:, 4])
    b2 = jnp.zeros((1, 128), f32).at[0, :80].set(p["conv2_b"])

    # fc1 -> (17920, 128): row = (oh*14 + ow)*128 + c (conv-kernel output
    # layout); PyTorch's CHW flatten permutation is baked in, and rows for
    # ow>=10 / c>=80 are zero so no slicing is needed between kernels.
    fw1 = p["fc1_w"].reshape(120, 80, 10, 10)                # (o, c, oh, ow)
    fw1 = jnp.transpose(fw1, (2, 3, 1, 0))                   # (oh, ow, c, o)
    fw1p = jnp.zeros((10, 14, 128, 128), f32).at[:, :10, :80, :120].set(fw1)
    fw1p = fw1p.reshape(140 * 128, 128)
    fb1 = jnp.zeros((1, 128), f32).at[0, :120].set(p["fc1_b"])

    # fc2 -> (128, 128)
    fw2p = jnp.zeros((128, 128), f32).at[:120, :num_classes].set(p["fc2_w"].T)
    fb2 = jnp.zeros((1, 128), f32).at[0, :num_classes].set(p["fc2_b"])

    return {
        "w1": w1p.astype(bf16), "b1": b1,
        "w2m": w2m.astype(bf16), "w2t": w2t.astype(bf16), "b2": b2,
        "fc1w": fw1p.astype(bf16), "fc1b": fb1,
        "fc2w": fw2p.astype(bf16), "fc2b": fb2,
    }


# --------------------------------- forward -----------------------------------

@jax.jit
def simple_net_forward(packed, x):
    """x: (N, 3, 32, 32) NCHW float32 -> logits (N, NUM_CLASSES) float32."""
    n = x.shape[0]
    n_pad = ((n + _CONV_B - 1) // _CONV_B) * _CONV_B
    if n_pad != n:
        x = jnp.pad(x, ((0, n_pad - n), (0, 0), (0, 0), (0, 0)))

    # Lane-dense conv1 im2col: 75 real K-lanes, zero-padded to 128, bf16
    # (~200 KB/img of extra HBM read, negligible vs the MXU work it unlocks).
    xh = jnp.transpose(x, (0, 2, 3, 1)).astype(jnp.bfloat16)     # (N,32,32,3)
    cols = [xh[:, kh:kh + 28, kw:kw + 28, :]
            for kh in range(5) for kw in range(5)]
    xcol = jnp.concatenate(cols, axis=-1).reshape(n_pad, 784, 75)
    xcol = jnp.pad(xcol, ((0, 0), (0, 0), (0, 128 - 75)))        # (N,784,128)

    h = _conv_stack(xcol, packed["w1"], packed["b1"],
                    packed["w2m"], packed["w2t"], packed["b2"])  # (N,140,128)

    # fc1 weights already carry zero rows for the dropped / padded positions,
    # so a single flatten is enough (no strided HBM gather between kernels).
    h = h.reshape(n_pad, 140 * 128)

    nb = max(d for d in (128, 64, 32, 16, 8) if n_pad % d == 0)
    logits = _fc_stack(h, packed["fc1w"], packed["fc1b"],
                       packed["fc2w"], packed["fc2b"], nb)       # (N, 128)
    return logits[:n, :NUM_CLASSES]


# ------------------------------ pure-JAX reference ---------------------------

def reference_forward(params, x):
    dn = ("NCHW", "OIHW", "NCHW")
    y = jax.lax.conv_general_dilated(x, params["conv1_w"], (1, 1), "VALID",
                                     dimension_numbers=dn)
    y = jnp.maximum(y + params["conv1_b"][None, :, None, None], 0.0)
    y = jax.lax.reduce_window(y, -jnp.inf, jax.lax.max,
                              (1, 1, 2, 2), (1, 1, 2, 2), "VALID")
    y = jax.lax.conv_general_dilated(y, params["conv2_w"], (1, 1), "VALID",
                                     dimension_numbers=dn)
    y = jnp.maximum(y + params["conv2_b"][None, :, None, None], 0.0)
    y = y.reshape(y.shape[0], -1)
    y = jnp.maximum(y @ params["fc1_w"].T + params["fc1_b"], 0.0)
    return y @ params["fc2_w"].T + params["fc2_b"]


if __name__ == "__main__":
    key = jax.random.PRNGKey(0)
    k_params, k_x = jax.random.split(key)
    params = init_params(k_params)
    packed = pack_params(params)
    x = jax.random.normal(k_x, (2, 3, 32, 32), jnp.float32)

    out = jax.block_until_ready(simple_net_forward(packed, x))

    assert out.shape == (2, NUM_CLASSES), out.shape
    assert out.dtype == jnp.float32
    assert bool(jnp.all(jnp.isfinite(out)))

    # bf16-operand / f32-accumulate kernels vs. float32 XLA reference.
    ref = reference_forward(params, x)
    err = float(jnp.max(jnp.abs(out - ref)))
    assert err < 2.5e-2, f"max abs error vs reference too large: {err}"

    print("KERNEL_OK")
</pallas_src>

<mosaic_0001>
module attributes {stable_mosaic.version = 11 : i64} {
  func.func @_conv_stack_kernel(%arg0: i32, %arg1: memref<8x784x128xbf16, #tpu.memory_space<vmem>>, %arg2: memref<128x128xbf16, #tpu.memory_space<vmem>>, %arg3: memref<1x128xf32, #tpu.memory_space<vmem>>, %arg4: memref<5x128x128xbf16, #tpu.memory_space<vmem>>, %arg5: memref<5x32x128xbf16, #tpu.memory_space<vmem>>, %arg6: memref<1x128xf32, #tpu.memory_space<vmem>>, %arg7: memref<8x140x128xbf16, #tpu.memory_space<vmem>>, %arg8: memref<784x128xf32, #tpu.memory_space<vmem>>, %arg9: memref<208x128xf32, #tpu.memory_space<vmem>>) attributes {dimension_semantics = [#tpu.dimension_semantics<parallel>], iteration_bounds = array<i64: 1>, scalar_prefetch = 0 : i64, scratch_operands = 2 : i64, tpu.core_type = #tpu.core_type<tc>, window_params = [{transform_indices = @transform_0, window_bounds = array<i64: 8, 784, 128>}, {pipeline_mode = #tpu.pipeline_mode<synchronous>, transform_indices = @transform_1, window_bounds = array<i64: 128, 128>}, {pipeline_mode = #tpu.pipeline_mode<synchronous>, transform_indices = @transform_2, window_bounds = array<i64: 1, 128>}, {pipeline_mode = #tpu.pipeline_mode<synchronous>, transform_indices = @transform_3, window_bounds = array<i64: 5, 128, 128>}, {pipeline_mode = #tpu.pipeline_mode<synchronous>, transform_indices = @transform_4, window_bounds = array<i64: 5, 32, 128>}, {pipeline_mode = #tpu.pipeline_mode<synchronous>, transform_indices = @transform_5, window_bounds = array<i64: 1, 128>}, {transform_indices = @transform_6, window_bounds = array<i64: 8, 140, 128>}]} {
    %cst = arith.constant 0.000000e+00 : f32
    %0 = vector.broadcast %cst : f32 to vector<16x128xf32>
    %c192 = arith.constant 192 : index
    %c0 = arith.constant 0 : index
    %1 = vector.load %arg9[%c192, %c0] : memref<208x128xf32, #tpu.memory_space<vmem>>, vector<16x128xf32>
    tpu.vector_store %arg9[%c192, %c0], %0 {strides = array<i32>} : memref<208x128xf32, #tpu.memory_space<vmem>>, vector<16x128xf32>,
    %c0_i32 = arith.constant 0 : i32
    %c8_i32 = arith.constant 8 : i32
    %2 = arith.addi %c0_i32, %c8_i32 : i32
    %c1_i32 = arith.constant 1 : i32
    scf.for %arg10 = %c0_i32 to %2 step %c1_i32  : i32 {
      %c1_i32_1 = arith.constant 1 : i32
      %3 = arith.muli %arg10, %c1_i32_1 : i32
      %c0_i32_2 = arith.constant 0 : i32
      %4 = arith.addi %c0_i32_2, %3 : i32
      %5 = arith.index_cast %4 : i32 to index
      %c0_3 = arith.constant 0 : index
      %c0_4 = arith.constant 0 : index
      %6 = vector.load %arg1[%5, %c0_3, %c0_4] : memref<8x784x128xbf16, #tpu.memory_space<vmem>>, vector<1x784x128xbf16>
      %7 = vector.shape_cast %6 : vector<1x784x128xbf16> to vector<784x128xbf16>
      %c0_5 = arith.constant 0 : index
      %c0_6 = arith.constant 0 : index
      %8 = vector.load %arg2[%c0_5, %c0_6] : memref<128x128xbf16, #tpu.memory_space<vmem>>, vector<128x128xbf16>
      %cst_7 = arith.constant dense<0.000000e+00> : vector<784x128xf32>
      %9 = tpu.matmul %7, %8, %cst_7 {dimension_numbers = #tpu.dot_dimension_numbers<[1], [0], [0], [1], [0, 0, 1, 1], [], []>} : vector<784x128xbf16>, vector<128x128xbf16>, vector<784x128xf32> -> vector<784x128xf32>
      %c0_8 = arith.constant 0 : index
      %c0_9 = arith.constant 0 : index
      %10 = vector.load %arg3[%c0_8, %c0_9] : memref<1x128xf32, #tpu.memory_space<vmem>>, vector<1x128xf32>
      %11 = vector.broadcast %10 : vector<1x128xf32> to vector<784x128xf32>
      %12 = arith.addf %9, %11 : vector<784x128xf32>
      %cst_10 = arith.constant 0.000000e+00 : f32
      %13 = vector.broadcast %cst_10 : f32 to vector<784x128xf32>
      %14 = arith.maximumf %12, %13 : vector<784x128xf32>
      %c0_11 = arith.constant 0 : index
      %c0_12 = arith.constant 0 : index
      %15 = vector.load %arg8[%c0_11, %c0_12] : memref<784x128xf32, #tpu.memory_space<vmem>>, vector<784x128xf32>
      tpu.vector_store %arg8[%c0_11, %c0_12], %14 {strides = array<i32>} : memref<784x128xf32, #tpu.memory_space<vmem>>, vector<784x128xf32>,
      %c0_13 = arith.constant 0 : index
      %c0_14 = arith.constant 0 : index
      %16 = tpu.strided_load %arg8[%c0_13, %c0_14] {strides = array<i32: 2, 1>} : memref<784x128xf32, #tpu.memory_space<vmem>>, vector<14x128xf32>
      %c1 = arith.constant 1 : index
      %c0_15 = arith.constant 0 : index
      %17 = tpu.strided_load %arg8[%c1, %c0_15] {strides = array<i32: 2, 1>} : memref<784x128xf32, #tpu.memory_space<vmem>>, vector<14x128xf32>
      %18 = arith.maximumf %16, %17 : vector<14x128xf32>
      %c28 = arith.constant 28 : index
      %c0_16 = arith.constant 0 : index
      %19 = tpu.strided_load %arg8[%c28, %c0_16] {strides = array<i32: 2, 1>} : memref<784x128xf32, #tpu.memory_space<vmem>>, vector<14x128xf32>
      %c29 = arith.constant 29 : index
      %c0_17 = arith.constant 0 : index
      %20 = tpu.strided_load %arg8[%c29, %c0_17] {strides = array<i32: 2, 1>} : memref<784x128xf32, #tpu.memory_space<vmem>>, vector<14x128xf32>
      %21 = arith.maximumf %19, %20 : vector<14x128xf32>
      %22 = arith.maximumf %18, %21 : vector<14x128xf32>
      %23 = vector.extract_strided_slice %22 {offsets = [0, 0], sizes = [14, 32], strides = [1, 1]} : vector<14x128xf32> to vector<14x32xf32>
      %c0_18 = arith.constant 0 : index
      %c0_19 = arith.constant 0 : index
      %24 = vector.load %arg9[%c0_18, %c0_19] : memref<208x128xf32, #tpu.memory_space<vmem>>, vector<14x32xf32>
      tpu.vector_store %arg9[%c0_18, %c0_19], %23 {strides = array<i32>} : memref<208x128xf32, #tpu.memory_space<vmem>>, vector<14x32xf32>,
      %25 = vector.extract_strided_slice %23 {offsets = [1, 0], sizes = [13, 32], strides = [1, 1]} : vector<14x32xf32> to vector<13x32xf32>
      %c0_20 = arith.constant 0 : index
      %c32 = arith.constant 32 : index
      %26 = vector.load %arg9[%c0_20, %c32] : memref<208x128xf32, #tpu.memory_space<vmem>>, vector<13x32xf32>
      tpu.vector_store %arg9[%c0_20, %c32], %25 {strides = array<i32>} : memref<208x128xf32, #tpu.memory_space<vmem>>, vector<13x32xf32>,
      %27 = vector.extract_strided_slice %23 {offsets = [2, 0], sizes = [12, 32], strides = [1, 1]} : vector<14x32xf32> to vector<12x32xf32>
      %c0_21 = arith.constant 0 : index
      %c64 = arith.constant 64 : index
      %28 = vector.load %arg9[%c0_21, %c64] : memref<208x128xf32, #tpu.memory_space<vmem>>, vector<12x32xf32>
      tpu.vector_store %arg9[%c0_21, %c64], %27 {strides = array<i32>} : memref<208x128xf32, #tpu.memory_space<vmem>>, vector<12x32xf32>,
      %29 = vector.extract_strided_slice %23 {offsets = [3, 0], sizes = [11, 32], strides = [1, 1]} : vector<14x32xf32> to vector<11x32xf32>
      %c0_22 = arith.constant 0 : index
      %c96 = arith.constant 96 : index
      %30 = vector.load %arg9[%c0_22, %c96] : memref<208x128xf32, #tpu.memory_space<vmem>>, vector<11x32xf32>
      tpu.vector_store %arg9[%c0_22, %c96], %29 {strides = array<i32>} : memref<208x128xf32, #tpu.memory_space<vmem>>, vector<11x32xf32>,
      %c56 = arith.constant 56 : index
      %c0_23 = arith.constant 0 : index
      %31 = tpu.strided_load %arg8[%c56, %c0_23] {strides = array<i32: 2, 1>} : memref<784x128xf32, #tpu.memory_space<vmem>>, vector<14x128xf32>
      %c57 = arith.constant 57 : index
      %c0_24 = arith.constant 0 : index
      %32 = tpu.strided_load %arg8[%c57, %c0_24] {strides = array<i32: 2, 1>} : memref<784x128xf32, #tpu.memory_space<vmem>>, vector<14x128xf32>
      %33 = arith.maximumf %31, %32 : vector<14x128xf32>
      %c84 = arith.constant 84 : index
      %c0_25 = arith.constant 0 : index
      %34 = tpu.strided_load %arg8[%c84, %c0_25] {strides = array<i32: 2, 1>} : memref<784x128xf32, #tpu.memory_space<vmem>>, vector<14x128xf32>
      %c85 = arith.constant 85 : index
      %c0_26 = arith.constant 0 : index
      %35 = tpu.strided_load %arg8[%c85, %c0_26] {strides = array<i32: 2, 1>} : memref<784x128xf32, #tpu.memory_space<vmem>>, vector<14x128xf32>
      %36 = arith.maximumf %34, %35 : vector<14x128xf32>
      %37 = arith.maximumf %33, %36 : vector<14x128xf32>
      %38 = vector.extract_strided_slice %37 {offsets = [0, 0], sizes = [14, 32], strides = [1, 1]} : vector<14x128xf32> to vector<14x32xf32>
      %c14 = arith.constant 14 : index
      %c0_27 = arith.constant 0 : index
      %39 = vector.load %arg9[%c14, %c0_27] : memref<208x128xf32, #tpu.memory_space<vmem>>, vector<14x32xf32>
      tpu.vector_store %arg9[%c14, %c0_27], %38 {strides = array<i32>} : memref<208x128xf32, #tpu.memory_space<vmem>>, vector<14x32xf32>,
      %c13 = arith.constant 13 : index
      %c32_28 = arith.constant 32 : index
      %40 = vector.load %arg9[%c13, %c32_28] : memref<208x128xf32, #tpu.memory_space<vmem>>, vector<14x32xf32>
      tpu.vector_store %arg9[%c13, %c32_28], %38 {strides = array<i32>} : memref<208x128xf32, #tpu.memory_space<vmem>>, vector<14x32xf32>,
      %c12 = arith.constant 12 : index
      %c64_29 = arith.constant 64 : index
      %41 = vector.load %arg9[%c12, %c64_29] : memref<208x128xf32, #tpu.memory_space<vmem>>, vector<14x32xf32>
      tpu.vector_store %arg9[%c12, %c64_29], %38 {strides = array<i32>} : memref<208x128xf32, #tpu.memory_space<vmem>>, vector<14x32xf32>,
      %c11 = arith.constant 11 : index
      %c96_30 = arith.constant 96 : index
      %42 = vector.load %arg9[%c11, %c96_30] : memref<208x128xf32, #tpu.memory_space<vmem>>, vector<14x32xf32>
      tpu.vector_store %arg9[%c11, %c96_30], %38 {strides = array<i32>} : memref<208x128xf32, #tpu.memory_space<vmem>>, vector<14x32xf32>,
      %c112 = arith.constant 112 : index
      %c0_31 = arith.constant 0 : index
      %43 = tpu.strided_load %arg8[%c112, %c0_31] {strides = array<i32: 2, 1>} : memref<784x128xf32, #tpu.memory_space<vmem>>, vector<14x128xf32>
      %c113 = arith.constant 113 : index
      %c0_32 = arith.constant 0 : index
      %44 = tpu.strided_load %arg8[%c113, %c0_32] {strides = array<i32: 2, 1>} : memref<784x128xf32, #tpu.memory_space<vmem>>, vector<14x128xf32>
      %45 = arith.maximumf %43, %44 : vector<14x128xf32>
      %c140 = arith.constant 140 : index
      %c0_33 = arith.constant 0 : index
      %46 = tpu.strided_load %arg8[%c140, %c0_33] {strides = array<i32: 2, 1>} : memref<784x128xf32, #tpu.memory_space<vmem>>, vector<14x128xf32>
      %c141 = arith.constant 141 : index
      %c0_34 = arith.constant 0 : index
      %47 = tpu.strided_load %arg8[%c141, %c0_34] {strides = array<i32: 2, 1>} : memref<784x128xf32, #tpu.memory_space<vmem>>, vector<14x128xf32>
      %48 = arith.maximumf %46, %47 : vector<14x128xf32>
      %49 = arith.maximumf %45, %48 : vector<14x128xf32>
      %50 = vector.extract_strided_slice %49 {offsets = [0, 0], sizes = [14, 32], strides = [1, 1]} : vector<14x128xf32> to vector<14x32xf32>
      %c28_35 = arith.constant 28 : index
      %c0_36 = arith.constant 0 : index
      %51 = vector.load %arg9[%c28_35, %c0_36] : memref<208x128xf32, #tpu.memory_space<vmem>>, vector<14x32xf32>
      tpu.vector_store %arg9[%c28_35, %c0_36], %50 {strides = array<i32>} : memref<208x128xf32, #tpu.memory_space<vmem>>, vector<14x32xf32>,
      %c27 = arith.constant 27 : index
      %c32_37 = arith.constant 32 : index
      %52 = vector.load %arg9[%c27, %c32_37] : memref<208x128xf32, #tpu.memory_space<vmem>>, vector<14x32xf32>
      tpu.vector_store %arg9[%c27, %c32_37], %50 {strides = array<i32>} : memref<208x128xf32, #tpu.memory_space<vmem>>, vector<14x32xf32>,
      %c26 = arith.constant 26 : index
      %c64_38 = arith.constant 64 : index
      %53 = vector.load %arg9[%c26, %c64_38] : memref<208x128xf32, #tpu.memory_space<vmem>>, vector<14x32xf32>
      tpu.vector_store %arg9[%c26, %c64_38], %50 {strides = array<i32>} : memref<208x128xf32, #tpu.memory_space<vmem>>, vector<14x32xf32>,
      %c25 = arith.constant 25 : index
      %c96_39 = arith.constant 96 : index
      %54 = vector.load %arg9[%c25, %c96_39] : memref<208x128xf32, #tpu.memory_space<vmem>>, vector<14x32xf32>
      tpu.vector_store %arg9[%c25, %c96_39], %50 {strides = array<i32>} : memref<208x128xf32, #tpu.memory_space<vmem>>, vector<14x32xf32>,
      %c168 = arith.constant 168 : index
      %c0_40 = arith.constant 0 : index
      %55 = tpu.strided_load %arg8[%c168, %c0_40] {strides = array<i32: 2, 1>} : memref<784x128xf32, #tpu.memory_space<vmem>>, vector<14x128xf32>
      %c169 = arith.constant 169 : index
      %c0_41 = arith.constant 0 : index
      %56 = tpu.strided_load %arg8[%c169, %c0_41] {strides = array<i32: 2, 1>} : memref<784x128xf32, #tpu.memory_space<vmem>>, vector<14x128xf32>
      %57 = arith.maximumf %55, %56 : vector<14x128xf32>
      %c196 = arith.constant 196 : index
      %c0_42 = arith.constant 0 : index
      %58 = tpu.strided_load %arg8[%c196, %c0_42] {strides = array<i32: 2, 1>} : memref<784x128xf32, #tpu.memory_space<vmem>>, vector<14x128xf32>
      %c197 = arith.constant 197 : index
      %c0_43 = arith.constant 0 : index
      %59 = tpu.strided_load %arg8[%c197, %c0_43] {strides = array<i32: 2, 1>} : memref<784x128xf32, #tpu.memory_space<vmem>>, vector<14x128xf32>
      %60 = arith.maximumf %58, %59 : vector<14x128xf32>
      %61 = arith.maximumf %57, %60 : vector<14x128xf32>
      %62 = vector.extract_strided_slice %61 {offsets = [0, 0], sizes = [14, 32], strides = [1, 1]} : vector<14x128xf32> to vector<14x32xf32>
      %c42 = arith.constant 42 : index
      %c0_44 = arith.constant 0 : index
      %63 = vector.load %arg9[%c42, %c0_44] : memref<208x128xf32, #tpu.memory_space<vmem>>, vector<14x32xf32>
      tpu.vector_store %arg9[%c42, %c0_44], %62 {strides = array<i32>} : memref<208x128xf32, #tpu.memory_space<vmem>>, vector<14x32xf32>,
      %c41 = arith.constant 41 : index
      %c32_45 = arith.constant 32 : index
      %64 = vector.load %arg9[%c41, %c32_45] : memref<208x128xf32, #tpu.memory_space<vmem>>, vector<14x32xf32>
      tpu.vector_store %arg9[%c41, %c32_45], %62 {strides = array<i32>} : memref<208x128xf32, #tpu.memory_space<vmem>>, vector<14x32xf32>,
      %c40 = arith.constant 40 : index
      %c64_46 = arith.constant 64 : index
      %65 = vector.load %arg9[%c40, %c64_46] : memref<208x128xf32, #tpu.memory_space<vmem>>, vector<14x32xf32>
      tpu.vector_store %arg9[%c40, %c64_46], %62 {strides = array<i32>} : memref<208x128xf32, #tpu.memory_space<vmem>>, vector<14x32xf32>,
      %c39 = arith.constant 39 : index
      %c96_47 = arith.constant 96 : index
      %66 = vector.load %arg9[%c39, %c96_47] : memref<208x128xf32, #tpu.memory_space<vmem>>, vector<14x32xf32>
      tpu.vector_store %arg9[%c39, %c96_47], %62 {strides = array<i32>} : memref<208x128xf32, #tpu.memory_space<vmem>>, vector<14x32xf32>,
      %c224 = arith.constant 224 : index
      %c0_48 = arith.constant 0 : index
      %67 = tpu.strided_load %arg8[%c224, %c0_48] {strides = array<i32: 2, 1>} : memref<784x128xf32, #tpu.memory_space<vmem>>, vector<14x128xf32>
      %c225 = arith.constant 225 : index
      %c0_49 = arith.constant 0 : index
      %68 = tpu.strided_load %arg8[%c225, %c0_49] {strides = array<i32: 2, 1>} : memref<784x128xf32, #tpu.memory_space<vmem>>, vector<14x128xf32>
      %69 = arith.maximumf %67, %68 : vector<14x128xf32>
      %c252 = arith.constant 252 : index
      %c0_50 = arith.constant 0 : index
      %70 = tpu.strided_load %arg8[%c252, %c0_50] {strides = array<i32: 2, 1>} : memref<784x128xf32, #tpu.memory_space<vmem>>, vector<14x128xf32>
      %c253 = arith.constant 253 : index
      %c0_51 = arith.constant 0 : index
      %71 = tpu.strided_load %arg8[%c253, %c0_51] {strides = array<i32: 2, 1>} : memref<784x128xf32, #tpu.memory_space<vmem>>, vector<14x128xf32>
      %72 = arith.maximumf %70, %71 : vector<14x128xf32>
      %73 = arith.maximumf %69, %72 : vector<14x128xf32>
      %74 = vector.extract_strided_slice %73 {offsets = [0, 0], sizes = [14, 32], strides = [1, 1]} : vector<14x128xf32> to vector<14x32xf32>
      %c56_52 = arith.constant 56 : index
      %c0_53 = arith.constant 0 : index
      %75 = vector.load %arg9[%c56_52, %c0_53] : memref<208x128xf32, #tpu.memory_space<vmem>>, vector<14x32xf32>
      tpu.vector_store %arg9[%c56_52, %c0_53], %74 {strides = array<i32>} : memref<208x128xf32, #tpu.memory_space<vmem>>, vector<14x32xf32>,
      %c55 = arith.constant 55 : index
      %c32_54 = arith.constant 32 : index
      %76 = vector.load %arg9[%c55, %c32_54] : memref<208x128xf32, #tpu.memory_space<vmem>>, vector<14x32xf32>
      tpu.vector_store %arg9[%c55, %c32_54], %74 {strides = array<i32>} : memref<208x128xf32, #tpu.memory_space<vmem>>, vector<14x32xf32>,
      %c54 = arith.constant 54 : index
      %c64_55 = arith.constant 64 : index
      %77 = vector.load %arg9[%c54, %c64_55] : memref<208x128xf32, #tpu.memory_space<vmem>>, vector<14x32xf32>
      tpu.vector_store %arg9[%c54, %c64_55], %74 {strides = array<i32>} : memref<208x128xf32, #tpu.memory_space<vmem>>, vector<14x32xf32>,
      %c53 = arith.constant 53 : index
      %c96_56 = arith.constant 96 : index
      %78 = vector.load %arg9[%c53, %c96_56] : memref<208x128xf32, #tpu.memory_space<vmem>>, vector<14x32xf32>
      tpu.vector_store %arg9[%c53, %c96_56], %74 {strides = array<i32>} : memref<208x128xf32, #tpu.memory_space<vmem>>, vector<14x32xf32>,
      %c280 = arith.constant 280 : index
      %c0_57 = arith.constant 0 : index
      %79 = tpu.strided_load %arg8[%c280, %c0_57] {strides = array<i32: 2, 1>} : memref<784x128xf32, #tpu.memory_space<vmem>>, vector<14x128xf32>
      %c281 = arith.constant 281 : index
      %c0_58 = arith.constant 0 : index
      %80 = tpu.strided_load %arg8[%c281, %c0_58] {strides = array<i32: 2, 1>} : memref<784x128xf32, #tpu.memory_space<vmem>>, vector<14x128xf32>
      %81 = arith.maximumf %79, %80 : vector<14x128xf32>
      %c308 = arith.constant 308 : index
      %c0_59 = arith.constant 0 : index
      %82 = tpu.strided_load %arg8[%c308, %c0_59] {strides = array<i32: 2, 1>} : memref<784x128xf32, #tpu.memory_space<vmem>>, vector<14x128xf32>
      %c309 = arith.constant 309 : index
      %c0_60 = arith.constant 0 : index
      %83 = tpu.strided_load %arg8[%c309, %c0_60] {strides = array<i32: 2, 1>} : memref<784x128xf32, #tpu.memory_space<vmem>>, vector<14x128xf32>
      %84 = arith.maximumf %82, %83 : vector<14x128xf32>
      %85 = arith.maximumf %81, %84 : vector<14x128xf32>
      %86 = vector.extract_strided_slice %85 {offsets = [0, 0], sizes = [14, 32], strides = [1, 1]} : vector<14x128xf32> to vector<14x32xf32>
      %c70 = arith.constant 70 : index
      %c0_61 = arith.constant 0 : index
      %87 = vector.load %arg9[%c70, %c0_61] : memref<208x128xf32, #tpu.memory_space<vmem>>, vector<14x32xf32>
      tpu.vector_store %arg9[%c70, %c0_61], %86 {strides = array<i32>} : memref<208x128xf32, #tpu.memory_space<vmem>>, vector<14x32xf32>,
      %c69 = arith.constant 69 : index
      %c32_62 = arith.constant 32 : index
      %88 = vector.load %arg9[%c69, %c32_62] : memref<208x128xf32, #tpu.memory_space<vmem>>, vector<14x32xf32>
      tpu.vector_store %arg9[%c69, %c32_62], %86 {strides = array<i32>} : memref<208x128xf32, #tpu.memory_space<vmem>>, vector<14x32xf32>,
      %c68 = arith.constant 68 : index
      %c64_63 = arith.constant 64 : index
      %89 = vector.load %arg9[%c68, %c64_63] : memref<208x128xf32, #tpu.memory_space<vmem>>, vector<14x32xf32>
      tpu.vector_store %arg9[%c68, %c64_63], %86 {strides = array<i32>} : memref<208x128xf32, #tpu.memory_space<vmem>>, vector<14x32xf32>,
      %c67 = arith.constant 67 : index
      %c96_64 = arith.constant 96 : index
      %90 = vector.load %arg9[%c67, %c96_64] : memref<208x128xf32, #tpu.memory_space<vmem>>, vector<14x32xf32>
      tpu.vector_store %arg9[%c67, %c96_64], %86 {strides = array<i32>} : memref<208x128xf32, #tpu.memory_space<vmem>>, vector<14x32xf32>,
      %c336 = arith.constant 336 : index
      %c0_65 = arith.constant 0 : index
      %91 = tpu.strided_load %arg8[%c336, %c0_65] {strides = array<i32: 2, 1>} : memref<784x128xf32, #tpu.memory_space<vmem>>, vector<14x128xf32>
      %c337 = arith.constant 337 : index
      %c0_66 = arith.constant 0 : index
      %92 = tpu.strided_load %arg8[%c337, %c0_66] {strides = array<i32: 2, 1>} : memref<784x128xf32, #tpu.memory_space<vmem>>, vector<14x128xf32>
      %93 = arith.maximumf %91, %92 : vector<14x128xf32>
      %c364 = arith.constant 364 : index
      %c0_67 = arith.constant 0 : index
      %94 = tpu.strided_load %arg8[%c364, %c0_67] {strides = array<i32: 2, 1>} : memref<784x128xf32, #tpu.memory_space<vmem>>, vector<14x128xf32>
      %c365 = arith.constant 365 : index
      %c0_68 = arith.constant 0 : index
      %95 = tpu.strided_load %arg8[%c365, %c0_68] {strides = array<i32: 2, 1>} : memref<784x128xf32, #tpu.memory_space<vmem>>, vector<14x128xf32>
      %96 = arith.maximumf %94, %95 : vector<14x128xf32>
      %97 = arith.maximumf %93, %96 : vector<14x128xf32>
      %98 = vector.extract_strided_slice %97 {offsets = [0, 0], sizes = [14, 32], strides = [1, 1]} : vector<14x128xf32> to vector<14x32xf32>
      %c84_69 = arith.constant 84 : index
      %c0_70 = arith.constant 0 : index
      %99 = vector.load %arg9[%c84_69, %c0_70] : memref<208x128xf32, #tpu.memory_space<vmem>>, vector<14x32xf32>
      tpu.vector_store %arg9[%c84_69, %c0_70], %98 {strides = array<i32>} : memref<208x128xf32, #tpu.memory_space<vmem>>, vector<14x32xf32>,
      %c83 = arith.constant 83 : index
      %c32_71 = arith.constant 32 : index
      %100 = vector.load %arg9[%c83, %c32_71] : memref<208x128xf32, #tpu.memory_space<vmem>>, vector<14x32xf32>
      tpu.vector_store %arg9[%c83, %c32_71], %98 {strides = array<i32>} : memref<208x128xf32, #tpu.memory_space<vmem>>, vector<14x32xf32>,
      %c82 = arith.constant 82 : index
      %c64_72 = arith.constant 64 : index
      %101 = vector.load %arg9[%c82, %c64_72] : memref<208x128xf32, #tpu.memory_space<vmem>>, vector<14x32xf32>
      tpu.vector_store %arg9[%c82, %c64_72], %98 {strides = array<i32>} : memref<208x128xf32, #tpu.memory_space<vmem>>, vector<14x32xf32>,
      %c81 = arith.constant 81 : index
      %c96_73 = arith.constant 96 : index
      %102 = vector.load %arg9[%c81, %c96_73] : memref<208x128xf32, #tpu.memory_space<vmem>>, vector<14x32xf32>
      tpu.vector_store %arg9[%c81, %c96_73], %98 {strides = array<i32>} : memref<208x128xf32, #tpu.memory_space<vmem>>, vector<14x32xf32>,
      %c392 = arith.constant 392 : index
      %c0_74 = arith.constant 0 : index
      %103 = tpu.strided_load %arg8[%c392, %c0_74] {strides = array<i32: 2, 1>} : memref<784x128xf32, #tpu.memory_space<vmem>>, vector<14x128xf32>
      %c393 = arith.constant 393 : index
      %c0_75 = arith.constant 0 : index
      %104 = tpu.strided_load %arg8[%c393, %c0_75] {strides = array<i32: 2, 1>} : memref<784x128xf32, #tpu.memory_space<vmem>>, vector<14x128xf32>
      %105 = arith.maximumf %103, %104 : vector<14x128xf32>
      %c420 = arith.constant 420 : index
      %c0_76 = arith.constant 0 : index
      %106 = tpu.strided_load %arg8[%c420, %c0_76] {strides = array<i32: 2, 1>} : memref<784x128xf32, #tpu.memory_space<vmem>>, vector<14x128xf32>
      %c421 = arith.constant 421 : index
      %c0_77 = arith.constant 0 : index
      %107 = tpu.strided_load %arg8[%c421, %c0_77] {strides = array<i32: 2, 1>} : memref<784x128xf32, #tpu.memory_space<vmem>>, vector<14x128xf32>
      %108 = arith.maximumf %106, %107 : vector<14x128xf32>
      %109 = arith.maximumf %105, %108 : vector<14x128xf32>
      %110 = vector.extract_strided_slice %109 {offsets = [0, 0], sizes = [14, 32], strides = [1, 1]} : vector<14x128xf32> to vector<14x32xf32>
      %c98 = arith.constant 98 : index
      %c0_78 = arith.constant 0 : index
      %111 = vector.load %arg9[%c98, %c0_78] : memref<208x128xf32, #tpu.memory_space<vmem>>, vector<14x32xf32>
      tpu.vector_store %arg9[%c98, %c0_78], %110 {strides = array<i32>} : memref<208x128xf32, #tpu.memory_space<vmem>>, vector<14x32xf32>,
      %c97 = arith.constant 97 : index
      %c32_79 = arith.constant 32 : index
      %112 = vector.load %arg9[%c97, %c32_79] : memref<208x128xf32, #tpu.memory_space<vmem>>, vector<14x32xf32>
      tpu.vector_store %arg9[%c97, %c32_79], %110 {strides = array<i32>} : memref<208x128xf32, #tpu.memory_space<vmem>>, vector<14x32xf32>,
      %c96_80 = arith.constant 96 : index
      %c64_81 = arith.constant 64 : index
      %113 = vector.load %arg9[%c96_80, %c64_81] : memref<208x128xf32, #tpu.memory_space<vmem>>, vector<14x32xf32>
      tpu.vector_store %arg9[%c96_80, %c64_81], %110 {strides = array<i32>} : memref<208x128xf32, #tpu.memory_space<vmem>>, vector<14x32xf32>,
      %c95 = arith.constant 95 : index
      %c96_82 = arith.constant 96 : index
      %114 = vector.load %arg9[%c95, %c96_82] : memref<208x128xf32, #tpu.memory_space<vmem>>, vector<14x32xf32>
      tpu.vector_store %arg9[%c95, %c96_82], %110 {strides = array<i32>} : memref<208x128xf32, #tpu.memory_space<vmem>>, vector<14x32xf32>,
      %c448 = arith.constant 448 : index
      %c0_83 = arith.constant 0 : index
      %115 = tpu.strided_load %arg8[%c448, %c0_83] {strides = array<i32: 2, 1>} : memref<784x128xf32, #tpu.memory_space<vmem>>, vector<14x128xf32>
      %c449 = arith.constant 449 : index
      %c0_84 = arith.constant 0 : index
      %116 = tpu.strided_load %arg8[%c449, %c0_84] {strides = array<i32: 2, 1>} : memref<784x128xf32, #tpu.memory_space<vmem>>, vector<14x128xf32>
      %117 = arith.maximumf %115, %116 : vector<14x128xf32>
      %c476 = arith.constant 476 : index
      %c0_85 = arith.constant 0 : index
      %118 = tpu.strided_load %arg8[%c476, %c0_85] {strides = array<i32: 2, 1>} : memref<784x128xf32, #tpu.memory_space<vmem>>, vector<14x128xf32>
      %c477 = arith.constant 477 : index
      %c0_86 = arith.constant 0 : index
      %119 = tpu.strided_load %arg8[%c477, %c0_86] {strides = array<i32: 2, 1>} : memref<784x128xf32, #tpu.memory_space<vmem>>, vector<14x128xf32>
      %120 = arith.maximumf %118, %119 : vector<14x128xf32>
      %121 = arith.maximumf %117, %120 : vector<14x128xf32>
      %122 = vector.extract_strided_slice %121 {offsets = [0, 0], sizes = [14, 32], strides = [1, 1]} : vector<14x128xf32> to vector<14x32xf32>
      %c112_87 = arith.constant 112 : index
      %c0_88 = arith.constant 0 : index
      %123 = vector.load %arg9[%c112_87, %c0_88] : memref<208x128xf32, #tpu.memory_space<vmem>>, vector<14x32xf32>
      tpu.vector_store %arg9[%c112_87, %c0_88], %122 {strides = array<i32>} : memref<208x128xf32, #tpu.memory_space<vmem>>, vector<14x32xf32>,
      %c111 = arith.constant 111 : index
      %c32_89 = arith.constant 32 : index
      %124 = vector.load %arg9[%c111, %c32_89] : memref<208x128xf32, #tpu.memory_space<vmem>>, vector<14x32xf32>
      tpu.vector_store %arg9[%c111, %c32_89], %122 {strides = array<i32>} : memref<208x128xf32, #tpu.memory_space<vmem>>, vector<14x32xf32>,
      %c110 = arith.constant 110 : index
      %c64_90 = arith.constant 64 : index
      %125 = vector.load %arg9[%c110, %c64_90] : memref<208x128xf32, #tpu.memory_space<vmem>>, vector<14x32xf32>
      tpu.vector_store %arg9[%c110, %c64_90], %122 {strides = array<i32>} : memref<208x128xf32, #tpu.memory_space<vmem>>, vector<14x32xf32>,
      %c109 = arith.constant 109 : index
      %c96_91 = arith.constant 96 : index
      %126 = vector.load %arg9[%c109, %c96_91] : memref<208x128xf32, #tpu.memory_space<vmem>>, vector<14x32xf32>
      tpu.vector_store %arg9[%c109, %c96_91], %122 {strides = array<i32>} : memref<208x128xf32, #tpu.memory_space<vmem>>, vector<14x32xf32>,
      %c504 = arith.constant 504 : index
      %c0_92 = arith.constant 0 : index
      %127 = tpu.strided_load %arg8[%c504, %c0_92] {strides = array<i32: 2, 1>} : memref<784x128xf32, #tpu.memory_space<vmem>>, vector<14x128xf32>
      %c505 = arith.constant 505 : index
      %c0_93 = arith.constant 0 : index
      %128 = tpu.strided_load %arg8[%c505, %c0_93] {strides = array<i32: 2, 1>} : memref<784x128xf32, #tpu.memory_space<vmem>>, vector<14x128xf32>
      %129 = arith.maximumf %127, %128 : vector<14x128xf32>
      %c532 = arith.constant 532 : index
      %c0_94 = arith.constant 0 : index
      %130 = tpu.strided_load %arg8[%c532, %c0_94] {strides = array<i32: 2, 1>} : memref<784x128xf32, #tpu.memory_space<vmem>>, vector<14x128xf32>
      %c533 = arith.constant 533 : index
      %c0_95 = arith.constant 0 : index
      %131 = tpu.strided_load %arg8[%c533, %c0_95] {strides = array<i32: 2, 1>} : memref<784x128xf32, #tpu.memory_space<vmem>>, vector<14x128xf32>
      %132 = arith.maximumf %130, %131 : vector<14x128xf32>
      %133 = arith.maximumf %129, %132 : vector<14x128xf32>
      %134 = vector.extract_strided_slice %133 {offsets = [0, 0], sizes = [14, 32], strides = [1, 1]} : vector<14x128xf32> to vector<14x32xf32>
      %c126 = arith.constant 126 : index
      %c0_96 = arith.constant 0 : index
      %135 = vector.load %arg9[%c126, %c0_96] : memref<208x128xf32, #tpu.memory_space<vmem>>, vector<14x32xf32>
      tpu.vector_store %arg9[%c126, %c0_96], %134 {strides = array<i32>} : memref<208x128xf32, #tpu.memory_space<vmem>>, vector<14x32xf32>,
      %c125 = arith.constant 125 : index
      %c32_97 = arith.constant 32 : index
      %136 = vector.load %arg9[%c125, %c32_97] : memref<208x128xf32, #tpu.memory_space<vmem>>, vector<14x32xf32>
      tpu.vector_store %arg9[%c125, %c32_97], %134 {strides = array<i32>} : memref<208x128xf32, #tpu.memory_space<vmem>>, vector<14x32xf32>,
      %c124 = arith.constant 124 : index
      %c64_98 = arith.constant 64 : index
      %137 = vector.load %arg9[%c124, %c64_98] : memref<208x128xf32, #tpu.memory_space<vmem>>, vector<14x32xf32>
      tpu.vector_store %arg9[%c124, %c64_98], %134 {strides = array<i32>} : memref<208x128xf32, #tpu.memory_space<vmem>>, vector<14x32xf32>,
      %c123 = arith.constant 123 : index
      %c96_99 = arith.constant 96 : index
      %138 = vector.load %arg9[%c123, %c96_99] : memref<208x128xf32, #tpu.memory_space<vmem>>, vector<14x32xf32>
      tpu.vector_store %arg9[%c123, %c96_99], %134 {strides = array<i32>} : memref<208x128xf32, #tpu.memory_space<vmem>>, vector<14x32xf32>,
      %c560 = arith.constant 560 : index
      %c0_100 = arith.constant 0 : index
      %139 = tpu.strided_load %arg8[%c560, %c0_100] {strides = array<i32: 2, 1>} : memref<784x128xf32, #tpu.memory_space<vmem>>, vector<14x128xf32>
      %c561 = arith.constant 561 : index
      %c0_101 = arith.constant 0 : index
      %140 = tpu.strided_load %arg8[%c561, %c0_101] {strides = array<i32: 2, 1>} : memref<784x128xf32, #tpu.memory_space<vmem>>, vector<14x128xf32>
      %141 = arith.maximumf %139, %140 : vector<14x128xf32>
      %c588 = arith.constant 588 : index
      %c0_102 = arith.constant 0 : index
      %142 = tpu.strided_load %arg8[%c588, %c0_102] {strides = array<i32: 2, 1>} : memref<784x128xf32, #tpu.memory_space<vmem>>, vector<14x128xf32>
      %c589 = arith.constant 589 : index
      %c0_103 = arith.constant 0 : index
      %143 = tpu.strided_load %arg8[%c589, %c0_103] {strides = array<i32: 2, 1>} : memref<784x128xf32, #tpu.memory_space<vmem>>, vector<14x128xf32>
      %144 = arith.maximumf %142, %143 : vector<14x128xf32>
      %145 = arith.maximumf %141, %144 : vector<14x128xf32>
      %146 = vector.extract_strided_slice %145 {offsets = [0, 0], sizes = [14, 32], strides = [1, 1]} : vector<14x128xf32> to vector<14x32xf32>
      %c140_104 = arith.constant 140 : index
      %c0_105 = arith.constant 0 : index
      %147 = vector.load %arg9[%c140_104, %c0_105] : memref<208x128xf32, #tpu.memory_space<vmem>>, vector<14x32xf32>
      tpu.vector_store %arg9[%c140_104, %c0_105], %146 {strides = array<i32>} : memref<208x128xf32, #tpu.memory_space<vmem>>, vector<14x32xf32>,
      %c139 = arith.constant 139 : index
      %c32_106 = arith.constant 32 : index
      %148 = vector.load %arg9[%c139, %c32_106] : memref<208x128xf32, #tpu.memory_space<vmem>>, vector<14x32xf32>
      tpu.vector_store %arg9[%c139, %c32_106], %146 {strides = array<i32>} : memref<208x128xf32, #tpu.memory_space<vmem>>, vector<14x32xf32>,
      %c138 = arith.constant 138 : index
      %c64_107 = arith.constant 64 : index
      %149 = vector.load %arg9[%c138, %c64_107] : memref<208x128xf32, #tpu.memory_space<vmem>>, vector<14x32xf32>
      tpu.vector_store %arg9[%c138, %c64_107], %146 {strides = array<i32>} : memref<208x128xf32, #tpu.memory_space<vmem>>, vector<14x32xf32>,
      %c137 = arith.constant 137 : index
      %c96_108 = arith.constant 96 : index
      %150 = vector.load %arg9[%c137, %c96_108] : memref<208x128xf32, #tpu.memory_space<vmem>>, vector<14x32xf32>
      tpu.vector_store %arg9[%c137, %c96_108], %146 {strides = array<i32>} : memref<208x128xf32, #tpu.memory_space<vmem>>, vector<14x32xf32>,
      %c616 = arith.constant 616 : index
      %c0_109 = arith.constant 0 : index
      %151 = tpu.strided_load %arg8[%c616, %c0_109] {strides = array<i32: 2, 1>} : memref<784x128xf32, #tpu.memory_space<vmem>>, vector<14x128xf32>
      %c617 = arith.constant 617 : index
      %c0_110 = arith.constant 0 : index
      %152 = tpu.strided_load %arg8[%c617, %c0_110] {strides = array<i32: 2, 1>} : memref<784x128xf32, #tpu.memory_space<vmem>>, vector<14x128xf32>
      %153 = arith.maximumf %151, %152 : vector<14x128xf32>
      %c644 = arith.constant 644 : index
      %c0_111 = arith.constant 0 : index
      %154 = tpu.strided_load %arg8[%c644, %c0_111] {strides = array<i32: 2, 1>} : memref<784x128xf32, #tpu.memory_space<vmem>>, vector<14x128xf32>
      %c645 = arith.constant 645 : index
      %c0_112 = arith.constant 0 : index
      %155 = tpu.strided_load %arg8[%c645, %c0_112] {strides = array<i32: 2, 1>} : memref<784x128xf32, #tpu.memory_space<vmem>>, vector<14x128xf32>
      %156 = arith.maximumf %154, %155 : vector<14x128xf32>
      %157 = arith.maximumf %153, %156 : vector<14x128xf32>
      %158 = vector.extract_strided_slice %157 {offsets = [0, 0], sizes = [14, 32], strides = [1, 1]} : vector<14x128xf32> to vector<14x32xf32>
      %c154 = arith.constant 154 : index
      %c0_113 = arith.constant 0 : index
      %159 = vector.load %arg9[%c154, %c0_113] : memref<208x128xf32, #tpu.memory_space<vmem>>, vector<14x32xf32>
      tpu.vector_store %arg9[%c154, %c0_113], %158 {strides = array<i32>} : memref<208x128xf32, #tpu.memory_space<vmem>>, vector<14x32xf32>,
      %c153 = arith.constant 153 : index
      %c32_114 = arith.constant 32 : index
      %160 = vector.load %arg9[%c153, %c32_114] : memref<208x128xf32, #tpu.memory_space<vmem>>, vector<14x32xf32>
      tpu.vector_store %arg9[%c153, %c32_114], %158 {strides = array<i32>} : memref<208x128xf32, #tpu.memory_space<vmem>>, vector<14x32xf32>,
      %c152 = arith.constant 152 : index
      %c64_115 = arith.constant 64 : index
      %161 = vector.load %arg9[%c152, %c64_115] : memref<208x128xf32, #tpu.memory_space<vmem>>, vector<14x32xf32>
      tpu.vector_store %arg9[%c152, %c64_115], %158 {strides = array<i32>} : memref<208x128xf32, #tpu.memory_space<vmem>>, vector<14x32xf32>,
      %c151 = arith.constant 151 : index
      %c96_116 = arith.constant 96 : index
      %162 = vector.load %arg9[%c151, %c96_116] : memref<208x128xf32, #tpu.memory_space<vmem>>, vector<14x32xf32>
      tpu.vector_store %arg9[%c151, %c96_116], %158 {strides = array<i32>} : memref<208x128xf32, #tpu.memory_space<vmem>>, vector<14x32xf32>,
      %c672 = arith.constant 672 : index
      %c0_117 = arith.constant 0 : index
      %163 = tpu.strided_load %arg8[%c672, %c0_117] {strides = array<i32: 2, 1>} : memref<784x128xf32, #tpu.memory_space<vmem>>, vector<14x128xf32>
      %c673 = arith.constant 673 : index
      %c0_118 = arith.constant 0 : index
      %164 = tpu.strided_load %arg8[%c673, %c0_118] {strides = array<i32: 2, 1>} : memref<784x128xf32, #tpu.memory_space<vmem>>, vector<14x128xf32>
      %165 = arith.maximumf %163, %164 : vector<14x128xf32>
      %c700 = arith.constant 700 : index
      %c0_119 = arith.constant 0 : index
      %166 = tpu.strided_load %arg8[%c700, %c0_119] {strides = array<i32: 2, 1>} : memref<784x128xf32, #tpu.memory_space<vmem>>, vector<14x128xf32>
      %c701 = arith.constant 701 : index
      %c0_120 = arith.constant 0 : index
      %167 = tpu.strided_load %arg8[%c701, %c0_120] {strides = array<i32: 2, 1>} : memref<784x128xf32, #tpu.memory_space<vmem>>, vector<14x128xf32>
      %168 = arith.maximumf %166, %167 : vector<14x128xf32>
      %169 = arith.maximumf %165, %168 : vector<14x128xf32>
      %170 = vector.extract_strided_slice %169 {offsets = [0, 0], sizes = [14, 32], strides = [1, 1]} : vector<14x128xf32> to vector<14x32xf32>
      %c168_121 = arith.constant 168 : index
      %c0_122 = arith.constant 0 : index
      %171 = vector.load %arg9[%c168_121, %c0_122] : memref<208x128xf32, #tpu.memory_space<vmem>>, vector<14x32xf32>
      tpu.vector_store %arg9[%c168_121, %c0_122], %170 {strides = array<i32>} : memref<208x128xf32, #tpu.memory_space<vmem>>, vector<14x32xf32>,
      %c167 = arith.constant 167 : index
      %c32_123 = arith.constant 32 : index
      %172 = vector.load %arg9[%c167, %c32_123] : memref<208x128xf32, #tpu.memory_space<vmem>>, vector<14x32xf32>
      tpu.vector_store %arg9[%c167, %c32_123], %170 {strides = array<i32>} : memref<208x128xf32, #tpu.memory_space<vmem>>, vector<14x32xf32>,
      %c166 = arith.constant 166 : index
      %c64_124 = arith.constant 64 : index
      %173 = vector.load %arg9[%c166, %c64_124] : memref<208x128xf32, #tpu.memory_space<vmem>>, vector<14x32xf32>
      tpu.vector_store %arg9[%c166, %c64_124], %170 {strides = array<i32>} : memref<208x128xf32, #tpu.memory_space<vmem>>, vector<14x32xf32>,
      %c165 = arith.constant 165 : index
      %c96_125 = arith.constant 96 : index
      %174 = vector.load %arg9[%c165, %c96_125] : memref<208x128xf32, #tpu.memory_space<vmem>>, vector<14x32xf32>
      tpu.vector_store %arg9[%c165, %c96_125], %170 {strides = array<i32>} : memref<208x128xf32, #tpu.memory_space<vmem>>, vector<14x32xf32>,
      %c728 = arith.constant 728 : index
      %c0_126 = arith.constant 0 : index
      %175 = tpu.strided_load %arg8[%c728, %c0_126] {strides = array<i32: 2, 1>} : memref<784x128xf32, #tpu.memory_space<vmem>>, vector<14x128xf32>
      %c729 = arith.constant 729 : index
      %c0_127 = arith.constant 0 : index
      %176 = tpu.strided_load %arg8[%c729, %c0_127] {strides = array<i32: 2, 1>} : memref<784x128xf32, #tpu.memory_space<vmem>>, vector<14x128xf32>
      %177 = arith.maximumf %175, %176 : vector<14x128xf32>
      %c756 = arith.constant 756 : index
      %c0_128 = arith.constant 0 : index
      %178 = tpu.strided_load %arg8[%c756, %c0_128] {strides = array<i32: 2, 1>} : memref<784x128xf32, #tpu.memory_space<vmem>>, vector<14x128xf32>
      %c757 = arith.constant 757 : index
      %c0_129 = arith.constant 0 : index
      %179 = tpu.strided_load %arg8[%c757, %c0_129] {strides = array<i32: 2, 1>} : memref<784x128xf32, #tpu.memory_space<vmem>>, vector<14x128xf32>
      %180 = arith.maximumf %178, %179 : vector<14x128xf32>
      %181 = arith.maximumf %177, %180 : vector<14x128xf32>
      %182 = vector.extract_strided_slice %181 {offsets = [0, 0], sizes = [14, 32], strides = [1, 1]} : vector<14x128xf32> to vector<14x32xf32>
      %c182 = arith.constant 182 : index
      %c0_130 = arith.constant 0 : index
      %183 = vector.load %arg9[%c182, %c0_130] : memref<208x128xf32, #tpu.memory_space<vmem>>, vector<14x32xf32>
      tpu.vector_store %arg9[%c182, %c0_130], %182 {strides = array<i32>} : memref<208x128xf32, #tpu.memory_space<vmem>>, vector<14x32xf32>,
      %c181 = arith.constant 181 : index
      %c32_131 = arith.constant 32 : index
      %184 = vector.load %arg9[%c181, %c32_131] : memref<208x128xf32, #tpu.memory_space<vmem>>, vector<14x32xf32>
      tpu.vector_store %arg9[%c181, %c32_131], %182 {strides = array<i32>} : memref<208x128xf32, #tpu.memory_space<vmem>>, vector<14x32xf32>,
      %c180 = arith.constant 180 : index
      %c64_132 = arith.constant 64 : index
      %185 = vector.load %arg9[%c180, %c64_132] : memref<208x128xf32, #tpu.memory_space<vmem>>, vector<14x32xf32>
      tpu.vector_store %arg9[%c180, %c64_132], %182 {strides = array<i32>} : memref<208x128xf32, #tpu.memory_space<vmem>>, vector<14x32xf32>,
      %c179 = arith.constant 179 : index
      %c96_133 = arith.constant 96 : index
      %186 = vector.load %arg9[%c179, %c96_133] : memref<208x128xf32, #tpu.memory_space<vmem>>, vector<14x32xf32>
      tpu.vector_store %arg9[%c179, %c96_133], %182 {strides = array<i32>} : memref<208x128xf32, #tpu.memory_space<vmem>>, vector<14x32xf32>,
      %c0_134 = arith.constant 0 : index
      %c0_135 = arith.constant 0 : index
      %187 = vector.load %arg9[%c0_134, %c0_135] : memref<208x128xf32, #tpu.memory_space<vmem>>, vector<140x128xf32>
      %188 = arith.truncf %187 : vector<140x128xf32> to vector<140x128xbf16>
      %c0_136 = arith.constant 0 : index
      %c0_137 = arith.constant 0 : index
      %c0_138 = arith.constant 0 : index
      %189 = vector.load %arg4[%c0_136, %c0_137, %c0_138] : memref<5x128x128xbf16, #tpu.memory_space<vmem>>, vector<1x128x128xbf16>
      %190 = vector.shape_cast %189 : vector<1x128x128xbf16> to vector<128x128xbf16>
      %cst_139 = arith.constant dense<0.000000e+00> : vector<140x128xf32>
      %191 = tpu.matmul %188, %190, %cst_139 {dimension_numbers = #tpu.dot_dimension_numbers<[1], [0], [0], [1], [0, 0, 1, 1], [], []>} : vector<140x128xbf16>, vector<128x128xbf16>, vector<140x128xf32> -> vector<140x128xf32>
      %c4 = arith.constant 4 : index
      %c0_140 = arith.constant 0 : index
      %192 = vector.load %arg9[%c4, %c0_140] : memref<208x128xf32, #tpu.memory_space<vmem>>, vector<140x32xf32>
      %193 = arith.truncf %192 : vector<140x32xf32> to vector<140x32xbf16>
      %c0_141 = arith.constant 0 : index
      %c0_142 = arith.constant 0 : index
      %c0_143 = arith.constant 0 : index
      %194 = vector.load %arg5[%c0_141, %c0_142, %c0_143] : memref<5x32x128xbf16, #tpu.memory_space<vmem>>, vector<1x32x128xbf16>
      %195 = vector.shape_cast %194 : vector<1x32x128xbf16> to vector<32x128xbf16>
      %cst_144 = arith.constant dense<0.000000e+00> : vector<140x128xf32>
      %196 = tpu.matmul %193, %195, %cst_144 {dimension_numbers = #tpu.dot_dimension_numbers<[1], [0], [0], [1], [0, 0, 1, 1], [], []>} : vector<140x32xbf16>, vector<32x128xbf16>, vector<140x128xf32> -> vector<140x128xf32>
      %197 = arith.addf %191, %196 : vector<140x128xf32>
      %c14_145 = arith.constant 14 : index
      %c0_146 = arith.constant 0 : index
      %198 = vector.load %arg9[%c14_145, %c0_146] : memref<208x128xf32, #tpu.memory_space<vmem>>, vector<140x128xf32>
      %199 = arith.truncf %198 : vector<140x128xf32> to vector<140x128xbf16>
      %c1_147 = arith.constant 1 : index
      %c0_148 = arith.constant 0 : index
      %c0_149 = arith.constant 0 : index
      %200 = vector.load %arg4[%c1_147, %c0_148, %c0_149] : memref<5x128x128xbf16, #tpu.memory_space<vmem>>, vector<1x128x128xbf16>
      %201 = vector.shape_cast %200 : vector<1x128x128xbf16> to vector<128x128xbf16>
      %cst_150 = arith.constant dense<0.000000e+00> : vector<140x128xf32>
      %202 = tpu.matmul %199, %201, %cst_150 {dimension_numbers = #tpu.dot_dimension_numbers<[1], [0], [0], [1], [0, 0, 1, 1], [], []>} : vector<140x128xbf16>, vector<128x128xbf16>, vector<140x128xf32> -> vector<140x128xf32>
      %203 = arith.addf %197, %202 : vector<140x128xf32>
      %c18 = arith.constant 18 : index
      %c0_151 = arith.constant 0 : index
      %204 = vector.load %arg9[%c18, %c0_151] : memref<208x128xf32, #tpu.memory_space<vmem>>, vector<140x32xf32>
      %205 = arith.truncf %204 : vector<140x32xf32> to vector<140x32xbf16>
      %c1_152 = arith.constant 1 : index
      %c0_153 = arith.constant 0 : index
      %c0_154 = arith.constant 0 : index
      %206 = vector.load %arg5[%c1_152, %c0_153, %c0_154] : memref<5x32x128xbf16, #tpu.memory_space<vmem>>, vector<1x32x128xbf16>
      %207 = vector.shape_cast %206 : vector<1x32x128xbf16> to vector<32x128xbf16>
      %cst_155 = arith.constant dense<0.000000e+00> : vector<140x128xf32>
      %208 = tpu.matmul %205, %207, %cst_155 {dimension_numbers = #tpu.dot_dimension_numbers<[1], [0], [0], [1], [0, 0, 1, 1], [], []>} : vector<140x32xbf16>, vector<32x128xbf16>, vector<140x128xf32> -> vector<140x128xf32>
      %209 = arith.addf %203, %208 : vector<140x128xf32>
      %c28_156 = arith.constant 28 : index
      %c0_157 = arith.constant 0 : index
      %210 = vector.load %arg9[%c28_156, %c0_157] : memref<208x128xf32, #tpu.memory_space<vmem>>, vector<140x128xf32>
      %211 = arith.truncf %210 : vector<140x128xf32> to vector<140x128xbf16>
      %c2 = arith.constant 2 : index
      %c0_158 = arith.constant 0 : index
      %c0_159 = arith.constant 0 : index
      %212 = vector.load %arg4[%c2, %c0_158, %c0_159] : memref<5x128x128xbf16, #tpu.memory_space<vmem>>, vector<1x128x128xbf16>
      %213 = vector.shape_cast %212 : vector<1x128x128xbf16> to vector<128x128xbf16>
      %cst_160 = arith.constant dense<0.000000e+00> : vector<140x128xf32>
      %214 = tpu.matmul %211, %213, %cst_160 {dimension_numbers = #tpu.dot_dimension_numbers<[1], [0], [0], [1], [0, 0, 1, 1], [], []>} : vector<140x128xbf16>, vector<128x128xbf16>, vector<140x128xf32> -> vector<140x128xf32>
      %215 = arith.addf %209, %214 : vector<140x128xf32>
      %c32_161 = arith.constant 32 : index
      %c0_162 = arith.constant 0 : index
      %216 = vector.load %arg9[%c32_161, %c0_162] : memref<208x128xf32, #tpu.memory_space<vmem>>, vector<140x32xf32>
      %217 = arith.truncf %216 : vector<140x32xf32> to vector<140x32xbf16>
      %c2_163 = arith.constant 2 : index
      %c0_164 = arith.constant 0 : index
      %c0_165 = arith.constant 0 : index
      %218 = vector.load %arg5[%c2_163, %c0_164, %c0_165] : memref<5x32x128xbf16, #tpu.memory_space<vmem>>, vector<1x32x128xbf16>
      %219 = vector.shape_cast %218 : vector<1x32x128xbf16> to vector<32x128xbf16>
      %cst_166 = arith.constant dense<0.000000e+00> : vector<140x128xf32>
      %220 = tpu.matmul %217, %219, %cst_166 {dimension_numbers = #tpu.dot_dimension_numbers<[1], [0], [0], [1], [0, 0, 1, 1], [], []>} : vector<140x32xbf16>, vector<32x128xbf16>, vector<140x128xf32> -> vector<140x128xf32>
      %221 = arith.addf %215, %220 : vector<140x128xf32>
      %c42_167 = arith.constant 42 : index
      %c0_168 = arith.constant 0 : index
      %222 = vector.load %arg9[%c42_167, %c0_168] : memref<208x128xf32, #tpu.memory_space<vmem>>, vector<140x128xf32>
      %223 = arith.truncf %222 : vector<140x128xf32> to vector<140x128xbf16>
      %c3 = arith.constant 3 : index
      %c0_169 = arith.constant 0 : index
      %c0_170 = arith.constant 0 : index
      %224 = vector.load %arg4[%c3, %c0_169, %c0_170] : memref<5x128x128xbf16, #tpu.memory_space<vmem>>, vector<1x128x128xbf16>
      %225 = vector.shape_cast %224 : vector<1x128x128xbf16> to vector<128x128xbf16>
      %cst_171 = arith.constant dense<0.000000e+00> : vector<140x128xf32>
      %226 = tpu.matmul %223, %225, %cst_171 {dimension_numbers = #tpu.dot_dimension_numbers<[1], [0], [0], [1], [0, 0, 1, 1], [], []>} : vector<140x128xbf16>, vector<128x128xbf16>, vector<140x128xf32> -> vector<140x128xf32>
      %227 = arith.addf %221, %226 : vector<140x128xf32>
      %c46 = arith.constant 46 : index
      %c0_172 = arith.constant 0 : index
      %228 = vector.load %arg9[%c46, %c0_172] : memref<208x128xf32, #tpu.memory_space<vmem>>, vector<140x32xf32>
      %229 = arith.truncf %228 : vector<140x32xf32> to vector<140x32xbf16>
      %c3_173 = arith.constant 3 : index
      %c0_174 = arith.constant 0 : index
      %c0_175 = arith.constant 0 : index
      %230 = vector.load %arg5[%c3_173, %c0_174, %c0_175] : memref<5x32x128xbf16, #tpu.memory_space<vmem>>, vector<1x32x128xbf16>
      %231 = vector.shape_cast %230 : vector<1x32x128xbf16> to vector<32x128xbf16>
      %cst_176 = arith.constant dense<0.000000e+00> : vector<140x128xf32>
      %232 = tpu.matmul %229, %231, %cst_176 {dimension_numbers = #tpu.dot_dimension_numbers<[1], [0], [0], [1], [0, 0, 1, 1], [], []>} : vector<140x32xbf16>, vector<32x128xbf16>, vector<140x128xf32> -> vector<140x128xf32>
      %233 = arith.addf %227, %232 : vector<140x128xf32>
      %c56_177 = arith.constant 56 : index
      %c0_178 = arith.constant 0 : index
      %234 = vector.load %arg9[%c56_177, %c0_178] : memref<208x128xf32, #tpu.memory_space<vmem>>, vector<140x128xf32>
      %235 = arith.truncf %234 : vector<140x128xf32> to vector<140x128xbf16>
      %c4_179 = arith.constant 4 : index
      %c0_180 = arith.constant 0 : index
      %c0_181 = arith.constant 0 : index
      %236 = vector.load %arg4[%c4_179, %c0_180, %c0_181] : memref<5x128x128xbf16, #tpu.memory_space<vmem>>, vector<1x128x128xbf16>
      %237 = vector.shape_cast %236 : vector<1x128x128xbf16> to vector<128x128xbf16>
      %cst_182 = arith.constant dense<0.000000e+00> : vector<140x128xf32>
      %238 = tpu.matmul %235, %237, %cst_182 {dimension_numbers = #tpu.dot_dimension_numbers<[1], [0], [0], [1], [0, 0, 1, 1], [], []>} : vector<140x128xbf16>, vector<128x128xbf16>, vector<140x128xf32> -> vector<140x128xf32>
      %239 = arith.addf %233, %238 : vector<140x128xf32>
      %c60 = arith.constant 60 : index
      %c0_183 = arith.constant 0 : index
      %240 = vector.load %arg9[%c60, %c0_183] : memref<208x128xf32, #tpu.memory_space<vmem>>, vector<140x32xf32>
      %241 = arith.truncf %240 : vector<140x32xf32> to vector<140x32xbf16>
      %c4_184 = arith.constant 4 : index
      %c0_185 = arith.constant 0 : index
      %c0_186 = arith.constant 0 : index
      %242 = vector.load %arg5[%c4_184, %c0_185, %c0_186] : memref<5x32x128xbf16, #tpu.memory_space<vmem>>, vector<1x32x128xbf16>
      %243 = vector.shape_cast %242 : vector<1x32x128xbf16> to vector<32x128xbf16>
      %cst_187 = arith.constant dense<0.000000e+00> : vector<140x128xf32>
      %244 = tpu.matmul %241, %243, %cst_187 {dimension_numbers = #tpu.dot_dimension_numbers<[1], [0], [0], [1], [0, 0, 1, 1], [], []>} : vector<140x32xbf16>, vector<32x128xbf16>, vector<140x128xf32> -> vector<140x128xf32>
      %245 = arith.addf %239, %244 : vector<140x128xf32>
      %c0_188 = arith.constant 0 : index
      %c0_189 = arith.constant 0 : index
      %246 = vector.load %arg6[%c0_188, %c0_189] : memref<1x128xf32, #tpu.memory_space<vmem>>, vector<1x128xf32>
      %247 = vector.broadcast %246 : vector<1x128xf32> to vector<140x128xf32>
      %248 = arith.addf %245, %247 : vector<140x128xf32>
      %cst_190 = arith.constant 0.000000e+00 : f32
      %249 = vector.broadcast %cst_190 : f32 to vector<140x128xf32>
      %250 = arith.maximumf %248, %249 : vector<140x128xf32>
      %251 = arith.truncf %250 : vector<140x128xf32> to vector<140x128xbf16>
      %252 = arith.index_cast %4 : i32 to index
      %c0_191 = arith.constant 0 : index
      %c0_192 = arith.constant 0 : index
      %253 = vector.load %arg7[%252, %c0_191, %c0_192] : memref<8x140x128xbf16, #tpu.memory_space<vmem>>, vector<1x140x128xbf16>
      %254 = vector.shape_cast %253 : vector<1x140x128xbf16> to vector<140x128xbf16>
      %255 = vector.shape_cast %251 : vector<140x128xbf16> to vector<1x140x128xbf16>
      tpu.vector_store %arg7[%252, %c0_191, %c0_192], %255 {strides = array<i32>} : memref<8x140x128xbf16, #tpu.memory_space<vmem>>, vector<1x140x128xbf16>,
    }
    %c8_i32_0 = arith.constant 8 : i32
    return
  }
  func.func @transform_0(%arg0: i32) -> (i32, i32, i32) {
    %c0_i32 = arith.constant 0 : i32
    %c0_i32_0 = arith.constant 0 : i32
    %c0_i32_1 = arith.constant 0 : i32
    return %arg0, %c0_i32, %c0_i32_0 : i32, i32, i32
  }
  func.func @transform_1(%arg0: i32) -> (i32, i32) {
    %c0_i32 = arith.constant 0 : i32
    %c0_i32_0 = arith.constant 0 : i32
    %c0_i32_1 = arith.constant 0 : i32
    return %c0_i32, %c0_i32_0 : i32, i32
  }
  func.func @transform_2(%arg0: i32) -> (i32, i32) {
    %c0_i32 = arith.constant 0 : i32
    %c0_i32_0 = arith.constant 0 : i32
    %c0_i32_1 = arith.constant 0 : i32
    return %c0_i32, %c0_i32_0 : i32, i32
  }
  func.func @transform_3(%arg0: i32) -> (i32, i32, i32) {
    %c0_i32 = arith.constant 0 : i32
    %c0_i32_0 = arith.constant 0 : i32
    %c0_i32_1 = arith.constant 0 : i32
    %c0_i32_2 = arith.constant 0 : i32
    return %c0_i32, %c0_i32_0, %c0_i32_1 : i32, i32, i32
  }
  func.func @transform_4(%arg0: i32) -> (i32, i32, i32) {
    %c0_i32 = arith.constant 0 : i32
    %c0_i32_0 = arith.constant 0 : i32
    %c0_i32_1 = arith.constant 0 : i32
    %c0_i32_2 = arith.constant 0 : i32
    return %c0_i32, %c0_i32_0, %c0_i32_1 : i32, i32, i32
  }
  func.func @transform_5(%arg0: i32) -> (i32, i32) {
    %c0_i32 = arith.constant 0 : i32
    %c0_i32_0 = arith.constant 0 : i32
    %c0_i32_1 = arith.constant 0 : i32
    return %c0_i32, %c0_i32_0 : i32, i32
  }
  func.func @transform_6(%arg0: i32) -> (i32, i32, i32) {
    %c0_i32 = arith.constant 0 : i32
    %c0_i32_0 = arith.constant 0 : i32
    %c0_i32_1 = arith.constant 0 : i32
    return %arg0, %c0_i32, %c0_i32_0 : i32, i32, i32
  }
}

module attributes {stable_mosaic.version = 11 : i64} {
  func.func @_fc_stack_kernel(%arg0: i32, %arg1: memref<8x17920xbf16, #tpu.memory_space<vmem>>, %arg2: memref<17920x128xbf16, #tpu.memory_space<vmem>>, %arg3: memref<1x128xf32, #tpu.memory_space<vmem>>, %arg4: memref<128x128xbf16, #tpu.memory_space<vmem>>, %arg5: memref<1x128xf32, #tpu.memory_space<vmem>>, %arg6: memref<8x128xf32, #tpu.memory_space<vmem>>) attributes {dimension_semantics = [#tpu.dimension_semantics<parallel>], iteration_bounds = array<i64: 1>, scalar_prefetch = 0 : i64, scratch_operands = 0 : i64, tpu.core_type = #tpu.core_type<tc>, window_params = [{transform_indices = @transform_0, window_bounds = array<i64: 8, 17920>}, {pipeline_mode = #tpu.pipeline_mode<synchronous>, transform_indices = @transform_1, window_bounds = array<i64: 17920, 128>}, {pipeline_mode = #tpu.pipeline_mode<synchronous>, transform_indices = @transform_2, window_bounds = array<i64: 1, 128>}, {pipeline_mode = #tpu.pipeline_mode<synchronous>, transform_indices = @transform_3, window_bounds = array<i64: 128, 128>}, {pipeline_mode = #tpu.pipeline_mode<synchronous>, transform_indices = @transform_4, window_bounds = array<i64: 1, 128>}, {transform_indices = @transform_5, window_bounds = array<i64: 8, 128>}]} {
    %c0 = arith.constant 0 : index
    %c0_0 = arith.constant 0 : index
    %0 = vector.load %arg1[%c0, %c0_0] : memref<8x17920xbf16, #tpu.memory_space<vmem>>, vector<8x17920xbf16>
    %c0_1 = arith.constant 0 : index
    %c0_2 = arith.constant 0 : index
    %1 = vector.load %arg2[%c0_1, %c0_2] : memref<17920x128xbf16, #tpu.memory_space<vmem>>, vector<17920x128xbf16>
    %cst = arith.constant dense<0.000000e+00> : vector<8x128xf32>
    %2 = tpu.matmul %0, %1, %cst {dimension_numbers = #tpu.dot_dimension_numbers<[1], [0], [0], [1], [0, 0, 1, 1], [], []>} : vector<8x17920xbf16>, vector<17920x128xbf16>, vector<8x128xf32> -> vector<8x128xf32>
    %c0_3 = arith.constant 0 : index
    %c0_4 = arith.constant 0 : index
    %3 = vector.load %arg3[%c0_3, %c0_4] : memref<1x128xf32, #tpu.memory_space<vmem>>, vector<1x128xf32>
    %4 = vector.broadcast %3 : vector<1x128xf32> to vector<8x128xf32>
    %5 = arith.addf %2, %4 : vector<8x128xf32>
    %cst_5 = arith.constant 0.000000e+00 : f32
    %6 = vector.broadcast %cst_5 : f32 to vector<8x128xf32>
    %7 = arith.maximumf %5, %6 : vector<8x128xf32>
    %8 = arith.truncf %7 : vector<8x128xf32> to vector<8x128xbf16>
    %c0_6 = arith.constant 0 : index
    %c0_7 = arith.constant 0 : index
    %9 = vector.load %arg4[%c0_6, %c0_7] : memref<128x128xbf16, #tpu.memory_space<vmem>>, vector<128x128xbf16>
    %cst_8 = arith.constant dense<0.000000e+00> : vector<8x128xf32>
    %10 = tpu.matmul %8, %9, %cst_8 {dimension_numbers = #tpu.dot_dimension_numbers<[1], [0], [0], [1], [0, 0, 1, 1], [], []>} : vector<8x128xbf16>, vector<128x128xbf16>, vector<8x128xf32> -> vector<8x128xf32>
    %c0_9 = arith.constant 0 : index
    %c0_10 = arith.constant 0 : index
    %11 = vector.load %arg5[%c0_9, %c0_10] : memref<1x128xf32, #tpu.memory_space<vmem>>, vector<1x128xf32>
    %12 = vector.broadcast %11 : vector<1x128xf32> to vector<8x128xf32>
    %13 = arith.addf %10, %12 : vector<8x128xf32>
    %c0_11 = arith.constant 0 : index
    %c0_12 = arith.constant 0 : index
    %14 = vector.load %arg6[%c0_11, %c0_12] : memref<8x128xf32, #tpu.memory_space<vmem>>, vector<8x128xf32>
    tpu.vector_store %arg6[%c0_11, %c0_12], %13 {strides = array<i32>} : memref<8x128xf32, #tpu.memory_space<vmem>>, vector<8x128xf32>,
    return
  }
  func.func @transform_0(%arg0: i32) -> (i32, i32) {
    %c0_i32 = arith.constant 0 : i32
    %c0_i32_0 = arith.constant 0 : i32
    return %arg0, %c0_i32 : i32, i32
  }
  func.func @transform_1(%arg0: i32) -> (i32, i32) {
    %c0_i32 = arith.constant 0 : i32
    %c0_i32_0 = arith.constant 0 : i32
    %c0_i32_1 = arith.constant 0 : i32
    return %c0_i32, %c0_i32_0 : i32, i32
  }
  func.func @transform_2(%arg0: i32) -> (i32, i32) {
    %c0_i32 = arith.constant 0 : i32
    %c0_i32_0 = arith.constant 0 : i32
    %c0_i32_1 = arith.constant 0 : i32
    return %c0_i32, %c0_i32_0 : i32, i32
  }
  func.func @transform_3(%arg0: i32) -> (i32, i32) {
    %c0_i32 = arith.constant 0 : i32
    %c0_i32_0 = arith.constant 0 : i32
    %c0_i32_1 = arith.constant 0 : i32
    return %c0_i32, %c0_i32_0 : i32, i32
  }
  func.func @transform_4(%arg0: i32) -> (i32, i32) {
    %c0_i32 = arith.constant 0 : i32
    %c0_i32_0 = arith.constant 0 : i32
    %c0_i32_1 = arith.constant 0 : i32
    return %c0_i32, %c0_i32_0 : i32, i32
  }
  func.func @transform_5(%arg0: i32) -> (i32, i32) {
    %c0_i32 = arith.constant 0 : i32
    %c0_i32_0 = arith.constant 0 : i32
    return %arg0, %c0_i32 : i32, i32
  }
}

</mosaic_0001>

<bundles_post_ra>
// kernel: simple_net_forward.2
= control target key start
LH: loop header
LB: loop body
LE: loop exit
PB: predicated region body
PF: predicated region fallthrough
CT: control target
= control target key end

     0   :  { %v5310_v0 = vmov 0.0   ;;  %s5351_s21 = smov 0   ;;  %s6950_s0 = inlined_call_operand.vmem [shape: bf16[8,784,128], index: 0, kind: input, shape index: {}]   ;;  %s6951_s1 = inlined_call_operand.vmem [shape: bf16[128,128], index: 1, kind: input, shape index: {}]   ;;  %s6952_s2 = inlined_call_operand.vmem [shape: f32[1,128], index: 2, kind: input, shape index: {}]   ;;  %s6953_s3 = inlined_call_operand.vmem [shape: bf16[5,128,128], index: 3, kind: input, shape index: {}]   ;;  %s6954_s4 = inlined_call_operand.vmem [shape: bf16[5,32,128], index: 4, kind: input, shape index: {}]   ;;  %s6955_s5 = inlined_call_operand.vmem [shape: f32[1,128], index: 5, kind: input, shape index: {}]   ;;  %s6956_s6 = inlined_call_operand.vmem [shape: bf16[8,140,128], index: 6, kind: output, shape index: {}]  }
   0x1   :  { %24 = vst [vmem:[#allocation3 + $0xc0] sm:$0xff] %v5310_v0 }
   0x2 LB: > { %v5193_v1 = vld [vmem:[%s6951_s1] sm:$0xff]   ;;  %v6957_v2 = vmov 0.0   ;;  %v5194_v3 = vld [vmem:[%s6951_s1 + $0x8] sm:$0xff]   ;;  %vm5312_vm0 = vmmov 0   ;;  %s4239_s26 = smul.u32 392, %s5308_s21  ;;  %v5195_v4 = vld [vmem:[%s6951_s1 + $0x10] sm:$0xff]   ;;  %s5308_s21 = sphi %s5351_s21, %s31_s21  }
   0x3   : > { %4503 = vmatprep.subr.bf16.mxu0 %v6957_v2  ;;  %4715 = vmatprep.subr.bf16.mxu1 %v6957_v2  ;;  %v5196_v5 = vld [vmem:[%s6951_s1 + $0x18] sm:$0xff]   ;;  %v5197_v6 = vld [vmem:[%s6951_s1 + $0x20] sm:$0xff]   ;;  %v5198_v7 = vld [vmem:[%s6951_s1 + $0x28] sm:$0xff]   ;;  %vm1140_vm1 = vcmask 261120   ;;  %s5313_s20 = smov 32   ;;  %vm1142_vm2 = vcmask 259072  }
   0x4   : > { %4504 = vmatpush3.bf16.msra.mxu0 %v5193_v1  ;;  %4519 = vmatprep.mubr.msk.bf16.mxu0 %vm5312_vm0, %v6957_v2  ;;  %s5377_s7 = scalar_lea.vmem %s6950_s0, %s4239_s26  ;;  %v5199_v8 = vld [vmem:[%s6951_s1 + $0x30] sm:$0xff]   ;;  %v5200_v9 = vld [vmem:[%s6951_s1 + $0x38] sm:$0xff]   ;;  %v5482_v37 = vld [vmem:[%s6952_s2] ss:$0 sm:$0xff]  ;;  %s5314_s22 = smov 64   ;;  %vm1152_vm3 = vcmask 523521  }
   0x5   : > { %4505 = vmatprep.subr.bf16.mxu0 %v6957_v2  ;;  %4719 = vmatprep.mubr.msk.bf16.mxu1 %vm5312_vm0, %v6957_v2  ;;  %v5201_v10 = vld [vmem:[%s5377_s7] sm:$0xff]   ;;  %v5202_v11 = vld [vmem:[%s5377_s7 + $0x8] sm:$0xff]   ;;  %v5203_v12 = vld [vmem:[%s5377_s7 + $0x10] sm:$0xff]   ;;  %s5315_s23 = smov 96   ;;  %vm1162_vm4 = vcmask 785922   ;;  %vm1172_vm5 = vcmask 1048323  }
   0x6   : > { %v5204_v13 = vld [vmem:[%s5377_s7 + $0x18] sm:$0xff]   ;;  %v5205_v14 = vld [vmem:[%s5377_s7 + $0x20] sm:$0xff]   ;;  %v5206_v15 = vld [vmem:[%s5377_s7 + $0x28] sm:$0xff]   ;;  %vm1154_vm6 = vcmask 521472   ;;  %vm1164_vm7 = vcmask 783872   ;;  %vm1174_vm8 = vcmask 1046272  }
   0x7   : > { %v5207_v16 = vld [vmem:[%s5377_s7 + $0x30] sm:$0xff]   ;;  %v5208_v17 = vld [vmem:[%s5377_s7 + $0x38] sm:$0xff]   ;;  %v5209_v18 = vld [vmem:[%s5377_s7 + $0x40] sm:$0xff]   ;;  %vm1208_vm9 = vcmask 523520   ;;  %vm1217_vm10 = vcmask 785920   ;;  %vm1226_vm11 = vcmask 1048320  }
   0x8   : > { %4506 = vmatpush3.bf16.msra.mxu0 %v5194_v3  ;;  %v5210_v19 = vld [vmem:[%s5377_s7 + $0x48] sm:$0xff]   ;;  %v5211_v20 = vld [vmem:[%s5377_s7 + $0x50] sm:$0xff]   ;;  %v5212_v21 = vld [vmem:[%s5377_s7 + $0x58] sm:$0xff]   ;;  %s4258_s18 = smul.u32 72, %s5308_s21  ;;  %s31_s21 = sadd.s32 1, %s5308_s21  }
   0x9   : > { %4507 = vmatprep.subr.bf16.mxu0 %v6957_v2  ;;  %v5213_v22 = vld [vmem:[%s5377_s7 + $0x60] sm:$0xff]   ;;  %v5214_v23 = vld [vmem:[%s5377_s7 + $0x68] sm:$0xff]   ;;  %v5215_v24 = vld [vmem:[%s5377_s7 + $0x70] sm:$0xff]   ;;  %p28_p0 = scmp.ge.s32.totalorder %s31_s21, 8  }
   0xa   : > { %v5216_v25 = vld [vmem:[%s5377_s7 + $0x78] sm:$0xff]   ;;  %v5217_v26 = vld [vmem:[%s5377_s7 + $0x80] sm:$0xff]   ;;  %v5218_v27 = vld [vmem:[%s5377_s7 + $0x88] sm:$0xff]  }
   0xb   : > { %v5219_v28 = vld [vmem:[%s5377_s7 + $0x90] sm:$0xff]   ;;  %v5220_v29 = vld [vmem:[%s5377_s7 + $0x98] sm:$0xff]   ;;  %v5221_v30 = vld [vmem:[%s5377_s7 + $0xa0] sm:$0xff]  }
   0xc   : > { %4508 = vmatpush3.bf16.msra.mxu0 %v5195_v4  ;;  %v5222_v31 = vld [vmem:[%s5377_s7 + $0xa8] sm:$0xff]   ;;  %v5223_v32 = vld [vmem:[%s5377_s7 + $0xb0] sm:$0xff]   ;;  %v5224_v33 = vld [vmem:[%s5377_s7 + $0xb8] sm:$0xff]  }
   0xd   : > { %4509 = vmatprep.subr.bf16.mxu0 %v6957_v2  ;;  %v5225_v34 = vld [vmem:[%s5377_s7 + $0xc0] sm:$0xff]   ;;  %v5226_v35 = vld [vmem:[%s5377_s7 + $0xc8] sm:$0xff]   ;;  %v5227_v36 = vld [vmem:[%s5377_s7 + $0xd0] sm:$0xff]  }
   0xe   : > { %v5228_v41 = vld [vmem:[%s5377_s7 + $0xd8] sm:$0xff]   ;;  %v5229_v50 = vld [vmem:[%s5377_s7 + $0xe0] sm:$0xff]   ;;  %v5230_v59 = vld [vmem:[%s5377_s7 + $0xe8] sm:$0xff]  }
  0x10   : > { %4510 = vmatpush3.bf16.msra.mxu0 %v5196_v5  ;;  %v5231_v5 = vld [vmem:[%s5377_s7 + $0xf0] sm:$0xff]  }
  0x11   : > { %4511 = vmatprep.subr.bf16.mxu0 %v6957_v2 }
  0x14   : > { %4512 = vmatpush3.bf16.msra.mxu0 %v5197_v6 }
  0x15   : > { %4513 = vmatprep.subr.bf16.mxu0 %v6957_v2 }
  0x18   : > { %4514 = vmatpush3.bf16.msra.mxu0 %v5198_v7 }
  0x19   : > { %4515 = vmatprep.subr.bf16.mxu0 %v6957_v2 }
  0x1c   : > { %4516 = vmatpush3.bf16.msra.mxu0 %v5199_v8 }
  0x1d   : > { %4517 = vmatprep.subr.bf16.mxu0 %v6957_v2 }
  0x20   : > { %4518 = vmatpush3.bf16.msra.mxu0 %v5200_v9 }
  0x21   : > { %4991 = vmatprep.subr.bf16.mxu0 %v6957_v2 }
  0x23   : > { %4520 = vmatmul.mubr.bf16.vlgmr.msra.gmra.mrb[0].mxu0 %v5201_v10 }
  0x24   : > { %4523 = vmatprep.mubr.msk.bf16.mxu0 %vm5312_vm0, %v6957_v2 }
  0x2b   : > { %4524 = vmatmul.mubr.bf16.gmra.mrb[4].mxu0 %v5202_v11 }
  0x2c   : > { %4527 = vmatprep.mubr.msk.bf16.mxu0 %vm5312_vm0, %v6957_v2 }
  0x33   : > { %4528 = vmatmul.mubr.bf16.gmra.mrb[8].mxu0 %v5203_v12 }
  0x34   : > { %4531 = vmatprep.mubr.msk.bf16.mxu0 %vm5312_vm0, %v6957_v2 }
  0x3b   : > { %4532 = vmatmul.mubr.bf16.gmra.mrb[12].mxu0 %v5204_v13 }
  0x3c   : > { %4535 = vmatprep.mubr.msk.bf16.mxu0 %vm5312_vm0, %v6957_v2 }
  0x43   : > { %4536 = vmatmul.mubr.bf16.gmra.mrb[16].mxu0 %v5205_v14 }
  0x44   : > { %4539 = vmatprep.mubr.msk.bf16.mxu0 %vm5312_vm0, %v6957_v2 }
  0x4b   : > { %4540 = vmatmul.mubr.bf16.gmra.mrb[20].mxu0 %v5206_v15 }
  0x4c   : > { %4543 = vmatprep.mubr.msk.bf16.mxu0 %vm5312_vm0, %v6957_v2 }
  0x53   : > { %4544 = vmatmul.mubr.bf16.gmra.mrb[24].mxu0 %v5207_v16 }
  0x54   : > { %4547 = vmatprep.mubr.msk.bf16.mxu0 %vm5312_vm0, %v6957_v2 }
  0x5b   : > { %4548 = vmatmul.mubr.bf16.gmra.mrb[28].mxu0 %v5208_v17 }
  0x5c   : > { %4551 = vmatprep.mubr.msk.bf16.mxu0 %vm5312_vm0, %v6957_v2 }
  0x63   : > { %4552 = vmatmul.mubr.bf16.gmra.mrb[32].mxu0 %v5209_v18 }
  0x64   : > { %4555 = vmatprep.mubr.msk.bf16.mxu0 %vm5312_vm0, %v6957_v2 }
  0x6b   : > { %4556 = vmatmul.mubr.bf16.gmra.mrb[36].mxu0 %v5210_v19 }
  0x6c   : > { %4559 = vmatprep.mubr.msk.bf16.mxu0 %vm5312_vm0, %v6957_v2 }
  0x73   : > { %4560 = vmatmul.mubr.bf16.gmra.mrb[40].mxu0 %v5211_v20 }
  0x74   : > { %4563 = vmatprep.mubr.msk.bf16.mxu0 %vm5312_vm0, %v6957_v2 }
  0x7b   : > { %4564 = vmatmul.mubr.bf16.gmra.mrb[44].mxu0 %v5212_v21  ;;  %v5232_v21 = vld [vmem:[%s5377_s7 + $0xf8] sm:$0xff]  }
  0x7c   : > { %4567 = vmatprep.mubr.msk.bf16.mxu0 %vm5312_vm0, %v6957_v2 }
  0x83   : > { %4568 = vmatmul.mubr.bf16.gmra.mrb[48].mxu0 %v5213_v22 }
  0x84   : > { %4571 = vmatprep.mubr.msk.bf16.mxu0 %vm5312_vm0, %v6957_v2 }
  0x8b   : > { %4572 = vmatmul.mubr.bf16.gmra.mrb[52].mxu0 %v5214_v23 }
  0x8c   : > { %4575 = vmatprep.mubr.msk.bf16.mxu0 %vm5312_vm0, %v6957_v2 }
  0x93   : > { %4576 = vmatmul.mubr.bf16.gmra.mrb[56].mxu0 %v5215_v24 }
  0x94   : > { %4579 = vmatprep.mubr.msk.bf16.mxu0 %vm5312_vm0, %v6957_v2 }
  0x9b   : > { %4580 = vmatmul.mubr.bf16.gmra.mrb[60].mxu0 %v5216_v25 }
  0x9c   : > { %4583 = vmatprep.mubr.msk.bf16.mxu0 %vm5312_vm0, %v6957_v2 }
  0xa3   : > { %4584 = vmatmul.mubr.bf16.gmra.mrb[64].mxu0 %v5217_v26 }
  0xa4   : > { %4587 = vmatprep.mubr.msk.bf16.mxu0 %vm5312_vm0, %v6957_v2 }
  0xab   : > { %4588 = vmatmul.mubr.bf16.gmra.mrb[68].mxu0 %v5218_v27 }
  0xac   : > { %4591 = vmatprep.mubr.msk.bf16.mxu0 %vm5312_vm0, %v6957_v2 }
  0xb3   : > { %4592 = vmatmul.mubr.bf16.gmra.mrb[72].mxu0 %v5219_v28 }
  0xb4   : > { %4595 = vmatprep.mubr.msk.bf16.mxu0 %vm5312_vm0, %v6957_v2 }
  0xbb   : > { %4596 = vmatmul.mubr.bf16.gmra.mrb[76].mxu0 %v5220_v29 }
  0xbc   : > { %4599 = vmatprep.mubr.msk.bf16.mxu0 %vm5312_vm0, %v6957_v2 }
  0xc3   : > { %4600 = vmatmul.mubr.bf16.gmra.mrb[80].mxu0 %v5221_v30 }
  0xc4   : > { %4603 = vmatprep.mubr.msk.bf16.mxu0 %vm5312_vm0, %v6957_v2 }
  0xcb   : > { %4604 = vmatmul.mubr.bf16.gmra.mrb[84].mxu0 %v5222_v31 }
  0xcc   : > { %4607 = vmatprep.mubr.msk.bf16.mxu0 %vm5312_vm0, %v6957_v2 }
  0xd3   : > { %4608 = vmatmul.mubr.bf16.gmra.mrb[88].mxu0 %v5223_v32 }
  0xd4   : > { %4611 = vmatprep.mubr.msk.bf16.mxu0 %vm5312_vm0, %v6957_v2 }
  0xdb   : > { %4612 = vmatmul.mubr.bf16.gmra.mrb[92].mxu0 %v5224_v33 }
  0xdc   : > { %4615 = vmatprep.mubr.msk.bf16.mxu0 %vm5312_vm0, %v6957_v2 }
  0xe3   : > { %4616 = vmatmul.mubr.bf16.gmra.mrb[96].mxu0 %v5225_v34 }
  0xe4   : > { %4619 = vmatprep.mubr.msk.bf16.mxu0 %vm5312_vm0, %v6957_v2 }
  0xeb   : > { %4620 = vmatmul.mubr.bf16.gmra.mrb[100].mxu0 %v5226_v35 }
  0xec   : > { %4623 = vmatprep.mubr.msk.bf16.mxu0 %vm5312_vm0, %v6957_v2 }
  0xf3   : > { %4624 = vmatmul.mubr.bf16.gmra.mrb[104].mxu0 %v5227_v36 }
  0xf4   : > { %4627 = vmatprep.mubr.msk.bf16.mxu0 %vm5312_vm0, %v6957_v2 }
  0xf6   : > { %v532_v38 = vpop.f32.mrb[0].mxu0 }
  0xf7   : > { %v533_v39 = vadd.f32 %v5482_v37, %v532_v38  ;;  %v4521_v40 = vpop.f32.mrb[1].mxu0  ;;  %v5233_v38 = vld [vmem:[%s5377_s7 + $0x100] sm:$0xff]  }
  0xf8   : > { %v535_v42 = vpop.f32.mrb[2].mxu0 }
  0xf9   : > { %v923_v43 = vmax.f32 %v533_v39, 0.0  ;;  %v536_v44 = vadd.f32 %v5482_v37, %v535_v42  ;;  %v4522_v45 = vpop.f32.mrb[3].mxu0 }
  0xfb   : > { %1021 = vst [vmem:[#allocation2] sm:$0xff] %v923_v43  ;;  %v924_v46 = vmax.f32 %v536_v44, 0.0  ;;  %4628 = vmatmul.mubr.bf16.gmra.mrb[108].mxu0 %v5228_v41 }
  0xfc   : > { %4631 = vmatprep.mubr.msk.bf16.mxu0 %vm5312_vm0, %v6957_v2 }
  0xfd   : > { %1022 = vst [vmem:[#allocation2 + $0x8] sm:$0xff] %v924_v46 }
  0xfe   : > { %v540_v47 = vpop.f32.mrb[4].mxu0 }
  0xff   : > { %v541_v48 = vadd.f32 %v5482_v37, %v540_v47  ;;  %v4525_v49 = vpop.f32.mrb[5].mxu0  ;;  %v5234_v47 = vld [vmem:[%s5377_s7 + $0x108] sm:$0xff]  }
 0x100   : > { %v543_v51 = vpop.f32.mrb[6].mxu0 }
 0x101   : > { %v925_v52 = vmax.f32 %v541_v48, 0.0  ;;  %v544_v53 = vadd.f32 %v5482_v37, %v543_v51  ;;  %v4526_v54 = vpop.f32.mrb[7].mxu0 }
 0x103   : > { %1023 = vst [vmem:[#allocation2 + $0x10] sm:$0xff] %v925_v52  ;;  %v926_v55 = vmax.f32 %v544_v53, 0.0  ;;  %4632 = vmatmul.mubr.bf16.gmra.mrb[112].mxu0 %v5229_v50 }
 0x104   : > { %4635 = vmatprep.mubr.msk.bf16.mxu0 %vm5312_vm0, %v6957_v2  ;;  %v1119_v10 = vld [vmem:[#allocation2] ss:$2 sm:$0xff]  ;;  %v1123_v11 = vld [vmem:[#allocation2 + $0x1] ss:$2 sm:$0xff] }
 0x105   : > { %1024 = vst [vmem:[#allocation2 + $0x18] sm:$0xff] %v926_v55  ;;  %v1126_v15 = vmax.f32 %v1119_v10, %v1123_v11 }
 0x106   : > { %v548_v56 = vpop.f32.mrb[8].mxu0 }
 0x107   : > { %v549_v57 = vadd.f32 %v5482_v37, %v548_v56  ;;  %v4529_v58 = vpop.f32.mrb[9].mxu0  ;;  %v5235_v56 = vld [vmem:[%s5377_s7 + $0x110] sm:$0xff]  }
 0x108   : > { %v551_v60 = vpop.f32.mrb[10].mxu0 }
 0x109   : > { %v927_v61 = vmax.f32 %v549_v57, 0.0  ;;  %v552_v62 = vadd.f32 %v5482_v37, %v551_v60  ;;  %v4530_v63 = vpop.f32.mrb[11].mxu0 }
 0x10b   : > { %1025 = vst [vmem:[#allocation2 + $0x20] sm:$0xff] %v927_v61  ;;  %v928_v0 = vmax.f32 %v552_v62, 0.0  ;;  %4636 = vmatmul.mubr.bf16.gmra.mrb[116].mxu0 %v5230_v59 }
 0x10c   : > { %4639 = vmatprep.mubr.msk.bf16.mxu0 %vm5312_vm0, %v6957_v2  ;;  %v1121_v22 = vld [vmem:[#allocation2 + $0x10] ss:$2 sm:$0x3f]  ;;  %v1125_v24 = vld [vmem:[#allocation2 + $0x11] ss:$2 sm:$0x3f] }
 0x10d   : > { %1026 = vst [vmem:[#allocation2 + $0x28] sm:$0xff] %v928_v0  ;;  %v1127_v31 = vmax.f32 %v1121_v22, %v1125_v24 }
 0x10e   : > { %v556_v1 = vpop.f32.mrb[12].mxu0 }
 0x10f   : > { %v557_v3 = vadd.f32 %v5482_v37, %v556_v1  ;;  %v4533_v4 = vpop.f32.mrb[13].mxu0 }
 0x110   : > { %v559_v6 = vpop.f32.mrb[14].mxu0 }
 0x111   : > { %v929_v7 = vmax.f32 %v557_v3, 0.0  ;;  %v560_v8 = vadd.f32 %v5482_v37, %v559_v6  ;;  %v4534_v9 = vpop.f32.mrb[15].mxu0 }
 0x113   : > { %1027 = vst [vmem:[#allocation2 + $0x30] sm:$0xff] %v929_v7  ;;  %v930_v12 = vmax.f32 %v560_v8, 0.0  ;;  %4640 = vmatmul.mubr.bf16.gmra.mrb[120].mxu0 %v5231_v5 }
 0x114   : > { %v1129_v13 = vld [vmem:[#allocation2 + $0x1c] ss:$2 sm:$0xff]  ;;  %v1133_v14 = vld [vmem:[#allocation2 + $0x1d] ss:$2 sm:$0xff]  ;;  %4643 = vmatprep.mubr.msk.bf16.mxu0 %vm5312_vm0, %v6957_v2 }
 0x115   : > { %1028 = vst [vmem:[#allocation2 + $0x38] sm:$0xff] %v930_v12  ;;  %v1136_v16 = vmax.f32 %v1129_v13, %v1133_v14 }
 0x116   : > { %v564_v17 = vpop.f32.mrb[16].mxu0 }
 0x117   : > { %v565_v18 = vadd.f32 %v5482_v37, %v564_v17  ;;  %v4537_v19 = vpop.f32.mrb[17].mxu0  ;;  %v1138_v20 = vmax.f32 %v1126_v15, %v1136_v16  ;;  %v5236_v15 = vld [vmem:[%s5377_s7 + $0x118] sm:$0xff]  }
 0x118   : > { %v567_v23 = vpop.f32.mrb[18].mxu0 }
 0x119   : > { %v931_v25 = vmax.f32 %v565_v18, 0.0  ;;  %v568_v26 = vadd.f32 %v5482_v37, %v567_v23  ;;  %1146 = vrot.lane.b32.xlu0 %v1138_v20, %s5313_s20  ;;  %v4538_v27 = vpop.f32.mrb[19].mxu0  ;;  %1141 = vst.msk [vmem:[#allocation3] sm:$0xff] %vm1140_vm1, %v1138_v20  ;;  %v5250_v18 = vld [vmem:[%s6954_s4] sm:$0xff]   ;;  %v5251_v23 = vld [vmem:[%s6954_s4 + $0x8] sm:$0xff]  }
 0x11a   : > { %v1131_v28 = vld [vmem:[#allocation2 + $0x2c] ss:$2 sm:$0x3f]  ;;  %v1135_v29 = vld [vmem:[#allocation2 + $0x2d] ss:$2 sm:$0x3f]  ;;  %4716 = vmatpush3.bf16.msra.mxu1 %v5250_v18 }
 0x11b   : > { %1029 = vst [vmem:[#allocation2 + $0x40] sm:$0xff] %v931_v25  ;;  %v932_v30 = vmax.f32 %v568_v26, 0.0  ;;  %4644 = vmatmul.mubr.bf16.gmra.mrb[124].mxu0 %v5232_v21  ;;  %v1137_v32 = vmax.f32 %v1131_v28, %v1135_v29  ;;  %4717 = vmatprep.subr.bf16.mxu1 %v6957_v2  ;;  %v5237_v27 = vld [vmem:[%s5377_s7 + $0x120] sm:$0xff]  }
 0x11c   : > { %4647 = vmatprep.mubr.msk.bf16.mxu0 %vm5312_vm0, %v6957_v2 }
 0x11d   : > { %1030 = vst [vmem:[#allocation2 + $0x48] sm:$0xff] %v932_v30  ;;  %1156 = vrot.lane.b32.xlu0 %v1138_v20, %s5314_s22  ;;  %v1139_v33 = vmax.f32 %v1127_v31, %v1137_v32 }
 0x11e   : > { %v572_v34 = vpop.f32.mrb[20].mxu0  ;;  %4718 = vmatpush3.bf16.msra.mxu1 %v5251_v23 }
 0x11f   : > { %v573_v35 = vadd.f32 %v5482_v37, %v572_v34  ;;  %1158 = vrot.lane.b32.xlu1 %v1139_v33, %s5314_s22  ;;  %v4541_v36 = vpop.f32.mrb[21].mxu0  ;;  %1143 = vst.msk [vmem:[#allocation3 + $0x8] sm:$0x3f] %vm1142_vm2, %v1139_v33  ;;  %4755 = vmatprep.subr.bf16.mxu1 %v6957_v2 }
 0x120   : > { %v575_v39 = vpop.f32.mrb[22].mxu0  ;;  %v5238_v36 = vld [vmem:[%s5377_s7 + $0x128] sm:$0xff]  }
 0x121   : > { %v933_v40 = vmax.f32 %v573_v35, 0.0  ;;  %v576_v41 = vadd.f32 %v5482_v37, %v575_v39  ;;  %1166 = vrot.lane.b32.xlu0 %v1138_v20, %s5315_s23  ;;  %v4542_v42 = vpop.f32.mrb[23].mxu0 }
 0x122   : > { %v1177_v57 = vld [vmem:[#allocation2 + $0x38] ss:$2 sm:$0xff]  ;;  %v1181_v59 = vld [vmem:[#allocation2 + $0x39] ss:$2 sm:$0xff] }
 0x123   : > { %1031 = vst [vmem:[#allocation2 + $0x50] sm:$0xff] %v933_v40  ;;  %v934_v43 = vmax.f32 %v576_v41, 0.0  ;;  %4648 = vmatmul.mubr.bf16.gmra.mrb[128].mxu0 %v5233_v38  ;;  %1168 = vrot.lane.b32.xlu1 %v1139_v33, %s5315_s23  ;;  %v1184_v5 = vmax.f32 %v1177_v57, %v1181_v59 }
 0x124   : > { %4651 = vmatprep.mubr.msk.bf16.mxu0 %vm5312_vm0, %v6957_v2 }
 0x125   : > { %1032 = vst [vmem:[#allocation2 + $0x58] sm:$0xff] %v934_v43  ;;  %1148 = vrot.lane.b32.xlu0 %v1139_v33, %s5313_s20 }
 0x126   : > { %v580_v44 = vpop.f32.mrb[24].mxu0 }
 0x127   : > { %v581_v45 = vadd.f32 %v5482_v37, %v580_v44  ;;  %v4545_v46 = vpop.f32.mrb[25].mxu0 }
 0x128   : > { %v583_v48 = vpop.f32.mrb[26].mxu0 }
 0x129   : > { %v935_v49 = vmax.f32 %v581_v45, 0.0  ;;  %v584_v50 = vadd.f32 %v5482_v37, %v583_v48  ;;  %v4546_v51 = vpop.f32.mrb[27].mxu0 }
 0x12a   : > { %v1179_v60 = vld [vmem:[#allocation2 + $0x48] ss:$2 sm:$0x3f]  ;;  %v1183_v0 = vld [vmem:[#allocation2 + $0x49] ss:$2 sm:$0x3f] }
 0x12b   : > { %1033 = vst [vmem:[#allocation2 + $0x60] sm:$0xff] %v935_v49  ;;  %v936_v52 = vmax.f32 %v584_v50, 0.0  ;;  %4652 = vmatmul.mubr.bf16.gmra.mrb[132].mxu0 %v5234_v47  ;;  %v1185_v10 = vmax.f32 %v1179_v60, %v1183_v0 }
 0x12c   : > { %4655 = vmatprep.mubr.msk.bf16.mxu0 %vm5312_vm0, %v6957_v2 }
 0x12d   : > { %1034 = vst [vmem:[#allocation2 + $0x68] sm:$0xff] %v936_v52 }
 0x12e   : > { %v588_v53 = vpop.f32.mrb[28].mxu0 }
 0x12f   : > { %v589_v54 = vadd.f32 %v5482_v37, %v588_v53  ;;  %v4549_v55 = vpop.f32.mrb[29].mxu0  ;;  %v5239_v53 = vld [vmem:[%s5377_s7 + $0x130] sm:$0xff]  }
 0x130   : > { %v591_v58 = vpop.f32.mrb[30].mxu0 }
 0x131   : > { %v937_v61 = vmax.f32 %v589_v54, 0.0  ;;  %v592_v62 = vadd.f32 %v5482_v37, %v591_v58  ;;  %v4550_v63 = vpop.f32.mrb[31].mxu0 }
 0x132   : > { %v1187_v1 = vld [vmem:[#allocation2 + $0x54] ss:$2 sm:$0xff]  ;;  %v1191_v3 = vld [vmem:[#allocation2 + $0x55] ss:$2 sm:$0xff] }
 0x133   : > { %1035 = vst [vmem:[#allocation2 + $0x70] sm:$0xff] %v937_v61  ;;  %v938_v4 = vmax.f32 %v592_v62, 0.0  ;;  %4656 = vmatmul.mubr.bf16.gmra.mrb[136].mxu0 %v5235_v56  ;;  %v1194_v6 = vmax.f32 %v1187_v1, %v1191_v3 }
 0x134   : > { %4659 = vmatprep.mubr.msk.bf16.mxu0 %vm5312_vm0, %v6957_v2  ;;  %v1189_v7 = vld [vmem:[#allocation2 + $0x64] ss:$2 sm:$0x3f]  ;;  %v1193_v8 = vld [vmem:[#allocation2 + $0x65] ss:$2 sm:$0x3f] }
 0x135   : > { %1036 = vst [vmem:[#allocation2 + $0x78] sm:$0xff] %v938_v4  ;;  %v1196_v9 = vmax.f32 %v1184_v5, %v1194_v6  ;;  %v1195_v11 = vmax.f32 %v1189_v7, %v1193_v8  ;;  %v5240_v6 = vld [vmem:[%s5377_s7 + $0x138] sm:$0xff]  }
 0x136   : > { %v596_v12 = vpop.f32.mrb[32].mxu0 }
 0x137   : > { %v597_v13 = vadd.f32 %v5482_v37, %v596_v12  ;;  %1211 = vrot.lane.b32.xlu0 %v1196_v9, %s5314_s22  ;;  %1202 = vrot.lane.b32.xlu1 %v1196_v9, %s5313_s20  ;;  %v4553_v14 = vpop.f32.mrb[33].mxu0  ;;  %v1197_v16 = vmax.f32 %v1185_v10, %v1195_v11  ;;  %1198 = vst.msk [vmem:[#allocation3 + $0xe] sm:$0xff] %vm1140_vm1, %v1196_v9 }
 0x138   : > { %v599_v17 = vpop.f32.mrb[34].mxu0 }
 0x139   : > { %v939_v19 = vmax.f32 %v597_v13, 0.0  ;;  %v600_v20 = vadd.f32 %v5482_v37, %v599_v17  ;;  %v4554_v21 = vpop.f32.mrb[35].mxu0  ;;  %1199 = vst.msk [vmem:[#allocation3 + $0x16] sm:$0x3f] %vm1142_vm2, %v1197_v16 }
 0x13b   : > { %1037 = vst [vmem:[#allocation2 + $0x80] sm:$0xff] %v939_v19  ;;  %v940_v22 = vmax.f32 %v600_v20, 0.0  ;;  %4660 = vmatmul.mubr.bf16.gmra.mrb[140].mxu0 %v5236_v15  ;;  %1220 = vrot.lane.b32.xlu0 %v1196_v9, %s5315_s23  ;;  %v5241_v15 = vld [vmem:[%s5377_s7 + $0x140] sm:$0xff]  }
 0x13c   : > { %1204 = vrot.lane.b32.xlu1 %v1197_v16, %s5313_s20  ;;  %4663 = vmatprep.mubr.msk.bf16.mxu0 %vm5312_vm0, %v6957_v2  ;;  %v1230_v42 = vld [vmem:[#allocation2 + $0x70] ss:$2 sm:$0xff]  ;;  %v1234_v43 = vld [vmem:[#allocation2 + $0x71] ss:$2 sm:$0xff] }
 0x13d   : > { %1038 = vst [vmem:[#allocation2 + $0x88] sm:$0xff] %v940_v22  ;;  %v1237_v47 = vmax.f32 %v1230_v42, %v1234_v43 }
 0x13e   : > { %v604_v24 = vpop.f32.mrb[36].mxu0 }
 0x13f   : > { %v605_v25 = vadd.f32 %v5482_v37, %v604_v24  ;;  %v4557_v26 = vpop.f32.mrb[37].mxu0  ;;  %v5242_v24 = vld [vmem:[%s5377_s7 + $0x148] sm:$0xff]  }
 0x140   : > { %1213 = vrot.lane.b32.xlu1 %v1197_v16, %s5314_s22  ;;  %v607_v28 = vpop.f32.mrb[38].mxu0 }
 0x141   : > { %v941_v29 = vmax.f32 %v605_v25, 0.0  ;;  %v608_v30 = vadd.f32 %v5482_v37, %v607_v28  ;;  %v4558_v31 = vpop.f32.mrb[39].mxu0 }
 0x143   : > { %1039 = vst [vmem:[#allocation2 + $0x90] sm:$0xff] %v941_v29  ;;  %v942_v32 = vmax.f32 %v608_v30, 0.0  ;;  %4664 = vmatmul.mubr.bf16.gmra.mrb[144].mxu0 %v5237_v27 }
 0x144   : > { %1222 = vrot.lane.b32.xlu1 %v1197_v16, %s5315_s23  ;;  %4667 = vmatprep.mubr.msk.bf16.mxu0 %vm5312_vm0, %v6957_v2  ;;  %v1232_v54 = vld [vmem:[#allocation2 + $0x80] ss:$2 sm:$0x3f]  ;;  %v1236_v56 = vld [vmem:[#allocation2 + $0x81] ss:$2 sm:$0x3f] }
 0x145   : > { %1040 = vst [vmem:[#allocation2 + $0x98] sm:$0xff] %v942_v32  ;;  %v1238_v63 = vmax.f32 %v1232_v54, %v1236_v56 }
 0x146   : > { %v612_v33 = vpop.f32.mrb[40].mxu0 }
 0x147   : > { %v613_v34 = vadd.f32 %v5482_v37, %v612_v33  ;;  %v4561_v35 = vpop.f32.mrb[41].mxu0 }
 0x148   : > { %v615_v38 = vpop.f32.mrb[42].mxu0  ;;  %v5252_v35 = vld [vmem:[%s6953_s3 + $0xc0] sm:$0xff]  }
 0x149   : > { %v943_v39 = vmax.f32 %v613_v34, 0.0  ;;  %v616_v40 = vadd.f32 %v5482_v37, %v615_v38  ;;  %v4562_v41 = vpop.f32.mrb[43].mxu0  ;;  %4992 = vmatpush3.bf16.msra.mxu0 %v5252_v35 }
 0x14a   : > { %4993 = vmatprep.subr.bf16.mxu0 %v6957_v2 }
 0x14b   : > { %1041 = vst [vmem:[#allocation2 + $0xa0] sm:$0xff] %v943_v39  ;;  %v944_v44 = vmax.f32 %v616_v40, 0.0  ;;  %4668 = vmatmul.mubr.bf16.gmra.mrb[148].mxu0 %v5238_v36 }
 0x14c   : > { %v1240_v45 = vld [vmem:[#allocation2 + $0x8c] ss:$2 sm:$0xff]  ;;  %v1244_v46 = vld [vmem:[#allocation2 + $0x8d] ss:$2 sm:$0xff]  ;;  %4671 = vmatprep.mubr.msk.bf16.mxu0 %vm5312_vm0, %v6957_v2 }
 0x14d   : > { %1042 = vst [vmem:[#allocation2 + $0xa8] sm:$0xff] %v944_v44  ;;  %v1247_v48 = vmax.f32 %v1240_v45, %v1244_v46  ;;  %v5253_v46 = vld [vmem:[%s6953_s3 + $0xc8] sm:$0xff]  }
 0x14e   : > { %v620_v49 = vpop.f32.mrb[44].mxu0  ;;  %4994 = vmatpush3.bf16.msra.mxu0 %v5253_v46  ;;  %v5247_v46 = vld [vmem:[%s5377_s7 + $0x170] sm:$0xff]  }
 0x14f   : > { %v621_v50 = vadd.f32 %v5482_v37, %v620_v49  ;;  %v4565_v51 = vpop.f32.mrb[45].mxu0  ;;  %v1249_v52 = vmax.f32 %v1237_v47, %v1247_v48  ;;  %4995 = vmatprep.subr.bf16.mxu0 %v6957_v2 }
 0x150   : > { %v623_v55 = vpop.f32.mrb[46].mxu0 }
 0x151   : > { %v945_v57 = vmax.f32 %v621_v50, 0.0  ;;  %v624_v58 = vadd.f32 %v5482_v37, %v623_v55  ;;  %1255 = vrot.lane.b32.xlu0 %v1249_v52, %s5313_s20  ;;  %v4566_v59 = vpop.f32.mrb[47].mxu0  ;;  %1251 = vst.msk [vmem:[#allocation3 + $0x1c] sm:$0xff] %vm1140_vm1, %v1249_v52  ;;  %v5243_v50 = vld [vmem:[%s5377_s7 + $0x150] sm:$0xff]  }
 0x152   : > { %v1242_v60 = vld [vmem:[#allocation2 + $0x9c] ss:$2 sm:$0x3f]  ;;  %v1246_v61 = vld [vmem:[#allocation2 + $0x9d] ss:$2 sm:$0x3f] }
 0x153   : > { %1043 = vst [vmem:[#allocation2 + $0xb0] sm:$0xff] %v945_v57  ;;  %v946_v62 = vmax.f32 %v624_v58, 0.0  ;;  %4672 = vmatmul.mubr.bf16.gmra.mrb[152].mxu0 %v5239_v53  ;;  %v1248_v0 = vmax.f32 %v1242_v60, %v1246_v61  ;;  %v5254_v55 = vld [vmem:[%s6953_s3 + $0xd0] sm:$0xff]   ;;  %v5255_v58 = vld [vmem:[%s6953_s3 + $0xd8] sm:$0xff]  }
 0x154   : > { %4675 = vmatprep.mubr.msk.bf16.mxu0 %vm5312_vm0, %v6957_v2  ;;  %4996 = vmatpush3.bf16.msra.mxu0 %v5254_v55  ;;  %v5244_v61 = vld [vmem:[%s5377_s7 + $0x158] sm:$0xff]  }
 0x155   : > { %1044 = vst [vmem:[#allocation2 + $0xb8] sm:$0xff] %v946_v62  ;;  %1263 = vrot.lane.b32.xlu0 %v1249_v52, %s5314_s22  ;;  %v1250_v1 = vmax.f32 %v1238_v63, %v1248_v0  ;;  %4997 = vmatprep.subr.bf16.mxu0 %v6957_v2 }
 0x156   : > { %v628_v3 = vpop.f32.mrb[48].mxu0 }
 0x157   : > { %v629_v4 = vadd.f32 %v5482_v37, %v628_v3  ;;  %1257 = vrot.lane.b32.xlu1 %v1250_v1, %s5313_s20  ;;  %v4569_v5 = vpop.f32.mrb[49].mxu0  ;;  %1252 = vst.msk [vmem:[#allocation3 + $0x24] sm:$0x3f] %vm1142_vm2, %v1250_v1  ;;  %v5256_v3 = vld [vmem:[%s6953_s3 + $0xe0] sm:$0xff]  }
 0x158   : > { %v631_v7 = vpop.f32.mrb[50].mxu0  ;;  %4998 = vmatpush3.bf16.msra.mxu0 %v5255_v58  ;;  %v5248_v58 = vld [vmem:[%s5377_s7 + $0x178] sm:$0xff]  }
 0x159   : > { %v947_v8 = vmax.f32 %v629_v4, 0.0  ;;  %v632_v9 = vadd.f32 %v5482_v37, %v631_v7  ;;  %1271 = vrot.lane.b32.xlu0 %v1249_v52, %s5315_s23  ;;  %v4570_v10 = vpop.f32.mrb[51].mxu0  ;;  %4999 = vmatprep.subr.bf16.mxu0 %v6957_v2 }
 0x15a   : > { %v1280_v25 = vld [vmem:[#allocation2 + $0xa8] ss:$2 sm:$0xff]  ;;  %v1284_v27 = vld [vmem:[#allocation2 + $0xa9] ss:$2 sm:$0xff] }
 0x15b   : > { %1045 = vst [vmem:[#allocation2 + $0xc0] sm:$0xff] %v947_v8  ;;  %v948_v11 = vmax.f32 %v632_v9, 0.0  ;;  %4676 = vmatmul.mubr.bf16.gmra.mrb[156].mxu0 %v5240_v6  ;;  %1265 = vrot.lane.b32.xlu1 %v1250_v1, %s5314_s22  ;;  %v1287_v38 = vmax.f32 %v1280_v25, %v1284_v27  ;;  %v5257_v6 = vld [vmem:[%s6953_s3 + $0xe8] sm:$0xff]   ;;  %v5245_v9 = vld [vmem:[%s5377_s7 + $0x160] sm:$0xff]  }
 0x15c   : > { %4679 = vmatprep.mubr.msk.bf16.mxu0 %vm5312_vm0, %v6957_v2  ;;  %5000 = vmatpush3.bf16.msra.mxu0 %v5256_v3  ;;  %v5246_v27 = vld [vmem:[%s5377_s7 + $0x168] sm:$0xff]  }
 0x15d   : > { %1046 = vst [vmem:[#allocation2 + $0xc8] sm:$0xff] %v948_v11  ;;  %5001 = vmatprep.subr.bf16.mxu0 %v6957_v2 }
 0x15e   : > { %v636_v12 = vpop.f32.mrb[52].mxu0 }
 0x15f   : > { %v637_v13 = vadd.f32 %v5482_v37, %v636_v12  ;;  %1273 = vrot.lane.b32.xlu1 %v1250_v1, %s5315_s23  ;;  %v4573_v14 = vpop.f32.mrb[53].mxu0 }
 0x160   : > { %v639_v16 = vpop.f32.mrb[54].mxu0  ;;  %5002 = vmatpush3.bf16.msra.mxu0 %v5257_v6 }
 0x161   : > { %v949_v17 = vmax.f32 %v637_v13, 0.0  ;;  %v640_v18 = vadd.f32 %v5482_v37, %v639_v16  ;;  %v4574_v19 = vpop.f32.mrb[55].mxu0  ;;  %5003 = vmatprep.subr.bf16.mxu0 %v6957_v2  ;;  %v5258_v16 = vld [vmem:[%s6953_s3 + $0xf0] sm:$0xff]  }
 0x162   : > { %v1282_v28 = vld [vmem:[#allocation2 + $0xb8] ss:$2 sm:$0x3f]  ;;  %v1286_v32 = vld [vmem:[#allocation2 + $0xb9] ss:$2 sm:$0x3f] }
 0x163   : > { %1047 = vst [vmem:[#allocation2 + $0xd0] sm:$0xff] %v949_v17  ;;  %v950_v20 = vmax.f32 %v640_v18, 0.0  ;;  %4680 = vmatmul.mubr.bf16.gmra.mrb[160].mxu0 %v5241_v15  ;;  %v1288_v43 = vmax.f32 %v1282_v28, %v1286_v32 }
 0x164   : > { %4683 = vmatprep.mubr.msk.bf16.mxu0 %vm5312_vm0, %v6957_v2  ;;  %5004 = vmatpush3.bf16.msra.mxu0 %v5258_v16 }
 0x165   : > { %1048 = vst [vmem:[#allocation2 + $0xd8] sm:$0xff] %v950_v20  ;;  %5005 = vmatprep.subr.bf16.mxu0 %v6957_v2 }
 0x166   : > { %v644_v21 = vpop.f32.mrb[56].mxu0 }
 0x167   : > { %v645_v22 = vadd.f32 %v5482_v37, %v644_v21  ;;  %v4577_v23 = vpop.f32.mrb[57].mxu0 }
 0x168   : > { %v647_v26 = vpop.f32.mrb[58].mxu0  ;;  %v5259_v23 = vld [vmem:[%s6953_s3 + $0xf8] sm:$0xff]  }
 0x169   : > { %v951_v29 = vmax.f32 %v645_v22, 0.0  ;;  %v648_v30 = vadd.f32 %v5482_v37, %v647_v26  ;;  %v4578_v31 = vpop.f32.mrb[59].mxu0  ;;  %5006 = vmatpush3.bf16.msra.mxu0 %v5259_v23 }
 0x16a   : > { %v1290_v33 = vld [vmem:[#allocation2 + $0xc4] ss:$2 sm:$0xff]  ;;  %v1294_v34 = vld [vmem:[#allocation2 + $0xc5] ss:$2 sm:$0xff]  ;;  %5083 = vmatprep.subr.bf16.mxu0 %v6957_v2 }
 0x16b   : > { %1049 = vst [vmem:[#allocation2 + $0xe0] sm:$0xff] %v951_v29  ;;  %v952_v36 = vmax.f32 %v648_v30, 0.0  ;;  %4684 = vmatmul.mubr.bf16.gmra.mrb[164].mxu0 %v5242_v24  ;;  %v1297_v39 = vmax.f32 %v1290_v33, %v1294_v34 }
 0x16c   : > { %v1292_v40 = vld [vmem:[#allocation2 + $0xd4] ss:$2 sm:$0x3f]  ;;  %v1296_v41 = vld [vmem:[#allocation2 + $0xd5] ss:$2 sm:$0x3f]  ;;  %4687 = vmatprep.mubr.msk.bf16.mxu0 %vm5312_vm0, %v6957_v2 }
 0x16d   : > { %1050 = vst [vmem:[#allocation2 + $0xe8] sm:$0xff] %v952_v36  ;;  %v1299_v42 = vmax.f32 %v1287_v38, %v1297_v39  ;;  %v1298_v44 = vmax.f32 %v1292_v40, %v1296_v41 }
 0x16e   : > { %v652_v45 = vpop.f32.mrb[60].mxu0 }
 0x16f   : > { %v653_v47 = vadd.f32 %v5482_v37, %v652_v45  ;;  %1305 = vrot.lane.b32.xlu0 %v1299_v42, %s5313_s20  ;;  %v4581_v48 = vpop.f32.mrb[61].mxu0  ;;  %v1300_v49 = vmax.f32 %v1288_v43, %v1298_v44  ;;  %1301 = vst.msk [vmem:[#allocation3 + $0x2a] sm:$0xff] %vm1140_vm1, %v1299_v42 }
 0x170   : > { %v655_v51 = vpop.f32.mrb[62].mxu0 }
 0x171   : > { %v953_v52 = vmax.f32 %v653_v47, 0.0  ;;  %v656_v53 = vadd.f32 %v5482_v37, %v655_v51  ;;  %1307 = vrot.lane.b32.xlu1 %v1300_v49, %s5313_s20  ;;  %v4582_v54 = vpop.f32.mrb[63].mxu0  ;;  %1302 = vst.msk [vmem:[#allocation3 + $0x32] sm:$0x3f] %vm1142_vm2, %v1300_v49 }
 0x173   : > { %1051 = vst [vmem:[#allocation2 + $0xf0] sm:$0xff] %v953_v52  ;;  %v954_v56 = vmax.f32 %v656_v53, 0.0  ;;  %4688 = vmatmul.mubr.bf16.gmra.mrb[168].mxu0 %v5243_v50  ;;  %1313 = vrot.lane.b32.xlu0 %v1299_v42, %s5314_s22 }
 0x174   : > { %4691 = vmatprep.mubr.msk.bf16.mxu0 %vm5312_vm0, %v6957_v2  ;;  %v1330_v14 = vld [vmem:[#allocation2 + $0xe0] ss:$2 sm:$0xff]  ;;  %v1334_v15 = vld [vmem:[#allocation2 + $0xe1] ss:$2 sm:$0xff] }
 0x175   : > { %1052 = vst [vmem:[#allocation2 + $0xf8] sm:$0xff] %v954_v56  ;;  %1315 = vrot.lane.b32.xlu1 %v1300_v49, %s5314_s22  ;;  %v1337_v20 = vmax.f32 %v1330_v14, %v1334_v15 }
 0x176   : > { %v660_v57 = vpop.f32.mrb[64].mxu0 }
 0x177   : > { %v661_v59 = vadd.f32 %v5482_v37, %v660_v57  ;;  %1321 = vrot.lane.b32.xlu0 %v1299_v42, %s5315_s23  ;;  %v4585_v60 = vpop.f32.mrb[65].mxu0 }
 0x178   : > { %v663_v62 = vpop.f32.mrb[66].mxu0 }
 0x179   : > { %v955_v63 = vmax.f32 %v661_v59, 0.0  ;;  %v664_v0 = vadd.f32 %v5482_v37, %v663_v62  ;;  %1323 = vrot.lane.b32.xlu1 %v1300_v49, %s5315_s23  ;;  %v4586_v1 = vpop.f32.mrb[67].mxu0 }
 0x17b   : > { %1053 = vst [vmem:[#allocation2 + $0x100] sm:$0xff] %v955_v63  ;;  %v956_v4 = vmax.f32 %v664_v0, 0.0  ;;  %4692 = vmatmul.mubr.bf16.gmra.mrb[172].mxu0 %v5244_v61 }
 0x17c   : > { %4695 = vmatprep.mubr.msk.bf16.mxu0 %vm5312_vm0, %v6957_v2  ;;  %v1332_v28 = vld [vmem:[#allocation2 + $0xf0] ss:$2 sm:$0x3f]  ;;  %v1336_v30 = vld [vmem:[#allocation2 + $0xf1] ss:$2 sm:$0x3f] }
 0x17d   : > { %1054 = vst [vmem:[#allocation2 + $0x108] sm:$0xff] %v956_v4  ;;  %v1338_v39 = vmax.f32 %v1332_v28, %v1336_v30 }
 0x17e   : > { %v668_v5 = vpop.f32.mrb[68].mxu0 }
 0x17f   : > { %v669_v7 = vadd.f32 %v5482_v37, %v668_v5  ;;  %v4589_v8 = vpop.f32.mrb[69].mxu0  ;;  %v5249_v5 = vld [vmem:[%s5377_s7 + $0x180] sm:$0xff]   ;;  %s6848_s7 = scalar_lea.vmem %s6956_s6, %s4258_s18 }
 0x180   : > { %v671_v10 = vpop.f32.mrb[70].mxu0 }
 0x181   : > { %v957_v11 = vmax.f32 %v669_v7, 0.0  ;;  %v672_v12 = vadd.f32 %v5482_v37, %v671_v10  ;;  %v4590_v13 = vpop.f32.mrb[71].mxu0 }
 0x183   : > { %1055 = vst [vmem:[#allocation2 + $0x110] sm:$0xff] %v957_v11  ;;  %v958_v17 = vmax.f32 %v672_v12, 0.0  ;;  %4696 = vmatmul.mubr.bf16.gmra.mrb[176].mxu0 %v5245_v9 }
 0x184   : > { %v1340_v18 = vld [vmem:[#allocation2 + $0xfc] ss:$2 sm:$0xff]  ;;  %v1344_v19 = vld [vmem:[#allocation2 + $0xfd] ss:$2 sm:$0xff]  ;;  %4699 = vmatprep.mubr.msk.bf16.mxu0 %vm5312_vm0, %v6957_v2 }
 0x185   : > { %1056 = vst [vmem:[#allocation2 + $0x118] sm:$0xff] %v958_v17  ;;  %v1347_v21 = vmax.f32 %v1340_v18, %v1344_v19 }
 0x186   : > { %v676_v22 = vpop.f32.mrb[72].mxu0 }
 0x187   : > { %v677_v24 = vadd.f32 %v5482_v37, %v676_v22  ;;  %v4593_v25 = vpop.f32.mrb[73].mxu0  ;;  %v1349_v26 = vmax.f32 %v1337_v20, %v1347_v21 }
 0x188   : > { %v679_v29 = vpop.f32.mrb[74].mxu0 }
 0x189   : > { %v959_v31 = vmax.f32 %v677_v24, 0.0  ;;  %v680_v32 = vadd.f32 %v5482_v37, %v679_v29  ;;  %1363 = vrot.lane.b32.xlu1 %v1349_v26, %s5314_s22  ;;  %1355 = vrot.lane.b32.xlu0 %v1349_v26, %s5313_s20  ;;  %v4594_v33 = vpop.f32.mrb[75].mxu0  ;;  %1351 = vst.msk [vmem:[#allocation3 + $0x38] sm:$0xff] %vm1140_vm1, %v1349_v26 }
 0x18a   : > { %v1342_v34 = vld [vmem:[#allocation2 + $0x10c] ss:$2 sm:$0x3f]  ;;  %v1346_v35 = vld [vmem:[#allocation2 + $0x10d] ss:$2 sm:$0x3f] }
 0x18b   : > { %1057 = vst [vmem:[#allocation2 + $0x120] sm:$0xff] %v959_v31  ;;  %v960_v36 = vmax.f32 %v680_v32, 0.0  ;;  %4700 = vmatmul.mubr.bf16.gmra.mrb[180].mxu0 %v5246_v27  ;;  %v1147_v38 = vpop.permute.xlu0 %1146  ;;  %v1348_v40 = vmax.f32 %v1342_v34, %v1346_v35 }
 0x18c   : > { %1153 = vst.msk [vmem:[#allocation3 - $0x1] sm:$0xfe] %vm1152_vm3, %v1147_v38  ;;  %4703 = vmatprep.mubr.msk.bf16.mxu0 %vm5312_vm0, %v6957_v2 }
 0x18d   : > { %1058 = vst [vmem:[#allocation2 + $0x128] sm:$0xff] %v960_v36  ;;  %1371 = vrot.lane.b32.xlu0 %v1349_v26, %s5315_s23  ;;  %v1350_v41 = vmax.f32 %v1338_v39, %v1348_v40 }
 0x18e   : > { %v684_v42 = vpop.f32.mrb[76].mxu0 }
 0x18f   : > { %v685_v43 = vadd.f32 %v5482_v37, %v684_v42  ;;  %v1157_v44 = vpop.permute.xlu0 %1156  ;;  %1357 = vrot.lane.b32.xlu1 %v1350_v41, %s5313_s20  ;;  %v4597_v45 = vpop.f32.mrb[77].mxu0  ;;  %1352 = vst.msk [vmem:[#allocation3 + $0x40] sm:$0x3f] %vm1142_vm2, %v1350_v41 }
 0x190   : > { %1163 = vst.msk [vmem:[#allocation3 - $0x2] sm:$0xfc] %vm1162_vm4, %v1157_v44  ;;  %v687_v47 = vpop.f32.mrb[78].mxu0 }
 0x191   : > { %v961_v48 = vmax.f32 %v685_v43, 0.0  ;;  %v688_v49 = vadd.f32 %v5482_v37, %v687_v47  ;;  %1365 = vrot.lane.b32.xlu0 %v1350_v41, %s5314_s22  ;;  %v4598_v50 = vpop.f32.mrb[79].mxu0  ;;  %v1159_v52 = vpop.permute.xlu1 %1158 }
 0x192   : > { %v1380_v6 = vld [vmem:[#allocation2 + $0x118] ss:$2 sm:$0xff]  ;;  %v1384_v8 = vld [vmem:[#allocation2 + $0x119] ss:$2 sm:$0xff] }
 0x193   : > { %1059 = vst [vmem:[#allocation2 + $0x130] sm:$0xff] %v961_v48  ;;  %v962_v51 = vmax.f32 %v688_v49, 0.0  ;;  %4704 = vmatmul.mubr.bf16.gmra.mrb[184].mxu0 %v5247_v46  ;;  %v1167_v53 = vpop.permute.xlu0 %1166  ;;  %1373 = vrot.lane.b32.xlu1 %v1350_v41, %s5315_s23  ;;  %v1387_v17 = vmax.f32 %v1380_v6, %v1384_v8 }
 0x194   : > { %1173 = vst.msk [vmem:[#allocation3 - $0x3] sm:$0xf8] %vm1172_vm5, %v1167_v53  ;;  %4707 = vmatprep.mubr.msk.bf16.mxu0 %vm5312_vm0, %v6957_v2  ;;  %v5701_v53 = vld [vmem:[%s6952_s2] ss:$0 sm:$0xff] }
 0x195   : > { %1060 = vst [vmem:[#allocation2 + $0x138] sm:$0xff] %v962_v51  ;;  %v1169_v60 = vpop.permute.xlu1 %1168 }
 0x196   : > { %v692_v54 = vpop.f32.mrb[80].mxu0 }
 0x197   : > { %v693_v55 = vadd.f32 %v5482_v37, %v692_v54  ;;  %v1149_v56 = vpop.permute.xlu0 %1148  ;;  %v4601_v57 = vpop.f32.mrb[81].mxu0 }
 0x198   : > { %1155 = vst.msk [vmem:[#allocation3 + $0x7] sm:$0x3f] %vm1154_vm6, %v1149_v56  ;;  %v695_v59 = vpop.f32.mrb[82].mxu0 }
 0x199   : > { %v963_v61 = vmax.f32 %v693_v55, 0.0  ;;  %v696_v62 = vadd.f32 %v5482_v37, %v695_v59  ;;  %v4602_v63 = vpop.f32.mrb[83].mxu0  ;;  %1165 = vst.msk [vmem:[#allocation3 + $0x6] sm:$0x3f] %vm1164_vm7, %v1159_v52 }
 0x19a   : > { %1175 = vst.msk [vmem:[#allocation3 + $0x5] sm:$0x3f] %vm1174_vm8, %v1169_v60  ;;  %v1382_v9 = vld [vmem:[#allocation2 + $0x128] ss:$2 sm:$0x3f] }
 0x19b   : > { %1061 = vst [vmem:[#allocation2 + $0x140] sm:$0xff] %v963_v61  ;;  %v964_v0 = vmax.f32 %v696_v62, 0.0  ;;  %4708 = vmatmul.mubr.bf16.gmra.mrb[188].mxu0 %v5248_v58  ;;  %v1386_v13 = vld [vmem:[#allocation2 + $0x129] ss:$2 sm:$0x3f] }
 0x19c   : > { %4711 = vmatprep.mubr.msk.bf16.mxu0 %vm5312_vm0, %v6957_v2  ;;  %v1388_v22 = vmax.f32 %v1382_v9, %v1386_v13 }
 0x19d   : > { %1062 = vst [vmem:[#allocation2 + $0x148] sm:$0xff] %v964_v0 }
 0x19e   : > { %v700_v1 = vpop.f32.mrb[84].mxu0 }
 0x19f   : > { %v701_v3 = vadd.f32 %v5482_v37, %v700_v1  ;;  %v4605_v4 = vpop.f32.mrb[85].mxu0 }
 0x1a0   : > { %v703_v7 = vpop.f32.mrb[86].mxu0 }
 0x1a1   : > { %v965_v10 = vmax.f32 %v701_v3, 0.0  ;;  %v704_v11 = vadd.f32 %v5482_v37, %v703_v7  ;;  %v4606_v12 = vpop.f32.mrb[87].mxu0 }
 0x1a2   : > { %v1390_v14 = vld [vmem:[#allocation2 + $0x134] ss:$2 sm:$0xff]  ;;  %v1394_v15 = vld [vmem:[#allocation2 + $0x135] ss:$2 sm:$0xff] }
 0x1a3   : > { %1063 = vst [vmem:[#allocation2 + $0x150] sm:$0xff] %v965_v10  ;;  %v966_v16 = vmax.f32 %v704_v11, 0.0  ;;  %4712 = vmatmul.mubr.bf16.gmra.mrb[192].mxu0 %v5249_v5  ;;  %v1397_v18 = vmax.f32 %v1390_v14, %v1394_v15 }
 0x1a4   : > { %v1392_v19 = vld [vmem:[#allocation2 + $0x144] ss:$2 sm:$0x3f]  ;;  %v1396_v20 = vld [vmem:[#allocation2 + $0x145] ss:$2 sm:$0x3f]  ;;  %5007 = vmatprep.mubr.msk.bf16.mxu0 %vm5312_vm0, %v6957_v2 }
 0x1a5   : > { %1064 = vst [vmem:[#allocation2 + $0x158] sm:$0xff] %v966_v16  ;;  %v1399_v21 = vmax.f32 %v1387_v17, %v1397_v18  ;;  %v1398_v23 = vmax.f32 %v1392_v19, %v1396_v20 }
 0x1a6   : > { %v708_v24 = vpop.f32.mrb[88].mxu0 }
 0x1a7   : > { %v709_v25 = vadd.f32 %v5482_v37, %v708_v24  ;;  %1413 = vrot.lane.b32.xlu1 %v1399_v21, %s5314_s22  ;;  %1401 = vst.msk [vmem:[#allocation3 + $0x46] sm:$0xff] %vm1140_vm1, %v1399_v21  ;;  %1405 = vrot.lane.b32.xlu0 %v1399_v21, %s5313_s20  ;;  %v4609_v26 = vpop.f32.mrb[89].mxu0  ;;  %v1400_v27 = vmax.f32 %v1388_v22, %v1398_v23 }
 0x1a8   : > { %v711_v28 = vpop.f32.mrb[90].mxu0 }
 0x1a9   : > { %v967_v29 = vmax.f32 %v709_v25, 0.0  ;;  %v712_v30 = vadd.f32 %v5482_v37, %v711_v28  ;;  %v1212_v31 = vpop.permute.xlu0 %1211  ;;  %v1203_v32 = vpop.permute.xlu1 %1202  ;;  %1402 = vst.msk [vmem:[#allocation3 + $0x4e] sm:$0x3f] %vm1142_vm2, %v1400_v27 }
 0x1aa   : > { %1209 = vst.msk [vmem:[#allocation3 + $0xd] sm:$0xff] %vm1208_vm9, %v1203_v32  ;;  %v4610_v33 = vpop.f32.mrb[91].mxu0 }
 0x1ab   : > { %1065 = vst [vmem:[#allocation2 + $0x160] sm:$0xff] %v967_v29  ;;  %v968_v34 = vmax.f32 %v712_v30, 0.0  ;;  %1421 = vrot.lane.b32.xlu0 %v1399_v21, %s5315_s23  ;;  %1407 = vrot.lane.b32.xlu1 %v1400_v27, %s5313_s20  ;;  %1218 = vst.msk [vmem:[#allocation3 + $0xc] sm:$0xff] %vm1217_vm10, %v1212_v31 }
 0x1ac   : > { %v1430_v56 = vld [vmem:[#allocation2 + $0x150] ss:$2 sm:$0xff]  ;;  %v1434_v57 = vld [vmem:[#allocation2 + $0x151] ss:$2 sm:$0xff] }
 0x1ad   : > { %1066 = vst [vmem:[#allocation2 + $0x168] sm:$0xff] %v968_v34  ;;  %v1221_v35 = vpop.permute.xlu0 %1220  ;;  %v1437_v61 = vmax.f32 %v1430_v56, %v1434_v57 }
 0x1ae   : > { %1227 = vst.msk [vmem:[#allocation3 + $0xb] sm:$0xff] %vm1226_vm11, %v1221_v35  ;;  %v1205_v36 = vpop.permute.xlu1 %1204  ;;  %v716_v38 = vpop.f32.mrb[92].mxu0 }
 0x1af   : > { %1210 = vst.msk [vmem:[#allocation3 + $0x15] sm:$0x3f] %vm1154_vm6, %v1205_v36  ;;  %v717_v39 = vadd.f32 %v5482_v37, %v716_v38  ;;  %1415 = vrot.lane.b32.xlu1 %v1400_v27, %s5314_s22  ;;  %v4613_v40 = vpop.f32.mrb[93].mxu0 }
 0x1b0   : > { %v719_v41 = vpop.f32.mrb[94].mxu0 }
 0x1b1   : > { %v969_v42 = vmax.f32 %v717_v39, 0.0  ;;  %v720_v43 = vadd.f32 %v5482_v37, %v719_v41  ;;  %v4614_v44 = vpop.f32.mrb[95].mxu0 }
 0x1b2   : > { %v1214_v45 = vpop.permute.xlu1 %1213 }
 0x1b3   : > { %1067 = vst [vmem:[#allocation2 + $0x170] sm:$0xff] %v969_v42  ;;  %v970_v46 = vmax.f32 %v720_v43, 0.0  ;;  %1219 = vst.msk [vmem:[#allocation3 + $0x14] sm:$0x3f] %vm1164_vm7, %v1214_v45  ;;  %1423 = vrot.lane.b32.xlu1 %v1400_v27, %s5315_s23 }
 0x1b4   : > { %v1432_v6 = vld [vmem:[#allocation2 + $0x160] ss:$2 sm:$0x3f]  ;;  %v1436_v8 = vld [vmem:[#allocation2 + $0x161] ss:$2 sm:$0x3f] }
 0x1b5   : > { %1068 = vst [vmem:[#allocation2 + $0x178] sm:$0xff] %v970_v46  ;;  %v1872_v63 = vld [vmem:[#allocation3 + $0x4] sm:$0xff]  ;;  %v1438_v16 = vmax.f32 %v1432_v6, %v1436_v8 }
 0x1b6   : > { %v1223_v47 = vpop.permute.xlu1 %1222  ;;  %v724_v48 = vpop.f32.mrb[96].mxu0 }
 0x1b7   : > { %1228 = vst.msk [vmem:[#allocation3 + $0x13] sm:$0x3f] %vm1174_vm8, %v1223_v47  ;;  %v725_v49 = vadd.f32 %v5482_v37, %v724_v48  ;;  %v4617_v50 = vpop.f32.mrb[97].mxu0 }
 0x1b8   : > { %v727_v51 = vpop.f32.mrb[98].mxu0 }
 0x1b9   : > { %v971_v52 = vmax.f32 %v725_v49, 0.0  ;;  %v728_v54 = vadd.f32 %v5701_v53, %v727_v51  ;;  %v4618_v55 = vpop.f32.mrb[99].mxu0 }
 0x1bb   : > { %1069 = vst [vmem:[#allocation2 + $0x180] sm:$0xff] %v971_v52  ;;  %v972_v58 = vmax.f32 %v728_v54, 0.0 }
 0x1bc   : > { %v1440_v59 = vld [vmem:[#allocation2 + $0x16c] ss:$2 sm:$0xff]  ;;  %v1444_v60 = vld [vmem:[#allocation2 + $0x16d] ss:$2 sm:$0xff] }
 0x1bd   : > { %1070 = vst [vmem:[#allocation2 + $0x188] sm:$0xff] %v972_v58  ;;  %v1447_v37 = vmax.f32 %v1440_v59, %v1444_v60 }
 0x1be   : > { %v732_v62 = vpop.f32.mrb[100].mxu0  ;;  %v1873_v0 = vld [vmem:[#allocation3 + $0xc] sm:$0xff] }
 0x1bf   : > { %v733_v1 = vadd.f32 %v5701_v53, %v732_v62  ;;  %v4621_v3 = vpop.f32.mrb[101].mxu0  ;;  %v1890_v4 = vpack.c.bf16 %v1873_v0, %v1872_v63  ;;  %v1449_v5 = vmax.f32 %v1437_v61, %v1447_v37 }
 0x1c0   : > { %v735_v7 = vpop.f32.mrb[102].mxu0 }
 0x1c1   : > { %v973_v9 = vmax.f32 %v733_v1, 0.0  ;;  %v736_v10 = vadd.f32 %v5701_v53, %v735_v7  ;;  %4720 = vmatmul.mubr.msk.bf16.vlgmr.msra.gmra.mrb[0].mxu1 %vm1140_vm1, %v1890_v4  ;;  %1455 = vrot.lane.b32.xlu0 %v1449_v5, %s5313_s20  ;;  %1451 = vst.msk [vmem:[#allocation3 + $0x54] sm:$0xff] %vm1140_vm1, %v1449_v5  ;;  %v4622_v11 = vpop.f32.mrb[103].mxu0 }
 0x1c2   : > { %v1442_v12 = vld [vmem:[#allocation2 + $0x17c] ss:$2 sm:$0x3f]  ;;  %v1446_v13 = vld [vmem:[#allocation2 + $0x17d] ss:$2 sm:$0x3f]  ;;  %4723 = vmatprep.mubr.msk.bf16.mxu1 %vm5312_vm0, %v6957_v2 }
 0x1c3   : > { %1071 = vst [vmem:[#allocation2 + $0x190] sm:$0xff] %v973_v9  ;;  %v974_v14 = vmax.f32 %v736_v10, 0.0  ;;  %v1256_v15 = vpop.permute.xlu0 %1255  ;;  %v1448_v17 = vmax.f32 %v1442_v12, %v1446_v13 }
 0x1c4   : > { %1261 = vst.msk [vmem:[#allocation3 + $0x1b] sm:$0xff] %vm1208_vm9, %v1256_v15 }
 0x1c5   : > { %1072 = vst [vmem:[#allocation2 + $0x198] sm:$0xff] %v974_v14  ;;  %1463 = vrot.lane.b32.xlu0 %v1449_v5, %s5314_s22  ;;  %v1450_v18 = vmax.f32 %v1438_v16, %v1448_v17 }
 0x1c6   : > { %v740_v19 = vpop.f32.mrb[104].mxu0 }
 0x1c7   : > { %v741_v20 = vadd.f32 %v5701_v53, %v740_v19  ;;  %v1264_v21 = vpop.permute.xlu0 %1263  ;;  %1457 = vrot.lane.b32.xlu1 %v1450_v18, %s5313_s20  ;;  %1452 = vst.msk [vmem:[#allocation3 + $0x5c] sm:$0x3f] %vm1142_vm2, %v1450_v18  ;;  %v4625_v22 = vpop.f32.mrb[105].mxu0 }
 0x1c8   : > { %1269 = vst.msk [vmem:[#allocation3 + $0x1a] sm:$0xff] %vm1217_vm10, %v1264_v21  ;;  %v743_v23 = vpop.f32.mrb[106].mxu0 }
 0x1c9   : > { %v975_v24 = vmax.f32 %v741_v20, 0.0  ;;  %v744_v25 = vadd.f32 %v5701_v53, %v743_v23  ;;  %v1258_v26 = vpop.permute.xlu1 %1257  ;;  %1471 = vrot.lane.b32.xlu0 %v1449_v5, %s5315_s23  ;;  %v4626_v27 = vpop.f32.mrb[107].mxu0 }
 0x1ca   : > { %1262 = vst.msk [vmem:[#allocation3 + $0x23] sm:$0x3f] %vm1154_vm6, %v1258_v26  ;;  %v1480_v44 = vld [vmem:[#allocation2 + $0x188] ss:$2 sm:$0xff]  ;;  %v1484_v46 = vld [vmem:[#allocation2 + $0x189] ss:$2 sm:$0xff] }
 0x1cb   : > { %1073 = vst [vmem:[#allocation2 + $0x1a0] sm:$0xff] %v975_v24  ;;  %v976_v28 = vmax.f32 %v744_v25, 0.0  ;;  %v1272_v29 = vpop.permute.xlu0 %1271  ;;  %1465 = vrot.lane.b32.xlu1 %v1450_v18, %s5314_s22  ;;  %v1487_v59 = vmax.f32 %v1480_v44, %v1484_v46 }
 0x1cc   : > { %1277 = vst.msk [vmem:[#allocation3 + $0x19] sm:$0xff] %vm1226_vm11, %v1272_v29 }
 0x1cd   : > { %1074 = vst [vmem:[#allocation2 + $0x1a8] sm:$0xff] %v976_v28  ;;  %v1266_v30 = vpop.permute.xlu1 %1265 }
 0x1ce   : > { %1270 = vst.msk [vmem:[#allocation3 + $0x22] sm:$0x3f] %vm1164_vm7, %v1266_v30  ;;  %v748_v31 = vpop.f32.mrb[108].mxu0 }
 0x1cf   : > { %v749_v32 = vadd.f32 %v5701_v53, %v748_v31  ;;  %1473 = vrot.lane.b32.xlu1 %v1450_v18, %s5315_s23  ;;  %v4629_v33 = vpop.f32.mrb[109].mxu0 }
 0x1d0   : > { %v751_v34 = vpop.f32.mrb[110].mxu0 }
 0x1d1   : > { %v977_v35 = vmax.f32 %v749_v32, 0.0  ;;  %v752_v36 = vadd.f32 %v5701_v53, %v751_v34  ;;  %v1274_v38 = vpop.permute.xlu1 %1273  ;;  %v4630_v39 = vpop.f32.mrb[111].mxu0 }
 0x1d2   : > { %1278 = vst.msk [vmem:[#allocation3 + $0x21] sm:$0x3f] %vm1174_vm8, %v1274_v38  ;;  %v1482_v47 = vld [vmem:[#allocation2 + $0x198] ss:$2 sm:$0x3f] }
 0x1d3   : > { %1075 = vst [vmem:[#allocation2 + $0x1b0] sm:$0xff] %v977_v35  ;;  %v978_v40 = vmax.f32 %v752_v36, 0.0  ;;  %v1486_v48 = vld [vmem:[#allocation2 + $0x199] ss:$2 sm:$0x3f]  ;;  %v1874_v52 = vld [vmem:[#allocation3 + $0x14] sm:$0xff] }
 0x1d4   : > { %v1488_v63 = vmax.f32 %v1482_v47, %v1486_v48  ;;  %v5260_v38 = vld [vmem:[%s6953_s3] sm:$0xff]  }
 0x1d5   : > { %1076 = vst [vmem:[#allocation2 + $0x1b8] sm:$0xff] %v978_v40  ;;  %4756 = vmatpush3.bf16.msra.mxu1 %v5260_v38 }
 0x1d6   : > { %v756_v41 = vpop.f32.mrb[112].mxu0  ;;  %4757 = vmatprep.subr.bf16.mxu1 %v6957_v2 }
 0x1d7   : > { %v757_v42 = vadd.f32 %v5701_v53, %v756_v41  ;;  %v4633_v43 = vpop.f32.mrb[113].mxu0 }
 0x1d8   : > { %v759_v45 = vpop.f32.mrb[114].mxu0 }
 0x1d9   : > { %v979_v49 = vmax.f32 %v757_v42, 0.0  ;;  %v760_v50 = vadd.f32 %v5701_v53, %v759_v45  ;;  %v4634_v51 = vpop.f32.mrb[115].mxu0  ;;  %v1875_v54 = vld [vmem:[#allocation3 + $0x1c] sm:$0xff] }
 0x1da   : > { %v1891_v55 = vpack.c.bf16 %v1875_v54, %v1874_v52  ;;  %v1490_v56 = vld [vmem:[#allocation2 + $0x1a4] ss:$2 sm:$0xff]  ;;  %v1494_v57 = vld [vmem:[#allocation2 + $0x1a5] ss:$2 sm:$0xff] }
 0x1db   : > { %1077 = vst [vmem:[#allocation2 + $0x1c0] sm:$0xff] %v979_v49  ;;  %v980_v58 = vmax.f32 %v760_v50, 0.0  ;;  %v1497_v60 = vmax.f32 %v1490_v56, %v1494_v57 }
 0x1dc   : > { %4724 = vmatmul.mubr.msk.bf16.gmra.mrb[4].mxu1 %vm1140_vm1, %v1891_v55  ;;  %v1492_v61 = vld [vmem:[#allocation2 + $0x1b4] ss:$2 sm:$0x3f]  ;;  %v1496_v37 = vld [vmem:[#allocation2 + $0x1b5] ss:$2 sm:$0x3f] }
 0x1dd   : > { %1078 = vst [vmem:[#allocation2 + $0x1c8] sm:$0xff] %v980_v58  ;;  %v1499_v62 = vmax.f32 %v1487_v59, %v1497_v60  ;;  %v1498_v0 = vmax.f32 %v1492_v61, %v1496_v37  ;;  %4727 = vmatprep.mubr.msk.bf16.mxu1 %vm5312_vm0, %v6957_v2  ;;  %v5261_v37 = vld [vmem:[%s6953_s3 + $0x8] sm:$0xff]  }
 0x1de   : > { %v764_v1 = vpop.f32.mrb[116].mxu0  ;;  %4758 = vmatpush3.bf16.msra.mxu1 %v5261_v37 }
 0x1df   : > { %v765_v3 = vadd.f32 %v5701_v53, %v764_v1  ;;  %1505 = vrot.lane.b32.xlu0 %v1499_v62, %s5313_s20  ;;  %1501 = vst.msk [vmem:[#allocation3 + $0x62] sm:$0xff] %vm1140_vm1, %v1499_v62  ;;  %v4637_v4 = vpop.f32.mrb[117].mxu0  ;;  %v1500_v5 = vmax.f32 %v1488_v63, %v1498_v0  ;;  %4759 = vmatprep.subr.bf16.mxu1 %v6957_v2 }
 0x1e0   : > { %v767_v6 = vpop.f32.mrb[118].mxu0 }
 0x1e1   : > { %v981_v7 = vmax.f32 %v765_v3, 0.0  ;;  %v768_v8 = vadd.f32 %v5701_v53, %v767_v6  ;;  %v1306_v9 = vpop.permute.xlu0 %1305  ;;  %1507 = vrot.lane.b32.xlu1 %v1500_v5, %s5313_s20  ;;  %1502 = vst.msk [vmem:[#allocation3 + $0x6a] sm:$0x3f] %vm1142_vm2, %v1500_v5  ;;  %v4638_v10 = vpop.f32.mrb[119].mxu0 }
 0x1e2   : > { %1311 = vst.msk [vmem:[#allocation3 + $0x29] sm:$0xff] %vm1208_vm9, %v1306_v9 }
 0x1e3   : > { %1079 = vst [vmem:[#allocation2 + $0x1d0] sm:$0xff] %v981_v7  ;;  %v982_v11 = vmax.f32 %v768_v8, 0.0  ;;  %v1308_v12 = vpop.permute.xlu1 %1307  ;;  %1513 = vrot.lane.b32.xlu0 %v1499_v62, %s5314_s22 }
 0x1e4   : > { %1312 = vst.msk [vmem:[#allocation3 + $0x31] sm:$0x3f] %vm1154_vm6, %v1308_v12  ;;  %v1530_v32 = vld [vmem:[#allocation2 + $0x1c0] ss:$2 sm:$0xff]  ;;  %v1534_v33 = vld [vmem:[#allocation2 + $0x1c1] ss:$2 sm:$0xff] }
 0x1e5   : > { %1080 = vst [vmem:[#allocation2 + $0x1d8] sm:$0xff] %v982_v11  ;;  %v1314_v13 = vpop.permute.xlu0 %1313  ;;  %1515 = vrot.lane.b32.xlu1 %v1500_v5, %s5314_s22  ;;  %v1537_v42 = vmax.f32 %v1530_v32, %v1534_v33  ;;  %v5262_v11 = vld [vmem:[%s6953_s3 + $0x10] sm:$0xff]  }
 0x1e6   : > { %1319 = vst.msk [vmem:[#allocation3 + $0x28] sm:$0xff] %vm1217_vm10, %v1314_v13  ;;  %v772_v14 = vpop.f32.mrb[120].mxu0  ;;  %4760 = vmatpush3.bf16.msra.mxu1 %v5262_v11 }
 0x1e7   : > { %v773_v15 = vadd.f32 %v5701_v53, %v772_v14  ;;  %v1316_v16 = vpop.permute.xlu1 %1315  ;;  %1521 = vrot.lane.b32.xlu0 %v1499_v62, %s5315_s23  ;;  %v4641_v17 = vpop.f32.mrb[121].mxu0  ;;  %4761 = vmatprep.subr.bf16.mxu1 %v6957_v2 }
 0x1e8   : > { %1320 = vst.msk [vmem:[#allocation3 + $0x30] sm:$0x3f] %vm1164_vm7, %v1316_v16  ;;  %v775_v18 = vpop.f32.mrb[122].mxu0 }
 0x1e9   : > { %v983_v19 = vmax.f32 %v773_v15, 0.0  ;;  %v776_v20 = vadd.f32 %v5701_v53, %v775_v18  ;;  %v1322_v21 = vpop.permute.xlu0 %1321  ;;  %1523 = vrot.lane.b32.xlu1 %v1500_v5, %s5315_s23  ;;  %v4642_v22 = vpop.f32.mrb[123].mxu0 }
 0x1ea   : > { %1327 = vst.msk [vmem:[#allocation3 + $0x27] sm:$0xff] %vm1226_vm11, %v1322_v21 }
 0x1eb   : > { %1081 = vst [vmem:[#allocation2 + $0x1e0] sm:$0xff] %v983_v19  ;;  %v984_v23 = vmax.f32 %v776_v20, 0.0  ;;  %v1324_v24 = vpop.permute.xlu1 %1323 }
 0x1ec   : > { %1328 = vst.msk [vmem:[#allocation3 + $0x2f] sm:$0x3f] %vm1174_vm8, %v1324_v24  ;;  %v1532_v48 = vld [vmem:[#allocation2 + $0x1d0] ss:$2 sm:$0x3f] }
 0x1ed   : > { %1082 = vst [vmem:[#allocation2 + $0x1e8] sm:$0xff] %v984_v23  ;;  %v1536_v50 = vld [vmem:[#allocation2 + $0x1d1] ss:$2 sm:$0x3f] }
 0x1ee   : > { %v780_v25 = vpop.f32.mrb[124].mxu0  ;;  %v1538_v60 = vmax.f32 %v1532_v48, %v1536_v50  ;;  %v5263_v24 = vld [vmem:[%s6953_s3 + $0x18] sm:$0xff]  }
 0x1ef   : > { %v781_v26 = vadd.f32 %v5701_v53, %v780_v25  ;;  %v4645_v27 = vpop.f32.mrb[125].mxu0  ;;  %4762 = vmatpush3.bf16.msra.mxu1 %v5263_v24 }
 0x1f0   : > { %v783_v28 = vpop.f32.mrb[126].mxu0  ;;  %4763 = vmatprep.subr.bf16.mxu1 %v6957_v2 }
 0x1f1   : > { %v985_v29 = vmax.f32 %v781_v26, 0.0  ;;  %v784_v30 = vadd.f32 %v5701_v53, %v783_v28  ;;  %v4646_v31 = vpop.f32.mrb[127].mxu0  ;;  %v1876_v35 = vld [vmem:[#allocation3 + $0x24] sm:$0xff] }
 0x1f3   : > { %1083 = vst [vmem:[#allocation2 + $0x1f0] sm:$0xff] %v985_v29  ;;  %v986_v34 = vmax.f32 %v784_v30, 0.0  ;;  %v1877_v36 = vld [vmem:[#allocation3 + $0x2c] sm:$0xff] }
 0x1f4   : > { %v1892_v39 = vpack.c.bf16 %v1877_v36, %v1876_v35  ;;  %v1540_v40 = vld [vmem:[#allocation2 + $0x1dc] ss:$2 sm:$0xff]  ;;  %v1544_v41 = vld [vmem:[#allocation2 + $0x1dd] ss:$2 sm:$0xff] }
 0x1f5   : > { %1084 = vst [vmem:[#allocation2 + $0x1f8] sm:$0xff] %v986_v34  ;;  %v1547_v43 = vmax.f32 %v1540_v40, %v1544_v41  ;;  %v3018_v16 = vld [vmem:[#allocation3 + $0x2a] sm:$0xff] }
 0x1f6   : > { %v788_v44 = vpop.f32.mrb[128].mxu0  ;;  %4728 = vmatmul.mubr.msk.bf16.gmra.mrb[8].mxu1 %vm1140_vm1, %v1892_v39 }
 0x1f7   : > { %v789_v45 = vadd.f32 %v5701_v53, %v788_v44  ;;  %v4649_v46 = vpop.f32.mrb[129].mxu0  ;;  %v1549_v47 = vmax.f32 %v1537_v42, %v1547_v43  ;;  %4731 = vmatprep.mubr.msk.bf16.mxu1 %vm5312_vm0, %v6957_v2 }
 0x1f8   : > { %v791_v49 = vpop.f32.mrb[130].mxu0 }
 0x1f9   : > { %v987_v51 = vmax.f32 %v789_v45, 0.0  ;;  %v792_v52 = vadd.f32 %v5701_v53, %v791_v49  ;;  %1555 = vrot.lane.b32.xlu0 %v1549_v47, %s5313_s20  ;;  %1551 = vst.msk [vmem:[#allocation3 + $0x70] sm:$0xff] %vm1140_vm1, %v1549_v47  ;;  %v4650_v54 = vpop.f32.mrb[131].mxu0 }
 0x1fa   : > { %v1542_v55 = vld [vmem:[#allocation2 + $0x1ec] ss:$2 sm:$0x3f]  ;;  %v1546_v56 = vld [vmem:[#allocation2 + $0x1ed] ss:$2 sm:$0x3f] }
 0x1fb   : > { %1085 = vst [vmem:[#allocation2 + $0x200] sm:$0xff] %v987_v51  ;;  %v988_v57 = vmax.f32 %v792_v52, 0.0  ;;  %v1364_v58 = vpop.permute.xlu1 %1363  ;;  %v1356_v59 = vpop.permute.xlu0 %1355  ;;  %v1548_v61 = vmax.f32 %v1542_v55, %v1546_v56  ;;  %v5264_v51 = vld [vmem:[%s6953_s3 + $0x20] sm:$0xff]  }
 0x1fc   : > { %1361 = vst.msk [vmem:[#allocation3 + $0x37] sm:$0xff] %vm1208_vm9, %v1356_v59  ;;  %4764 = vmatpush3.bf16.msra.mxu1 %v5264_v51 }
 0x1fd   : > { %1086 = vst [vmem:[#allocation2 + $0x208] sm:$0xff] %v988_v57  ;;  %1369 = vst.msk [vmem:[#allocation3 + $0x36] sm:$0xff] %vm1217_vm10, %v1364_v58  ;;  %1563 = vrot.lane.b32.xlu0 %v1549_v47, %s5314_s22  ;;  %v1550_v62 = vmax.f32 %v1538_v60, %v1548_v61  ;;  %4765 = vmatprep.subr.bf16.mxu1 %v6957_v2  ;;  %v5265_v60 = vld [vmem:[%s6953_s3 + $0x28] sm:$0xff]  }
 0x1fe   : > { %v796_v63 = vpop.f32.mrb[132].mxu0 }
 0x1ff   : > { %v797_v0 = vadd.f32 %v5701_v53, %v796_v63  ;;  %v1372_v1 = vpop.permute.xlu0 %1371  ;;  %1557 = vrot.lane.b32.xlu1 %v1550_v62, %s5313_s20  ;;  %1552 = vst.msk [vmem:[#allocation3 + $0x78] sm:$0x3f] %vm1142_vm2, %v1550_v62  ;;  %v4653_v3 = vpop.f32.mrb[133].mxu0 }
 0x200   : > { %1377 = vst.msk [vmem:[#allocation3 + $0x35] sm:$0xff] %vm1226_vm11, %v1372_v1  ;;  %v799_v4 = vpop.f32.mrb[134].mxu0  ;;  %4766 = vmatpush3.bf16.msra.mxu1 %v5265_v60 }
 0x201   : > { %v989_v5 = vmax.f32 %v797_v0, 0.0  ;;  %v800_v6 = vadd.f32 %v5701_v53, %v799_v4  ;;  %v1358_v7 = vpop.permute.xlu1 %1357  ;;  %1571 = vrot.lane.b32.xlu0 %v1549_v47, %s5315_s23  ;;  %v4654_v8 = vpop.f32.mrb[135].mxu0  ;;  %4767 = vmatprep.subr.bf16.mxu1 %v6957_v2 }
 0x202   : > { %1362 = vst.msk [vmem:[#allocation3 + $0x3f] sm:$0x3f] %vm1154_vm6, %v1358_v7  ;;  %v1580_v28 = vld [vmem:[#allocation2 + $0x1f8] ss:$2 sm:$0xff]  ;;  %v1584_v30 = vld [vmem:[#allocation2 + $0x1f9] ss:$2 sm:$0xff] }
 0x203   : > { %1087 = vst [vmem:[#allocation2 + $0x210] sm:$0xff] %v989_v5  ;;  %v990_v9 = vmax.f32 %v800_v6, 0.0  ;;  %v1366_v10 = vpop.permute.xlu0 %1365  ;;  %1573 = vrot.lane.b32.xlu1 %v1550_v62, %s5315_s23  ;;  %v1587_v40 = vmax.f32 %v1580_v28, %v1584_v30 }
 0x204   : > { %1370 = vst.msk [vmem:[#allocation3 + $0x3e] sm:$0x3f] %vm1164_vm7, %v1366_v10 }
 0x205   : > { %1088 = vst [vmem:[#allocation2 + $0x218] sm:$0xff] %v990_v9  ;;  %v1374_v12 = vpop.permute.xlu1 %1373  ;;  %1565 = vrot.lane.b32.xlu0 %v1550_v62, %s5314_s22 }
 0x206   : > { %1378 = vst.msk [vmem:[#allocation3 + $0x3d] sm:$0x3f] %vm1174_vm8, %v1374_v12  ;;  %v804_v13 = vpop.f32.mrb[136].mxu0 }
 0x207   : > { %v805_v14 = vadd.f32 %v5701_v53, %v804_v13  ;;  %v4657_v15 = vpop.f32.mrb[137].mxu0  ;;  %v3019_v17 = vld [vmem:[#allocation3 + $0x32] sm:$0xff] }
 0x208   : > { %v807_v18 = vpop.f32.mrb[138].mxu0  ;;  %v3036_v19 = vpack.c.bf16 %v3019_v17, %v3018_v16  ;;  %v1878_v8 = vld [vmem:[#allocation3 + $0x34] sm:$0xff] }
 0x209   : > { %v991_v20 = vmax.f32 %v805_v14, 0.0  ;;  %v808_v21 = vadd.f32 %v5701_v53, %v807_v18  ;;  %v4658_v22 = vpop.f32.mrb[139].mxu0 }
 0x20a   : > { %5008 = vmatmul.mubr.bf16.vlgmr.msra.gmra.mrb[196].mxu0 %v3036_v19  ;;  %v1582_v31 = vld [vmem:[#allocation2 + $0x208] ss:$2 sm:$0x3f]  ;;  %v1586_v35 = vld [vmem:[#allocation2 + $0x209] ss:$2 sm:$0x3f] }
 0x20b   : > { %1089 = vst [vmem:[#allocation2 + $0x220] sm:$0xff] %v991_v20  ;;  %v992_v23 = vmax.f32 %v808_v21, 0.0  ;;  %5011 = vmatprep.mubr.msk.bf16.mxu0 %vm5312_vm0, %v6957_v2  ;;  %v1588_v45 = vmax.f32 %v1582_v31, %v1586_v35  ;;  %v5266_v19 = vld [vmem:[%s6953_s3 + $0x30] sm:$0xff]  }
 0x20c   : > { %4768 = vmatpush3.bf16.msra.mxu1 %v5266_v19 }
 0x20d   : > { %1090 = vst [vmem:[#allocation2 + $0x228] sm:$0xff] %v992_v23  ;;  %v3020_v11 = vld [vmem:[#allocation3 + $0x3a] sm:$0xff]  ;;  %4769 = vmatprep.subr.bf16.mxu1 %v6957_v2 }
 0x20e   : > { %v812_v25 = vpop.f32.mrb[140].mxu0 }
 0x20f   : > { %v813_v26 = vadd.f32 %v5701_v53, %v812_v25  ;;  %v4661_v27 = vpop.f32.mrb[141].mxu0 }
 0x210   : > { %v815_v29 = vpop.f32.mrb[142].mxu0 }
 0x211   : > { %v993_v32 = vmax.f32 %v813_v26, 0.0  ;;  %v816_v33 = vadd.f32 %v5701_v53, %v815_v29  ;;  %v4662_v34 = vpop.f32.mrb[143].mxu0 }
 0x212   : > { %v1590_v36 = vld [vmem:[#allocation2 + $0x214] ss:$2 sm:$0xff]  ;;  %v1594_v38 = vld [vmem:[#allocation2 + $0x215] ss:$2 sm:$0xff] }
 0x213   : > { %1091 = vst [vmem:[#allocation2 + $0x230] sm:$0xff] %v993_v32  ;;  %v994_v39 = vmax.f32 %v816_v33, 0.0  ;;  %v1597_v41 = vmax.f32 %v1590_v36, %v1594_v38 }
 0x214   : > { %v1592_v42 = vld [vmem:[#allocation2 + $0x224] ss:$2 sm:$0x3f]  ;;  %v1596_v43 = vld [vmem:[#allocation2 + $0x225] ss:$2 sm:$0x3f] }
 0x215   : > { %1092 = vst [vmem:[#allocation2 + $0x238] sm:$0xff] %v994_v39  ;;  %v1599_v44 = vmax.f32 %v1587_v40, %v1597_v41  ;;  %v1598_v46 = vmax.f32 %v1592_v42, %v1596_v43  ;;  %v5267_v43 = vld [vmem:[%s6953_s3 + $0x38] sm:$0xff]  }
 0x216   : > { %v820_v47 = vpop.f32.mrb[144].mxu0  ;;  %4770 = vmatpush3.bf16.msra.mxu1 %v5267_v43 }
 0x217   : > { %v821_v48 = vadd.f32 %v5701_v53, %v820_v47  ;;  %1613 = vrot.lane.b32.xlu1 %v1599_v44, %s5314_s22  ;;  %1601 = vst.msk [vmem:[#allocation3 + $0x7e] sm:$0xff] %vm1140_vm1, %v1599_v44  ;;  %1605 = vrot.lane.b32.xlu0 %v1599_v44, %s5313_s20  ;;  %v4665_v49 = vpop.f32.mrb[145].mxu0  ;;  %v1600_v50 = vmax.f32 %v1588_v45, %v1598_v46 }
 0x218   : > { %v823_v52 = vpop.f32.mrb[146].mxu0  ;;  %4807 = vmatprep.subr.bf16.mxu1 %v6957_v2 }
 0x219   : > { %v995_v54 = vmax.f32 %v821_v48, 0.0  ;;  %v824_v55 = vadd.f32 %v5701_v53, %v823_v52  ;;  %v1414_v56 = vpop.permute.xlu1 %1413  ;;  %v1406_v57 = vpop.permute.xlu0 %1405  ;;  %1602 = vst.msk [vmem:[#allocation3 + $0x86] sm:$0x3f] %vm1142_vm2, %v1600_v50 }
 0x21a   : > { %1411 = vst.msk [vmem:[#allocation3 + $0x45] sm:$0xff] %vm1208_vm9, %v1406_v57  ;;  %v4666_v58 = vpop.f32.mrb[147].mxu0 }
 0x21b   : > { %1093 = vst [vmem:[#allocation2 + $0x240] sm:$0xff] %v995_v54  ;;  %v996_v59 = vmax.f32 %v824_v55, 0.0  ;;  %1419 = vst.msk [vmem:[#allocation3 + $0x44] sm:$0xff] %vm1217_vm10, %v1414_v56  ;;  %1615 = vrot.lane.b32.xlu0 %v1600_v50, %s5314_s22  ;;  %1607 = vrot.lane.b32.xlu1 %v1600_v50, %s5313_s20 }
 0x21c   : > { %v1630_v23 = vld [vmem:[#allocation2 + $0x230] ss:$2 sm:$0xff]  ;;  %v1634_v24 = vld [vmem:[#allocation2 + $0x231] ss:$2 sm:$0xff] }
 0x21d   : > { %1094 = vst [vmem:[#allocation2 + $0x248] sm:$0xff] %v996_v59  ;;  %v1422_v61 = vpop.permute.xlu0 %1421  ;;  %v1408_v37 = vpop.permute.xlu1 %1407  ;;  %v1637_v29 = vmax.f32 %v1630_v23, %v1634_v24 }
 0x21e   : > { %1427 = vst.msk [vmem:[#allocation3 + $0x43] sm:$0xff] %vm1226_vm11, %v1422_v61  ;;  %v828_v62 = vpop.f32.mrb[148].mxu0 }
 0x21f   : > { %1412 = vst.msk [vmem:[#allocation3 + $0x4d] sm:$0x3f] %vm1154_vm6, %v1408_v37  ;;  %v829_v63 = vadd.f32 %v5701_v53, %v828_v62  ;;  %1621 = vrot.lane.b32.xlu0 %v1599_v44, %s5315_s23  ;;  %1623 = vrot.lane.b32.xlu1 %v1600_v50, %s5315_s23  ;;  %v4669_v0 = vpop.f32.mrb[149].mxu0 }
 0x220   : > { %v831_v1 = vpop.f32.mrb[150].mxu0 }
 0x221   : > { %v997_v3 = vmax.f32 %v829_v63, 0.0  ;;  %v832_v4 = vadd.f32 %v5701_v53, %v831_v1  ;;  %v1416_v5 = vpop.permute.xlu1 %1415  ;;  %v4670_v6 = vpop.f32.mrb[151].mxu0 }
 0x222   : > { %1420 = vst.msk [vmem:[#allocation3 + $0x4c] sm:$0x3f] %vm1164_vm7, %v1416_v5 }
 0x223   : > { %1095 = vst [vmem:[#allocation2 + $0x250] sm:$0xff] %v997_v3  ;;  %v998_v7 = vmax.f32 %v832_v4, 0.0 }
 0x224   : > { %v1632_v35 = vld [vmem:[#allocation2 + $0x240] ss:$2 sm:$0x3f]  ;;  %v1636_v38 = vld [vmem:[#allocation2 + $0x241] ss:$2 sm:$0x3f] }
 0x225   : > { %v5820_v9 = vld [vmem:[#allocation3 + $0x3c] sm:$0xff]  ;;  %1096 = vst [vmem:[#allocation2 + $0x258] sm:$0xff] %v998_v7  ;;  %v1424_v10 = vpop.permute.xlu1 %1423  ;;  %v1638_v47 = vmax.f32 %v1632_v35, %v1636_v38 }
 0x226   : > { %v3021_v12 = vld [vmem:[#allocation3 + $0x42] sm:$0xff]  ;;  %1428 = vst.msk [vmem:[#allocation3 + $0x4b] sm:$0x3f] %vm1174_vm8, %v1424_v10  ;;  %v836_v13 = vpop.f32.mrb[152].mxu0  ;;  %v1893_v14 = vpack.c.bf16 %v5820_v9, %v1878_v8 }
 0x227   : > { %v3037_v15 = vpack.c.bf16 %v3021_v12, %v3020_v11  ;;  %v837_v16 = vadd.f32 %v5701_v53, %v836_v13  ;;  %v4673_v17 = vpop.f32.mrb[153].mxu0 }
 0x228   : > { %4732 = vmatmul.mubr.msk.bf16.gmra.mrb[12].mxu1 %vm1140_vm1, %v1893_v14  ;;  %v839_v18 = vpop.f32.mrb[154].mxu0 }
 0x229   : > { %5012 = vmatmul.mubr.bf16.gmra.mrb[200].mxu0 %v3037_v15  ;;  %v999_v20 = vmax.f32 %v837_v16, 0.0  ;;  %v840_v21 = vadd.f32 %v5701_v53, %v839_v18  ;;  %v4674_v22 = vpop.f32.mrb[155].mxu0  ;;  %4735 = vmatprep.mubr.msk.bf16.mxu1 %vm5312_vm0, %v6957_v2 }
 0x22a   : > { %5015 = vmatprep.mubr.msk.bf16.mxu0 %vm5312_vm0, %v6957_v2 }
 0x22b   : > { %1097 = vst [vmem:[#allocation2 + $0x260] sm:$0xff] %v999_v20  ;;  %v1000_v25 = vmax.f32 %v840_v21, 0.0 }
 0x22c   : > { %v1640_v26 = vld [vmem:[#allocation2 + $0x24c] ss:$2 sm:$0xff]  ;;  %v1644_v27 = vld [vmem:[#allocation2 + $0x24d] ss:$2 sm:$0xff] }
 0x22d   : > { %v5835_v28 = vld [vmem:[#allocation3 + $0x44] sm:$0xff]  ;;  %v1647_v30 = vmax.f32 %v1640_v26, %v1644_v27  ;;  %1098 = vst [vmem:[#allocation2 + $0x268] sm:$0xff] %v1000_v25 }
 0x22e   : > { %v3660_v31 = vpack.c.bf16 %v5835_v28, %v5820_v9  ;;  %v844_v32 = vpop.f32.mrb[156].mxu0  ;;  %v5295_v9 = vld [vmem:[%s6953_s3 + $0xb8] sm:$0xff]  }
 0x22f   : > { %v1649_v33 = vmax.f32 %v1637_v29, %v1647_v30  ;;  %v845_v34 = vadd.f32 %v5701_v53, %v844_v32  ;;  %v4677_v36 = vpop.f32.mrb[157].mxu0 }
 0x230   : > { %v847_v39 = vpop.f32.mrb[158].mxu0 }
 0x231   : > { %1663 = vrot.lane.b32.xlu1 %v1649_v33, %s5314_s22  ;;  %1651 = vst.msk [vmem:[#allocation3 + $0x8c] sm:$0xff] %vm1140_vm1, %v1649_v33  ;;  %1655 = vrot.lane.b32.xlu0 %v1649_v33, %s5313_s20  ;;  %v1001_v40 = vmax.f32 %v845_v34, 0.0  ;;  %v848_v41 = vadd.f32 %v5701_v53, %v847_v39  ;;  %v4678_v42 = vpop.f32.mrb[159].mxu0 }
 0x232   : > { %v1642_v44 = vld [vmem:[#allocation2 + $0x25c] ss:$2 sm:$0x3f]  ;;  %v1646_v45 = vld [vmem:[#allocation2 + $0x25d] ss:$2 sm:$0x3f] }
 0x233   : > { %v1456_v46 = vpop.permute.xlu0 %1455  ;;  %1099 = vst [vmem:[#allocation2 + $0x270] sm:$0xff] %v1001_v40  ;;  %v1648_v48 = vmax.f32 %v1642_v44, %v1646_v45  ;;  %v1002_v49 = vmax.f32 %v848_v41, 0.0 }
 0x234   : > { %1461 = vst.msk [vmem:[#allocation3 + $0x53] sm:$0xff] %vm1208_vm9, %v1456_v46 }
 0x235   : > { %1671 = vrot.lane.b32.xlu0 %v1649_v33, %s5315_s23  ;;  %v1650_v50 = vmax.f32 %v1638_v47, %v1648_v48  ;;  %1100 = vst [vmem:[#allocation2 + $0x278] sm:$0xff] %v1002_v49 }
 0x236   : > { %v852_v51 = vpop.f32.mrb[160].mxu0 }
 0x237   : > { %v1464_v52 = vpop.permute.xlu0 %1463  ;;  %1657 = vrot.lane.b32.xlu1 %v1650_v50, %s5313_s20  ;;  %1652 = vst.msk [vmem:[#allocation3 + $0x94] sm:$0x3f] %vm1142_vm2, %v1650_v50  ;;  %v853_v54 = vadd.f32 %v5701_v53, %v852_v51  ;;  %v4681_v55 = vpop.f32.mrb[161].mxu0 }
 0x238   : > { %1469 = vst.msk [vmem:[#allocation3 + $0x52] sm:$0xff] %vm1217_vm10, %v1464_v52  ;;  %v855_v56 = vpop.f32.mrb[162].mxu0 }
 0x239   : > { %v1458_v57 = vpop.permute.xlu1 %1457  ;;  %v1003_v58 = vmax.f32 %v853_v54, 0.0  ;;  %v856_v59 = vadd.f32 %v5701_v53, %v855_v56  ;;  %v4682_v60 = vpop.f32.mrb[163].mxu0 }
 0x23a   : > { %1462 = vst.msk [vmem:[#allocation3 + $0x5b] sm:$0x3f] %vm1154_vm6, %v1458_v57  ;;  %v1680_v12 = vld [vmem:[#allocation2 + $0x268] ss:$2 sm:$0xff]  ;;  %v1684_v13 = vld [vmem:[#allocation2 + $0x269] ss:$2 sm:$0xff] }
 0x23b   : > { %1101 = vst [vmem:[#allocation2 + $0x280] sm:$0xff] %v1003_v58  ;;  %v1472_v61 = vpop.permute.xlu0 %1471  ;;  %1665 = vrot.lane.b32.xlu1 %v1650_v50, %s5314_s22  ;;  %v1004_v37 = vmax.f32 %v856_v59, 0.0  ;;  %v1687_v22 = vmax.f32 %v1680_v12, %v1684_v13 }
 0x23c   : > { %1477 = vst.msk [vmem:[#allocation3 + $0x51] sm:$0xff] %vm1226_vm11, %v1472_v61 }
 0x23d   : > { %1102 = vst [vmem:[#allocation2 + $0x288] sm:$0xff] %v1004_v37  ;;  %v1466_v62 = vpop.permute.xlu1 %1465 }
 0x23e   : > { %1470 = vst.msk [vmem:[#allocation3 + $0x5a] sm:$0x3f] %vm1164_vm7, %v1466_v62  ;;  %v860_v63 = vpop.f32.mrb[164].mxu0 }
 0x23f   : > { %v861_v0 = vadd.f32 %v5701_v53, %v860_v63  ;;  %1673 = vrot.lane.b32.xlu1 %v1650_v50, %s5315_s23  ;;  %v4685_v1 = vpop.f32.mrb[165].mxu0 }
 0x240   : > { %v863_v3 = vpop.f32.mrb[166].mxu0 }
 0x241   : > { %v1005_v4 = vmax.f32 %v861_v0, 0.0  ;;  %v864_v5 = vadd.f32 %v5701_v53, %v863_v3  ;;  %v1474_v6 = vpop.permute.xlu1 %1473  ;;  %v4686_v7 = vpop.f32.mrb[167].mxu0 }
 0x242   : > { %1478 = vst.msk [vmem:[#allocation3 + $0x59] sm:$0x3f] %vm1174_vm8, %v1474_v6  ;;  %v1682_v15 = vld [vmem:[#allocation2 + $0x278] ss:$2 sm:$0x3f] }
 0x243   : > { %1103 = vst [vmem:[#allocation2 + $0x290] sm:$0xff] %v1005_v4  ;;  %v1006_v8 = vmax.f32 %v864_v5, 0.0  ;;  %v1881_v10 = vld [vmem:[#allocation3 + $0x4c] sm:$0xff] }
 0x244   : > { %v1894_v11 = vpack.c.bf16 %v1881_v10, %v5835_v28  ;;  %v1686_v18 = vld [vmem:[#allocation2 + $0x279] ss:$2 sm:$0x3f] }
 0x245   : > { %1104 = vst [vmem:[#allocation2 + $0x298] sm:$0xff] %v1006_v8  ;;  %v3022_v20 = vld [vmem:[#allocation3 + $0x4a] sm:$0xff]  ;;  %v1688_v32 = vmax.f32 %v1682_v15, %v1686_v18 }
 0x246   : > { %4736 = vmatmul.mubr.msk.bf16.gmra.mrb[16].mxu1 %vm1140_vm1, %v1894_v11  ;;  %v868_v14 = vpop.f32.mrb[168].mxu0 }
 0x247   : > { %v869_v16 = vadd.f32 %v5701_v53, %v868_v14  ;;  %v4689_v17 = vpop.f32.mrb[169].mxu0  ;;  %4739 = vmatprep.mubr.msk.bf16.mxu1 %vm5312_vm0, %v6957_v2 }
 0x248   : > { %v871_v19 = vpop.f32.mrb[170].mxu0 }
 0x249   : > { %v3023_v21 = vld [vmem:[#allocation3 + $0x52] sm:$0xff]  ;;  %v1007_v23 = vmax.f32 %v869_v16, 0.0  ;;  %v872_v24 = vadd.f32 %v5701_v53, %v871_v19  ;;  %v4690_v25 = vpop.f32.mrb[171].mxu0 }
 0x24a   : > { %v3038_v26 = vpack.c.bf16 %v3023_v21, %v3022_v20  ;;  %v1690_v27 = vld [vmem:[#allocation2 + $0x284] ss:$2 sm:$0xff]  ;;  %v1694_v29 = vld [vmem:[#allocation2 + $0x285] ss:$2 sm:$0xff] }
 0x24b   : > { %v1697_v30 = vmax.f32 %v1690_v27, %v1694_v29  ;;  %1105 = vst [vmem:[#allocation2 + $0x2a0] sm:$0xff] %v1007_v23  ;;  %v1008_v33 = vmax.f32 %v872_v24, 0.0  ;;  %v1882_v5 = vld [vmem:[#allocation3 + $0x54] sm:$0xff] }
 0x24c   : > { %5016 = vmatmul.mubr.bf16.gmra.mrb[204].mxu0 %v3038_v26  ;;  %v1692_v34 = vld [vmem:[#allocation2 + $0x294] ss:$2 sm:$0x3f]  ;;  %v1696_v35 = vld [vmem:[#allocation2 + $0x295] ss:$2 sm:$0x3f] }
 0x24d   : > { %v1699_v36 = vmax.f32 %v1687_v22, %v1697_v30  ;;  %v1698_v38 = vmax.f32 %v1692_v34, %v1696_v35  ;;  %1106 = vst [vmem:[#allocation2 + $0x2a8] sm:$0xff] %v1008_v33  ;;  %5019 = vmatprep.mubr.msk.bf16.mxu0 %vm5312_vm0, %v6957_v2 }
 0x24e   : > { %v876_v39 = vpop.f32.mrb[172].mxu0 }
 0x24f   : > { %1705 = vrot.lane.b32.xlu0 %v1699_v36, %s5313_s20  ;;  %1701 = vst.msk [vmem:[#allocation3 + $0x9a] sm:$0xff] %vm1140_vm1, %v1699_v36  ;;  %v1700_v40 = vmax.f32 %v1688_v32, %v1698_v38  ;;  %v877_v41 = vadd.f32 %v5701_v53, %v876_v39  ;;  %v4693_v42 = vpop.f32.mrb[173].mxu0 }
 0x250   : > { %v879_v43 = vpop.f32.mrb[174].mxu0 }
 0x251   : > { %v1506_v44 = vpop.permute.xlu0 %1505  ;;  %1707 = vrot.lane.b32.xlu1 %v1700_v40, %s5313_s20  ;;  %1702 = vst.msk [vmem:[#allocation3 + $0xa2] sm:$0x3f] %vm1142_vm2, %v1700_v40  ;;  %v1009_v45 = vmax.f32 %v877_v41, 0.0  ;;  %v880_v46 = vadd.f32 %v5701_v53, %v879_v43  ;;  %v4694_v47 = vpop.f32.mrb[175].mxu0  ;;  %v5301_v41 = vld [vmem:[%s6952_s2] ss:$0 sm:$0xff] }
 0x252   : > { %1511 = vst.msk [vmem:[#allocation3 + $0x61] sm:$0xff] %vm1208_vm9, %v1506_v44 }
 0x253   : > { %v1508_v48 = vpop.permute.xlu1 %1507  ;;  %1713 = vrot.lane.b32.xlu0 %v1699_v36, %s5314_s22  ;;  %1107 = vst [vmem:[#allocation2 + $0x2b0] sm:$0xff] %v1009_v45  ;;  %v1010_v49 = vmax.f32 %v880_v46, 0.0 }
 0x254   : > { %1512 = vst.msk [vmem:[#allocation3 + $0x69] sm:$0x3f] %vm1154_vm6, %v1508_v48  ;;  %v1730_v3 = vld [vmem:[#allocation2 + $0x2a0] ss:$2 sm:$0xff]  ;;  %v1734_v4 = vld [vmem:[#allocation2 + $0x2a1] ss:$2 sm:$0xff] }
 0x255   : > { %v1514_v50 = vpop.permute.xlu0 %1513  ;;  %1715 = vrot.lane.b32.xlu1 %v1700_v40, %s5314_s22  ;;  %1108 = vst [vmem:[#allocation2 + $0x2b8] sm:$0xff] %v1010_v49  ;;  %v1737_v15 = vmax.f32 %v1730_v3, %v1734_v4  ;;  %v5275_v49 = vld [vmem:[%s6953_s3 + $0x100] sm:$0xff]   ;;  %v5278_v3 = vld [vmem:[%s6953_s3 + $0x110] sm:$0xff]  }
 0x256   : > { %1519 = vst.msk [vmem:[#allocation3 + $0x60] sm:$0xff] %vm1217_vm10, %v1514_v50  ;;  %v884_v51 = vpop.f32.mrb[176].mxu0  ;;  %5084 = vmatpush3.bf16.msra.mxu0 %v5275_v49 }
 0x257   : > { %v1516_v52 = vpop.permute.xlu1 %1515  ;;  %1721 = vrot.lane.b32.xlu0 %v1699_v36, %s5315_s23  ;;  %v885_v54 = vadd.f32 %v5701_v53, %v884_v51  ;;  %v4697_v55 = vpop.f32.mrb[177].mxu0  ;;  %5085 = vmatprep.subr.bf16.mxu0 %v6957_v2 }
 0x258   : > { %1520 = vst.msk [vmem:[#allocation3 + $0x68] sm:$0x3f] %vm1164_vm7, %v1516_v52  ;;  %v887_v56 = vpop.f32.mrb[178].mxu0  ;;  %v5277_v52 = vld [vmem:[%s6953_s3 + $0x108] sm:$0xff]  }
 0x259   : > { %v1522_v57 = vpop.permute.xlu0 %1521  ;;  %1723 = vrot.lane.b32.xlu1 %v1700_v40, %s5315_s23  ;;  %v1011_v58 = vmax.f32 %v885_v54, 0.0  ;;  %v888_v59 = vadd.f32 %v5701_v53, %v887_v56  ;;  %v4698_v60 = vpop.f32.mrb[179].mxu0 }
 0x25a   : > { %1527 = vst.msk [vmem:[#allocation3 + $0x5f] sm:$0xff] %vm1226_vm11, %v1522_v57  ;;  %5086 = vmatpush3.bf16.msra.mxu0 %v5277_v52 }
 0x25b   : > { %v1524_v61 = vpop.permute.xlu1 %1523  ;;  %1109 = vst [vmem:[#allocation2 + $0x2c0] sm:$0xff] %v1011_v58  ;;  %v1012_v37 = vmax.f32 %v888_v59, 0.0  ;;  %5087 = vmatprep.subr.bf16.mxu0 %v6957_v2 }
 0x25c   : > { %1528 = vst.msk [vmem:[#allocation3 + $0x67] sm:$0x3f] %vm1174_vm8, %v1524_v61  ;;  %v1732_v20 = vld [vmem:[#allocation2 + $0x2b0] ss:$2 sm:$0x3f] }
 0x25d   : > { %1110 = vst [vmem:[#allocation2 + $0x2c8] sm:$0xff] %v1012_v37  ;;  %v1736_v22 = vld [vmem:[#allocation2 + $0x2b1] ss:$2 sm:$0x3f] }
 0x25e   : > { %v892_v62 = vpop.f32.mrb[180].mxu0  ;;  %v1738_v32 = vmax.f32 %v1732_v20, %v1736_v22  ;;  %5088 = vmatpush3.bf16.msra.mxu0 %v5278_v3  ;;  %v1832_v3 = vld [vmem:[#allocation3 + $0x18] sm:$0xff] }
 0x25f   : > { %v893_v63 = vadd.f32 %v5701_v53, %v892_v62  ;;  %v4701_v0 = vpop.f32.mrb[181].mxu0  ;;  %5089 = vmatprep.subr.bf16.mxu0 %v6957_v2 }
 0x260   : > { %v895_v1 = vpop.f32.mrb[182].mxu0 }
 0x261   : > { %v1883_v6 = vld [vmem:[#allocation3 + $0x5c] sm:$0xff]  ;;  %v1013_v7 = vmax.f32 %v893_v63, 0.0  ;;  %v896_v8 = vadd.f32 %v5701_v53, %v895_v1  ;;  %v4702_v10 = vpop.f32.mrb[183].mxu0 }
 0x262   : > { %v1895_v11 = vpack.c.bf16 %v1883_v6, %v1882_v5  ;;  %v3024_v12 = vld [vmem:[#allocation3 + $0x5a] sm:$0xff] }
 0x263   : > { %v3025_v13 = vld [vmem:[#allocation3 + $0x62] sm:$0xff]  ;;  %1111 = vst [vmem:[#allocation2 + $0x2d0] sm:$0xff] %v1013_v7  ;;  %v1014_v14 = vmax.f32 %v896_v8, 0.0  ;;  %v2424_v28 = vld [vmem:[#allocation3 + $0x5a] sm:$0xff] }
 0x264   : > { %4740 = vmatmul.mubr.msk.bf16.gmra.mrb[20].mxu1 %vm1140_vm1, %v1895_v11  ;;  %v3039_v16 = vpack.c.bf16 %v3025_v13, %v3024_v12  ;;  %v1740_v17 = vld [vmem:[#allocation2 + $0x2bc] ss:$2 sm:$0xff]  ;;  %v1744_v18 = vld [vmem:[#allocation2 + $0x2bd] ss:$2 sm:$0xff]  ;;  %v1884_v62 = vld [vmem:[#allocation3 + $0x64] sm:$0xff] }
 0x265   : > { %1112 = vst [vmem:[#allocation2 + $0x2d8] sm:$0xff] %v1014_v14  ;;  %v1747_v19 = vmax.f32 %v1740_v17, %v1744_v18  ;;  %4743 = vmatprep.mubr.msk.bf16.mxu1 %vm5312_vm0, %v6957_v2  ;;  %v5279_v7 = vld [vmem:[%s6953_s3 + $0x118] sm:$0xff]   ;;  %v5281_v18 = vld [vmem:[%s6953_s3 + $0x120] sm:$0xff]  }
 0x266   : > { %5020 = vmatmul.mubr.bf16.gmra.mrb[208].mxu0 %v3039_v16  ;;  %v900_v21 = vpop.f32.mrb[184].mxu0 }
 0x267   : > { %v901_v23 = vadd.f32 %v5701_v53, %v900_v21  ;;  %v4705_v24 = vpop.f32.mrb[185].mxu0  ;;  %v1749_v25 = vmax.f32 %v1737_v15, %v1747_v19  ;;  %5023 = vmatprep.mubr.msk.bf16.mxu0 %vm5312_vm0, %v6957_v2  ;;  %5090 = vmatpush3.bf16.msra.mxu0 %v5279_v7 }
 0x268   : > { %v903_v26 = vpop.f32.mrb[186].mxu0  ;;  %5091 = vmatprep.subr.bf16.mxu0 %v6957_v2 }
 0x269   : > { %v1015_v27 = vmax.f32 %v901_v23, 0.0  ;;  %v904_v29 = vadd.f32 %v5701_v53, %v903_v26  ;;  %v4706_v30 = vpop.f32.mrb[187].mxu0  ;;  %1755 = vrot.lane.b32.xlu0 %v1749_v25, %s5313_s20  ;;  %1751 = vst.msk [vmem:[#allocation3 + $0xa8] sm:$0xff] %vm1140_vm1, %v1749_v25  ;;  %v5282_v23 = vld [vmem:[%s6953_s3 + $0x128] sm:$0xff]  }
 0x26a   : > { %v1742_v33 = vld [vmem:[#allocation2 + $0x2cc] ss:$2 sm:$0x3f]  ;;  %v1746_v34 = vld [vmem:[#allocation2 + $0x2cd] ss:$2 sm:$0x3f] }
 0x26b   : > { %v1556_v35 = vpop.permute.xlu0 %1555  ;;  %1113 = vst [vmem:[#allocation2 + $0x2e0] sm:$0xff] %v1015_v27  ;;  %v1016_v36 = vmax.f32 %v904_v29, 0.0  ;;  %v1748_v38 = vmax.f32 %v1742_v33, %v1746_v34  ;;  %5092 = vmatpush3.bf16.msra.mxu0 %v5281_v18  ;;  %v5283_v27 = vld [vmem:[%s6953_s3 + $0x130] sm:$0xff]  }
 0x26c   : > { %1561 = vst.msk [vmem:[#allocation3 + $0x6f] sm:$0xff] %vm1208_vm9, %v1556_v35  ;;  %5093 = vmatprep.subr.bf16.mxu0 %v6957_v2 }
 0x26d   : > { %1114 = vst [vmem:[#allocation2 + $0x2e8] sm:$0xff] %v1016_v36  ;;  %1763 = vrot.lane.b32.xlu0 %v1749_v25, %s5314_s22  ;;  %v1750_v39 = vmax.f32 %v1738_v32, %v1748_v38  ;;  %v5284_v32 = vld [vmem:[%s6953_s3 + $0x138] sm:$0xff]  }
 0x26e   : > { %v908_v40 = vpop.f32.mrb[188].mxu0 }
 0x26f   : > { %v1564_v53 = vpop.permute.xlu0 %1563  ;;  %v909_v42 = vadd.f32 %v5301_v41, %v908_v40  ;;  %v4709_v43 = vpop.f32.mrb[189].mxu0  ;;  %1757 = vrot.lane.b32.xlu1 %v1750_v39, %s5313_s20  ;;  %1752 = vst.msk [vmem:[#allocation3 + $0xb0] sm:$0x3f] %vm1142_vm2, %v1750_v39  ;;  %5094 = vmatpush3.bf16.msra.mxu0 %v5282_v23 }
 0x270   : > { %1569 = vst.msk [vmem:[#allocation3 + $0x6e] sm:$0xff] %vm1217_vm10, %v1564_v53  ;;  %v911_v44 = vpop.f32.mrb[190].mxu0  ;;  %5095 = vmatprep.subr.bf16.mxu0 %v6957_v2 }
 0x271   : > { %v1558_v45 = vpop.permute.xlu1 %1557  ;;  %v1017_v46 = vmax.f32 %v909_v42, 0.0  ;;  %v912_v47 = vadd.f32 %v5301_v41, %v911_v44  ;;  %v4710_v48 = vpop.f32.mrb[191].mxu0  ;;  %1771 = vrot.lane.b32.xlu0 %v1749_v25, %s5315_s23 }
 0x272   : > { %1562 = vst.msk [vmem:[#allocation3 + $0x77] sm:$0x3f] %vm1154_vm6, %v1558_v45  ;;  %v1780_v4 = vld [vmem:[#allocation2 + $0x2d8] ss:$2 sm:$0xff]  ;;  %v1784_v5 = vld [vmem:[#allocation2 + $0x2d9] ss:$2 sm:$0xff] }
 0x273   : > { %1115 = vst [vmem:[#allocation2 + $0x2f0] sm:$0xff] %v1017_v46  ;;  %v1572_v50 = vpop.permute.xlu0 %1571  ;;  %v1018_v51 = vmax.f32 %v912_v47, 0.0  ;;  %1765 = vrot.lane.b32.xlu1 %v1750_v39, %s5314_s22  ;;  %v1787_v13 = vmax.f32 %v1780_v4, %v1784_v5  ;;  %5096 = vmatpush3.bf16.msra.mxu0 %v5283_v27  ;;  %v1831_v4 = vld [vmem:[#allocation3 + $0x10] sm:$0xff]  ;;  %v5270_v5 = vld [vmem:[%s6953_s3 + $0x50] sm:$0xff]  }
 0x274   : > { %1577 = vst.msk [vmem:[#allocation3 + $0x6d] sm:$0xff] %vm1226_vm11, %v1572_v50  ;;  %5097 = vmatprep.subr.bf16.mxu0 %v6957_v2  ;;  %v1835_v27 = vld [vmem:[#allocation3 + $0x30] sm:$0xff] }
 0x275   : > { %1116 = vst [vmem:[#allocation2 + $0x2f8] sm:$0xff] %v1018_v51  ;;  %v1574_v58 = vpop.permute.xlu1 %1573 }
 0x276   : > { %v916_v54 = vpop.f32.mrb[192].mxu0 }
 0x277   : > { %v917_v55 = vadd.f32 %v5301_v41, %v916_v54  ;;  %v1566_v56 = vpop.permute.xlu0 %1565  ;;  %1773 = vrot.lane.b32.xlu1 %v1750_v39, %s5315_s23  ;;  %v4713_v57 = vpop.f32.mrb[193].mxu0  ;;  %5098 = vmatpush3.bf16.msra.mxu0 %v5284_v32 }
 0x278   : > { %1570 = vst.msk [vmem:[#allocation3 + $0x76] sm:$0x3f] %vm1164_vm7, %v1566_v56  ;;  %v919_v59 = vpop.f32.mrb[194].mxu0  ;;  %5135 = vmatprep.subr.bf16.mxu0 %v6957_v2 }
 0x279   : > { %v1019_v60 = vmax.f32 %v917_v55, 0.0  ;;  %1578 = vst.msk [vmem:[#allocation3 + $0x75] sm:$0x3f] %vm1174_vm8, %v1574_v58  ;;  %v920_v61 = vadd.f32 %v5301_v41, %v919_v59  ;;  %v4714_v37 = vpop.f32.mrb[195].mxu0 }
 0x27a   : > { %v1782_v6 = vld [vmem:[#allocation2 + $0x2e8] ss:$2 sm:$0x3f]  ;;  %v1786_v11 = vld [vmem:[#allocation2 + $0x2e9] ss:$2 sm:$0x3f] }
 0x27b   : > { %1117 = vst [vmem:[#allocation2 + $0x300] sm:$0xff] %v1019_v60  ;;  %v1885_v63 = vld [vmem:[#allocation3 + $0x6c] sm:$0xff]  ;;  %v1020_v0 = vmax.f32 %v920_v61, 0.0  ;;  %v1788_v17 = vmax.f32 %v1782_v6, %v1786_v11  ;;  %v1829_v61 = vld [vmem:[#allocation3] sm:$0xff]  ;;  %v1848_v6 = vpack.c.bf16 %v1832_v3, %v1831_v4 }
 0x27c   : > { %v1896_v1 = vpack.c.bf16 %v1885_v63, %v1884_v62  ;;  %v5933_v8 = vld [vmem:[#allocation3 + $0x6a] sm:$0xff] }
 0x27d   : > { %1118 = vst [vmem:[#allocation2 + $0x308] sm:$0xff] %v1020_v0  ;;  %v1830_v60 = vld [vmem:[#allocation3 + $0x8] sm:$0xff]  ;;  %v5268_v37 = vld [vmem:[%s6953_s3 + $0x40] sm:$0xff]  }
 0x27e   : > { %4744 = vmatmul.mubr.msk.bf16.gmra.mrb[24].mxu1 %vm1140_vm1, %v1896_v1  ;;  %v1847_v62 = vpack.c.bf16 %v1830_v60, %v1829_v61  ;;  %v5269_v1 = vld [vmem:[%s6953_s3 + $0x48] sm:$0xff]   ;;  %v6095_v60 = vld [vmem:[#allocation3 + $0x68] sm:$0xff] }
 0x27f   : > { %4747 = vmatprep.mubr.msk.bf16.mxu1 %vm5312_vm0, %v6957_v2 }
 0x280   : > { %v5935_v10 = vld [vmem:[#allocation3 + $0x72] sm:$0xff] }
 0x281   : > { %v3040_v12 = vpack.c.bf16 %v5935_v10, %v5933_v8 }
 0x282   : > { %v1790_v14 = vld [vmem:[#allocation2 + $0x2f4] ss:$2 sm:$0xff]  ;;  %v1794_v15 = vld [vmem:[#allocation2 + $0x2f5] ss:$2 sm:$0xff] }
 0x283   : > { %5024 = vmatmul.mubr.bf16.gmra.mrb[212].mxu0 %v3040_v12  ;;  %v1797_v16 = vmax.f32 %v1790_v14, %v1794_v15  ;;  %v5271_v12 = vld [vmem:[%s6953_s3 + $0x58] sm:$0xff]  }
 0x284   : > { %5027 = vmatprep.mubr.msk.bf16.mxu0 %vm5312_vm0, %v6957_v2  ;;  %v1792_v19 = vld [vmem:[#allocation2 + $0x304] ss:$2 sm:$0x3f]  ;;  %v1796_v20 = vld [vmem:[#allocation2 + $0x305] ss:$2 sm:$0x3f] }
 0x285   : > { %v1799_v21 = vmax.f32 %v1787_v13, %v1797_v16  ;;  %v1798_v22 = vmax.f32 %v1792_v19, %v1796_v20  ;;  %v1834_v14 = vld [vmem:[#allocation3 + $0x28] sm:$0xff]  ;;  %v1833_v16 = vld [vmem:[#allocation3 + $0x20] sm:$0xff] }
 0x286   : > { %v1849_v18 = vpack.c.bf16 %v1834_v14, %v1833_v16 }
 0x287   : > { %1805 = vrot.lane.b32.xlu0 %v1799_v21, %s5313_s20  ;;  %1801 = vst.msk [vmem:[#allocation3 + $0xb6] sm:$0xff] %vm1140_vm1, %v1799_v21  ;;  %v1800_v24 = vmax.f32 %v1788_v17, %v1798_v22  ;;  %v5272_v17 = vld [vmem:[%s6953_s3 + $0x60] sm:$0xff]  }
 0x289   : > { %v1614_v25 = vpop.permute.xlu1 %1613  ;;  %v1606_v26 = vpop.permute.xlu0 %1605  ;;  %1807 = vrot.lane.b32.xlu1 %v1800_v24, %s5313_s20  ;;  %1802 = vst.msk [vmem:[#allocation3 + $0xbe] sm:$0x3f] %vm1142_vm2, %v1800_v24 }
 0x28a   : > { %1611 = vst.msk [vmem:[#allocation3 + $0x7d] sm:$0xff] %vm1208_vm9, %v1606_v26  ;;  %v6045_v26 = vld [vmem:[#allocation3 + $0x38] sm:$0xff] }
 0x28b   : > { %1619 = vst.msk [vmem:[#allocation3 + $0x7c] sm:$0xff] %vm1217_vm10, %v1614_v25  ;;  %1813 = vrot.lane.b32.xlu0 %v1799_v21, %s5314_s22 }
 0x28d   : > { %v1616_v29 = vpop.permute.xlu0 %1615  ;;  %v1608_v30 = vpop.permute.xlu1 %1607  ;;  %1823 = vrot.lane.b32.xlu1 %v1800_v24, %s5315_s23 }
 0x28e   : > { %1612 = vst.msk [vmem:[#allocation3 + $0x85] sm:$0x3f] %vm1154_vm6, %v1608_v30  ;;  %v1850_v30 = vpack.c.bf16 %v6045_v26, %v1835_v27 }
 0x28f   : > { %1620 = vst.msk [vmem:[#allocation3 + $0x84] sm:$0x3f] %vm1164_vm7, %v1616_v29  ;;  %1821 = vrot.lane.b32.xlu0 %v1799_v21, %s5315_s23  ;;  %v5274_v29 = vld [vmem:[%s6953_s3 + $0x70] sm:$0xff]  }
 0x291   : > { %v1622_v33 = vpop.permute.xlu0 %1621  ;;  %v1624_v34 = vpop.permute.xlu1 %1623 }
 0x292   : > { %1627 = vst.msk [vmem:[#allocation3 + $0x7b] sm:$0xff] %vm1226_vm11, %v1622_v33 }
 0x293   : > { %1628 = vst.msk [vmem:[#allocation3 + $0x83] sm:$0x3f] %vm1174_vm8, %v1624_v34  ;;  %1815 = vrot.lane.b32.xlu0 %v1800_v24, %s5314_s22  ;;  %v5273_v24 = vld [vmem:[%s6953_s3 + $0x68] sm:$0xff]   ;;  %v5276_v34 = vld [vmem:[%s6953_s3 + $0x78] sm:$0xff]  }
 0x294   : > { %v5972_v35 = vpop.f32.mrb[0].mxu1 }
 0x295   : > { %v4721_v36 = vpop.f32.mrb[1].mxu1 }
 0x296   : > { %v5974_v38 = vpop.f32.mrb[2].mxu1 }
 0x297   : > { %v4722_v39 = vpop.f32.mrb[3].mxu1 }
 0x299   : > { %v1886_v40 = vld [vmem:[#allocation3 + $0x74] sm:$0xff] }
 0x29a   : > { %v1887_v53 = vld [vmem:[#allocation3 + $0x7c] sm:$0xff] }
 0x29b   : > { %v5976_v41 = vld [vmem:[#allocation3 + $0x7a] sm:$0xff]  ;;  %v1897_v42 = vpack.c.bf16 %v1887_v53, %v1886_v40  ;;  %v6068_v53 = vld [vmem:[#allocation3 + $0x48] sm:$0xff] }
 0x29c   : > { %v2439_v43 = vpack.c.bf16 %v5976_v41, %v5935_v10 }
 0x29d   : > { %4748 = vmatmul.mubr.msk.bf16.gmra.mrb[28].mxu1 %vm1140_vm1, %v1897_v42  ;;  %v6072_v42 = vld [vmem:[#allocation3 + $0x40] sm:$0xff] }
 0x29e   : > { %4751 = vmatprep.mubr.msk.bf16.mxu1 %vm5312_vm0, %v6957_v2 }
 0x2a3   : > { %v1664_v44 = vpop.permute.xlu1 %1663  ;;  %v1656_v45 = vpop.permute.xlu0 %1655 }
 0x2a4   : > { %1661 = vst.msk [vmem:[#allocation3 + $0x8b] sm:$0xff] %vm1208_vm9, %v1656_v45 }
 0x2a5   : > { %1669 = vst.msk [vmem:[#allocation3 + $0x8a] sm:$0xff] %vm1217_vm10, %v1664_v44  ;;  %v1851_v44 = vpack.c.bf16 %v6068_v53, %v6072_v42 }
 0x2a7   : > { %v1672_v46 = vpop.permute.xlu0 %1671 }
 0x2a8   : > { %1677 = vst.msk [vmem:[#allocation3 + $0x89] sm:$0xff] %vm1226_vm11, %v1672_v46 }
 0x2a9   : > { %v1658_v47 = vpop.permute.xlu1 %1657 }
 0x2aa   : > { %1662 = vst.msk [vmem:[#allocation3 + $0x93] sm:$0x3f] %vm1154_vm6, %v1658_v47  ;;  %v6082_v47 = vld [vmem:[#allocation3 + $0x58] sm:$0xff] }
 0x2ad   : > { %v1666_v48 = vpop.permute.xlu1 %1665 }
 0x2ae   : > { %1670 = vst.msk [vmem:[#allocation3 + $0x92] sm:$0x3f] %vm1164_vm7, %v1666_v48 }
 0x2af   : > { %v5988_v49 = vpop.f32.mrb[4].mxu1  ;;  %v1888_v50 = vld [vmem:[#allocation3 + $0x84] sm:$0xff]  ;;  %v1889_v51 = vld [vmem:[#allocation3 + $0x8c] sm:$0xf] }
 0x2b0   : > { %v5990_v52 = vld [vmem:[#allocation3 + $0x82] sm:$0xff]  ;;  %v4725_v54 = vpop.f32.mrb[5].mxu1  ;;  %v1898_v55 = vpack.c.bf16 %v1889_v51, %v1888_v50  ;;  %v6086_v51 = vld [vmem:[#allocation3 + $0x50] sm:$0xff] }
 0x2b1   : > { %v3041_v56 = vpack.c.bf16 %v5990_v52, %v5976_v41  ;;  %v5994_v57 = vpop.f32.mrb[6].mxu1  ;;  %v1674_v58 = vpop.permute.xlu1 %1673 }
 0x2b2   : > { %1678 = vst.msk [vmem:[#allocation3 + $0x91] sm:$0x3f] %vm1174_vm8, %v1674_v58  ;;  %v4726_v59 = vpop.f32.mrb[7].mxu1  ;;  %4752 = vmatmul.mubr.msk.bf16.gmra.mrb[32].mxu1 %vm1140_vm1, %v1898_v55 }
 0x2b3   : > { %5028 = vmatmul.mubr.bf16.gmra.mrb[216].mxu0 %v3041_v56  ;;  %4771 = vmatprep.mubr.msk.bf16.mxu1 %vm5312_vm0, %v6957_v2  ;;  %v1852_v56 = vpack.c.bf16 %v6082_v47, %v6086_v51 }
 0x2b4   : > { %5031 = vmatprep.mubr.msk.bf16.mxu0 %vm5312_vm0, %v6957_v2 }
 0x2b9   : > { %v6005_v63 = vld [vmem:[#allocation3 + $0x8a] sm:$0xff] }
 0x2ba   : > { %4772 = vmatmul.mubr.bf16.vlgmr.msra.gmra.mrb[36].mxu1 %v1847_v62  ;;  %v2440_v0 = vpack.c.bf16 %v6005_v63, %v5990_v52 }
 0x2bb   : > { %4808 = vmatpush3.bf16.msra.mxu1 %v5268_v37  ;;  %4775 = vmatprep.mubr.msk.bf16.mxu1 %vm5312_vm0, %v6957_v2  ;;  %v6098_v37 = vld [vmem:[#allocation3 + $0x60] sm:$0xff] }
 0x2bc   : > { %4809 = vmatprep.subr.bf16.mxu1 %v6957_v2  ;;  %v1853_v62 = vpack.c.bf16 %v6095_v60, %v6098_v37 }
 0x2bf   : > { %4810 = vmatpush3.bf16.msra.mxu1 %v5269_v1 }
 0x2c0   : > { %4811 = vmatprep.subr.bf16.mxu1 %v6957_v2 }
 0x2c1   : > { %v1706_v7 = vpop.permute.xlu0 %1705 }
 0x2c2   : > { %1711 = vst.msk [vmem:[#allocation3 + $0x99] sm:$0xff] %vm1208_vm9, %v1706_v7  ;;  %4776 = vmatmul.mubr.bf16.gmra.mrb[40].mxu1 %v1848_v6  ;;  %v6105_v6 = vld [vmem:[#allocation3 + $0x78] sm:$0xff]  ;;  %v6107_v7 = vld [vmem:[#allocation3 + $0x70] sm:$0xff] }
 0x2c3   : > { %v1708_v11 = vpop.permute.xlu1 %1707  ;;  %4779 = vmatprep.mubr.msk.bf16.mxu1 %vm5312_vm0, %v6957_v2  ;;  %4812 = vmatpush3.bf16.msra.mxu1 %v5270_v5 }
 0x2c4   : > { %1712 = vst.msk [vmem:[#allocation3 + $0xa1] sm:$0x3f] %vm1154_vm6, %v1708_v11  ;;  %4813 = vmatprep.subr.bf16.mxu1 %v6957_v2  ;;  %v1854_v11 = vpack.c.bf16 %v6105_v6, %v6107_v7 }
 0x2c5   : > { %v1714_v13 = vpop.permute.xlu0 %1713 }
 0x2c6   : > { %1719 = vst.msk [vmem:[#allocation3 + $0x98] sm:$0xff] %vm1217_vm10, %v1714_v13  ;;  %v6115_v13 = vld [vmem:[#allocation3 + $0x80] sm:$0xff] }
 0x2c7   : > { %v1716_v15 = vpop.permute.xlu1 %1715  ;;  %4814 = vmatpush3.bf16.msra.mxu1 %v5271_v12  ;;  %v1846_v12 = vld [vmem:[#allocation3 + $0x88] sm:$0xf] }
 0x2c8   : > { %1720 = vst.msk [vmem:[#allocation3 + $0xa0] sm:$0x3f] %vm1164_vm7, %v1716_v15  ;;  %4815 = vmatprep.subr.bf16.mxu1 %v6957_v2  ;;  %v1855_v14 = vpack.c.bf16 %v1846_v12, %v6115_v13  ;;  %v3445_v12 = vpack.c.bf16 %v6072_v42, %v6045_v26 }
 0x2c9   : > { %v6033_v19 = vpop.f32.mrb[8].mxu1  ;;  %v1722_v20 = vpop.permute.xlu0 %1721 }
 0x2ca   : > { %1727 = vst.msk [vmem:[#allocation3 + $0x97] sm:$0xff] %vm1226_vm11, %v1722_v20  ;;  %v4729_v21 = vpop.f32.mrb[9].mxu1  ;;  %4780 = vmatmul.mubr.bf16.gmra.mrb[44].mxu1 %v1849_v18 }
 0x2cb   : > { %v6036_v22 = vpop.f32.mrb[10].mxu1  ;;  %v1724_v23 = vpop.permute.xlu1 %1723  ;;  %4783 = vmatprep.mubr.msk.bf16.mxu1 %vm5312_vm0, %v6957_v2  ;;  %4816 = vmatpush3.bf16.msra.mxu1 %v5272_v17 }
 0x2cc   : > { %1728 = vst.msk [vmem:[#allocation3 + $0x9f] sm:$0x3f] %vm1174_vm8, %v1724_v23  ;;  %v4730_v25 = vpop.f32.mrb[11].mxu1  ;;  %4817 = vmatprep.subr.bf16.mxu1 %v6957_v2 }
 0x2cf   : > { %4818 = vmatpush3.bf16.msra.mxu1 %v5273_v24  ;;  %v2201_v24 = vld [vmem:[#allocation3 + $0x16] sm:$0xff] }
 0x2d0   : > { %4819 = vmatprep.subr.bf16.mxu1 %v6957_v2 }
 0x2d1   : > { %v6052_v32 = vld [vmem:[#allocation3 + $0x92] sm:$0xff] }
 0x2d2   : > { %4784 = vmatmul.mubr.bf16.gmra.mrb[48].mxu1 %v1850_v30  ;;  %v3042_v33 = vpack.c.bf16 %v6052_v32, %v6005_v63  ;;  %v6061_v36 = vld [vmem:[#allocation3 + $0x90] sm:$0xff] }
 0x2d3   : > { %4787 = vmatprep.mubr.msk.bf16.mxu1 %vm5312_vm0, %v6957_v2  ;;  %4820 = vmatpush3.bf16.msra.mxu1 %v5274_v29  ;;  %v6063_v39 = vld [vmem:[#allocation3 + $0x98] sm:$0xff]  ;;  %v2200_v30 = vld [vmem:[#allocation3 + $0xe] sm:$0xff] }
 0x2d4   : > { %5032 = vmatmul.mubr.bf16.gmra.mrb[220].mxu0 %v3042_v33  ;;  %4821 = vmatprep.subr.bf16.mxu1 %v6957_v2  ;;  %v3032_v3 = vld [vmem:[#allocation3 + $0x9a] sm:$0xff] }
 0x2d5   : > { %5035 = vmatprep.mubr.msk.bf16.mxu0 %vm5312_vm0, %v6957_v2  ;;  %v5280_v33 = vld [vmem:[%s6954_s4 + $0x10] sm:$0xff]  }
 0x2d7   : > { %4822 = vmatpush3.bf16.msra.mxu1 %v5276_v34 }
 0x2d8   : > { %4859 = vmatprep.subr.bf16.mxu1 %v6957_v2 }
 0x2da   : > { %4788 = vmatmul.mubr.bf16.gmra.mrb[52].mxu1 %v1851_v44  ;;  %v2218_v44 = vpack.c.bf16 %v2201_v24, %v2200_v30 }
 0x2db   : > { %4791 = vmatprep.mubr.msk.bf16.mxu1 %vm5312_vm0, %v6957_v2  ;;  %v1756_v45 = vpop.permute.xlu0 %1755 }
 0x2dc   : > { %1761 = vst.msk [vmem:[#allocation3 + $0xa7] sm:$0xff] %vm1208_vm9, %v1756_v45 }
 0x2dd   : > { %v6080_v46 = vpop.f32.mrb[196].mxu0 }
 0x2de   : > { %v5009_v48 = vpop.f32.mrb[197].mxu0 }
 0x2df   : > { %v6084_v50 = vpop.f32.mrb[198].mxu0  ;;  %v1764_v54 = vpop.permute.xlu0 %1763  ;;  %v5285_v48 = vld [vmem:[%s6954_s4 + $0x18] sm:$0xff]  }
 0x2e0   : > { %v5010_v55 = vpop.f32.mrb[199].mxu0  ;;  %1769 = vst.msk [vmem:[#allocation3 + $0xa6] sm:$0xff] %vm1217_vm10, %v1764_v54 }
 0x2e1   : > { %v1758_v58 = vpop.permute.xlu1 %1757  ;;  %v2203_v55 = vld [vmem:[#allocation3 + $0x26] sm:$0xff] }
 0x2e2   : > { %4792 = vmatmul.mubr.bf16.gmra.mrb[56].mxu1 %v1852_v56  ;;  %1762 = vst.msk [vmem:[#allocation3 + $0xaf] sm:$0x3f] %vm1154_vm6, %v1758_v58  ;;  %v2202_v58 = vld [vmem:[#allocation3 + $0x1e] sm:$0xff] }
 0x2e3   : > { %4795 = vmatprep.mubr.msk.bf16.mxu1 %vm5312_vm0, %v6957_v2  ;;  %v1772_v59 = vpop.permute.xlu0 %1771 }
 0x2e4   : > { %1777 = vst.msk [vmem:[#allocation3 + $0xa5] sm:$0xff] %vm1226_vm11, %v1772_v59 }
 0x2e5   : > { %v1766_v61 = vpop.permute.xlu1 %1765 }
 0x2e6   : > { %1770 = vst.msk [vmem:[#allocation3 + $0xae] sm:$0x3f] %vm1164_vm7, %v1766_v61  ;;  %v2219_v61 = vpack.c.bf16 %v2203_v55, %v2202_v58 }
 0x2e9   : > { %v1774_v1 = vpop.permute.xlu1 %1773 }
 0x2ea   : > { %4796 = vmatmul.mubr.bf16.gmra.mrb[60].mxu1 %v1853_v62  ;;  %1778 = vst.msk [vmem:[#allocation3 + $0xad] sm:$0x3f] %vm1174_vm8, %v1774_v1 }
 0x2eb   : > { %4799 = vmatprep.mubr.msk.bf16.mxu1 %vm5312_vm0, %v6957_v2  ;;  %v3033_v4 = vld [vmem:[#allocation3 + $0xa2] sm:$0xff] }
 0x2ec   : > { %v3043_v5 = vpack.c.bf16 %v3033_v4, %v3032_v3  ;;  %v2205_v3 = vld [vmem:[#allocation3 + $0x36] sm:$0xff]  ;;  %v2204_v4 = vld [vmem:[#allocation3 + $0x2e] sm:$0xff]  ;;  %v2626_v40 = vld [vmem:[#allocation3 + $0xa4] sm:$0xf] }
 0x2ee   : > { %5036 = vmatmul.mubr.bf16.gmra.mrb[224].mxu0 %v3043_v5  ;;  %v6148_v5 = vpack.c.bf16 %v2205_v3, %v2204_v4 }
 0x2ef   : > { %5039 = vmatprep.mubr.msk.bf16.mxu0 %vm5312_vm0, %v6957_v2 }
 0x2f1   : > { %v3034_v59 = vld [vmem:[#allocation3 + $0xaa] sm:$0xff] }
 0x2f2   : > { %4800 = vmatmul.mubr.bf16.gmra.mrb[64].mxu1 %v1854_v11  ;;  %v6153_v11 = vld [vmem:[%s6954_s4 + $0x40] sm:$0xff]  }
 0x2f3   : > { %4803 = vmatprep.mubr.msk.bf16.mxu1 %vm5312_vm0, %v6957_v2 }
 0x2f9   : > { %v1806_v15 = vpop.permute.xlu0 %1805 }
 0x2fa   : > { %1811 = vst.msk [vmem:[#allocation3 + $0xb5] sm:$0xff] %vm1208_vm9, %v1806_v15  ;;  %4804 = vmatmul.mubr.bf16.gmra.mrb[68].mxu1 %v1855_v14  ;;  %v2207_v14 = vld [vmem:[#allocation3 + $0x46] sm:$0xff]  ;;  %v6166_v15 = vld [vmem:[%s6954_s4 + $0x48] sm:$0xff]  }
 0x2fb   : > { %v6119_v16 = vpop.f32.mrb[12].mxu1  ;;  %4823 = vmatprep.mubr.msk.bf16.mxu1 %vm5312_vm0, %v6957_v2  ;;  %v1808_v34 = vpop.permute.xlu1 %1807 }
 0x2fc   : > { %v6121_v17 = vpop.f32.mrb[200].mxu0  ;;  %v4733_v18 = vpop.f32.mrb[13].mxu1  ;;  %1812 = vst.msk [vmem:[#allocation3 + $0xbd] sm:$0x3f] %vm1154_vm6, %v1808_v34 }
 0x2fd   : > { %v5013_v20 = vpop.f32.mrb[201].mxu0  ;;  %v6125_v21 = vpop.f32.mrb[14].mxu1  ;;  %v2206_v18 = vld [vmem:[#allocation3 + $0x3e] sm:$0xff] }
 0x2fe   : > { %v1814_v23 = vpop.permute.xlu0 %1813  ;;  %v6128_v25 = vpop.f32.mrb[202].mxu0  ;;  %v6169_v20 = vpack.c.bf16 %v2207_v14, %v2206_v18 }
 0x2ff   : > { %1819 = vst.msk [vmem:[#allocation3 + $0xb4] sm:$0xff] %vm1217_vm10, %v1814_v23  ;;  %v4734_v27 = vpop.f32.mrb[15].mxu1  ;;  %v5014_v29 = vpop.f32.mrb[203].mxu0  ;;  %v3446_v23 = vpack.c.bf16 %v6086_v51, %v6068_v53  ;;  %v3447_v51 = vpack.c.bf16 %v6098_v37, %v6082_v47  ;;  %v2213_v47 = vld [vmem:[#allocation3 + $0x76] sm:$0xff]  ;;  %v2212_v37 = vld [vmem:[#allocation3 + $0x6e] sm:$0xff] }
 0x300   : > { %v1824_v54 = vpop.permute.xlu1 %1823  ;;  %v2209_v29 = vld [vmem:[#allocation3 + $0x56] sm:$0xff]  ;;  %v6205_v58 = vpack.c.bf16 %v2213_v47, %v2212_v37 }
 0x302   : > { %v1822_v45 = vpop.permute.xlu0 %1821  ;;  %4824 = vmatmul.mubr.bf16.vlgmr.msra.gmra.mrb[72].mxu1 %v2218_v44 }
 0x303   : > { %1827 = vst.msk [vmem:[#allocation3 + $0xb3] sm:$0xff] %vm1226_vm11, %v1822_v45  ;;  %4860 = vmatpush3.bf16.msra.mxu1 %v5280_v33  ;;  %4827 = vmatprep.mubr.msk.bf16.mxu1 %vm5312_vm0, %v6957_v2  ;;  %v2208_v33 = vld [vmem:[#allocation3 + $0x4e] sm:$0xff] }
 0x304   : > { %4861 = vmatprep.subr.bf16.mxu1 %v6957_v2  ;;  %v6185_v44 = vpack.c.bf16 %v2209_v29, %v2208_v33  ;;  %v6235_v29 = vld [vmem:[#allocation3 + $0xa0] sm:$0xff] }
 0x306   : > { %v1816_v56 = vpop.permute.xlu0 %1815 }
 0x307   : > { %1820 = vst.msk [vmem:[#allocation3 + $0xbc] sm:$0x3f] %vm1164_vm7, %v1816_v56  ;;  %4862 = vmatpush3.bf16.msra.mxu1 %v5285_v48  ;;  %v2211_v48 = vld [vmem:[#allocation3 + $0x66] sm:$0xff]  ;;  %v3448_v56 = vpack.c.bf16 %v6107_v7, %v6095_v60 }
 0x308   : > { %1828 = vst.msk [vmem:[#allocation3 + $0xbb] sm:$0x3f] %vm1174_vm8, %v1824_v54  ;;  %4899 = vmatprep.subr.bf16.mxu1 %v6957_v2  ;;  %v2210_v54 = vld [vmem:[#allocation3 + $0x5e] sm:$0xff]  ;;  %v2215_v60 = vld [vmem:[#allocation3 + $0x86] sm:$0xff] }
 0x309   : > { %v6196_v55 = vpack.c.bf16 %v2211_v48, %v2210_v54  ;;  %v2415_v54 = vld [vmem:[#allocation3 + $0x12] sm:$0xff] }
 0x30a   : > { %v3035_v62 = vld [vmem:[#allocation3 + $0xb2] sm:$0xf]  ;;  %4828 = vmatmul.mubr.bf16.gmra.mrb[76].mxu1 %v2219_v61  ;;  %v2214_v61 = vld [vmem:[#allocation3 + $0x7e] sm:$0xff] }
 0x30b   : > { %v3044_v1 = vpack.c.bf16 %v3035_v62, %v3034_v59  ;;  %4831 = vmatprep.mubr.msk.bf16.mxu1 %vm5312_vm0, %v6957_v2  ;;  %v3449_v59 = vpack.c.bf16 %v6115_v13, %v6105_v6  ;;  %v3442_v48 = vld [vmem:[#allocation3 + $0xb0] sm:$0xff] }
 0x30d   : > { %5040 = vmatmul.mubr.bf16.gmra.mrb[228].mxu0 %v3044_v1  ;;  %v6216_v1 = vpack.c.bf16 %v2215_v60, %v2214_v61  ;;  %v2418_v60 = vld [vmem:[#allocation3 + $0x2a] sm:$0xff] }
 0x30e   : > { %5099 = vmatprep.mubr.msk.bf16.mxu0 %vm5312_vm0, %v6957_v2 }
 0x30f   : > { %v3443_v61 = vld [vmem:[#allocation3 + $0xb8] sm:$0xff] }
 0x312   : > { %4832 = vmatmul.mubr.bf16.gmra.mrb[80].mxu1 %v6148_v5 }
 0x313   : > { %4835 = vmatprep.mubr.msk.bf16.mxu1 %vm5312_vm0, %v6957_v2 }
 0x315   : > { %5100 = vmatmul.mubr.bf16.vlgmr.msra.gmra.mrb[232].mxu0 %v3445_v12  ;;  %v6222_v12 = vld [vmem:[#allocation3 + $0x88] sm:$0xff] }
 0x316   : > { %5103 = vmatprep.mubr.msk.bf16.mxu0 %vm5312_vm0, %v6957_v2  ;;  %5136 = vmatpush3.bf16.msra.mxu0 %v6153_v11  ;;  %v3450_v14 = vpack.c.bf16 %v6061_v36, %v6222_v12 }
 0x317   : > { %5137 = vmatprep.subr.bf16.mxu0 %v6957_v2 }
 0x319   : > { %v6171_v26 = vpop.f32.mrb[16].mxu1 }
 0x31a   : > { %5138 = vmatpush3.bf16.msra.mxu0 %v6166_v15  ;;  %v4737_v42 = vpop.f32.mrb[17].mxu1  ;;  %4836 = vmatmul.mubr.bf16.gmra.mrb[84].mxu1 %v6169_v20 }
 0x31b   : > { %v6177_v24 = vpop.f32.mrb[18].mxu1  ;;  %4839 = vmatprep.mubr.msk.bf16.mxu1 %vm5312_vm0, %v6957_v2 }
 0x31c   : > { %v4738_v27 = vpop.f32.mrb[19].mxu1 }
 0x31d   : > { %5104 = vmatmul.mubr.bf16.gmra.mrb[236].mxu0 %v3446_v23  ;;  %v2217_v23 = vld [vmem:[#allocation3 + $0x96] sm:$0xf]  ;;  %v6233_v27 = vld [vmem:[#allocation3 + $0x8e] sm:$0xff] }
 0x31e   : > { %5107 = vmatprep.mubr.msk.bf16.mxu0 %vm5312_vm0, %v6957_v2  ;;  %v2226_v33 = vpack.c.bf16 %v2217_v23, %v6233_v27 }
 0x31f   : > { %v6183_v30 = vpop.f32.mrb[204].mxu0 }
 0x320   : > { %v5017_v34 = vpop.f32.mrb[205].mxu0 }
 0x321   : > { %v6187_v45 = vpop.f32.mrb[206].mxu0  ;;  %v3451_v34 = vpack.c.bf16 %v6235_v29, %v6063_v39 }
 0x322   : > { %4840 = vmatmul.mubr.bf16.gmra.mrb[88].mxu1 %v6185_v44  ;;  %v5018_v53 = vpop.f32.mrb[207].mxu0 }
 0x323   : > { %4843 = vmatprep.mubr.msk.bf16.mxu1 %vm5312_vm0, %v6957_v2  ;;  %v2416_v53 = vld [vmem:[#allocation3 + $0x1a] sm:$0xff] }
 0x324   : > { %v2433_v47 = vpack.c.bf16 %v2416_v53, %v2415_v54  ;;  %v5291_v53 = vld [vmem:[%s6953_s3 + $0x98] sm:$0xff]  }
 0x325   : > { %5108 = vmatmul.mubr.bf16.gmra.mrb[240].mxu0 %v3447_v51  ;;  %v3441_v51 = vld [vmem:[#allocation3 + $0xa8] sm:$0xff] }
 0x326   : > { %5111 = vmatprep.mubr.msk.bf16.mxu0 %vm5312_vm0, %v6957_v2  ;;  %v3452_v37 = vpack.c.bf16 %v3442_v48, %v3441_v51  ;;  %v2420_v48 = vld [vmem:[#allocation3 + $0x3a] sm:$0xff] }
 0x32a   : > { %4844 = vmatmul.mubr.bf16.gmra.mrb[92].mxu1 %v6196_v55 }
 0x32b   : > { %4847 = vmatprep.mubr.msk.bf16.mxu1 %vm5312_vm0, %v6957_v2 }
 0x32d   : > { %5112 = vmatmul.mubr.bf16.gmra.mrb[244].mxu0 %v3448_v56  ;;  %v5286_v56 = vld [vmem:[%s6953_s3 + $0x80] sm:$0xff]  }
 0x32e   : > { %5115 = vmatprep.mubr.msk.bf16.mxu0 %vm5312_vm0, %v6957_v2 }
 0x332   : > { %4848 = vmatmul.mubr.bf16.gmra.mrb[96].mxu1 %v6205_v58 }
 0x333   : > { %4851 = vmatprep.mubr.msk.bf16.mxu1 %vm5312_vm0, %v6957_v2 }
 0x335   : > { %5116 = vmatmul.mubr.bf16.gmra.mrb[248].mxu0 %v3449_v59  ;;  %v5287_v59 = vld [vmem:[%s6953_s3 + $0x88] sm:$0xff]  }
 0x336   : > { %5119 = vmatprep.mubr.msk.bf16.mxu0 %vm5312_vm0, %v6957_v2 }
 0x337   : > { %v6214_v7 = vpop.f32.mrb[20].mxu1 }
 0x338   : > { %v4741_v62 = vpop.f32.mrb[21].mxu1 }
 0x339   : > { %v6218_v3 = vpop.f32.mrb[22].mxu1  ;;  %v6220_v4 = vpop.f32.mrb[208].mxu0  ;;  %v3444_v62 = vld [vmem:[#allocation3 + $0xc0] sm:$0xf] }
 0x33a   : > { %v4742_v6 = vpop.f32.mrb[23].mxu1  ;;  %4852 = vmatmul.mubr.bf16.gmra.mrb[100].mxu1 %v6216_v1  ;;  %v5021_v13 = vpop.f32.mrb[209].mxu0 }
 0x33b   : > { %v6227_v18 = vpop.f32.mrb[210].mxu0  ;;  %4855 = vmatprep.mubr.msk.bf16.mxu1 %vm5312_vm0, %v6957_v2  ;;  %v2417_v6 = vld [vmem:[#allocation3 + $0x22] sm:$0xff] }
 0x33c   : > { %v5022_v42 = vpop.f32.mrb[211].mxu0  ;;  %v5290_v13 = vld [vmem:[%s6953_s3 + $0x90] sm:$0xff]  }
 0x33d   : > { %5120 = vmatmul.mubr.bf16.gmra.mrb[252].mxu0 %v3450_v14  ;;  %v2434_v14 = vpack.c.bf16 %v2418_v60, %v2417_v6  ;;  %v3453_v42 = vpack.c.bf16 %v3444_v62, %v3443_v61  ;;  %v5293_v62 = vld [vmem:[%s6953_s3 + $0xa8] sm:$0xff]   ;;  %v2422_v6 = vld [vmem:[#allocation3 + $0x4a] sm:$0xff] }
 0x33e   : > { %5123 = vmatprep.mubr.msk.bf16.mxu0 %vm5312_vm0, %v6957_v2 }
 0x342   : > { %4856 = vmatmul.mubr.bf16.gmra.mrb[104].mxu1 %v2226_v33 }
 0x343   : > { %4863 = vmatprep.mubr.msk.bf16.mxu1 %vm5312_vm0, %v6957_v2 }
 0x345   : > { %5124 = vmatmul.mubr.bf16.gmra.mrb[0].mxu0 %v3451_v34 }
 0x346   : > { %5127 = vmatprep.mubr.msk.bf16.mxu0 %vm5312_vm0, %v6957_v2 }
 0x34a   : > { %4864 = vmatmul.mubr.msk.bf16.vlgmr.msra.gmra.mrb[108].mxu1 %vm1140_vm1, %v2433_v47  ;;  %v2419_v47 = vld [vmem:[#allocation3 + $0x32] sm:$0xff] }
 0x34b   : > { %4900 = vmatpush3.bf16.msra.mxu1 %v5286_v56  ;;  %4867 = vmatprep.mubr.msk.bf16.mxu1 %vm5312_vm0, %v6957_v2  ;;  %v2435_v60 = vpack.c.bf16 %v2420_v48, %v2419_v47 }
 0x34c   : > { %4901 = vmatprep.subr.bf16.mxu1 %v6957_v2 }
 0x34d   : > { %5128 = vmatmul.mubr.bf16.gmra.mrb[4].mxu0 %v3452_v37  ;;  %v5292_v37 = vld [vmem:[%s6953_s3 + $0xa0] sm:$0xff]  }
 0x34e   : > { %5131 = vmatprep.mubr.msk.bf16.mxu0 %vm5312_vm0, %v6957_v2 }
 0x34f   : > { %4902 = vmatpush3.bf16.msra.mxu1 %v5287_v59 }
 0x350   : > { %4903 = vmatprep.subr.bf16.mxu1 %v6957_v2 }
 0x351   : > { %v6260_v23 = vpop.f32.mrb[24].mxu1 }
 0x352   : > { %v4745_v33 = vpop.f32.mrb[25].mxu1  ;;  %4868 = vmatmul.mubr.msk.bf16.gmra.mrb[112].mxu1 %vm1140_vm1, %v2434_v14  ;;  %v5294_v14 = vld [vmem:[%s6953_s3 + $0xb0] sm:$0xff]  }
 0x353   : > { %v6263_v34 = vpop.f32.mrb[26].mxu1  ;;  %4871 = vmatprep.mubr.msk.bf16.mxu1 %vm5312_vm0, %v6957_v2  ;;  %4904 = vmatpush3.bf16.msra.mxu1 %v5290_v13  ;;  %v2421_v13 = vld [vmem:[#allocation3 + $0x42] sm:$0xff] }
 0x354   : > { %v4746_v51 = vpop.f32.mrb[27].mxu1  ;;  %4905 = vmatprep.subr.bf16.mxu1 %v6957_v2 }
 0x355   : > { %5132 = vmatmul.mubr.bf16.gmra.mrb[8].mxu0 %v3453_v42  ;;  %v2436_v42 = vpack.c.bf16 %v2422_v6, %v2421_v13  ;;  %v2425_v51 = vld [vmem:[#allocation3 + $0x62] sm:$0xff] }
 0x356   : > { %5139 = vmatprep.mubr.msk.bf16.mxu0 %vm5312_vm0, %v6957_v2  ;;  %v6273_v54 = vpop.f32.mrb[212].mxu0 }
 0x357   : > { %v5025_v56 = vpop.f32.mrb[213].mxu0  ;;  %4906 = vmatpush3.bf16.msra.mxu1 %v5291_v53 }
 0x358   : > { %v6278_v59 = vpop.f32.mrb[214].mxu0  ;;  %4907 = vmatprep.subr.bf16.mxu1 %v6957_v2  ;;  %v2438_v56 = vpack.c.bf16 %v5933_v8, %v2425_v51 }
 0x359   : > { %v5026_v61 = vpop.f32.mrb[215].mxu0 }
 0x35a   : > { %4872 = vmatmul.mubr.msk.bf16.gmra.mrb[116].mxu1 %vm1140_vm1, %v2435_v60  ;;  %v2432_v61 = vld [vmem:[#allocation3 + $0x9a] sm:$0xf] }
 0x35b   : > { %4875 = vmatprep.mubr.msk.bf16.mxu1 %vm5312_vm0, %v6957_v2  ;;  %4908 = vmatpush3.bf16.msra.mxu1 %v5292_v37  ;;  %v2441_v52 = vpack.c.bf16 %v2432_v61, %v6052_v32 }
 0x35c   : > { %4909 = vmatprep.subr.bf16.mxu1 %v6957_v2 }
 0x35d   : > { %5140 = vmatmul.mubr.msk.bf16.vlgmr.msra.gmra.mrb[12].mxu0 %vm1140_vm1, %v3660_v31  ;;  %v2423_v31 = vld [vmem:[#allocation3 + $0x52] sm:$0xff] }
 0x35e   : > { %v2437_v33 = vpack.c.bf16 %v2424_v28, %v2423_v31  ;;  %v2609_v28 = vld [vmem:[#allocation3 + $0x1c] sm:$0xff]  ;;  %v5296_v31 = vld [vmem:[%s6954_s4 + $0x20] sm:$0xff]  }
 0x35f   : > { %4910 = vmatpush3.bf16.msra.mxu1 %v5293_v62 }
 0x360   : > { %4911 = vmatprep.subr.bf16.mxu1 %v6957_v2 }
 0x362   : > { %4876 = vmatmul.mubr.msk.bf16.gmra.mrb[120].mxu1 %vm1140_vm1, %v2436_v42 }
 0x363   : > { %4879 = vmatprep.mubr.msk.bf16.mxu1 %vm5312_vm0, %v6957_v2  ;;  %4912 = vmatpush3.bf16.msra.mxu1 %v5294_v14 }
 0x364   : > { %4913 = vmatprep.subr.bf16.mxu1 %v6957_v2 }
 0x367   : > { %4914 = vmatpush3.bf16.msra.mxu1 %v5295_v9 }
 0x368   : > { %4951 = vmatprep.subr.bf16.mxu1 %v6957_v2 }
 0x36a   : > { %4880 = vmatmul.mubr.msk.bf16.gmra.mrb[124].mxu1 %vm1140_vm1, %v2437_v33 }
 0x36b   : > { %4883 = vmatprep.mubr.msk.bf16.mxu1 %vm5312_vm0, %v6957_v2 }
 0x370   : > { %v6307_v53 = vpop.f32.mrb[28].mxu1 }
 0x371   : > { %v4749_v48 = vpop.f32.mrb[29].mxu1 }
 0x372   : > { %v6310_v47 = vpop.f32.mrb[30].mxu1  ;;  %4884 = vmatmul.mubr.msk.bf16.gmra.mrb[128].mxu1 %vm1140_vm1, %v2438_v56  ;;  %v2612_v56 = vld [vmem:[#allocation3 + $0x34] sm:$0xff] }
 0x373   : > { %v4750_v37 = vpop.f32.mrb[31].mxu1  ;;  %4887 = vmatprep.mubr.msk.bf16.mxu1 %vm5312_vm0, %v6957_v2 }
 0x37a   : > { %4888 = vmatmul.mubr.msk.bf16.gmra.mrb[132].mxu1 %vm1140_vm1, %v2439_v43 }
 0x37b   : > { %4891 = vmatprep.mubr.msk.bf16.mxu1 %vm5312_vm0, %v6957_v2 }
 0x382   : > { %4892 = vmatmul.mubr.msk.bf16.gmra.mrb[136].mxu1 %vm1140_vm1, %v2440_v0  ;;  %v2610_v0 = vld [vmem:[#allocation3 + $0x24] sm:$0xff] }
 0x383   : > { %4895 = vmatprep.mubr.msk.bf16.mxu1 %vm5312_vm0, %v6957_v2  ;;  %v2627_v51 = vpack.c.bf16 %v2610_v0, %v2609_v28 }
 0x385   : > { %v6327_v8 = vpop.f32.mrb[32].mxu1 }
 0x386   : > { %v6329_v60 = vpop.f32.mrb[216].mxu0  ;;  %v4753_v62 = vpop.f32.mrb[33].mxu1 }
 0x387   : > { %v5029_v10 = vpop.f32.mrb[217].mxu0  ;;  %v6331_v41 = vpop.f32.mrb[34].mxu1  ;;  %v2611_v62 = vld [vmem:[#allocation3 + $0x2c] sm:$0xff] }
 0x388   : > { %v6333_v43 = vpop.f32.mrb[218].mxu0  ;;  %v4754_v6 = vpop.f32.mrb[35].mxu1 }
 0x389   : > { %v5030_v13 = vpop.f32.mrb[219].mxu0 }
 0x38a   : > { %4896 = vmatmul.mubr.msk.bf16.gmra.mrb[140].mxu1 %vm1140_vm1, %v2441_v52  ;;  %v2628_v13 = vpack.c.bf16 %v2612_v56, %v2611_v62 }
 0x38b   : > { %4915 = vmatprep.mubr.msk.bf16.mxu1 %vm5312_vm0, %v6957_v2 }
 0x38d   : > { %v2129_v63 = vpop.f32.mrb[36].mxu1 }
 0x38e   : > { %v6340_v14 = vadd.f32 %v2129_v63, %v5972_v35  ;;  %v4773_v42 = vpop.f32.mrb[37].mxu1  ;;  %v5297_v35 = vld [vmem:[%s6954_s4 + $0x28] sm:$0xff]   ;;  %v2614_v63 = vld [vmem:[#allocation3 + $0x44] sm:$0xff] }
 0x38f   : > { %v2132_v9 = vpop.f32.mrb[38].mxu1 }
 0x390   : > { %v6346_v33 = vadd.f32 %v2132_v9, %v5974_v38  ;;  %v4774_v32 = vpop.f32.mrb[39].mxu1  ;;  %v2613_v9 = vld [vmem:[#allocation3 + $0x3c] sm:$0xff] }
 0x392   : > { %4916 = vmatmul.mubr.bf16.vlgmr.msra.gmra.mrb[144].mxu1 %v2627_v51  ;;  %v2616_v51 = vld [vmem:[#allocation3 + $0x54] sm:$0xff] }
 0x393   : > { %4952 = vmatpush3.bf16.msra.mxu1 %v5296_v31  ;;  %4919 = vmatprep.mubr.msk.bf16.mxu1 %vm5312_vm0, %v6957_v2  ;;  %v2629_v31 = vpack.c.bf16 %v2614_v63, %v2613_v9  ;;  %v2618_v63 = vld [vmem:[#allocation3 + $0x64] sm:$0xff]  ;;  %v2617_v9 = vld [vmem:[#allocation3 + $0x5c] sm:$0xff] }
 0x394   : > { %4953 = vmatprep.subr.bf16.mxu1 %v6957_v2 }
 0x395   : > { %v2137_v48 = vpop.f32.mrb[40].mxu1 }
 0x396   : > { %v6355_v37 = vadd.f32 %v2137_v48, %v5988_v49  ;;  %v4777_v38 = vpop.f32.mrb[41].mxu1 }
 0x397   : > { %v2140_v61 = vpop.f32.mrb[42].mxu1  ;;  %4954 = vmatpush3.bf16.msra.mxu1 %v5297_v35  ;;  %v2615_v38 = vld [vmem:[#allocation3 + $0x4c] sm:$0xff] }
 0x398   : > { %v6358_v10 = vadd.f32 %v2140_v61, %v5994_v57  ;;  %v4778_v6 = vpop.f32.mrb[43].mxu1  ;;  %5043 = vmatprep.subr.bf16.mxu1 %v6957_v2 }
 0x399   : > { %v6379_v6 = vpack.c.bf16 %v2616_v51, %v2615_v38 }
 0x39a   : > { %4920 = vmatmul.mubr.bf16.gmra.mrb[148].mxu1 %v2628_v13 }
 0x39b   : > { %4923 = vmatprep.mubr.msk.bf16.mxu1 %vm5312_vm0, %v6957_v2 }
 0x39d   : > { %v2145_v52 = vpop.f32.mrb[44].mxu1 }
 0x39e   : > { %v6364_v49 = vadd.f32 %v2145_v52, %v6033_v19  ;;  %v4781_v0 = vpop.f32.mrb[45].mxu1 }
 0x39f   : > { %v2148_v42 = vpop.f32.mrb[46].mxu1 }
 0x3a0   : > { %v6367_v28 = vadd.f32 %v2148_v42, %v6036_v22  ;;  %v4782_v57 = vpop.f32.mrb[47].mxu1 }
 0x3a2   : > { %4924 = vmatmul.mubr.bf16.gmra.mrb[152].mxu1 %v2629_v31 }
 0x3a3   : > { %4927 = vmatprep.mubr.msk.bf16.mxu1 %vm5312_vm0, %v6957_v2 }
 0x3a5   : > { %v2153_v32 = vpop.f32.mrb[48].mxu1 }
 0x3a6   : > { %v6372_v35 = vadd.f32 %v2153_v32, %v6119_v16  ;;  %v4785_v48 = vpop.f32.mrb[49].mxu1  ;;  %v6392_v32 = vpack.c.bf16 %v2618_v63, %v2617_v9  ;;  %v2622_v63 = vld [vmem:[#allocation3 + $0x84] sm:$0xff]  ;;  %v2621_v9 = vld [vmem:[#allocation3 + $0x7c] sm:$0xff] }
 0x3a7   : > { %v2156_v19 = vpop.f32.mrb[50].mxu1  ;;  %v6374_v56 = vpop.f32.mrb[220].mxu0  ;;  %v2620_v48 = vld [vmem:[#allocation3 + $0x74] sm:$0xff] }
 0x3a8   : > { %6959 = vst [vmem:[#allocation4_spill] sm:$0xff] %v6374_v56  ;;  %v6377_v61 = vadd.f32 %v2156_v19, %v6125_v21  ;;  %v4786_v22 = vpop.f32.mrb[51].mxu1  ;;  %v5033_v62 = vpop.f32.mrb[221].mxu0 }
 0x3a9   : > { %v6381_v13 = vpop.f32.mrb[222].mxu0  ;;  %v2619_v22 = vld [vmem:[#allocation3 + $0x6c] sm:$0xff] }
 0x3aa   : > { %6960 = vst [vmem:[#allocation5_spill] sm:$0xff] %v6381_v13  ;;  %4928 = vmatmul.mubr.bf16.gmra.mrb[156].mxu1 %v6379_v6  ;;  %v5034_v52 = vpop.f32.mrb[223].mxu0 }
 0x3ab   : > { %4931 = vmatprep.mubr.msk.bf16.mxu1 %vm5312_vm0, %v6957_v2  ;;  %v6403_v52 = vpack.c.bf16 %v2620_v48, %v2619_v22 }
 0x3ad   : > { %v2161_v16 = vpop.f32.mrb[52].mxu1 }
 0x3ae   : > { %v6387_v0 = vadd.f32 %v2161_v16, %v6171_v26  ;;  %v4789_v42 = vpop.f32.mrb[53].mxu1 }
 0x3af   : > { %v2164_v21 = vpop.f32.mrb[54].mxu1 }
 0x3b0   : > { %v6390_v57 = vadd.f32 %v2164_v21, %v6177_v24  ;;  %v4790_v31 = vpop.f32.mrb[55].mxu1 }
 0x3b2   : > { %4932 = vmatmul.mubr.bf16.gmra.mrb[160].mxu1 %v6392_v32 }
 0x3b3   : > { %4935 = vmatprep.mubr.msk.bf16.mxu1 %vm5312_vm0, %v6957_v2 }
 0x3b5   : > { %v2169_v51 = vpop.f32.mrb[56].mxu1 }
 0x3b6   : > { %v6398_v19 = vadd.f32 %v2169_v51, %v6214_v7  ;;  %v4793_v26 = vpop.f32.mrb[57].mxu1  ;;  %v6414_v51 = vpack.c.bf16 %v2622_v63, %v2621_v9  ;;  %v2623_v63 = vld [vmem:[#allocation3 + $0x8c] sm:$0xff] }
 0x3b7   : > { %v2172_v38 = vpop.f32.mrb[58].mxu1 }
 0x3b8   : > { %v6401_v62 = vadd.f32 %v2172_v38, %v6218_v3  ;;  %v4794_v24 = vpop.f32.mrb[59].mxu1 }
 0x3b9   : > { %v2624_v24 = vld [vmem:[#allocation3 + $0x94] sm:$0xff] }
 0x3ba   : > { %4936 = vmatmul.mubr.bf16.gmra.mrb[164].mxu1 %v6403_v52 }
 0x3bb   : > { %4939 = vmatprep.mubr.msk.bf16.mxu1 %vm5312_vm0, %v6957_v2 }
 0x3bd   : > { %v2177_v16 = vpop.f32.mrb[60].mxu1 }
 0x3be   : > { %v6409_v42 = vadd.f32 %v2177_v16, %v6260_v23  ;;  %v4797_v7 = vpop.f32.mrb[61].mxu1 }
 0x3bf   : > { %v2180_v21 = vpop.f32.mrb[62].mxu1 }
 0x3c0   : > { %v6412_v31 = vadd.f32 %v2180_v21, %v6263_v34  ;;  %v4798_v3 = vpop.f32.mrb[63].mxu1 }
 0x3c1   : > { %v6416_v48 = vpop.f32.mrb[224].mxu0  ;;  %v6429_v3 = vpack.c.bf16 %v2624_v24, %v2623_v63 }
 0x3c2   : > { %6961 = vst [vmem:[#allocation6_spill] sm:$0xff] %v6416_v48  ;;  %4940 = vmatmul.mubr.bf16.gmra.mrb[168].mxu1 %v6414_v51  ;;  %v5037_v26 = vpop.f32.mrb[225].mxu0 }
 0x3c3   : > { %4943 = vmatprep.mubr.msk.bf16.mxu1 %vm5312_vm0, %v6957_v2  ;;  %v6421_v38 = vpop.f32.mrb[226].mxu0 }
 0x3c4   : > { %6962 = vst [vmem:[#allocation7_spill] sm:$0xff] %v6421_v38  ;;  %v5038_v23 = vpop.f32.mrb[227].mxu0 }
 0x3c5   : > { %v2185_v22 = vpop.f32.mrb[64].mxu1  ;;  %v6434_v23 = vld [vmem:[#allocation3 + $0x9c] sm:$0xff] }
 0x3c6   : > { %v6424_v16 = vadd.f32 %v2185_v22, %v6307_v53  ;;  %v4801_v34 = vpop.f32.mrb[65].mxu1  ;;  %v2635_v24 = vpack.c.bf16 %v2626_v40, %v6434_v23 }
 0x3c7   : > { %v2188_v7 = vpop.f32.mrb[66].mxu1 }
 0x3c8   : > { %v6427_v21 = vadd.f32 %v2188_v7, %v6310_v47  ;;  %v4802_v9 = vpop.f32.mrb[67].mxu1 }
 0x3c9   : > { %v2825_v9 = vld [vmem:[#allocation3 + $0x28] sm:$0xff] }
 0x3ca   : > { %4944 = vmatmul.mubr.bf16.gmra.mrb[172].mxu1 %v6429_v3 }
 0x3cb   : > { %4947 = vmatprep.mubr.msk.bf16.mxu1 %vm5312_vm0, %v6957_v2 }
 0x3cd   : > { %v2193_v26 = vpop.f32.mrb[68].mxu1 }
 0x3ce   : > { %v6437_v53 = vadd.f32 %v2193_v26, %v6327_v8  ;;  %v4805_v22 = vpop.f32.mrb[69].mxu1  ;;  %v2824_v26 = vld [vmem:[#allocation3 + $0x20] sm:$0xff] }
 0x3cf   : > { %v2196_v34 = vpop.f32.mrb[70].mxu1 }
 0x3d0   : > { %v6440_v47 = vadd.f32 %v2196_v34, %v6331_v41  ;;  %v4806_v7 = vpop.f32.mrb[71].mxu1  ;;  %v5298_v41 = vld [vmem:[%s6954_s4 + $0x30] sm:$0xff]   ;;  %v2842_v34 = vpack.c.bf16 %v2825_v9, %v2824_v26  ;;  %v2826_v9 = vld [vmem:[#allocation3 + $0x30] sm:$0xff] }
 0x3d1   : > { %v2827_v7 = vld [vmem:[#allocation3 + $0x38] sm:$0xff] }
 0x3d2   : > { %4948 = vmatmul.mubr.bf16.gmra.mrb[176].mxu1 %v2635_v24 }
 0x3d3   : > { %4955 = vmatprep.mubr.msk.bf16.mxu1 %vm5312_vm0, %v6957_v2 }
 0x3d5   : > { %v2326_v63 = vpop.f32.mrb[72].mxu1 }
 0x3d6   : > { %v6446_v38 = vadd.f32 %v2326_v63, %v6340_v14  ;;  %v4825_v48 = vpop.f32.mrb[73].mxu1  ;;  %v5299_v14 = vld [vmem:[%s6954_s4 + $0x38] sm:$0xff]  }
 0x3d7   : > { %v2329_v8 = vpop.f32.mrb[74].mxu1 }
 0x3d8   : > { %v6452_v22 = vadd.f32 %v2329_v8, %v6346_v33  ;;  %v4826_v40 = vpop.f32.mrb[75].mxu1 }
 0x3d9   : > { %v2843_v40 = vpack.c.bf16 %v2827_v7, %v2826_v9  ;;  %v2828_v7 = vld [vmem:[#allocation3 + $0x40] sm:$0xff] }
 0x3da   : > { %4956 = vmatmul.mubr.msk.bf16.vlgmr.msra.gmra.mrb[180].mxu1 %vm1140_vm1, %v2842_v34 }
 0x3db   : > { %5044 = vmatpush3.bf16.msra.mxu1 %v5298_v41  ;;  %4959 = vmatprep.mubr.msk.bf16.mxu1 %vm5312_vm0, %v6957_v2 }
 0x3dc   : > { %5045 = vmatprep.subr.bf16.mxu1 %v6957_v2 }
 0x3dd   : > { %v2334_v48 = vpop.f32.mrb[76].mxu1 }
 0x3de   : > { %v6462_v24 = vadd.f32 %v2334_v48, %v6355_v37  ;;  %v4829_v33 = vpop.f32.mrb[77].mxu1 }
 0x3df   : > { %v2337_v63 = vpop.f32.mrb[78].mxu1  ;;  %5046 = vmatpush3.bf16.msra.mxu1 %v5299_v14  ;;  %v2829_v33 = vld [vmem:[#allocation3 + $0x48] sm:$0xff] }
 0x3e0   : > { %v6464_v8 = vpop.f32.mrb[228].mxu0  ;;  %v6467_v26 = vadd.f32 %v2337_v63, %v6358_v10  ;;  %v4830_v41 = vpop.f32.mrb[79].mxu1  ;;  %5175 = vmatprep.subr.bf16.mxu1 %v6957_v2 }
 0x3e1   : > { %6963 = vst [vmem:[#allocation8_spill] sm:$0xff] %v6464_v8  ;;  %v5041_v34 = vpop.f32.mrb[229].mxu0  ;;  %v6967_v8 = vmov 0.0  }
 0x3e2   : > { %v6470_v13 = vpop.f32.mrb[230].mxu0  ;;  %4960 = vmatmul.mubr.msk.bf16.gmra.mrb[184].mxu1 %vm1140_vm1, %v2843_v40  ;;  %v2844_v40 = vpack.c.bf16 %v2829_v33, %v2828_v7 }
 0x3e3   : > { %6964 = vst [vmem:[#allocation9_spill] sm:$0xff] %v6470_v13  ;;  %v5042_v37 = vpop.f32.mrb[231].mxu0  ;;  %4963 = vmatprep.mubr.msk.bf16.mxu1 %vm5312_vm0, %v6957_v2 }
 0x3e5   : > { %v2342_v48 = vpop.f32.mrb[80].mxu1 }
 0x3e6   : > { %v6476_v14 = vadd.f32 %v2342_v48, %v6364_v49  ;;  %v4833_v10 = vpop.f32.mrb[81].mxu1  ;;  %v2831_v48 = vld [vmem:[#allocation3 + $0x58] sm:$0xff] }
 0x3e7   : > { %v2345_v63 = vpop.f32.mrb[82].mxu1 }
 0x3e8   : > { %v6478_v41 = vpop.f32.mrb[232].mxu0  ;;  %v6481_v9 = vadd.f32 %v2345_v63, %v6367_v28  ;;  %v4834_v34 = vpop.f32.mrb[83].mxu1  ;;  %v2830_v63 = vld [vmem:[#allocation3 + $0x50] sm:$0xff] }
 0x3e9   : > { %6965 = vst [vmem:[#allocation10_spill] sm:$0xff] %v6478_v41  ;;  %v5101_v13 = vpop.f32.mrb[233].mxu0  ;;  %v2845_v34 = vpack.c.bf16 %v2831_v48, %v2830_v63 }
 0x3ea   : > { %v6483_v37 = vpop.f32.mrb[234].mxu0  ;;  %4964 = vmatmul.mubr.msk.bf16.gmra.mrb[188].mxu1 %vm1140_vm1, %v2844_v40 }
 0x3eb   : > { %6966 = vst [vmem:[#allocation11_spill] sm:$0xff] %v6483_v37  ;;  %v5102_v2 = vpop.f32.mrb[235].mxu0  ;;  %4967 = vmatprep.mubr.msk.bf16.mxu1 %vm5312_vm0, %v6967_v8 }
 0x3ed   : > { %v2350_v49 = vpop.f32.mrb[84].mxu1 }
 0x3ee   : > { %v6489_v10 = vadd.f32 %v2350_v49, %v6372_v35  ;;  %v4837_v41 = vpop.f32.mrb[85].mxu1 }
 0x3ef   : > { %v2353_v56 = vpop.f32.mrb[86].mxu1  ;;  %v2833_v41 = vld [vmem:[#allocation3 + $0x68] sm:$0xff] }
 0x3f0   : > { %v6491_v28 = vpop.f32.mrb[236].mxu0  ;;  %v6494_v13 = vadd.f32 %v2353_v56, %v6377_v61  ;;  %v4838_v33 = vpop.f32.mrb[87].mxu1  ;;  %v2832_v61 = vld [vmem:[#allocation3 + $0x60] sm:$0xff] }
 0x3f1   : > { %6968 = vst [vmem:[#allocation12_spill] sm:$0xff] %v6491_v28  ;;  %v5105_v7 = vpop.f32.mrb[237].mxu0 }
 0x3f2   : > { %v6496_v2 = vpop.f32.mrb[238].mxu0  ;;  %4968 = vmatmul.mubr.msk.bf16.gmra.mrb[192].mxu1 %vm1140_vm1, %v2845_v34  ;;  %v2846_v7 = vpack.c.bf16 %v2833_v41, %v2832_v61 }
 0x3f3   : > { %6969 = vst [vmem:[#allocation13_spill] sm:$0xff] %v6496_v2  ;;  %v5106_v40 = vpop.f32.mrb[239].mxu0  ;;  %4971 = vmatprep.mubr.msk.bf16.mxu1 %vm5312_vm0, %v6967_v8 }
 0x3f5   : > { %v2358_v35 = vpop.f32.mrb[88].mxu1 }
 0x3f6   : > { %v6502_v49 = vadd.f32 %v2358_v35, %v6387_v0  ;;  %v4841_v28 = vpop.f32.mrb[89].mxu1 }
 0x3f7   : > { %v2361_v37 = vpop.f32.mrb[90].mxu1  ;;  %v2835_v28 = vld [vmem:[#allocation3 + $0x78] sm:$0xff] }
 0x3f8   : > { %v6504_v56 = vpop.f32.mrb[240].mxu0  ;;  %v6507_v48 = vadd.f32 %v2361_v37, %v6390_v57  ;;  %v4842_v63 = vpop.f32.mrb[91].mxu1  ;;  %v2834_v37 = vld [vmem:[#allocation3 + $0x70] sm:$0xff] }
 0x3f9   : > { %6970 = vst [vmem:[#allocation14_spill] sm:$0xff] %v6504_v56  ;;  %v5109_v33 = vpop.f32.mrb[241].mxu0 }
 0x3fa   : > { %v6509_v34 = vpop.f32.mrb[242].mxu0  ;;  %4972 = vmatmul.mubr.msk.bf16.gmra.mrb[196].mxu1 %vm1140_vm1, %v2846_v7  ;;  %v2847_v33 = vpack.c.bf16 %v2835_v28, %v2834_v37 }
 0x3fb   : > { %6971 = vst [vmem:[#allocation15_spill] sm:$0xff] %v6509_v34  ;;  %v5110_v40 = vpop.f32.mrb[243].mxu0  ;;  %4975 = vmatprep.mubr.msk.bf16.mxu1 %vm5312_vm0, %v6967_v8 }
 0x3fd   : > { %v2366_v0 = vpop.f32.mrb[92].mxu1 }
 0x3fe   : > { %v6515_v35 = vadd.f32 %v2366_v0, %v6398_v19  ;;  %v4845_v56 = vpop.f32.mrb[93].mxu1 }
 0x3ff   : > { %v2369_v2 = vpop.f32.mrb[94].mxu1 }
 0x400   : > { %v6517_v57 = vpop.f32.mrb[244].mxu0  ;;  %v6520_v41 = vadd.f32 %v2369_v2, %v6401_v62  ;;  %v4846_v61 = vpop.f32.mrb[95].mxu1  ;;  %v2836_v62 = vld [vmem:[#allocation3 + $0x80] sm:$0xff] }
 0x401   : > { %6972 = vst [vmem:[#allocation16_spill] sm:$0xff] %v6517_v57  ;;  %v5113_v63 = vpop.f32.mrb[245].mxu0  ;;  %v2848_v61 = vpack.c.bf16 %v6222_v12, %v2836_v62 }
 0x402   : > { %v6522_v7 = vpop.f32.mrb[246].mxu0  ;;  %4976 = vmatmul.mubr.msk.bf16.gmra.mrb[200].mxu1 %vm1140_vm1, %v2847_v33 }
 0x403   : > { %v5114_v40 = vpop.f32.mrb[247].mxu0  ;;  %4979 = vmatprep.mubr.msk.bf16.mxu1 %vm5312_vm0, %v6967_v8 }
 0x405   : > { %v2374_v19 = vpop.f32.mrb[96].mxu1 }
 0x406   : > { %v6528_v56 = vadd.f32 %v2374_v19, %v6409_v42  ;;  %v4849_v0 = vpop.f32.mrb[97].mxu1 }
 0x407   : > { %v2377_v57 = vpop.f32.mrb[98].mxu1 }
 0x408   : > { %v6530_v34 = vpop.f32.mrb[248].mxu0  ;;  %v6533_v2 = vadd.f32 %v2377_v57, %v6412_v31  ;;  %v4850_v28 = vpop.f32.mrb[99].mxu1 }
 0x409   : > { %v5117_v37 = vpop.f32.mrb[249].mxu0 }
 0x40a   : > { %v6536_v63 = vpop.f32.mrb[250].mxu0  ;;  %4980 = vmatmul.mubr.msk.bf16.gmra.mrb[204].mxu1 %vm1140_vm1, %v2848_v61  ;;  %v6973_v37 = vpack.c.bf16 %v6063_v39, %v6061_v36 }
 0x40b   : > { %v5118_v33 = vpop.f32.mrb[251].mxu0  ;;  %4983 = vmatprep.mubr.msk.bf16.mxu1 %vm5312_vm0, %v6967_v8 }
 0x40c   : > { %v2841_v33 = vld [vmem:[#allocation3 + $0xa8] sm:$0xf] }
 0x40d   : > { %v2382_v42 = vpop.f32.mrb[100].mxu1  ;;  %v2850_v39 = vpack.c.bf16 %v2841_v33, %v6235_v29 }
 0x40e   : > { %v6542_v40 = vadd.f32 %v2382_v42, %v6424_v16  ;;  %v4853_v19 = vpop.f32.mrb[101].mxu1 }
 0x40f   : > { %v2385_v0 = vpop.f32.mrb[102].mxu1 }
 0x410   : > { %v6544_v31 = vpop.f32.mrb[252].mxu0  ;;  %v6547_v57 = vadd.f32 %v2385_v0, %v6427_v21  ;;  %v4854_v12 = vpop.f32.mrb[103].mxu1 }
 0x411   : > { %v5121_v62 = vpop.f32.mrb[253].mxu0 }
 0x412   : > { %v6549_v28 = vpop.f32.mrb[254].mxu0  ;;  %4984 = vmatmul.mubr.msk.bf16.gmra.mrb[208].mxu1 %vm1140_vm1, %v6973_v37 }
 0x413   : > { %v5122_v61 = vpop.f32.mrb[255].mxu0  ;;  %4987 = vmatprep.mubr.msk.bf16.mxu1 %vm5312_vm0, %v6967_v8 }
 0x415   : > { %v2390_v16 = vpop.f32.mrb[104].mxu1 }
 0x416   : > { %v6558_v42 = vadd.f32 %v2390_v16, %v6437_v53  ;;  %v4857_v21 = vpop.f32.mrb[105].mxu1 }
 0x417   : > { %v2393_v19 = vpop.f32.mrb[106].mxu1 }
 0x418   : > { %v6560_v0 = vpop.f32.mrb[0].mxu0  ;;  %v6563_v12 = vadd.f32 %v2393_v19, %v6440_v47  ;;  %v4858_v62 = vpop.f32.mrb[107].mxu1 }
 0x419   : > { %6974 = vst [vmem:[#allocation17_spill] sm:$0xff] %v6560_v0  ;;  %v5125_v36 = vpop.f32.mrb[1].mxu0 }
 0x41a   : > { %v6566_v37 = vpop.f32.mrb[2].mxu0  ;;  %4988 = vmatmul.mubr.msk.bf16.gmra.mrb[212].mxu1 %vm1140_vm1, %v2850_v39 }
 0x41b   : > { %v5126_v61 = vpop.f32.mrb[3].mxu0  ;;  %5047 = vmatprep.mubr.msk.bf16.mxu1 %vm5312_vm0, %v6967_v8 }
 0x41d   : > { %v2520_v53 = vpop.f32.mrb[108].mxu1 }
 0x41e   : > { %v6572_v16 = vadd.f32 %v2520_v53, %v6446_v38  ;;  %v4865_v21 = vpop.f32.mrb[109].mxu1 }
 0x41f   : > { %v2523_v0 = vpop.f32.mrb[110].mxu1 }
 0x420   : > { %v6574_v47 = vpop.f32.mrb[4].mxu0  ;;  %v6577_v19 = vadd.f32 %v2523_v0, %v6452_v22  ;;  %v4866_v29 = vpop.f32.mrb[111].mxu1 }
 0x421   : > { %v5129_v33 = vpop.f32.mrb[5].mxu0 }
 0x422   : > { %v6579_v62 = vpop.f32.mrb[6].mxu0  ;;  %5048 = vmatmul.mubr.msk.bf16.vlgmr.msra.gmra.mrb[216].mxu1 %vm1140_vm1, %v6148_v5 }
 0x423   : > { %v5130_v36 = vpop.f32.mrb[7].mxu0  ;;  %5177 = vmatpush3.bf16.msra.mxu1 %v6153_v11  ;;  %5051 = vmatprep.mubr.msk.bf16.mxu1 %vm5312_vm0, %v6967_v8 }
 0x424   : > { %5176 = vmatprep.subr.bf16.mxu1 %v6967_v8 }
 0x425   : > { %v2528_v38 = vpop.f32.mrb[112].mxu1 }
 0x426   : > { %v6588_v39 = vadd.f32 %v2528_v38, %v6462_v24  ;;  %v4869_v22 = vpop.f32.mrb[113].mxu1 }
 0x427   : > { %v2531_v0 = vpop.f32.mrb[114].mxu1  ;;  %5178 = vmatpush3.bf16.msra.mxu1 %v6166_v15 }
 0x428   : > { %v6590_v61 = vpop.f32.mrb[8].mxu0  ;;  %v6594_v5 = vadd.f32 %v2531_v0, %v6467_v26  ;;  %v4870_v53 = vpop.f32.mrb[115].mxu1 }
 0x429   : > { %v5133_v11 = vpop.f32.mrb[9].mxu0 }
 0x42a   : > { %v6596_v21 = vpop.f32.mrb[10].mxu0  ;;  %5052 = vmatmul.mubr.msk.bf16.gmra.mrb[220].mxu1 %vm1140_vm1, %v6169_v20 }
 0x42b   : > { %v5134_v29 = vpop.f32.mrb[11].mxu0  ;;  %5055 = vmatprep.mubr.msk.bf16.mxu1 %vm5312_vm0, %v6967_v8 }
 0x42d   : > { %v2536_v24 = vpop.f32.mrb[116].mxu1 }
 0x42e   : > { %v6603_v33 = vadd.f32 %v2536_v24, %v6476_v14  ;;  %v4873_v36 = vpop.f32.mrb[117].mxu1 }
 0x42f   : > { %v2539_v15 = vpop.f32.mrb[118].mxu1 }
 0x430   : > { %v6605_v38 = vpop.f32.mrb[12].mxu0  ;;  %v6608_v26 = vadd.f32 %v2539_v15, %v6481_v9  ;;  %v4874_v22 = vpop.f32.mrb[119].mxu1 }
 0x431   : > { %v5141_v0 = vpop.f32.mrb[13].mxu0 }
 0x432   : > { %v6610_v53 = vpop.f32.mrb[14].mxu0  ;;  %5056 = vmatmul.mubr.msk.bf16.gmra.mrb[224].mxu1 %vm1140_vm1, %v6185_v44 }
 0x433   : > { %v5142_v20 = vpop.f32.mrb[15].mxu0  ;;  %5059 = vmatprep.mubr.msk.bf16.mxu1 %vm5312_vm0, %v6967_v8 }
 0x435   : > { %v2544_v14 = vpop.f32.mrb[120].mxu1 }
 0x436   : > { %v6617_v11 = vadd.f32 %v2544_v14, %v6489_v10  ;;  %v4877_v29 = vpop.f32.mrb[121].mxu1 }
 0x437   : > { %v2547_v24 = vpop.f32.mrb[122].mxu1 }
 0x438   : > { %v6620_v9 = vadd.f32 %v2547_v24, %v6494_v13  ;;  %v4878_v36 = vpop.f32.mrb[123].mxu1 }
 0x43a   : > { %5060 = vmatmul.mubr.msk.bf16.gmra.mrb[228].mxu1 %vm1140_vm1, %v6196_v55 }
 0x43b   : > { %5063 = vmatprep.mubr.msk.bf16.mxu1 %vm5312_vm0, %v6967_v8 }
 0x43d   : > { %v2552_v44 = vpop.f32.mrb[124].mxu1 }
 0x43e   : > { %v6627_v15 = vadd.f32 %v2552_v44, %v6502_v49  ;;  %v4881_v22 = vpop.f32.mrb[125].mxu1 }
 0x43f   : > { %v2555_v0 = vpop.f32.mrb[126].mxu1 }
 0x440   : > { %v6630_v10 = vadd.f32 %v2555_v0, %v6507_v48  ;;  %v4882_v20 = vpop.f32.mrb[127].mxu1  ;;  %v3246_v48 = vld [vmem:[#allocation3 + $0x96] sm:$0xff] }
 0x441   : > { %v3247_v20 = vld [vmem:[#allocation3 + $0x9e] sm:$0xff] }
 0x442   : > { %5064 = vmatmul.mubr.msk.bf16.gmra.mrb[232].mxu1 %vm1140_vm1, %v6205_v58 }
 0x443   : > { %5067 = vmatprep.mubr.msk.bf16.mxu1 %vm5312_vm0, %v6967_v8 }
 0x445   : > { %v2560_v55 = vpop.f32.mrb[128].mxu1 }
 0x446   : > { %v6637_v13 = vadd.f32 %v2560_v55, %v6515_v35  ;;  %v4885_v14 = vpop.f32.mrb[129].mxu1  ;;  %v3248_v55 = vld [vmem:[#allocation3 + $0xa6] sm:$0xff] }
 0x447   : > { %v2563_v29 = vpop.f32.mrb[130].mxu1 }
 0x448   : > { %v6640_v49 = vadd.f32 %v2563_v29, %v6520_v41  ;;  %v4886_v24 = vpop.f32.mrb[131].mxu1  ;;  %v3257_v41 = vpack.c.bf16 %v3246_v48, %v6233_v27  ;;  %v3249_v48 = vld [vmem:[#allocation3 + $0xae] sm:$0xff] }
 0x44a   : > { %5068 = vmatmul.mubr.msk.bf16.gmra.mrb[236].mxu1 %vm1140_vm1, %v6216_v1 }
 0x44b   : > { %5071 = vmatprep.mubr.msk.bf16.mxu1 %vm5312_vm0, %v6967_v8 }
 0x44d   : > { %v2568_v58 = vpop.f32.mrb[132].mxu1 }
 0x44e   : > { %v6647_v36 = vadd.f32 %v2568_v58, %v6528_v56  ;;  %v4889_v44 = vpop.f32.mrb[133].mxu1  ;;  %v3258_v58 = vpack.c.bf16 %v3248_v55, %v3247_v20 }
 0x44f   : > { %v2571_v35 = vpop.f32.mrb[134].mxu1  ;;  %v3250_v44 = vld [vmem:[#allocation3 + $0xb6] sm:$0xf] }
 0x450   : > { %v6650_v22 = vadd.f32 %v2571_v35, %v6533_v2  ;;  %v4890_v0 = vpop.f32.mrb[135].mxu1 }
 0x452   : > { %5072 = vmatmul.mubr.msk.bf16.gmra.mrb[240].mxu1 %vm1140_vm1, %v3257_v41 }
 0x453   : > { %5075 = vmatprep.mubr.msk.bf16.mxu1 %vm5312_vm0, %v6967_v8 }
 0x455   : > { %v2576_v1 = vpop.f32.mrb[136].mxu1 }
 0x456   : > { %v6657_v14 = vadd.f32 %v2576_v1, %v6542_v40  ;;  %v4893_v56 = vpop.f32.mrb[137].mxu1  ;;  %v3259_v1 = vpack.c.bf16 %v3250_v44, %v3249_v48 }
 0x457   : > { %v2579_v29 = vpop.f32.mrb[138].mxu1 }
 0x458   : > { %v6660_v24 = vadd.f32 %v2579_v29, %v6547_v57  ;;  %v4894_v2 = vpop.f32.mrb[139].mxu1 }
 0x45a   : > { %5076 = vmatmul.mubr.msk.bf16.gmra.mrb[244].mxu1 %vm1140_vm1, %v3258_v58 }
 0x45b   : > { %5079 = vmatprep.mubr.msk.bf16.mxu1 %vm5312_vm0, %v6967_v8 }
 0x45d   : > { %v2584_v27 = vpop.f32.mrb[140].mxu1 }
 0x45e   : > { %v6666_v35 = vadd.f32 %v2584_v27, %v6558_v42  ;;  %v4897_v40 = vpop.f32.mrb[141].mxu1 }
 0x45f   : > { %v2587_v0 = vpop.f32.mrb[142].mxu1 }
 0x460   : > { %v6669_v41 = vadd.f32 %v2587_v0, %v6563_v12  ;;  %v4898_v57 = vpop.f32.mrb[143].mxu1 }
 0x462   : > { %5080 = vmatmul.mubr.msk.bf16.gmra.mrb[248].mxu1 %vm1140_vm1, %v3259_v1 }
 0x463   : > { %5143 = vmatprep.mubr.msk.bf16.mxu1 %vm5312_vm0, %v6967_v8 }
 0x465   : > { %v2735_v20 = vpop.f32.mrb[144].mxu1 }
 0x466   : > { %v6675_v55 = vadd.f32 %v2735_v20, %v6572_v16  ;;  %v4917_v56 = vpop.f32.mrb[145].mxu1 }
 0x467   : > { %v2738_v29 = vpop.f32.mrb[146].mxu1 }
 0x468   : > { %v6678_v42 = vadd.f32 %v2738_v29, %v6577_v19  ;;  %v4918_v2 = vpop.f32.mrb[147].mxu1 }
 0x46a   : > { %5144 = vmatmul.mubr.msk.bf16.vlgmr.msra.gmra.mrb[252].mxu1 %vm1140_vm1, %v6379_v6 }
 0x46b   : > { %5147 = vmatprep.mubr.msk.bf16.mxu1 %vm5312_vm0, %v6967_v8 }
 0x46d   : > { %v2743_v12 = vpop.f32.mrb[148].mxu1 }
 0x46e   : > { %v6685_v58 = vadd.f32 %v2743_v12, %v6588_v39  ;;  %v4921_v27 = vpop.f32.mrb[149].mxu1 }
 0x46f   : > { %v2746_v48 = vpop.f32.mrb[150].mxu1 }
 0x470   : > { %v6688_v16 = vadd.f32 %v2746_v48, %v6594_v5  ;;  %v4922_v44 = vpop.f32.mrb[151].mxu1 }
 0x472   : > { %5148 = vmatmul.mubr.msk.bf16.gmra.mrb[0].mxu1 %vm1140_vm1, %v6392_v32 }
 0x473   : > { %5151 = vmatprep.mubr.msk.bf16.mxu1 %vm5312_vm0, %v6967_v8 }
 0x475   : > { %v2751_v6 = vpop.f32.mrb[152].mxu1 }
 0x476   : > { %v6695_v19 = vadd.f32 %v2751_v6, %v6603_v33  ;;  %v4925_v40 = vpop.f32.mrb[153].mxu1 }
 0x477   : > { %v2754_v0 = vpop.f32.mrb[154].mxu1  ;;  %v3656_v40 = vld [vmem:[#allocation3 + $0xac] sm:$0xff] }
 0x478   : > { %v6698_v39 = vadd.f32 %v2754_v0, %v6608_v26  ;;  %v4926_v57 = vpop.f32.mrb[155].mxu1  ;;  %v3657_v0 = vld [vmem:[#allocation3 + $0xb4] sm:$0xff] }
 0x47a   : > { %5152 = vmatmul.mubr.msk.bf16.gmra.mrb[4].mxu1 %vm1140_vm1, %v6403_v52 }
 0x47b   : > { %5155 = vmatprep.mubr.msk.bf16.mxu1 %vm5312_vm0, %v6967_v8 }
 0x47d   : > { %v2759_v32 = vpop.f32.mrb[156].mxu1 }
 0x47e   : > { %v6705_v5 = vadd.f32 %v2759_v32, %v6617_v11  ;;  %v4929_v1 = vpop.f32.mrb[157].mxu1 }
 0x47f   : > { %v2762_v20 = vpop.f32.mrb[158].mxu1 }
 0x480   : > { %v6708_v33 = vadd.f32 %v2762_v20, %v6620_v9  ;;  %v4930_v56 = vpop.f32.mrb[159].mxu1  ;;  %v3655_v9 = vld [vmem:[#allocation3 + $0xa4] sm:$0xff]  ;;  %v3667_v20 = vpack.c.bf16 %v3657_v0, %v3656_v40 }
 0x481   : > { %v3658_v56 = vld [vmem:[#allocation3 + $0xbc] sm:$0xff] }
 0x482   : > { %5156 = vmatmul.mubr.msk.bf16.gmra.mrb[8].mxu1 %vm1140_vm1, %v6414_v51 }
 0x483   : > { %5159 = vmatprep.mubr.msk.bf16.mxu1 %vm5312_vm0, %v6967_v8 }
 0x485   : > { %v2767_v52 = vpop.f32.mrb[160].mxu1 }
 0x486   : > { %v6715_v26 = vadd.f32 %v2767_v52, %v6627_v15  ;;  %v4933_v29 = vpop.f32.mrb[161].mxu1  ;;  %v3659_v52 = vld [vmem:[#allocation3 + $0xc4] sm:$0xf] }
 0x487   : > { %v2770_v2 = vpop.f32.mrb[162].mxu1 }
 0x488   : > { %v6718_v11 = vadd.f32 %v2770_v2, %v6630_v10  ;;  %v4934_v12 = vpop.f32.mrb[163].mxu1  ;;  %v3666_v10 = vpack.c.bf16 %v3655_v9, %v6434_v23 }
 0x48a   : > { %5160 = vmatmul.mubr.msk.bf16.gmra.mrb[12].mxu1 %vm1140_vm1, %v6429_v3 }
 0x48b   : > { %5163 = vmatprep.mubr.msk.bf16.mxu1 %vm5312_vm0, %v6967_v8 }
 0x48d   : > { %v2775_v51 = vpop.f32.mrb[164].mxu1 }
 0x48e   : > { %v6725_v27 = vadd.f32 %v2775_v51, %v6637_v13  ;;  %v4937_v48 = vpop.f32.mrb[165].mxu1  ;;  %v3668_v51 = vpack.c.bf16 %v3659_v52, %v3658_v56 }
 0x48f   : > { %v2778_v15 = vpop.f32.mrb[166].mxu1 }
 0x490   : > { %v6728_v44 = vadd.f32 %v2778_v15, %v6640_v49  ;;  %v4938_v6 = vpop.f32.mrb[167].mxu1 }
 0x492   : > { %5164 = vmatmul.mubr.msk.bf16.gmra.mrb[16].mxu1 %vm1140_vm1, %v3666_v10 }
 0x493   : > { %5167 = vmatprep.mubr.msk.bf16.mxu1 %vm5312_vm0, %v6967_v8 }
 0x495   : > { %v2783_v3 = vpop.f32.mrb[168].mxu1 }
 0x496   : > { %v6735_v57 = vadd.f32 %v2783_v3, %v6647_v36  ;;  %v4941_v13 = vpop.f32.mrb[169].mxu1 }
 0x497   : > { %v2786_v32 = vpop.f32.mrb[170].mxu1 }
 0x498   : > { %v6738_v1 = vadd.f32 %v2786_v32, %v6650_v22  ;;  %v4942_v49 = vpop.f32.mrb[171].mxu1 }
 0x49a   : > { %5168 = vmatmul.mubr.msk.bf16.gmra.mrb[20].mxu1 %vm1140_vm1, %v3667_v20 }
 0x49b   : > { %5171 = vmatprep.mubr.msk.bf16.mxu1 %vm5312_vm0, %v6967_v8 }
 0x49d   : > { %v2791_v23 = vpop.f32.mrb[172].mxu1 }
 0x49e   : > { %v6744_v29 = vadd.f32 %v2791_v23, %v6657_v14  ;;  %v4945_v36 = vpop.f32.mrb[173].mxu1 }
 0x49f   : > { %v2794_v2 = vpop.f32.mrb[174].mxu1 }
 0x4a0   : > { %v6747_v12 = vadd.f32 %v2794_v2, %v6660_v24  ;;  %v4946_v22 = vpop.f32.mrb[175].mxu1 }
 0x4a2   : > { %5172 = vmatmul.mubr.msk.bf16.gmra.mrb[24].mxu1 %vm1140_vm1, %v3668_v51 }
 0x4a5   : > { %v2799_v9 = vpop.f32.mrb[176].mxu1 }
 0x4a6   : > { %v6751_v48 = vadd.f32 %v2799_v9, %v6666_v35  ;;  %v4949_v8 = vpop.f32.mrb[177].mxu1 }
 0x4a7   : > { %v2802_v15 = vpop.f32.mrb[178].mxu1 }
 0x4a8   : > { %v6754_v6 = vadd.f32 %v2802_v15, %v6669_v41  ;;  %v4950_v14 = vpop.f32.mrb[179].mxu1 }
 0x4ad   : > { %v2929_v10 = vpop.f32.mrb[180].mxu1 }
 0x4ae   : > { %v3000_v3 = vadd.f32 %v2929_v10, %v6675_v55  ;;  %v4957_v40 = vpop.f32.mrb[181].mxu1 }
 0x4af   : > { %v2932_v24 = vpop.f32.mrb[182].mxu1 }
 0x4b0   : > { %v3001_v0 = vadd.f32 %v2932_v24, %v6678_v42  ;;  %v4958_v13 = vpop.f32.mrb[183].mxu1  ;;  %v6759_v32 = vadd.f32 %v6080_v46, %v3000_v3 }
 0x4b2   : > { %v6762_v35 = vadd.f32 %v6084_v50, %v3001_v0 }
 0x4b5   : > { %v2937_v49 = vpop.f32.mrb[184].mxu1 }
 0x4b6   : > { %v3002_v20 = vadd.f32 %v2937_v49, %v6685_v58  ;;  %v4961_v41 = vpop.f32.mrb[185].mxu1 }
 0x4b7   : > { %v2940_v23 = vpop.f32.mrb[186].mxu1 }
 0x4b8   : > { %v3003_v56 = vadd.f32 %v2940_v23, %v6688_v16  ;;  %v4962_v52 = vpop.f32.mrb[187].mxu1  ;;  %v6767_v55 = vadd.f32 %v6121_v17, %v3002_v20 }
 0x4ba   : > { %v6770_v42 = vadd.f32 %v6128_v25, %v3003_v56 }
 0x4bd   : > { %v2945_v36 = vpop.f32.mrb[188].mxu1 }
 0x4be   : > { %v3004_v46 = vadd.f32 %v2945_v36, %v6695_v19  ;;  %v4965_v2 = vpop.f32.mrb[189].mxu1 }
 0x4bf   : > { %v2948_v50 = vpop.f32.mrb[190].mxu1 }
 0x4c0   : > { %v3005_v22 = vadd.f32 %v2948_v50, %v6698_v39  ;;  %v4966_v51 = vpop.f32.mrb[191].mxu1  ;;  %v6775_v58 = vadd.f32 %v6183_v30, %v3004_v46  ;;  %v6976_v46 = vld [vmem:[#allocation5_spill] sm:$0xff] }
 0x4c2   : > { %v6778_v16 = vadd.f32 %v6187_v45, %v3005_v22 }
 0x4c5   : > { %v2953_v9 = vpop.f32.mrb[192].mxu1 }
 0x4c6   : > { %v3006_v17 = vadd.f32 %v2953_v9, %v6705_v5  ;;  %v4969_v8 = vpop.f32.mrb[193].mxu1 }
 0x4c7   : > { %v2956_v25 = vpop.f32.mrb[194].mxu1 }
 0x4c8   : > { %v3007_v15 = vadd.f32 %v2956_v25, %v6708_v33  ;;  %v4970_v14 = vpop.f32.mrb[195].mxu1  ;;  %v6783_v19 = vadd.f32 %v6220_v4, %v3006_v17  ;;  %v6978_v17 = vld [vmem:[#allocation7_spill] sm:$0xff] }
 0x4ca   : > { %v6786_v39 = vadd.f32 %v6227_v18, %v3007_v15 }
 0x4cd   : > { %v2961_v10 = vpop.f32.mrb[196].mxu1 }
 0x4ce   : > { %v3008_v30 = vadd.f32 %v2961_v10, %v6715_v26  ;;  %v4973_v3 = vpop.f32.mrb[197].mxu1 }
 0x4cf   : > { %v2964_v45 = vpop.f32.mrb[198].mxu1 }
 0x4d0   : > { %v3009_v40 = vadd.f32 %v2964_v45, %v6718_v11  ;;  %v4974_v24 = vpop.f32.mrb[199].mxu1  ;;  %v6791_v5 = vadd.f32 %v6273_v54, %v3008_v30  ;;  %v6979_v30 = vld [vmem:[#allocation8_spill] sm:$0xff] }
 0x4d2   : > { %v6794_v33 = vadd.f32 %v6278_v59, %v3009_v40 }
 0x4d5   : > { %v2969_v0 = vpop.f32.mrb[200].mxu1 }
 0x4d6   : > { %v3010_v4 = vadd.f32 %v2969_v0, %v6725_v27  ;;  %v4977_v13 = vpop.f32.mrb[201].mxu1  ;;  %v6975_v27 = vld [vmem:[#allocation4_spill] sm:$0xff] }
 0x4d7   : > { %v2972_v18 = vpop.f32.mrb[202].mxu1  ;;  %v6981_v13 = vld [vmem:[#allocation10_spill] sm:$0xff] }
 0x4d8   : > { %v3011_v49 = vadd.f32 %v2972_v18, %v6728_v44  ;;  %v4978_v20 = vpop.f32.mrb[203].mxu1  ;;  %v6799_v26 = vadd.f32 %v6329_v60, %v3010_v4 }
 0x4da   : > { %v6802_v11 = vadd.f32 %v6333_v43, %v3011_v49 }
 0x4dd   : > { %v2977_v41 = vpop.f32.mrb[204].mxu1 }
 0x4de   : > { %v3012_v54 = vadd.f32 %v2977_v41, %v6735_v57  ;;  %v4981_v23 = vpop.f32.mrb[205].mxu1  ;;  %v6977_v57 = vld [vmem:[#allocation6_spill] sm:$0xff]  ;;  %v6982_v41 = vld [vmem:[#allocation11_spill] sm:$0xff] }
 0x4df   : > { %v2980_v59 = vpop.f32.mrb[206].mxu1 }
 0x4e0   : > { %v3013_v56 = vadd.f32 %v2980_v59, %v6738_v1  ;;  %v4982_v52 = vpop.f32.mrb[207].mxu1  ;;  %v6807_v36 = vadd.f32 %v6975_v27, %v3012_v54 }
 0x4e2   : > { %v6810_v44 = vadd.f32 %v6976_v46, %v3013_v56 }
 0x4e5   : > { %v2985_v2 = vpop.f32.mrb[208].mxu1 }
 0x4e6   : > { %v3014_v60 = vadd.f32 %v2985_v2, %v6744_v29  ;;  %v4985_v50 = vpop.f32.mrb[209].mxu1 }
 0x4e7   : > { %v2988_v43 = vpop.f32.mrb[210].mxu1 }
 0x4e8   : > { %v3015_v22 = vadd.f32 %v2988_v43, %v6747_v12  ;;  %v4986_v51 = vpop.f32.mrb[211].mxu1  ;;  %v6815_v9 = vadd.f32 %v6977_v57, %v3014_v60  ;;  %v6980_v12 = vld [vmem:[#allocation9_spill] sm:$0xff] }
 0x4ea   : > { %v6818_v1 = vadd.f32 %v6978_v17, %v3015_v22  ;;  %v6984_v22 = vld [vmem:[#allocation13_spill] sm:$0xff] }
 0x4ed   : > { %v2993_v8 = vpop.f32.mrb[212].mxu1 }
 0x4ee   : > { %v3016_v25 = vadd.f32 %v2993_v8, %v6751_v48  ;;  %v4989_v15 = vpop.f32.mrb[213].mxu1 }
 0x4ef   : > { %v2996_v14 = vpop.f32.mrb[214].mxu1  ;;  %v6985_v15 = vld [vmem:[#allocation14_spill] sm:$0xff] }
 0x4f0   : > { %v3017_v10 = vadd.f32 %v2996_v14, %v6754_v6  ;;  %v4990_v29 = vpop.f32.mrb[215].mxu1  ;;  %v6823_v3 = vadd.f32 %v6979_v30, %v3016_v25  ;;  %v6834_v6 = vld [vmem:[%s6955_s5] ss:$0 sm:$0xff] }
 0x4f2   : > { %v6826_v45 = vadd.f32 %v6980_v12, %v3017_v10  ;;  %v6986_v10 = vld [vmem:[#allocation15_spill] sm:$0xff] }
 0x4f5   : > { %v3338_v40 = vpop.f32.mrb[216].mxu1 }
 0x4f6   : > { %v3409_v24 = vadd.f32 %v3338_v40, %v6759_v32  ;;  %v5049_v0 = vpop.f32.mrb[217].mxu1 }
 0x4f7   : > { %v3341_v4 = vpop.f32.mrb[218].mxu1 }
 0x4f8   : > { %v3624_v18 = vadd.f32 %v6981_v13, %v3409_v24  ;;  %v3410_v48 = vadd.f32 %v3341_v4, %v6762_v35  ;;  %v5050_v49 = vpop.f32.mrb[219].mxu1  ;;  %v6987_v13 = vld [vmem:[#allocation16_spill] sm:$0xff] }
 0x4fa   : > { %v3818_v20 = vadd.f32 %v6605_v38, %v3624_v18  ;;  %v3625_v54 = vadd.f32 %v6982_v41, %v3410_v48  ;;  %v6983_v38 = vld [vmem:[#allocation12_spill] sm:$0xff] }
 0x4fc   : > { %v3843_v23 = vadd.f32 %v6834_v6, %v3818_v20  ;;  %v3819_v32 = vadd.f32 %v6610_v53, %v3625_v54 }
 0x4fd   : > { %v3346_v59 = vpop.f32.mrb[220].mxu1 }
 0x4fe   : > { %v3844_v56 = vadd.f32 %v6834_v6, %v3819_v32  ;;  %v3411_v35 = vadd.f32 %v3346_v59, %v6767_v55  ;;  %v5053_v52 = vpop.f32.mrb[221].mxu1  ;;  %v3861_v46 = vmax.f32 %v3843_v23, 0.0 }
 0x4ff   : > { %v3349_v27 = vpop.f32.mrb[222].mxu1 }
 0x500   : > { %v3862_v2 = vmax.f32 %v3844_v56, 0.0  ;;  %v3412_v60 = vadd.f32 %v3349_v27, %v6770_v42  ;;  %v5054_v50 = vpop.f32.mrb[223].mxu1  ;;  %v3626_v43 = vadd.f32 %v6983_v38, %v3411_v35 }
 0x502   : > { %v4262_v53 = vpack.c.bf16 %v3862_v2, %v3861_v46  ;;  %v6851_v51 = vadd.f32 %v6984_v22, %v3412_v60 }
 0x504   : > { %4263 = vst [vmem:[%s6848_s7] sm:$0xff] %v4262_v53  }
 0x505   : > { %v3354_v55 = vpop.f32.mrb[224].mxu1 }
 0x506   : > { %v3413_v57 = vadd.f32 %v3354_v55, %v6775_v58  ;;  %v5057_v17 = vpop.f32.mrb[225].mxu1 }
 0x507   : > { %v3357_v8 = vpop.f32.mrb[226].mxu1 }
 0x508   : > { %v3414_v42 = vadd.f32 %v3357_v8, %v6778_v16  ;;  %v5058_v25 = vpop.f32.mrb[227].mxu1  ;;  %v3628_v14 = vadd.f32 %v6985_v15, %v3413_v57 }
 0x50a   : > { %v6858_v29 = vadd.f32 %v6986_v10, %v3414_v42 }
 0x50d   : > { %v3362_v30 = vpop.f32.mrb[228].mxu1 }
 0x50e   : > { %v3415_v12 = vadd.f32 %v3362_v30, %v6783_v19  ;;  %v5061_v40 = vpop.f32.mrb[229].mxu1 }
 0x50f   : > { %v3365_v24 = vpop.f32.mrb[230].mxu1 }
 0x510   : > { %v3416_v0 = vadd.f32 %v3365_v24, %v6786_v39  ;;  %v5062_v4 = vpop.f32.mrb[231].mxu1  ;;  %v6863_v58 = vadd.f32 %v6987_v13, %v3415_v12 }
 0x512   : > { %v6866_v18 = vadd.f32 %v6522_v7, %v3416_v0 }
 0x515   : > { %v3370_v16 = vpop.f32.mrb[232].mxu1 }
 0x516   : > { %v3417_v48 = vadd.f32 %v3370_v16, %v6791_v5  ;;  %v5065_v49 = vpop.f32.mrb[233].mxu1 }
 0x517   : > { %v3373_v20 = vpop.f32.mrb[234].mxu1 }
 0x518   : > { %v3418_v41 = vadd.f32 %v3373_v20, %v6794_v33  ;;  %v5066_v54 = vpop.f32.mrb[235].mxu1  ;;  %v6871_v19 = vadd.f32 %v6530_v34, %v3417_v48 }
 0x51a   : > { %v6874_v39 = vadd.f32 %v6536_v63, %v3418_v41 }
 0x51d   : > { %v3378_v23 = vpop.f32.mrb[236].mxu1 }
 0x51e   : > { %v3419_v32 = vadd.f32 %v3378_v23, %v6799_v26  ;;  %v5069_v59 = vpop.f32.mrb[237].mxu1  ;;  %v6988_v26 = vld [vmem:[#allocation17_spill] sm:$0xff] }
 0x51f   : > { %v3381_v7 = vpop.f32.mrb[238].mxu1 }
 0x520   : > { %v3420_v56 = vadd.f32 %v3381_v7, %v6802_v11  ;;  %v5070_v35 = vpop.f32.mrb[239].mxu1  ;;  %v6879_v5 = vadd.f32 %v6544_v31, %v3419_v32 }
 0x522   : > { %v6882_v33 = vadd.f32 %v6549_v28, %v3420_v56 }
 0x525   : > { %v3386_v52 = vpop.f32.mrb[240].mxu1 }
 0x526   : > { %v3421_v34 = vadd.f32 %v3386_v52, %v6807_v36  ;;  %v5073_v27 = vpop.f32.mrb[241].mxu1 }
 0x527   : > { %v3389_v63 = vpop.f32.mrb[242].mxu1 }
 0x528   : > { %v3422_v46 = vadd.f32 %v3389_v63, %v6810_v44  ;;  %v5074_v2 = vpop.f32.mrb[243].mxu1  ;;  %v6887_v60 = vadd.f32 %v6988_v26, %v3421_v34 }
 0x52a   : > { %v6890_v11 = vadd.f32 %v6566_v37, %v3422_v46 }
 0x52d   : > { %v3394_v50 = vpop.f32.mrb[244].mxu1 }
 0x52e   : > { %v3423_v31 = vadd.f32 %v3394_v50, %v6815_v9  ;;  %v5077_v38 = vpop.f32.mrb[245].mxu1 }
 0x52f   : > { %v3397_v28 = vpop.f32.mrb[246].mxu1 }
 0x530   : > { %v3424_v53 = vadd.f32 %v3397_v28, %v6818_v1  ;;  %v5078_v22 = vpop.f32.mrb[247].mxu1  ;;  %v6895_v36 = vadd.f32 %v6574_v47, %v3423_v31 }
 0x532   : > { %v6898_v44 = vadd.f32 %v6579_v62, %v3424_v53 }
 0x535   : > { %v3402_v55 = vpop.f32.mrb[248].mxu1 }
 0x536   : > { %v3425_v57 = vadd.f32 %v3402_v55, %v6823_v3  ;;  %v5081_v17 = vpop.f32.mrb[249].mxu1 }
 0x537   : > { %v3405_v37 = vpop.f32.mrb[250].mxu1 }
 0x538   : > { %v3426_v8 = vadd.f32 %v3405_v37, %v6826_v45  ;;  %v5082_v42 = vpop.f32.mrb[251].mxu1  ;;  %v6903_v9 = vadd.f32 %v6590_v61, %v3425_v57 }
 0x53a   : > { %v6906_v1 = vadd.f32 %v6596_v21, %v3426_v8 }
 0x53d   : > { %v3755_v47 = vpop.f32.mrb[252].mxu1 }
 0x53e   : > { %v3820_v25 = vadd.f32 %v3755_v47, %v3626_v43  ;;  %v5145_v15 = vpop.f32.mrb[253].mxu1 }
 0x53f   : > { %v3758_v62 = vpop.f32.mrb[254].mxu1 }
 0x540   : > { %v3845_v10 = vadd.f32 %v6834_v6, %v3820_v25  ;;  %v3821_v3 = vadd.f32 %v3758_v62, %v6851_v51  ;;  %v5146_v30 = vpop.f32.mrb[255].mxu1 }
 0x542   : > { %v3846_v12 = vadd.f32 %v6834_v6, %v3821_v3  ;;  %v3863_v45 = vmax.f32 %v3845_v10, 0.0 }
 0x544   : > { %v3864_v40 = vmax.f32 %v3846_v12, 0.0 }
 0x545   : > { %v3763_v24 = vpop.f32.mrb[0].mxu1 }
 0x546   : > { %v4267_v61 = vpack.c.bf16 %v3864_v40, %v3863_v45  ;;  %v3822_v0 = vadd.f32 %v3763_v24, %v3628_v14  ;;  %v5149_v21 = vpop.f32.mrb[1].mxu1 }
 0x547   : > { %v3766_v4 = vpop.f32.mrb[2].mxu1 }
 0x548   : > { %4299 = vst [vmem:[%s6848_s7 + $0x8] sm:$0xff] %v4267_v61   ;;  %v3847_v43 = vadd.f32 %v6834_v6, %v3822_v0  ;;  %v3823_v13 = vadd.f32 %v3766_v4, %v6858_v29  ;;  %v5150_v16 = vpop.f32.mrb[3].mxu1 }
 0x54a   : > { %v3848_v48 = vadd.f32 %v6834_v6, %v3823_v13  ;;  %v3865_v51 = vmax.f32 %v3847_v43, 0.0 }
 0x54c   : > { %v3866_v49 = vmax.f32 %v3848_v48, 0.0 }
 0x54d   : > { %v3771_v20 = vpop.f32.mrb[4].mxu1 }
 0x54e   : > { %v4272_v41 = vpack.c.bf16 %v3866_v49, %v3865_v51  ;;  %v3824_v54 = vadd.f32 %v3771_v20, %v6863_v58  ;;  %v5153_v23 = vpop.f32.mrb[5].mxu1 }
 0x54f   : > { %v3774_v32 = vpop.f32.mrb[6].mxu1 }
 0x550   : > { %4300 = vst [vmem:[%s6848_s7 + $0x10] sm:$0xff] %v4272_v41   ;;  %v3849_v14 = vadd.f32 %v6834_v6, %v3824_v54  ;;  %v3825_v59 = vadd.f32 %v3774_v32, %v6866_v18  ;;  %v5154_v7 = vpop.f32.mrb[7].mxu1 }
 0x552   : > { %v3850_v29 = vadd.f32 %v6834_v6, %v3825_v59  ;;  %v3867_v56 = vmax.f32 %v3849_v14, 0.0 }
 0x554   : > { %v3868_v35 = vmax.f32 %v3850_v29, 0.0 }
 0x555   : > { %v3779_v52 = vpop.f32.mrb[8].mxu1 }
 0x556   : > { %v4277_v34 = vpack.c.bf16 %v3868_v35, %v3867_v56  ;;  %v3826_v27 = vadd.f32 %v3779_v52, %v6871_v19  ;;  %v5157_v63 = vpop.f32.mrb[9].mxu1 }
 0x557   : > { %v3782_v46 = vpop.f32.mrb[10].mxu1 }
 0x558   : > { %4301 = vst [vmem:[%s6848_s7 + $0x18] sm:$0xff] %v4277_v34   ;;  %v3851_v58 = vadd.f32 %v6834_v6, %v3826_v27  ;;  %v3827_v2 = vadd.f32 %v3782_v46, %v6874_v39  ;;  %v5158_v26 = vpop.f32.mrb[11].mxu1 }
 0x55a   : > { %v3852_v18 = vadd.f32 %v6834_v6, %v3827_v2  ;;  %v3869_v50 = vmax.f32 %v3851_v58, 0.0 }
 0x55c   : > { %v3870_v31 = vmax.f32 %v3852_v18, 0.0 }
 0x55d   : > { %v3787_v38 = vpop.f32.mrb[12].mxu1 }
 0x55e   : > { %v4282_v28 = vpack.c.bf16 %v3870_v31, %v3869_v50  ;;  %v3828_v53 = vadd.f32 %v3787_v38, %v6879_v5  ;;  %v5161_v22 = vpop.f32.mrb[13].mxu1 }
 0x55f   : > { %v3790_v55 = vpop.f32.mrb[14].mxu1 }
 0x560   : > { %4302 = vst [vmem:[%s6848_s7 + $0x20] sm:$0xff] %v4282_v28   ;;  %v3853_v19 = vadd.f32 %v6834_v6, %v3828_v53  ;;  %v3829_v57 = vadd.f32 %v3790_v55, %v6882_v33  ;;  %v5162_v17 = vpop.f32.mrb[15].mxu1 }
 0x562   : > { %v3854_v39 = vadd.f32 %v6834_v6, %v3829_v57  ;;  %v3871_v37 = vmax.f32 %v3853_v19, 0.0 }
 0x564   : > { %v3872_v8 = vmax.f32 %v3854_v39, 0.0 }
 0x565   : > { %v3795_v42 = vpop.f32.mrb[16].mxu1 }
 0x566   : > { %v4287_v47 = vpack.c.bf16 %v3872_v8, %v3871_v37  ;;  %v3830_v25 = vadd.f32 %v3795_v42, %v6887_v60  ;;  %v5165_v15 = vpop.f32.mrb[17].mxu1 }
 0x567   : > { %v3798_v62 = vpop.f32.mrb[18].mxu1 }
 0x568   : > { %4303 = vst [vmem:[%s6848_s7 + $0x28] sm:$0xff] %v4287_v47   ;;  %v3855_v5 = vadd.f32 %v6834_v6, %v3830_v25  ;;  %v3831_v10 = vadd.f32 %v3798_v62, %v6890_v11  ;;  %v5166_v3 = vpop.f32.mrb[19].mxu1 }
 0x56a   : > { %v3856_v33 = vadd.f32 %v6834_v6, %v3831_v10  ;;  %v3873_v30 = vmax.f32 %v3855_v5, 0.0 }
 0x56c   : > { %v3874_v12 = vmax.f32 %v3856_v33, 0.0 }
 0x56d   : > { %v3803_v45 = vpop.f32.mrb[20].mxu1 }
 0x56e   : > { %v4292_v40 = vpack.c.bf16 %v3874_v12, %v3873_v30  ;;  %v3832_v24 = vadd.f32 %v3803_v45, %v6895_v36  ;;  %v5169_v61 = vpop.f32.mrb[21].mxu1 }
 0x56f   : > { %v3806_v0 = vpop.f32.mrb[22].mxu1 }
 0x570   : > { %4304 = vst [vmem:[%s6848_s7 + $0x30] sm:$0xff] %v4292_v40   ;;  %v3857_v60 = vadd.f32 %v6834_v6, %v3832_v24  ;;  %v3833_v21 = vadd.f32 %v3806_v0, %v6898_v44  ;;  %v5170_v4 = vpop.f32.mrb[23].mxu1 }
 0x572   : > { %v3858_v11 = vadd.f32 %v6834_v6, %v3833_v21  ;;  %v3875_v43 = vmax.f32 %v3857_v60, 0.0 }
 0x574   : > { %v3876_v13 = vmax.f32 %v3858_v11, 0.0 }
 0x575   : > { %v3811_v16 = vpop.f32.mrb[24].mxu1 }
 0x576   : > { %v4297_v48 = vpack.c.bf16 %v3876_v13, %v3875_v43  ;;  %v3834_v51 = vadd.f32 %v3811_v16, %v6903_v9  ;;  %v5173_v49 = vpop.f32.mrb[25].mxu1 }
 0x577   : > { %v3814_v36 = vpop.f32.mrb[26].mxu1 }
 0x578   : > { %4305 = vst [vmem:[%s6848_s7 + $0x38] sm:$0xff] %v4297_v48   ;;  %v3859_v20 = vadd.f32 %v6834_v6, %v3834_v51  ;;  %v3835_v41 = vadd.f32 %v3814_v36, %v6906_v1  ;;  %v5174_v54 = vpop.f32.mrb[27].mxu1 }
 0x57a   : > { %v3877_v44 = vmax.f32 %v3859_v20, 0.0  ;;  %v3860_v23 = vadd.f32 %v6834_v6, %v3835_v41  ;;  %30 = sbr.rel (!%p28_p0) target bundleno = 2 (0x2), region = 172 }
 0x57c   : > { %v4256_v32 = vpack.c.bf16 %v3877_v44, %v3877_v44  ;;  %v3878_v14 = vmax.f32 %v3860_v23, 0.0 }
 0x57e   : > { %3970 = vst [vmem:[%s6848_s7 + $0x40] sm:$0xf] %v4256_v32  ;;  %v4257_v59 = vpack.c.bf16 %v3878_v14, %v3878_v14 }
 0x580   : > { %3971 = vst [vmem:[%s6848_s7 + $0x44] sm:$0x3] %v4257_v59 }

// kernel: simple_net_forward.3
= control target key start
LH: loop header
LB: loop body
LE: loop exit
PB: predicated region body
PF: predicated region fallthrough
CT: control target
= control target key end

     0   :  { %10 = vsyncpa [#allocation3], 0  ;;  %s16617_s18 = smov [#allocation2]   ;;  %s16988_s0 = inlined_call_operand.vmem [shape: bf16[8,17920], index: 0, kind: input, shape index: {}]   ;;  %s16989_s1 = inlined_call_operand.hbm [shape: bf16[17920,128], index: 1, kind: input, shape index: {}]   ;;  %s16990_s2 = inlined_call_operand.vmem [shape: f32[1,128], index: 2, kind: input, shape index: {}]   ;;  %s16991_s3 = inlined_call_operand.vmem [shape: bf16[128,128], index: 3, kind: input, shape index: {}]   ;;  %s16992_s4 = inlined_call_operand.vmem [shape: f32[1,128], index: 4, kind: input, shape index: {}]   ;;  %s16993_s5 = inlined_call_operand.vmem [shape: f32[8,128], index: 5, kind: output, shape index: {}]  }
   0x1   :  { %s18_s19 = sshll.u32 %s16617_s18, 4  ;;  %s16593_s22 = scalar_lea.hbm %s16989_s1, 143360  ;;  %s19_s19 = int_to_ptr.vmem [resolvable:$true] %s18_s19 }
   0x2   :  { %p16594_p0 = scmp.ne.s32.totalorder %s16989_s1, %s16593_s22  ;;  %p16597_p1 = scmp.lt.u32.totalorder %s16593_s22, %s16989_s1 }
   0x4   :  { %p16599_p2 = pnand %p16597_p1, %p16594_p0 }
   0x6   :  { %16602 = shalt.err (!%p16599_p2)
}
   0x7   :  { %s16603_s27 = scalar_lea.vmem %s19_s19, 143360  ;;  %p16608_p4 = scmp.lt.s32.totalorder %s19_s19, %s19_s19 }
   0x8   :  { %p16604_p3 = scmp.ne.s32.totalorder %s19_s19, %s16603_s27  ;;  %p16609_p5 = scmp.lt.s32.totalorder %s16603_s27, %s16603_s27 }
   0xa   :  { %p16610_p6 = por %p16609_p5, %p16608_p4 }
   0xc   :  { %p16611_p7 = pnand %p16610_p6, %p16604_p3 }
   0xe   :  { %16614 = shalt.err (!%p16611_p7)
}
   0xf   :  { %s16618_s28 = smov 64   ;;  %s16619_s29 = smov 4  }
  0x10   :  { %24 = dma.hbm_to_vmem [thread:$0]  %s16989_s1, 143360, %s19_s19, [#allocation3], %s16618_s28, %s16618_s28, %s16619_s29  }
  0x11   :  { %16615 = dma.done.wait [#allocation3], 143360  }
  0x12   :  { %16616 = vsyncadd [#allocation3], 4294823936  ;;  %v15325_v0 = vld [vmem:[#allocation2 + $0x40] sm:$0xff]   ;;  %v15329_v4 = vld [vmem:[#allocation2 + $0x48] sm:$0xff]   ;;  %vm16621_vm0 = vmmov 0  }
  0x13   :  { %v15326_v1 = vld [vmem:[#allocation2 + $0xc0] sm:$0xff]   ;;  %13751 = vmatprep.subr.bf16.mxu0 %v15325_v0  ;;  %v15330_v5 = vld [vmem:[#allocation2 + $0xc8] sm:$0xff]   ;;  %v15333_v8 = vld [vmem:[#allocation2 + $0x50] sm:$0xff]  }
  0x14   :  { %v15327_v2 = vld [vmem:[#allocation2] sm:$0xff]   ;;  %13773 = vmatprep.subr.bf16.mxu1 %v15326_v1  ;;  %v15331_v6 = vld [vmem:[#allocation2 + $0x8] sm:$0xff]   ;;  %v15334_v9 = vld [vmem:[#allocation2 + $0xd0] sm:$0xff]  }
  0x15   :  { %v15328_v3 = vld [vmem:[#allocation2 + $0x80] sm:$0xff]   ;;  %13752 = vmatpush3.bf16.msra.mxu0 %v15327_v2  ;;  %v15332_v7 = vld [vmem:[#allocation2 + $0x88] sm:$0xff]   ;;  %v15335_v10 = vld [vmem:[#allocation2 + $0x10] sm:$0xff]  }
  0x16   :  { %13774 = vmatpush3.bf16.msra.mxu1 %v15328_v3  ;;  %13753 = vmatprep.subr.bf16.mxu0 %v15329_v4  ;;  %v15336_v11 = vld [vmem:[#allocation2 + $0x90] sm:$0xff]   ;;  %v15337_v12 = vld [vmem:[#allocation2 + $0x58] sm:$0xff]   ;;  %v15341_v16 = vld [vmem:[#allocation2 + $0x60] sm:$0xff]  }
  0x17   :  { %13775 = vmatprep.subr.bf16.mxu1 %v15330_v5  ;;  %v15338_v13 = vld [vmem:[#allocation2 + $0xd8] sm:$0xff]   ;;  %v15342_v17 = vld [vmem:[#allocation2 + $0xe0] sm:$0xff]   ;;  %v15345_v20 = vld [vmem:[#allocation2 + $0x68] sm:$0xff]  }
  0x18   :  { %v15339_v14 = vld [vmem:[#allocation2 + $0x18] sm:$0xff]   ;;  %v15343_v18 = vld [vmem:[#allocation2 + $0x20] sm:$0xff]   ;;  %v15346_v21 = vld [vmem:[#allocation2 + $0xe8] sm:$0xff]  }
  0x19   :  { %13754 = vmatpush3.bf16.msra.mxu0 %v15331_v6  ;;  %v15340_v15 = vld [vmem:[#allocation2 + $0x98] sm:$0xff]   ;;  %v15344_v19 = vld [vmem:[#allocation2 + $0xa0] sm:$0xff]   ;;  %v15347_v22 = vld [vmem:[#allocation2 + $0x28] sm:$0xff]  }
  0x1a   :  { %13776 = vmatpush3.bf16.msra.mxu1 %v15332_v7  ;;  %13755 = vmatprep.subr.bf16.mxu0 %v15333_v8  ;;  %v15348_v23 = vld [vmem:[#allocation2 + $0xa8] sm:$0xff]   ;;  %v15349_v24 = vld [vmem:[#allocation2 + $0x70] sm:$0xff]   ;;  %v15353_v28 = vld [vmem:[#allocation2 + $0x78] sm:$0xff]  }
  0x1b   :  { %13777 = vmatprep.subr.bf16.mxu1 %v15334_v9  ;;  %v15350_v25 = vld [vmem:[#allocation2 + $0xf0] sm:$0xff]   ;;  %v15354_v29 = vld [vmem:[#allocation2 + $0xf8] sm:$0xff]   ;;  %v35_v32 = vld [vmem:[%s16988_s0] sm:$0xff] }
  0x1c   :  { %v15351_v26 = vld [vmem:[#allocation2 + $0x30] sm:$0xff]   ;;  %v15355_v30 = vld [vmem:[#allocation2 + $0x38] sm:$0xff]   ;;  %v36_v33 = vld [vmem:[%s16988_s0 + $0x8] sm:$0xff]  ;;  %v12482_v34 = vcombine.low %v35_v32, %v35_v32  ;;  %v12483_v35 = vcombine.high %v35_v32, %v35_v32 }
  0x1d   :  { %13756 = vmatpush3.bf16.msra.mxu0 %v15335_v10  ;;  %v15352_v27 = vld [vmem:[#allocation2 + $0xb0] sm:$0xff]   ;;  %v15356_v31 = vld [vmem:[#allocation2 + $0xb8] sm:$0xff]   ;;  %v12484_v36 = vcombine.low %v36_v33, %v36_v33  ;;  %v12485_v37 = vcombine.high %v36_v33, %v36_v33  ;;  %v15361_v38 = vld [vmem:[#allocation2 + $0x140] sm:$0xff]  }
  0x1e   :  { %13778 = vmatpush3.bf16.msra.mxu1 %v15336_v11  ;;  %13757 = vmatprep.subr.bf16.mxu0 %v15337_v12  ;;  %v15362_v39 = vld [vmem:[#allocation2 + $0x1c0] sm:$0xff]   ;;  %v15365_v42 = vld [vmem:[#allocation2 + $0x148] sm:$0xff]   ;;  %v15369_v46 = vld [vmem:[#allocation2 + $0x150] sm:$0xff]  }
  0x1f   :  { %13779 = vmatprep.subr.bf16.mxu1 %v15338_v13  ;;  %9594 = vmatprep.mubr.bf16.mxu0 %v12483_v35  ;;  %v15363_v40 = vld [vmem:[#allocation2 + $0x100] sm:$0xff]   ;;  %v15366_v43 = vld [vmem:[#allocation2 + $0x1c8] sm:$0xff]   ;;  %v15370_v47 = vld [vmem:[#allocation2 + $0x1d0] sm:$0xff]  }
  0x20   :  { %9634 = vmatprep.mubr.bf16.mxu1 %v12485_v37  ;;  %v15364_v41 = vld [vmem:[#allocation2 + $0x180] sm:$0xff]   ;;  %v15367_v44 = vld [vmem:[#allocation2 + $0x108] sm:$0xff]   ;;  %v15371_v48 = vld [vmem:[#allocation2 + $0x110] sm:$0xff]  }
  0x21   :  { %13758 = vmatpush3.bf16.msra.mxu0 %v15339_v14  ;;  %v15368_v45 = vld [vmem:[#allocation2 + $0x188] sm:$0xff]   ;;  %v15372_v49 = vld [vmem:[#allocation2 + $0x190] sm:$0xff]   ;;  %v15373_v50 = vld [vmem:[#allocation2 + $0x158] sm:$0xff]  }
  0x22   :  { %13780 = vmatpush3.bf16.msra.mxu1 %v15340_v15  ;;  %13759 = vmatprep.subr.bf16.mxu0 %v15341_v16  ;;  %v15374_v51 = vld [vmem:[#allocation2 + $0x1d8] sm:$0xff]   ;;  %v15377_v54 = vld [vmem:[#allocation2 + $0x160] sm:$0xff]   ;;  %v15381_v58 = vld [vmem:[#allocation2 + $0x168] sm:$0xff]  }
  0x23   :  { %13781 = vmatprep.subr.bf16.mxu1 %v15342_v17  ;;  %v15375_v52 = vld [vmem:[#allocation2 + $0x118] sm:$0xff]   ;;  %v15378_v55 = vld [vmem:[#allocation2 + $0x1e0] sm:$0xff]   ;;  %v15382_v59 = vld [vmem:[#allocation2 + $0x1e8] sm:$0xff]  }
  0x24   :  { %v15376_v53 = vld [vmem:[#allocation2 + $0x198] sm:$0xff]   ;;  %v15379_v56 = vld [vmem:[#allocation2 + $0x120] sm:$0xff]   ;;  %v15383_v60 = vld [vmem:[#allocation2 + $0x128] sm:$0xff]  }
  0x25   :  { %13760 = vmatpush3.bf16.msra.mxu0 %v15343_v18  ;;  %v15380_v57 = vld [vmem:[#allocation2 + $0x1a0] sm:$0xff]   ;;  %v15384_v61 = vld [vmem:[#allocation2 + $0x1a8] sm:$0xff]   ;;  %v15385_v62 = vld [vmem:[#allocation2 + $0x170] sm:$0xff]  }
  0x26   :  { %13782 = vmatpush3.bf16.msra.mxu1 %v15344_v19  ;;  %13761 = vmatprep.subr.bf16.mxu0 %v15345_v20  ;;  %v15386_v63 = vld [vmem:[#allocation2 + $0x1f0] sm:$0xff]   ;;  %v15389_v2 = vld [vmem:[#allocation2 + $0x178] sm:$0xff]   ;;  %v15397_v12 = vld [vmem:[#allocation2 + $0x240] sm:$0xff]  }
  0x27   :  { %13783 = vmatprep.subr.bf16.mxu1 %v15346_v21  ;;  %v15387_v0 = vld [vmem:[#allocation2 + $0x130] sm:$0xff]   ;;  %v15390_v3 = vld [vmem:[#allocation2 + $0x1f8] sm:$0xff]   ;;  %v15398_v13 = vld [vmem:[#allocation2 + $0x2c0] sm:$0xff]  }
  0x28   :  { %v15388_v1 = vld [vmem:[#allocation2 + $0x1b0] sm:$0xff]   ;;  %v15391_v4 = vld [vmem:[#allocation2 + $0x138] sm:$0xff]   ;;  %v15399_v14 = vld [vmem:[#allocation2 + $0x200] sm:$0xff]  }
  0x29   :  { %13762 = vmatpush3.bf16.msra.mxu0 %v15347_v22  ;;  %v15392_v5 = vld [vmem:[#allocation2 + $0x1b8] sm:$0xff]   ;;  %v37_v6 = vld [vmem:[%s16988_s0 + $0x10] sm:$0xff]  ;;  %v15400_v15 = vld [vmem:[#allocation2 + $0x280] sm:$0xff]  }
  0x2a   :  { %13784 = vmatpush3.bf16.msra.mxu1 %v15348_v23  ;;  %13763 = vmatprep.subr.bf16.mxu0 %v15349_v24  ;;  %v12486_v7 = vcombine.low %v37_v6, %v37_v6  ;;  %v12487_v8 = vcombine.high %v37_v6, %v37_v6  ;;  %v38_v9 = vld [vmem:[%s16988_s0 + $0x18] sm:$0xff]  ;;  %v15401_v16 = vld [vmem:[#allocation2 + $0x248] sm:$0xff]   ;;  %v15405_v20 = vld [vmem:[#allocation2 + $0x250] sm:$0xff]  }
  0x2b   :  { %13785 = vmatprep.subr.bf16.mxu1 %v15350_v25  ;;  %v12488_v10 = vcombine.low %v38_v9, %v38_v9  ;;  %v12489_v11 = vcombine.high %v38_v9, %v38_v9  ;;  %v15402_v17 = vld [vmem:[#allocation2 + $0x2c8] sm:$0xff]   ;;  %v15406_v21 = vld [vmem:[#allocation2 + $0x2d0] sm:$0xff]   ;;  %v15409_v24 = vld [vmem:[#allocation2 + $0x258] sm:$0xff]  }
  0x2c   :  { %v15403_v18 = vld [vmem:[#allocation2 + $0x208] sm:$0xff]   ;;  %v15407_v22 = vld [vmem:[#allocation2 + $0x210] sm:$0xff]   ;;  %v15410_v25 = vld [vmem:[#allocation2 + $0x2d8] sm:$0xff]  }
  0x2d   :  { %13764 = vmatpush3.bf16.msra.mxu0 %v15351_v26  ;;  %v15404_v19 = vld [vmem:[#allocation2 + $0x288] sm:$0xff]   ;;  %v15408_v23 = vld [vmem:[#allocation2 + $0x290] sm:$0xff]   ;;  %v15411_v26 = vld [vmem:[#allocation2 + $0x218] sm:$0xff]  }
  0x2e   :  { %13786 = vmatpush3.bf16.msra.mxu1 %v15352_v27  ;;  %13765 = vmatprep.subr.bf16.mxu0 %v15353_v28  ;;  %v15412_v27 = vld [vmem:[#allocation2 + $0x298] sm:$0xff]   ;;  %v15413_v28 = vld [vmem:[#allocation2 + $0x260] sm:$0xff]   ;;  %v15417_v32 = vld [vmem:[#allocation2 + $0x268] sm:$0xff]  }
  0x2f   :  { %13787 = vmatprep.subr.bf16.mxu1 %v15354_v29  ;;  %v15414_v29 = vld [vmem:[#allocation2 + $0x2e0] sm:$0xff]   ;;  %v15418_v33 = vld [vmem:[#allocation2 + $0x2e8] sm:$0xff]   ;;  %v15422_v37 = vld [vmem:[#allocation2 + $0x2f0] sm:$0xff]  }
  0x30   :  { %v15420_v35 = vld [vmem:[#allocation2 + $0x2a8] sm:$0xff]  }
  0x31   :  { %13766 = vmatpush3.bf16.msra.mxu0 %v15355_v30  ;;  %v15415_v30 = vld [vmem:[#allocation2 + $0x220] sm:$0xff]   ;;  %v15453_v6 = vld [vmem:[#allocation2 + $0x368] sm:$0xff]  }
  0x32   :  { %13788 = vmatpush3.bf16.msra.mxu1 %v15356_v31  ;;  %13795 = vmatprep.subr.bf16.mxu0 %v15361_v38  ;;  %v15416_v31 = vld [vmem:[#allocation2 + $0x2a0] sm:$0xff]   ;;  %v15423_v38 = vld [vmem:[#allocation2 + $0x230] sm:$0xff]   ;;  %v15456_v9 = vld [vmem:[#allocation2 + $0x3a8] sm:$0xff]  }
  0x33   :  { %13817 = vmatprep.subr.bf16.mxu1 %v15362_v39  ;;  %v15424_v39 = vld [vmem:[#allocation2 + $0x2b0] sm:$0xff]  }
  0x34   :  { %9595 = vmatmul.mubr.bf16.vlgmr.msra.gmra.mrb[0].mxu0 %v12482_v34  ;;  %v15419_v34 = vld [vmem:[#allocation2 + $0x228] sm:$0xff]  }
  0x35   :  { %9635 = vmatmul.mubr.bf16.vlgmr.msra.gmra.mrb[0].mxu1 %v12484_v36  ;;  %13796 = vmatpush3.bf16.msra.mxu0 %v15363_v40  ;;  %v15421_v36 = vld [vmem:[#allocation2 + $0x270] sm:$0xff]   ;;  %v15425_v40 = vld [vmem:[#allocation2 + $0x278] sm:$0xff]  }
  0x36   :  { %13818 = vmatpush3.bf16.msra.mxu1 %v15364_v41  ;;  %13797 = vmatprep.subr.bf16.mxu0 %v15365_v42  ;;  %v15426_v41 = vld [vmem:[#allocation2 + $0x2f8] sm:$0xff]  }
  0x37   :  { %13819 = vmatprep.subr.bf16.mxu1 %v15366_v43  ;;  %9674 = vmatprep.mubr.bf16.mxu0 %v12487_v8  ;;  %v15427_v42 = vld [vmem:[#allocation2 + $0x238] sm:$0xff]   ;;  %v15455_v8 = vld [vmem:[#allocation2 + $0x328] sm:$0xff]  }
  0x38   :  { %9714 = vmatprep.mubr.bf16.mxu1 %v12489_v11  ;;  %v15428_v43 = vld [vmem:[#allocation2 + $0x2b8] sm:$0xff]   ;;  %v15458_v11 = vld [vmem:[#allocation2 + $0x3f0] sm:$0xff]  }
  0x39   :  { %13798 = vmatpush3.bf16.msra.mxu0 %v15367_v44  ;;  %v39_v44 = vld [vmem:[%s16988_s0 + $0x20] sm:$0xff] }
  0x3a   :  { %13820 = vmatpush3.bf16.msra.mxu1 %v15368_v45  ;;  %13799 = vmatprep.subr.bf16.mxu0 %v15369_v46  ;;  %v40_v45 = vld [vmem:[%s16988_s0 + $0x28] sm:$0xff]  ;;  %v12490_v46 = vcombine.low %v39_v44, %v39_v44 }
  0x3b   :  { %13821 = vmatprep.subr.bf16.mxu1 %v15370_v47  ;;  %v12491_v47 = vcombine.high %v39_v44, %v39_v44  ;;  %v15489_v44 = vld [vmem:[#allocation2 + $0x468] sm:$0xff]  }
  0x3d   :  { %13800 = vmatpush3.bf16.msra.mxu0 %v15371_v48  ;;  %v12492_v48 = vcombine.low %v40_v45, %v40_v45 }
  0x3e   :  { %13822 = vmatpush3.bf16.msra.mxu1 %v15372_v49  ;;  %13801 = vmatprep.subr.bf16.mxu0 %v15373_v50  ;;  %v12493_v49 = vcombine.high %v40_v45, %v40_v45  ;;  %v15433_v50 = vld [vmem:[#allocation2 + $0x340] sm:$0xff]   ;;  %v15490_v45 = vld [vmem:[#allocation2 + $0x4e8] sm:$0xff]  }
  0x3f   :  { %13823 = vmatprep.subr.bf16.mxu1 %v15374_v51  ;;  %v15434_v51 = vld [vmem:[#allocation2 + $0x3c0] sm:$0xff]  }
  0x41   :  { %13802 = vmatpush3.bf16.msra.mxu0 %v15375_v52  ;;  %v15435_v52 = vld [vmem:[#allocation2 + $0x300] sm:$0xff]  }
  0x42   :  { %13824 = vmatpush3.bf16.msra.mxu1 %v15376_v53  ;;  %13803 = vmatprep.subr.bf16.mxu0 %v15377_v54  ;;  %v15436_v53 = vld [vmem:[#allocation2 + $0x380] sm:$0xff]   ;;  %v15437_v54 = vld [vmem:[#allocation2 + $0x348] sm:$0xff]  }
  0x43   :  { %13825 = vmatprep.subr.bf16.mxu1 %v15378_v55  ;;  %v15438_v55 = vld [vmem:[#allocation2 + $0x3c8] sm:$0xff]  }
  0x45   :  { %13804 = vmatpush3.bf16.msra.mxu0 %v15379_v56  ;;  %v15439_v56 = vld [vmem:[#allocation2 + $0x308] sm:$0xff]  }
  0x46   :  { %13826 = vmatpush3.bf16.msra.mxu1 %v15380_v57  ;;  %13805 = vmatprep.subr.bf16.mxu0 %v15381_v58  ;;  %v15440_v57 = vld [vmem:[#allocation2 + $0x388] sm:$0xff]   ;;  %v15441_v58 = vld [vmem:[#allocation2 + $0x350] sm:$0xff]  }
  0x47   :  { %13827 = vmatprep.subr.bf16.mxu1 %v15382_v59  ;;  %v15442_v59 = vld [vmem:[#allocation2 + $0x3d0] sm:$0xff]  }
  0x49   :  { %13806 = vmatpush3.bf16.msra.mxu0 %v15383_v60  ;;  %v15443_v60 = vld [vmem:[#allocation2 + $0x310] sm:$0xff]  }
  0x4a   :  { %13828 = vmatpush3.bf16.msra.mxu1 %v15384_v61  ;;  %13807 = vmatprep.subr.bf16.mxu0 %v15385_v62  ;;  %v15444_v61 = vld [vmem:[#allocation2 + $0x390] sm:$0xff]   ;;  %v15445_v62 = vld [vmem:[#allocation2 + $0x358] sm:$0xff]  }
  0x4b   :  { %13829 = vmatprep.subr.bf16.mxu1 %v15386_v63  ;;  %v15446_v63 = vld [vmem:[#allocation2 + $0x3d8] sm:$0xff]  }
  0x4d   :  { %13808 = vmatpush3.bf16.msra.mxu0 %v15387_v0  ;;  %v15447_v0 = vld [vmem:[#allocation2 + $0x318] sm:$0xff]  }
  0x4e   :  { %13830 = vmatpush3.bf16.msra.mxu1 %v15388_v1  ;;  %13809 = vmatprep.subr.bf16.mxu0 %v15389_v2  ;;  %v15448_v1 = vld [vmem:[#allocation2 + $0x398] sm:$0xff]   ;;  %v15449_v2 = vld [vmem:[#allocation2 + $0x360] sm:$0xff]  }
  0x4f   :  { %13831 = vmatprep.subr.bf16.mxu1 %v15390_v3  ;;  %v15450_v3 = vld [vmem:[#allocation2 + $0x3e0] sm:$0xff]  }
  0x51   :  { %13810 = vmatpush3.bf16.msra.mxu0 %v15391_v4  ;;  %v15451_v4 = vld [vmem:[#allocation2 + $0x320] sm:$0xff]  }
  0x52   :  { %13832 = vmatpush3.bf16.msra.mxu1 %v15392_v5  ;;  %13839 = vmatprep.subr.bf16.mxu0 %v15397_v12  ;;  %v15452_v5 = vld [vmem:[#allocation2 + $0x3a0] sm:$0xff]   ;;  %v15459_v12 = vld [vmem:[#allocation2 + $0x330] sm:$0xff]  }
  0x53   :  { %13861 = vmatprep.subr.bf16.mxu1 %v15398_v13  ;;  %v15460_v13 = vld [vmem:[#allocation2 + $0x3b0] sm:$0xff]  }
  0x54   :  { %9675 = vmatmul.mubr.bf16.vlgmr.msra.gmra.mrb[4].mxu0 %v12486_v7  ;;  %v15454_v7 = vld [vmem:[#allocation2 + $0x3e8] sm:$0xff]  }
  0x55   :  { %9715 = vmatmul.mubr.bf16.vlgmr.msra.gmra.mrb[4].mxu1 %v12488_v10  ;;  %13840 = vmatpush3.bf16.msra.mxu0 %v15399_v14  ;;  %v15457_v10 = vld [vmem:[#allocation2 + $0x370] sm:$0xff]   ;;  %v15461_v14 = vld [vmem:[#allocation2 + $0x378] sm:$0xff]  }
  0x56   :  { %13862 = vmatpush3.bf16.msra.mxu1 %v15400_v15  ;;  %13841 = vmatprep.subr.bf16.mxu0 %v15401_v16  ;;  %v15462_v15 = vld [vmem:[#allocation2 + $0x3f8] sm:$0xff]  }
  0x57   :  { %13863 = vmatprep.subr.bf16.mxu1 %v15402_v17  ;;  %9754 = vmatprep.mubr.bf16.mxu0 %v12491_v47  ;;  %v15463_v16 = vld [vmem:[#allocation2 + $0x338] sm:$0xff]   ;;  %v15492_v47 = vld [vmem:[#allocation2 + $0x4a8] sm:$0xff]  }
  0x58   :  { %9794 = vmatprep.mubr.bf16.mxu1 %v12493_v49  ;;  %v15464_v17 = vld [vmem:[#allocation2 + $0x3b8] sm:$0xff]   ;;  %v15494_v49 = vld [vmem:[#allocation2 + $0x4f0] sm:$0xff]  }
  0x59   :  { %13842 = vmatpush3.bf16.msra.mxu0 %v15403_v18  ;;  %v41_v18 = vld [vmem:[%s16988_s0 + $0x30] sm:$0xff] }
  0x5a   :  { %13864 = vmatpush3.bf16.msra.mxu1 %v15404_v19  ;;  %13843 = vmatprep.subr.bf16.mxu0 %v15405_v20  ;;  %v42_v19 = vld [vmem:[%s16988_s0 + $0x38] sm:$0xff]  ;;  %v12494_v20 = vcombine.low %v41_v18, %v41_v18 }
  0x5b   :  { %13865 = vmatprep.subr.bf16.mxu1 %v15406_v21  ;;  %v12495_v21 = vcombine.high %v41_v18, %v41_v18  ;;  %v15525_v18 = vld [vmem:[#allocation2 + $0x568] sm:$0xff]  }
  0x5d   :  { %13844 = vmatpush3.bf16.msra.mxu0 %v15407_v22  ;;  %v12496_v22 = vcombine.low %v42_v19, %v42_v19 }
  0x5e   :  { %13866 = vmatpush3.bf16.msra.mxu1 %v15408_v23  ;;  %13845 = vmatprep.subr.bf16.mxu0 %v15409_v24  ;;  %v15469_v23 = vld [vmem:[#allocation2 + $0x440] sm:$0xff]   ;;  %v12497_v24 = vcombine.high %v42_v19, %v42_v19  ;;  %v15526_v19 = vld [vmem:[#allocation2 + $0x5e8] sm:$0xff]  }
  0x5f   :  { %13867 = vmatprep.subr.bf16.mxu1 %v15410_v25  ;;  %v15470_v25 = vld [vmem:[#allocation2 + $0x4c0] sm:$0xff]  }
  0x61   :  { %13846 = vmatpush3.bf16.msra.mxu0 %v15411_v26  ;;  %v15471_v26 = vld [vmem:[#allocation2 + $0x400] sm:$0xff]  }
  0x62   :  { %13868 = vmatpush3.bf16.msra.mxu1 %v15412_v27  ;;  %13847 = vmatprep.subr.bf16.mxu0 %v15413_v28  ;;  %v15472_v27 = vld [vmem:[#allocation2 + $0x480] sm:$0xff]   ;;  %v15473_v28 = vld [vmem:[#allocation2 + $0x448] sm:$0xff]  }
  0x63   :  { %13869 = vmatprep.subr.bf16.mxu1 %v15414_v29  ;;  %v15474_v29 = vld [vmem:[#allocation2 + $0x4c8] sm:$0xff]  }
  0x65   :  { %13848 = vmatpush3.bf16.msra.mxu0 %v15415_v30  ;;  %v15475_v30 = vld [vmem:[#allocation2 + $0x408] sm:$0xff]  }
  0x66   :  { %13870 = vmatpush3.bf16.msra.mxu1 %v15416_v31  ;;  %13849 = vmatprep.subr.bf16.mxu0 %v15417_v32  ;;  %v15476_v31 = vld [vmem:[#allocation2 + $0x488] sm:$0xff]   ;;  %v15477_v32 = vld [vmem:[#allocation2 + $0x450] sm:$0xff]  }
  0x67   :  { %13871 = vmatprep.subr.bf16.mxu1 %v15418_v33  ;;  %v15478_v33 = vld [vmem:[#allocation2 + $0x4d0] sm:$0xff]  }
  0x69   :  { %13850 = vmatpush3.bf16.msra.mxu0 %v15419_v34  ;;  %v15479_v34 = vld [vmem:[#allocation2 + $0x410] sm:$0xff]  }
  0x6a   :  { %13872 = vmatpush3.bf16.msra.mxu1 %v15420_v35  ;;  %13851 = vmatprep.subr.bf16.mxu0 %v15421_v36  ;;  %v15480_v35 = vld [vmem:[#allocation2 + $0x490] sm:$0xff]   ;;  %v15481_v36 = vld [vmem:[#allocation2 + $0x458] sm:$0xff]  }
  0x6b   :  { %13873 = vmatprep.subr.bf16.mxu1 %v15422_v37  ;;  %v15482_v37 = vld [vmem:[#allocation2 + $0x4d8] sm:$0xff]  }
  0x6d   :  { %13852 = vmatpush3.bf16.msra.mxu0 %v15423_v38  ;;  %v15483_v38 = vld [vmem:[#allocation2 + $0x418] sm:$0xff]  }
  0x6e   :  { %13874 = vmatpush3.bf16.msra.mxu1 %v15424_v39  ;;  %13853 = vmatprep.subr.bf16.mxu0 %v15425_v40  ;;  %v15484_v39 = vld [vmem:[#allocation2 + $0x498] sm:$0xff]   ;;  %v15485_v40 = vld [vmem:[#allocation2 + $0x460] sm:$0xff]  }
  0x6f   :  { %13875 = vmatprep.subr.bf16.mxu1 %v15426_v41  ;;  %v15486_v41 = vld [vmem:[#allocation2 + $0x4e0] sm:$0xff]  }
  0x71   :  { %13854 = vmatpush3.bf16.msra.mxu0 %v15427_v42  ;;  %v15487_v42 = vld [vmem:[#allocation2 + $0x420] sm:$0xff]  }
  0x72   :  { %13876 = vmatpush3.bf16.msra.mxu1 %v15428_v43  ;;  %13883 = vmatprep.subr.bf16.mxu0 %v15433_v50  ;;  %v15488_v43 = vld [vmem:[#allocation2 + $0x4a0] sm:$0xff]   ;;  %v15495_v50 = vld [vmem:[#allocation2 + $0x430] sm:$0xff]  }
  0x73   :  { %13905 = vmatprep.subr.bf16.mxu1 %v15434_v51  ;;  %v15496_v51 = vld [vmem:[#allocation2 + $0x4b0] sm:$0xff]  }
  0x74   :  { %9755 = vmatmul.mubr.bf16.vlgmr.msra.gmra.mrb[8].mxu0 %v12490_v46  ;;  %v15491_v46 = vld [vmem:[#allocation2 + $0x428] sm:$0xff]  }
  0x75   :  { %9795 = vmatmul.mubr.bf16.vlgmr.msra.gmra.mrb[8].mxu1 %v12492_v48  ;;  %13884 = vmatpush3.bf16.msra.mxu0 %v15435_v52  ;;  %v15493_v48 = vld [vmem:[#allocation2 + $0x470] sm:$0xff]   ;;  %v15497_v52 = vld [vmem:[#allocation2 + $0x478] sm:$0xff]  }
  0x76   :  { %13906 = vmatpush3.bf16.msra.mxu1 %v15436_v53  ;;  %13885 = vmatprep.subr.bf16.mxu0 %v15437_v54  ;;  %v15498_v53 = vld [vmem:[#allocation2 + $0x4f8] sm:$0xff]  }
  0x77   :  { %13907 = vmatprep.subr.bf16.mxu1 %v15438_v55  ;;  %9834 = vmatprep.mubr.bf16.mxu0 %v12495_v21  ;;  %v15499_v54 = vld [vmem:[#allocation2 + $0x438] sm:$0xff]   ;;  %v15528_v21 = vld [vmem:[#allocation2 + $0x5a8] sm:$0xff]  }
  0x78   :  { %9874 = vmatprep.mubr.bf16.mxu1 %v12497_v24  ;;  %v15500_v55 = vld [vmem:[#allocation2 + $0x4b8] sm:$0xff]   ;;  %v15531_v24 = vld [vmem:[#allocation2 + $0x530] sm:$0xff]  }
  0x79   :  { %13886 = vmatpush3.bf16.msra.mxu0 %v15439_v56  ;;  %v43_v56 = vld [vmem:[%s16988_s0 + $0x40] sm:$0xff] }
  0x7a   :  { %13908 = vmatpush3.bf16.msra.mxu1 %v15440_v57  ;;  %13887 = vmatprep.subr.bf16.mxu0 %v15441_v58  ;;  %v12498_v57 = vcombine.low %v43_v56, %v43_v56  ;;  %v12499_v58 = vcombine.high %v43_v56, %v43_v56  ;;  %v15561_v56 = vld [vmem:[#allocation2 + $0x668] sm:$0xff]  }
  0x7b   :  { %13909 = vmatprep.subr.bf16.mxu1 %v15442_v59  ;;  %v44_v59 = vld [vmem:[%s16988_s0 + $0x48] sm:$0xff] }
  0x7d   :  { %13888 = vmatpush3.bf16.msra.mxu0 %v15443_v60  ;;  %v12500_v60 = vcombine.low %v44_v59, %v44_v59 }
  0x7e   :  { %13910 = vmatpush3.bf16.msra.mxu1 %v15444_v61  ;;  %13889 = vmatprep.subr.bf16.mxu0 %v15445_v62  ;;  %v12501_v61 = vcombine.high %v44_v59, %v44_v59  ;;  %v15505_v62 = vld [vmem:[#allocation2 + $0x540] sm:$0xff]   ;;  %v15564_v59 = vld [vmem:[#allocation2 + $0x6a8] sm:$0xff]  }
  0x7f   :  { %13911 = vmatprep.subr.bf16.mxu1 %v15446_v63  ;;  %v15506_v63 = vld [vmem:[#allocation2 + $0x5c0] sm:$0xff]  }
  0x81   :  { %13890 = vmatpush3.bf16.msra.mxu0 %v15447_v0  ;;  %v15507_v0 = vld [vmem:[#allocation2 + $0x500] sm:$0xff]  }
  0x82   :  { %13912 = vmatpush3.bf16.msra.mxu1 %v15448_v1  ;;  %13891 = vmatprep.subr.bf16.mxu0 %v15449_v2  ;;  %v15508_v1 = vld [vmem:[#allocation2 + $0x580] sm:$0xff]   ;;  %v15509_v2 = vld [vmem:[#allocation2 + $0x548] sm:$0xff]  }
  0x83   :  { %13913 = vmatprep.subr.bf16.mxu1 %v15450_v3  ;;  %v15510_v3 = vld [vmem:[#allocation2 + $0x5c8] sm:$0xff]  }
  0x85   :  { %13892 = vmatpush3.bf16.msra.mxu0 %v15451_v4  ;;  %v15511_v4 = vld [vmem:[#allocation2 + $0x508] sm:$0xff]  }
  0x86   :  { %13914 = vmatpush3.bf16.msra.mxu1 %v15452_v5  ;;  %13893 = vmatprep.subr.bf16.mxu0 %v15453_v6  ;;  %v15512_v5 = vld [vmem:[#allocation2 + $0x588] sm:$0xff]   ;;  %v15513_v6 = vld [vmem:[#allocation2 + $0x550] sm:$0xff]  }
  0x87   :  { %13915 = vmatprep.subr.bf16.mxu1 %v15454_v7  ;;  %v15514_v7 = vld [vmem:[#allocation2 + $0x5d0] sm:$0xff]  }
  0x89   :  { %13894 = vmatpush3.bf16.msra.mxu0 %v15455_v8  ;;  %v15515_v8 = vld [vmem:[#allocation2 + $0x510] sm:$0xff]  }
  0x8a   :  { %13916 = vmatpush3.bf16.msra.mxu1 %v15456_v9  ;;  %13895 = vmatprep.subr.bf16.mxu0 %v15457_v10  ;;  %v15516_v9 = vld [vmem:[#allocation2 + $0x590] sm:$0xff]   ;;  %v15517_v10 = vld [vmem:[#allocation2 + $0x558] sm:$0xff]  }
  0x8b   :  { %13917 = vmatprep.subr.bf16.mxu1 %v15458_v11  ;;  %v15518_v11 = vld [vmem:[#allocation2 + $0x5d8] sm:$0xff]  }
  0x8d   :  { %13896 = vmatpush3.bf16.msra.mxu0 %v15459_v12  ;;  %v15519_v12 = vld [vmem:[#allocation2 + $0x518] sm:$0xff]  }
  0x8e   :  { %13918 = vmatpush3.bf16.msra.mxu1 %v15460_v13  ;;  %13897 = vmatprep.subr.bf16.mxu0 %v15461_v14  ;;  %v15520_v13 = vld [vmem:[#allocation2 + $0x598] sm:$0xff]   ;;  %v15521_v14 = vld [vmem:[#allocation2 + $0x560] sm:$0xff]  }
  0x8f   :  { %13919 = vmatprep.subr.bf16.mxu1 %v15462_v15  ;;  %v15522_v15 = vld [vmem:[#allocation2 + $0x5e0] sm:$0xff]  }
  0x91   :  { %13898 = vmatpush3.bf16.msra.mxu0 %v15463_v16  ;;  %v15523_v16 = vld [vmem:[#allocation2 + $0x520] sm:$0xff]  }
  0x92   :  { %13920 = vmatpush3.bf16.msra.mxu1 %v15464_v17  ;;  %13927 = vmatprep.subr.bf16.mxu0 %v15469_v23  ;;  %v15524_v17 = vld [vmem:[#allocation2 + $0x5a0] sm:$0xff]   ;;  %v15530_v23 = vld [vmem:[#allocation2 + $0x5f0] sm:$0xff]  }
  0x93   :  { %13949 = vmatprep.subr.bf16.mxu1 %v15470_v25  ;;  %v15532_v25 = vld [vmem:[#allocation2 + $0x5b0] sm:$0xff]  }
  0x94   :  { %9835 = vmatmul.mubr.bf16.vlgmr.msra.gmra.mrb[12].mxu0 %v12494_v20  ;;  %v15527_v20 = vld [vmem:[#allocation2 + $0x528] sm:$0xff]  }
  0x95   :  { %9875 = vmatmul.mubr.bf16.vlgmr.msra.gmra.mrb[12].mxu1 %v12496_v22  ;;  %13928 = vmatpush3.bf16.msra.mxu0 %v15471_v26  ;;  %v15529_v22 = vld [vmem:[#allocation2 + $0x570] sm:$0xff]   ;;  %v15533_v26 = vld [vmem:[#allocation2 + $0x578] sm:$0xff]  }
  0x96   :  { %13950 = vmatpush3.bf16.msra.mxu1 %v15472_v27  ;;  %13929 = vmatprep.subr.bf16.mxu0 %v15473_v28  ;;  %v15534_v27 = vld [vmem:[#allocation2 + $0x5f8] sm:$0xff]  }
  0x97   :  { %13951 = vmatprep.subr.bf16.mxu1 %v15474_v29  ;;  %9914 = vmatprep.mubr.bf16.mxu0 %v12499_v58  ;;  %v15535_v28 = vld [vmem:[#allocation2 + $0x538] sm:$0xff]   ;;  %v15563_v58 = vld [vmem:[#allocation2 + $0x628] sm:$0xff]  }
  0x98   :  { %9954 = vmatprep.mubr.bf16.mxu1 %v12501_v61  ;;  %v15536_v29 = vld [vmem:[#allocation2 + $0x5b8] sm:$0xff]   ;;  %v15566_v61 = vld [vmem:[#allocation2 + $0x6f0] sm:$0xff]  }
  0x99   :  { %13930 = vmatpush3.bf16.msra.mxu0 %v15475_v30  ;;  %v45_v30 = vld [vmem:[%s16988_s0 + $0x50] sm:$0xff] }
  0x9a   :  { %13952 = vmatpush3.bf16.msra.mxu1 %v15476_v31  ;;  %13931 = vmatprep.subr.bf16.mxu0 %v15477_v32  ;;  %v46_v31 = vld [vmem:[%s16988_s0 + $0x58] sm:$0xff]  ;;  %v12502_v32 = vcombine.low %v45_v30, %v45_v30 }
  0x9b   :  { %13953 = vmatprep.subr.bf16.mxu1 %v15478_v33  ;;  %v12503_v33 = vcombine.high %v45_v30, %v45_v30  ;;  %v15596_v30 = vld [vmem:[#allocation2 + $0x7a0] sm:$0xff]  }
  0x9d   :  { %13932 = vmatpush3.bf16.msra.mxu0 %v15479_v34  ;;  %v12504_v34 = vcombine.low %v46_v31, %v46_v31 }
  0x9e   :  { %13954 = vmatpush3.bf16.msra.mxu1 %v15480_v35  ;;  %13933 = vmatprep.subr.bf16.mxu0 %v15481_v36  ;;  %v12505_v35 = vcombine.high %v46_v31, %v46_v31  ;;  %v15541_v36 = vld [vmem:[#allocation2 + $0x640] sm:$0xff]  }
  0x9f   :  { %13955 = vmatprep.subr.bf16.mxu1 %v15482_v37  ;;  %v15542_v37 = vld [vmem:[#allocation2 + $0x6c0] sm:$0xff]  }
  0xa1   :  { %13934 = vmatpush3.bf16.msra.mxu0 %v15483_v38  ;;  %v15543_v38 = vld [vmem:[#allocation2 + $0x600] sm:$0xff]  }
  0xa2   :  { %13956 = vmatpush3.bf16.msra.mxu1 %v15484_v39  ;;  %13935 = vmatprep.subr.bf16.mxu0 %v15485_v40  ;;  %v15544_v39 = vld [vmem:[#allocation2 + $0x680] sm:$0xff]   ;;  %v15545_v40 = vld [vmem:[#allocation2 + $0x648] sm:$0xff]  }
  0xa3   :  { %13957 = vmatprep.subr.bf16.mxu1 %v15486_v41  ;;  %v15546_v41 = vld [vmem:[#allocation2 + $0x6c8] sm:$0xff]  }
  0xa5   :  { %13936 = vmatpush3.bf16.msra.mxu0 %v15487_v42  ;;  %v15547_v42 = vld [vmem:[#allocation2 + $0x608] sm:$0xff]  }
  0xa6   :  { %13958 = vmatpush3.bf16.msra.mxu1 %v15488_v43  ;;  %13937 = vmatprep.subr.bf16.mxu0 %v15489_v44  ;;  %v15548_v43 = vld [vmem:[#allocation2 + $0x688] sm:$0xff]   ;;  %v15549_v44 = vld [vmem:[#allocation2 + $0x650] sm:$0xff]  }
  0xa7   :  { %13959 = vmatprep.subr.bf16.mxu1 %v15490_v45  ;;  %v15550_v45 = vld [vmem:[#allocation2 + $0x6d0] sm:$0xff]  }
  0xa9   :  { %13938 = vmatpush3.bf16.msra.mxu0 %v15491_v46  ;;  %v15551_v46 = vld [vmem:[#allocation2 + $0x610] sm:$0xff]  }
  0xaa   :  { %13960 = vmatpush3.bf16.msra.mxu1 %v15492_v47  ;;  %13939 = vmatprep.subr.bf16.mxu0 %v15493_v48  ;;  %v15552_v47 = vld [vmem:[#allocation2 + $0x690] sm:$0xff]   ;;  %v15553_v48 = vld [vmem:[#allocation2 + $0x658] sm:$0xff]  }
  0xab   :  { %13961 = vmatprep.subr.bf16.mxu1 %v15494_v49  ;;  %v15554_v49 = vld [vmem:[#allocation2 + $0x6d8] sm:$0xff]  }
  0xad   :  { %13940 = vmatpush3.bf16.msra.mxu0 %v15495_v50  ;;  %v15555_v50 = vld [vmem:[#allocation2 + $0x618] sm:$0xff]  }
  0xae   :  { %13962 = vmatpush3.bf16.msra.mxu1 %v15496_v51  ;;  %13941 = vmatprep.subr.bf16.mxu0 %v15497_v52  ;;  %v15556_v51 = vld [vmem:[#allocation2 + $0x698] sm:$0xff]   ;;  %v15557_v52 = vld [vmem:[#allocation2 + $0x660] sm:$0xff]  }
  0xaf   :  { %13963 = vmatprep.subr.bf16.mxu1 %v15498_v53  ;;  %v15558_v53 = vld [vmem:[#allocation2 + $0x6e0] sm:$0xff]  }
  0xb1   :  { %13942 = vmatpush3.bf16.msra.mxu0 %v15499_v54  ;;  %v15559_v54 = vld [vmem:[#allocation2 + $0x620] sm:$0xff]  }
  0xb2   :  { %13964 = vmatpush3.bf16.msra.mxu1 %v15500_v55  ;;  %13971 = vmatprep.subr.bf16.mxu0 %v15505_v62  ;;  %v15560_v55 = vld [vmem:[#allocation2 + $0x6a0] sm:$0xff]   ;;  %v15567_v62 = vld [vmem:[#allocation2 + $0x630] sm:$0xff]  }
  0xb3   :  { %13993 = vmatprep.subr.bf16.mxu1 %v15506_v63  ;;  %v15568_v63 = vld [vmem:[#allocation2 + $0x6b0] sm:$0xff]  }
  0xb4   :  { %9915 = vmatmul.mubr.bf16.vlgmr.msra.gmra.mrb[16].mxu0 %v12498_v57  ;;  %v15562_v57 = vld [vmem:[#allocation2 + $0x6e8] sm:$0xff]  }
  0xb5   :  { %9955 = vmatmul.mubr.bf16.vlgmr.msra.gmra.mrb[16].mxu1 %v12500_v60  ;;  %13972 = vmatpush3.bf16.msra.mxu0 %v15507_v0  ;;  %v15565_v60 = vld [vmem:[#allocation2 + $0x670] sm:$0xff]   ;;  %v15569_v0 = vld [vmem:[#allocation2 + $0x678] sm:$0xff]  }
  0xb6   :  { %13994 = vmatpush3.bf16.msra.mxu1 %v15508_v1  ;;  %13973 = vmatprep.subr.bf16.mxu0 %v15509_v2  ;;  %v15570_v1 = vld [vmem:[#allocation2 + $0x6f8] sm:$0xff]  }
  0xb7   :  { %13995 = vmatprep.subr.bf16.mxu1 %v15510_v3  ;;  %9994 = vmatprep.mubr.bf16.mxu0 %v12503_v33  ;;  %v15571_v2 = vld [vmem:[#allocation2 + $0x638] sm:$0xff]  }
  0xb8   :  { %10034 = vmatprep.mubr.bf16.mxu1 %v12505_v35  ;;  %v15572_v3 = vld [vmem:[#allocation2 + $0x6b8] sm:$0xff]  }
  0xb9   :  { %13974 = vmatpush3.bf16.msra.mxu0 %v15511_v4  ;;  %v47_v4 = vld [vmem:[%s16988_s0 + $0x60] sm:$0xff] }
  0xba   :  { %13996 = vmatpush3.bf16.msra.mxu1 %v15512_v5  ;;  %13975 = vmatprep.subr.bf16.mxu0 %v15513_v6  ;;  %v48_v5 = vld [vmem:[%s16988_s0 + $0x68] sm:$0xff]  ;;  %v12506_v6 = vcombine.low %v47_v4, %v47_v4 }
  0xbb   :  { %13997 = vmatprep.subr.bf16.mxu1 %v15514_v7  ;;  %v12507_v7 = vcombine.high %v47_v4, %v47_v4  ;;  %v15620_v4 = vld [vmem:[#allocation2 + $0x888] sm:$0xff]  }
  0xbd   :  { %13976 = vmatpush3.bf16.msra.mxu0 %v15515_v8  ;;  %v12508_v8 = vcombine.low %v48_v5, %v48_v5 }
  0xbe   :  { %13998 = vmatpush3.bf16.msra.mxu1 %v15516_v9  ;;  %13977 = vmatprep.subr.bf16.mxu0 %v15517_v10  ;;  %v15577_v9 = vld [vmem:[#allocation2 + $0x740] sm:$0xff]   ;;  %v12509_v10 = vcombine.high %v48_v5, %v48_v5  ;;  %v15621_v5 = vld [vmem:[#allocation2 + $0x850] sm:$0xff]  }
  0xbf   :  { %13999 = vmatprep.subr.bf16.mxu1 %v15518_v11  ;;  %v15578_v11 = vld [vmem:[#allocation2 + $0x7c0] sm:$0xff]  }
  0xc1   :  { %13978 = vmatpush3.bf16.msra.mxu0 %v15519_v12  ;;  %v15579_v12 = vld [vmem:[#allocation2 + $0x700] sm:$0xff]  }
  0xc2   :  { %14000 = vmatpush3.bf16.msra.mxu1 %v15520_v13  ;;  %13979 = vmatprep.subr.bf16.mxu0 %v15521_v14  ;;  %v15580_v13 = vld [vmem:[#allocation2 + $0x780] sm:$0xff]   ;;  %v15581_v14 = vld [vmem:[#allocation2 + $0x748] sm:$0xff]  }
  0xc3   :  { %14001 = vmatprep.subr.bf16.mxu1 %v15522_v15  ;;  %v15582_v15 = vld [vmem:[#allocation2 + $0x7c8] sm:$0xff]  }
  0xc5   :  { %13980 = vmatpush3.bf16.msra.mxu0 %v15523_v16  ;;  %v15583_v16 = vld [vmem:[#allocation2 + $0x708] sm:$0xff]  }
  0xc6   :  { %14002 = vmatpush3.bf16.msra.mxu1 %v15524_v17  ;;  %13981 = vmatprep.subr.bf16.mxu0 %v15525_v18  ;;  %v15584_v17 = vld [vmem:[#allocation2 + $0x788] sm:$0xff]   ;;  %v15585_v18 = vld [vmem:[#allocation2 + $0x750] sm:$0xff]  }
  0xc7   :  { %14003 = vmatprep.subr.bf16.mxu1 %v15526_v19  ;;  %v15586_v19 = vld [vmem:[#allocation2 + $0x7d0] sm:$0xff]  }
  0xc9   :  { %13982 = vmatpush3.bf16.msra.mxu0 %v15527_v20  ;;  %v15587_v20 = vld [vmem:[#allocation2 + $0x710] sm:$0xff]  }
  0xca   :  { %14004 = vmatpush3.bf16.msra.mxu1 %v15528_v21  ;;  %13983 = vmatprep.subr.bf16.mxu0 %v15529_v22  ;;  %v15588_v21 = vld [vmem:[#allocation2 + $0x790] sm:$0xff]   ;;  %v15589_v22 = vld [vmem:[#allocation2 + $0x758] sm:$0xff]  }
  0xcb   :  { %14005 = vmatprep.subr.bf16.mxu1 %v15530_v23  ;;  %v15590_v23 = vld [vmem:[#allocation2 + $0x7d8] sm:$0xff]  }
  0xcd   :  { %13984 = vmatpush3.bf16.msra.mxu0 %v15531_v24  ;;  %v15591_v24 = vld [vmem:[#allocation2 + $0x718] sm:$0xff]  }
  0xce   :  { %14006 = vmatpush3.bf16.msra.mxu1 %v15532_v25  ;;  %13985 = vmatprep.subr.bf16.mxu0 %v15533_v26  ;;  %v15592_v25 = vld [vmem:[#allocation2 + $0x798] sm:$0xff]   ;;  %v15593_v26 = vld [vmem:[#allocation2 + $0x760] sm:$0xff]  }
  0xcf   :  { %14007 = vmatprep.subr.bf16.mxu1 %v15534_v27  ;;  %v15594_v27 = vld [vmem:[#allocation2 + $0x7e0] sm:$0xff]  }
  0xd1   :  { %13986 = vmatpush3.bf16.msra.mxu0 %v15535_v28  ;;  %v15595_v28 = vld [vmem:[#allocation2 + $0x720] sm:$0xff]  }
  0xd2   :  { %14008 = vmatpush3.bf16.msra.mxu1 %v15536_v29  ;;  %14015 = vmatprep.subr.bf16.mxu0 %v15541_v36 }
  0xd3   :  { %14037 = vmatprep.subr.bf16.mxu1 %v15542_v37  ;;  %v15597_v37 = vld [vmem:[#allocation2 + $0x768] sm:$0xff]  }
  0xd4   :  { %9995 = vmatmul.mubr.bf16.vlgmr.msra.gmra.mrb[20].mxu0 %v12502_v32  ;;  %v12481_v32 = vld [vmem:[%s16990_s2] ss:$0 sm:$0xff] }
  0xd5   :  { %10035 = vmatmul.mubr.bf16.vlgmr.msra.gmra.mrb[20].mxu1 %v12504_v34  ;;  %14016 = vmatpush3.bf16.msra.mxu0 %v15543_v38 }
  0xd6   :  { %14038 = vmatpush3.bf16.msra.mxu1 %v15544_v39  ;;  %14017 = vmatprep.subr.bf16.mxu0 %v15545_v40  ;;  %v15598_v39 = vld [vmem:[#allocation2 + $0x7e8] sm:$0xff]  }
  0xd7   :  { %14039 = vmatprep.subr.bf16.mxu1 %v15546_v41  ;;  %10074 = vmatprep.mubr.bf16.mxu0 %v12507_v7  ;;  %v15623_v7 = vld [vmem:[#allocation2 + $0x810] sm:$0xff]  }
  0xd8   :  { %10114 = vmatprep.mubr.bf16.mxu1 %v12509_v10  ;;  %v15626_v10 = vld [vmem:[#allocation2 + $0x8d8] sm:$0xff]  }
  0xd9   :  { %14018 = vmatpush3.bf16.msra.mxu0 %v15547_v42  ;;  %v15599_v42 = vld [vmem:[#allocation2 + $0x728] sm:$0xff]  }
  0xda   :  { %14040 = vmatpush3.bf16.msra.mxu1 %v15548_v43  ;;  %14019 = vmatprep.subr.bf16.mxu0 %v15549_v44  ;;  %v15600_v44 = vld [vmem:[#allocation2 + $0x7a8] sm:$0xff]  }
  0xdb   :  { %14041 = vmatprep.subr.bf16.mxu1 %v15550_v45 }
  0xdd   :  { %14020 = vmatpush3.bf16.msra.mxu0 %v15551_v46 }
  0xde   :  { %14042 = vmatpush3.bf16.msra.mxu1 %v15552_v47  ;;  %14021 = vmatprep.subr.bf16.mxu0 %v15553_v48  ;;  %v15601_v47 = vld [vmem:[#allocation2 + $0x770] sm:$0xff]  }
  0xdf   :  { %14043 = vmatprep.subr.bf16.mxu1 %v15554_v49  ;;  %v15602_v48 = vld [vmem:[#allocation2 + $0x7f0] sm:$0xff]  }
  0xe0   :  { %v15603_v49 = vld [vmem:[#allocation2 + $0x730] sm:$0xff]  }
  0xe1   :  { %14022 = vmatpush3.bf16.msra.mxu0 %v15555_v50  ;;  %v15604_v50 = vld [vmem:[#allocation2 + $0x7b0] sm:$0xff]  }
  0xe2   :  { %14044 = vmatpush3.bf16.msra.mxu1 %v15556_v51  ;;  %14023 = vmatprep.subr.bf16.mxu0 %v15557_v52  ;;  %v15605_v51 = vld [vmem:[#allocation2 + $0x778] sm:$0xff]  }
  0xe3   :  { %14045 = vmatprep.subr.bf16.mxu1 %v15558_v53  ;;  %v15606_v52 = vld [vmem:[#allocation2 + $0x7f8] sm:$0xff]  }
  0xe4   :  { %v15607_v53 = vld [vmem:[#allocation2 + $0x738] sm:$0xff]  }
  0xe5   :  { %14024 = vmatpush3.bf16.msra.mxu0 %v15559_v54  ;;  %v15608_v54 = vld [vmem:[#allocation2 + $0x7b8] sm:$0xff]  }
  0xe6   :  { %14046 = vmatpush3.bf16.msra.mxu1 %v15560_v55  ;;  %14025 = vmatprep.subr.bf16.mxu0 %v15561_v56  ;;  %v49_v55 = vld [vmem:[%s16988_s0 + $0x70] sm:$0xff]  ;;  %v50_v56 = vld [vmem:[%s16988_s0 + $0x78] sm:$0xff] }
  0xe7   :  { %14047 = vmatprep.subr.bf16.mxu1 %v15562_v57  ;;  %v12510_v57 = vcombine.low %v49_v55, %v49_v55 }
  0xe9   :  { %14026 = vmatpush3.bf16.msra.mxu0 %v15563_v58  ;;  %v12511_v58 = vcombine.high %v49_v55, %v49_v55  ;;  %v15657_v55 = vld [vmem:[#allocation2 + $0x950] sm:$0xff]  }
  0xea   :  { %14048 = vmatpush3.bf16.msra.mxu1 %v15564_v59  ;;  %14027 = vmatprep.subr.bf16.mxu0 %v15565_v60  ;;  %v12512_v59 = vcombine.low %v50_v56, %v50_v56  ;;  %v12513_v60 = vcombine.high %v50_v56, %v50_v56  ;;  %v15658_v56 = vld [vmem:[#allocation2 + $0x9d0] sm:$0xff]  }
  0xeb   :  { %14049 = vmatprep.subr.bf16.mxu1 %v15566_v61  ;;  %v15613_v61 = vld [vmem:[#allocation2 + $0x840] sm:$0xff]  }
  0xed   :  { %14028 = vmatpush3.bf16.msra.mxu0 %v15567_v62  ;;  %v15614_v62 = vld [vmem:[#allocation2 + $0x8c0] sm:$0xff]  }
  0xee   :  { %14050 = vmatpush3.bf16.msra.mxu1 %v15568_v63  ;;  %14029 = vmatprep.subr.bf16.mxu0 %v15569_v0  ;;  %v15615_v63 = vld [vmem:[#allocation2 + $0x800] sm:$0xff]  }
  0xef   :  { %14051 = vmatprep.subr.bf16.mxu1 %v15570_v1  ;;  %v15616_v0 = vld [vmem:[#allocation2 + $0x880] sm:$0xff]   ;;  %v15617_v1 = vld [vmem:[#allocation2 + $0x848] sm:$0xff]  }
  0xf1   :  { %14030 = vmatpush3.bf16.msra.mxu0 %v15571_v2  ;;  %v15618_v2 = vld [vmem:[#allocation2 + $0x8c8] sm:$0xff]  }
  0xf2   :  { %14052 = vmatpush3.bf16.msra.mxu1 %v15572_v3  ;;  %14059 = vmatprep.subr.bf16.mxu0 %v15577_v9  ;;  %v15619_v3 = vld [vmem:[#allocation2 + $0x808] sm:$0xff]   ;;  %v15625_v9 = vld [vmem:[#allocation2 + $0x858] sm:$0xff]  }
  0xf3   :  { %14081 = vmatprep.subr.bf16.mxu1 %v15578_v11  ;;  %v15627_v11 = vld [vmem:[#allocation2 + $0x818] sm:$0xff]  }
  0xf4   :  { %10075 = vmatmul.mubr.bf16.vlgmr.msra.gmra.mrb[24].mxu0 %v12506_v6  ;;  %v15622_v6 = vld [vmem:[#allocation2 + $0x8d0] sm:$0xff]  }
  0xf5   :  { %10115 = vmatmul.mubr.bf16.vlgmr.msra.gmra.mrb[24].mxu1 %v12508_v8  ;;  %14060 = vmatpush3.bf16.msra.mxu0 %v15579_v12  ;;  %v15624_v8 = vld [vmem:[#allocation2 + $0x890] sm:$0xff]   ;;  %v15628_v12 = vld [vmem:[#allocation2 + $0x898] sm:$0xff]  }
  0xf6   :  { %14082 = vmatpush3.bf16.msra.mxu1 %v15580_v13  ;;  %14061 = vmatprep.subr.bf16.mxu0 %v15581_v14  ;;  %v15629_v13 = vld [vmem:[#allocation2 + $0x860] sm:$0xff]  }
  0xf7   :  { %14083 = vmatprep.subr.bf16.mxu1 %v15582_v15  ;;  %10154 = vmatprep.mubr.bf16.mxu0 %v12511_v58  ;;  %v15630_v14 = vld [vmem:[#allocation2 + $0x8e0] sm:$0xff]   ;;  %v15660_v58 = vld [vmem:[#allocation2 + $0x990] sm:$0xff]  }
  0xf8   :  { %10194 = vmatprep.mubr.bf16.mxu1 %v12513_v60  ;;  %v15631_v15 = vld [vmem:[#allocation2 + $0x820] sm:$0xff]   ;;  %v15662_v60 = vld [vmem:[#allocation2 + $0x9d8] sm:$0xff]  }
  0xf9   :  { %14062 = vmatpush3.bf16.msra.mxu0 %v15583_v16 }
  0xfa   :  { %14084 = vmatpush3.bf16.msra.mxu1 %v15584_v17  ;;  %14063 = vmatprep.subr.bf16.mxu0 %v15585_v18  ;;  %v15632_v17 = vld [vmem:[#allocation2 + $0x8a0] sm:$0xff]  }
  0xfb   :  { %14085 = vmatprep.subr.bf16.mxu1 %v15586_v19 }
  0xfd   :  { %14064 = vmatpush3.bf16.msra.mxu0 %v15587_v20 }
  0xfe   :  { %14086 = vmatpush3.bf16.msra.mxu1 %v15588_v21  ;;  %14065 = vmatprep.subr.bf16.mxu0 %v15589_v22 }
  0xff   :  { %14087 = vmatprep.subr.bf16.mxu1 %v15590_v23  ;;  %v15633_v23 = vld [vmem:[#allocation2 + $0x868] sm:$0xff]  }
 0x101   :  { %14066 = vmatpush3.bf16.msra.mxu0 %v15591_v24 }
 0x102   :  { %14088 = vmatpush3.bf16.msra.mxu1 %v15592_v25  ;;  %14067 = vmatprep.subr.bf16.mxu0 %v15593_v26  ;;  %v15634_v25 = vld [vmem:[#allocation2 + $0x8e8] sm:$0xff]  }
 0x103   :  { %14089 = vmatprep.subr.bf16.mxu1 %v15594_v27 }
 0x105   :  { %14068 = vmatpush3.bf16.msra.mxu0 %v15595_v28  ;;  %v15635_v28 = vld [vmem:[#allocation2 + $0x828] sm:$0xff]  }
 0x106   :  { %14090 = vmatpush3.bf16.msra.mxu1 %v15596_v30  ;;  %14069 = vmatprep.subr.bf16.mxu0 %v15597_v37  ;;  %v15636_v30 = vld [vmem:[#allocation2 + $0x8a8] sm:$0xff]   ;;  %v15641_v37 = vld [vmem:[#allocation2 + $0x878] sm:$0xff]  }
 0x107   :  { %v13767_v29 = vpop.f32.mrb[0].mxu0  ;;  %14091 = vmatprep.subr.bf16.mxu1 %v15598_v39  ;;  %v15643_v39 = vld [vmem:[#allocation2 + $0x838] sm:$0xff]  }
 0x108   :  { %v13789_v31 = vpop.f32.mrb[0].mxu1  ;;  %v13768_v33 = vpop.f32.mrb[1].mxu0 }
 0x109   :  { %v13790_v34 = vpop.f32.mrb[1].mxu1  ;;  %v13769_v35 = vadd.f32 %v13768_v33, %v13767_v29  ;;  %v13770_v38 = vpop.f32.mrb[2].mxu0  ;;  %14070 = vmatpush3.bf16.msra.mxu0 %v15599_v42  ;;  %v15637_v33 = vld [vmem:[#allocation2 + $0x870] sm:$0xff]   ;;  %v52_v42 = vld [vmem:[%s16988_s0 + $0x88] sm:$0xff] }
 0x10a   :  { %v13791_v36 = vadd.f32 %v13790_v34, %v13789_v31  ;;  %v13792_v40 = vpop.f32.mrb[2].mxu1  ;;  %v13771_v43 = vpop.f32.mrb[3].mxu0  ;;  %14092 = vmatpush3.bf16.msra.mxu1 %v15600_v44  ;;  %14071 = vmatprep.subr.bf16.mxu0 %v15601_v47  ;;  %v15638_v34 = vld [vmem:[#allocation2 + $0x8f0] sm:$0xff]   ;;  %v15642_v38 = vld [vmem:[#allocation2 + $0x8f8] sm:$0xff]   ;;  %v15649_v47 = vld [vmem:[#allocation2 + $0x940] sm:$0xff]  }
 0x10b   :  { %v9597_v41 = vadd.f32 %v13769_v35, %v12481_v32  ;;  %v13793_v45 = vpop.f32.mrb[3].mxu1  ;;  %14093 = vmatprep.subr.bf16.mxu1 %v15602_v48  ;;  %v15639_v35 = vld [vmem:[#allocation2 + $0x830] sm:$0xff]   ;;  %v15644_v40 = vld [vmem:[#allocation2 + $0x8b8] sm:$0xff]   ;;  %v15650_v48 = vld [vmem:[#allocation2 + $0x9c0] sm:$0xff]  }
 0x10c   :  { %v12516_v45 = vcombine.low %v52_v42, %v52_v42 }
 0x10d   :  { %v16709_v46 = vadd.f32 %v13791_v36, %v9597_v41  ;;  %14072 = vmatpush3.bf16.msra.mxu0 %v15603_v49  ;;  %v15640_v36 = vld [vmem:[#allocation2 + $0x8b0] sm:$0xff]   ;;  %v51_v41 = vld [vmem:[%s16988_s0 + $0x80] sm:$0xff] }
 0x10e   :  { %14094 = vmatpush3.bf16.msra.mxu1 %v15604_v50  ;;  %14073 = vmatprep.subr.bf16.mxu0 %v15605_v51  ;;  %v12514_v43 = vcombine.low %v51_v41, %v51_v41  ;;  %v12515_v44 = vcombine.high %v51_v41, %v51_v41  ;;  %v15651_v49 = vld [vmem:[#allocation2 + $0x900] sm:$0xff]   ;;  %v15653_v51 = vld [vmem:[#allocation2 + $0x948] sm:$0xff]   ;;  %v15693_v41 = vld [vmem:[#allocation2 + $0xa50] sm:$0xff]  }
 0x10f   :  { %14095 = vmatprep.subr.bf16.mxu1 %v15606_v52  ;;  %v15652_v50 = vld [vmem:[#allocation2 + $0x980] sm:$0xff]   ;;  %v15654_v52 = vld [vmem:[#allocation2 + $0x9c8] sm:$0xff]  }
 0x111   :  { %14074 = vmatpush3.bf16.msra.mxu0 %v15607_v53  ;;  %v15655_v53 = vld [vmem:[#allocation2 + $0x908] sm:$0xff]  }
 0x112   :  { %14096 = vmatpush3.bf16.msra.mxu1 %v15608_v54  ;;  %14103 = vmatprep.subr.bf16.mxu0 %v15613_v61  ;;  %v15656_v54 = vld [vmem:[#allocation2 + $0x988] sm:$0xff]   ;;  %v15663_v61 = vld [vmem:[#allocation2 + $0x918] sm:$0xff]  }
 0x113   :  { %14125 = vmatprep.subr.bf16.mxu1 %v15614_v62  ;;  %v15664_v62 = vld [vmem:[#allocation2 + $0x998] sm:$0xff]  }
 0x114   :  { %10155 = vmatmul.mubr.bf16.vlgmr.msra.gmra.mrb[28].mxu0 %v12510_v57  ;;  %v15659_v57 = vld [vmem:[#allocation2 + $0x910] sm:$0xff]  }
 0x115   :  { %10195 = vmatmul.mubr.bf16.vlgmr.msra.gmra.mrb[28].mxu1 %v12512_v59  ;;  %14104 = vmatpush3.bf16.msra.mxu0 %v15615_v63  ;;  %v15661_v59 = vld [vmem:[#allocation2 + $0x958] sm:$0xff]   ;;  %v15665_v63 = vld [vmem:[#allocation2 + $0x960] sm:$0xff]  }
 0x116   :  { %14126 = vmatpush3.bf16.msra.mxu1 %v15616_v0  ;;  %14105 = vmatprep.subr.bf16.mxu0 %v15617_v1  ;;  %v15666_v0 = vld [vmem:[#allocation2 + $0x9e0] sm:$0xff]  }
 0x117   :  { %14127 = vmatprep.subr.bf16.mxu1 %v15618_v2  ;;  %10234 = vmatprep.mubr.bf16.mxu0 %v12515_v44  ;;  %v15667_v2 = vld [vmem:[#allocation2 + $0x920] sm:$0xff]   ;;  %v15696_v44 = vld [vmem:[#allocation2 + $0xa90] sm:$0xff]  }
 0x119   :  { %14106 = vmatpush3.bf16.msra.mxu0 %v15619_v3 }
 0x11a   :  { %14128 = vmatpush3.bf16.msra.mxu1 %v15620_v4  ;;  %14107 = vmatprep.subr.bf16.mxu0 %v15621_v5  ;;  %v15668_v4 = vld [vmem:[#allocation2 + $0x9a0] sm:$0xff]  }
 0x11b   :  { %14129 = vmatprep.subr.bf16.mxu1 %v15622_v6 }
 0x11d   :  { %14108 = vmatpush3.bf16.msra.mxu0 %v15623_v7 }
 0x11e   :  { %14130 = vmatpush3.bf16.msra.mxu1 %v15624_v8  ;;  %14109 = vmatprep.subr.bf16.mxu0 %v15625_v9  ;;  %v15669_v8 = vld [vmem:[#allocation2 + $0x968] sm:$0xff]  }
 0x11f   :  { %14131 = vmatprep.subr.bf16.mxu1 %v15626_v10  ;;  %v15670_v10 = vld [vmem:[#allocation2 + $0x9e8] sm:$0xff]  }
 0x121   :  { %14110 = vmatpush3.bf16.msra.mxu0 %v15627_v11 }
 0x122   :  { %14132 = vmatpush3.bf16.msra.mxu1 %v15628_v12  ;;  %14111 = vmatprep.subr.bf16.mxu0 %v15629_v13 }
 0x123   :  { %14133 = vmatprep.subr.bf16.mxu1 %v15630_v14  ;;  %v15671_v14 = vld [vmem:[#allocation2 + $0x928] sm:$0xff]  }
 0x125   :  { %14112 = vmatpush3.bf16.msra.mxu0 %v15631_v15  ;;  %v15672_v15 = vld [vmem:[#allocation2 + $0x9a8] sm:$0xff]  }
 0x126   :  { %14134 = vmatpush3.bf16.msra.mxu1 %v15632_v17  ;;  %14113 = vmatprep.subr.bf16.mxu0 %v15633_v23  ;;  %v15677_v23 = vld [vmem:[#allocation2 + $0x978] sm:$0xff]  }
 0x127   :  { %v13811_v16 = vpop.f32.mrb[4].mxu0  ;;  %14135 = vmatprep.subr.bf16.mxu1 %v15634_v25  ;;  %v15679_v25 = vld [vmem:[#allocation2 + $0x938] sm:$0xff]  }
 0x128   :  { %v13833_v18 = vpop.f32.mrb[4].mxu1  ;;  %v13812_v19 = vpop.f32.mrb[5].mxu0 }
 0x129   :  { %v13834_v20 = vpop.f32.mrb[5].mxu1  ;;  %v13813_v21 = vadd.f32 %v13812_v19, %v13811_v16  ;;  %v13814_v24 = vpop.f32.mrb[6].mxu0  ;;  %14114 = vmatpush3.bf16.msra.mxu0 %v15635_v28  ;;  %v15673_v19 = vld [vmem:[#allocation2 + $0x970] sm:$0xff]   ;;  %v54_v28 = vld [vmem:[%s16988_s0 + $0x98] sm:$0xff] }
 0x12a   :  { %v13835_v22 = vadd.f32 %v13834_v20, %v13833_v18  ;;  %v13836_v26 = vpop.f32.mrb[6].mxu1  ;;  %v13815_v29 = vpop.f32.mrb[7].mxu0  ;;  %14136 = vmatpush3.bf16.msra.mxu1 %v15636_v30  ;;  %14115 = vmatprep.subr.bf16.mxu0 %v15637_v33  ;;  %v15674_v20 = vld [vmem:[#allocation2 + $0x9f0] sm:$0xff]   ;;  %v15678_v24 = vld [vmem:[#allocation2 + $0x9f8] sm:$0xff]   ;;  %v12521_v33 = vcombine.high %v54_v28, %v54_v28 }
 0x12b   :  { %v9677_v27 = vadd.f32 %v13813_v21, %v16709_v46  ;;  %v13837_v31 = vpop.f32.mrb[7].mxu1  ;;  %14137 = vmatprep.subr.bf16.mxu1 %v15638_v34  ;;  %v12517_v46 = vcombine.high %v52_v42, %v52_v42  ;;  %v15675_v21 = vld [vmem:[#allocation2 + $0x930] sm:$0xff]   ;;  %v15680_v26 = vld [vmem:[#allocation2 + $0x9b8] sm:$0xff]   ;;  %v15686_v34 = vld [vmem:[#allocation2 + $0xac0] sm:$0xff]  }
 0x12c   :  { %v12520_v31 = vcombine.low %v54_v28, %v54_v28  ;;  %v15694_v42 = vld [vmem:[#allocation2 + $0xad0] sm:$0xff]  }
 0x12d   :  { %v16718_v32 = vadd.f32 %v13835_v22, %v9677_v27  ;;  %14116 = vmatpush3.bf16.msra.mxu0 %v15639_v35  ;;  %10274 = vmatprep.mubr.bf16.mxu1 %v12517_v46  ;;  %v15676_v22 = vld [vmem:[#allocation2 + $0x9b0] sm:$0xff]   ;;  %v15687_v35 = vld [vmem:[#allocation2 + $0xa00] sm:$0xff]   ;;  %v15698_v46 = vld [vmem:[#allocation2 + $0xad8] sm:$0xff]  }
 0x12e   :  { %14138 = vmatpush3.bf16.msra.mxu1 %v15640_v36  ;;  %14117 = vmatprep.subr.bf16.mxu0 %v15641_v37  ;;  %v53_v27 = vld [vmem:[%s16988_s0 + $0x90] sm:$0xff]  ;;  %v15688_v36 = vld [vmem:[#allocation2 + $0xa80] sm:$0xff]   ;;  %v15689_v37 = vld [vmem:[#allocation2 + $0xa48] sm:$0xff]  }
 0x12f   :  { %14139 = vmatprep.subr.bf16.mxu1 %v15642_v38  ;;  %v12518_v29 = vcombine.low %v53_v27, %v53_v27  ;;  %v12519_v30 = vcombine.high %v53_v27, %v53_v27  ;;  %v15690_v38 = vld [vmem:[#allocation2 + $0xac8] sm:$0xff]   ;;  %v15729_v27 = vld [vmem:[#allocation2 + $0xb50] sm:$0xff]  }
 0x130   :  { %v15730_v28 = vld [vmem:[#allocation2 + $0xbd0] sm:$0xff]  }
 0x131   :  { %14118 = vmatpush3.bf16.msra.mxu0 %v15643_v39  ;;  %v15691_v39 = vld [vmem:[#allocation2 + $0xa08] sm:$0xff]  }
 0x132   :  { %14140 = vmatpush3.bf16.msra.mxu1 %v15644_v40  ;;  %14147 = vmatprep.subr.bf16.mxu0 %v15649_v47  ;;  %v15692_v40 = vld [vmem:[#allocation2 + $0xa88] sm:$0xff]   ;;  %v15699_v47 = vld [vmem:[#allocation2 + $0xa18] sm:$0xff]  }
 0x133   :  { %14169 = vmatprep.subr.bf16.mxu1 %v15650_v48  ;;  %v15700_v48 = vld [vmem:[#allocation2 + $0xa98] sm:$0xff]  }
 0x134   :  { %10235 = vmatmul.mubr.bf16.vlgmr.msra.gmra.mrb[32].mxu0 %v12514_v43  ;;  %v15695_v43 = vld [vmem:[#allocation2 + $0xa10] sm:$0xff]  }
 0x135   :  { %10275 = vmatmul.mubr.bf16.vlgmr.msra.gmra.mrb[32].mxu1 %v12516_v45  ;;  %14148 = vmatpush3.bf16.msra.mxu0 %v15651_v49  ;;  %v15697_v45 = vld [vmem:[#allocation2 + $0xa58] sm:$0xff]   ;;  %v15701_v49 = vld [vmem:[#allocation2 + $0xa60] sm:$0xff]  }
 0x136   :  { %14170 = vmatpush3.bf16.msra.mxu1 %v15652_v50  ;;  %14149 = vmatprep.subr.bf16.mxu0 %v15653_v51  ;;  %v15702_v50 = vld [vmem:[#allocation2 + $0xae0] sm:$0xff]  }
 0x137   :  { %14171 = vmatprep.subr.bf16.mxu1 %v15654_v52  ;;  %10314 = vmatprep.mubr.bf16.mxu0 %v12519_v30  ;;  %v15703_v52 = vld [vmem:[#allocation2 + $0xa20] sm:$0xff]   ;;  %v15732_v30 = vld [vmem:[#allocation2 + $0xb90] sm:$0xff]  }
 0x138   :  { %10354 = vmatprep.mubr.bf16.mxu1 %v12521_v33  ;;  %v15735_v33 = vld [vmem:[#allocation2 + $0xb18] sm:$0xff]  }
 0x139   :  { %14150 = vmatpush3.bf16.msra.mxu0 %v15655_v53 }
 0x13a   :  { %14172 = vmatpush3.bf16.msra.mxu1 %v15656_v54  ;;  %14151 = vmatprep.subr.bf16.mxu0 %v15657_v55  ;;  %v15704_v54 = vld [vmem:[#allocation2 + $0xaa0] sm:$0xff]  }
 0x13b   :  { %14173 = vmatprep.subr.bf16.mxu1 %v15658_v56 }
 0x13d   :  { %14152 = vmatpush3.bf16.msra.mxu0 %v15659_v57  ;;  %v15705_v57 = vld [vmem:[#allocation2 + $0xa68] sm:$0xff]  }
 0x13e   :  { %14174 = vmatpush3.bf16.msra.mxu1 %v15660_v58  ;;  %14153 = vmatprep.subr.bf16.mxu0 %v15661_v59 }
 0x13f   :  { %14175 = vmatprep.subr.bf16.mxu1 %v15662_v60  ;;  %v15706_v60 = vld [vmem:[#allocation2 + $0xae8] sm:$0xff]  }
 0x141   :  { %14154 = vmatpush3.bf16.msra.mxu0 %v15663_v61 }
 0x142   :  { %14176 = vmatpush3.bf16.msra.mxu1 %v15664_v62  ;;  %14155 = vmatprep.subr.bf16.mxu0 %v15665_v63  ;;  %v15707_v63 = vld [vmem:[#allocation2 + $0xa28] sm:$0xff]  }
 0x143   :  { %14177 = vmatprep.subr.bf16.mxu1 %v15666_v0 }
 0x145   :  { %14156 = vmatpush3.bf16.msra.mxu0 %v15667_v2 }
 0x146   :  { %14178 = vmatpush3.bf16.msra.mxu1 %v15668_v4  ;;  %14157 = vmatprep.subr.bf16.mxu0 %v15669_v8  ;;  %v15709_v4 = vld [vmem:[#allocation2 + $0xa70] sm:$0xff]  }
 0x147   :  { %v13855_v1 = vpop.f32.mrb[8].mxu0  ;;  %14179 = vmatprep.subr.bf16.mxu1 %v15670_v10  ;;  %v15712_v8 = vld [vmem:[#allocation2 + $0xab0] sm:$0xff]   ;;  %v15714_v10 = vld [vmem:[#allocation2 + $0xaf8] sm:$0xff]  }
 0x148   :  { %v13877_v3 = vpop.f32.mrb[8].mxu1  ;;  %v13856_v5 = vpop.f32.mrb[9].mxu0 }
 0x149   :  { %v13857_v6 = vadd.f32 %v13856_v5, %v13855_v1  ;;  %v13878_v7 = vpop.f32.mrb[9].mxu1  ;;  %v13858_v11 = vpop.f32.mrb[10].mxu0  ;;  %14158 = vmatpush3.bf16.msra.mxu0 %v15671_v14  ;;  %v15708_v1 = vld [vmem:[#allocation2 + $0xaa8] sm:$0xff]  }
 0x14a   :  { %v13879_v9 = vadd.f32 %v13878_v7, %v13877_v3  ;;  %v13880_v13 = vpop.f32.mrb[10].mxu1  ;;  %v13859_v16 = vpop.f32.mrb[11].mxu0  ;;  %14180 = vmatpush3.bf16.msra.mxu1 %v15672_v15  ;;  %14159 = vmatprep.subr.bf16.mxu0 %v15673_v19  ;;  %v15711_v7 = vld [vmem:[#allocation2 + $0xa30] sm:$0xff]   ;;  %v15715_v11 = vld [vmem:[#allocation2 + $0xa38] sm:$0xff]   ;;  %v15721_v19 = vld [vmem:[#allocation2 + $0xb40] sm:$0xff]  }
 0x14b   :  { %v9757_v12 = vadd.f32 %v13857_v6, %v16718_v32  ;;  %v13881_v18 = vpop.f32.mrb[11].mxu1  ;;  %14181 = vmatprep.subr.bf16.mxu1 %v15674_v20  ;;  %v15685_v32 = vld [vmem:[#allocation2 + $0xa40] sm:$0xff]   ;;  %v15710_v6 = vld [vmem:[#allocation2 + $0xaf0] sm:$0xff]   ;;  %v56_v16 = vld [vmem:[%s16988_s0 + $0xa8] sm:$0xff] }
 0x14c   :  { %v55_v13 = vld [vmem:[%s16988_s0 + $0xa0] sm:$0xff]  ;;  %v12525_v18 = vcombine.high %v56_v16, %v56_v16 }
 0x14d   :  { %v16727_v17 = vadd.f32 %v13879_v9, %v9757_v12  ;;  %14160 = vmatpush3.bf16.msra.mxu0 %v15675_v21  ;;  %v15713_v9 = vld [vmem:[#allocation2 + $0xa78] sm:$0xff]   ;;  %v12522_v14 = vcombine.low %v55_v13, %v55_v13  ;;  %v12523_v15 = vcombine.high %v55_v13, %v55_v13  ;;  %v15722_v20 = vld [vmem:[#allocation2 + $0xbc0] sm:$0xff]   ;;  %v15765_v13 = vld [vmem:[#allocation2 + $0xc50] sm:$0xff]  }
 0x14e   :  { %14182 = vmatpush3.bf16.msra.mxu1 %v15676_v22  ;;  %14161 = vmatprep.subr.bf16.mxu0 %v15677_v23  ;;  %v15716_v12 = vld [vmem:[#allocation2 + $0xab8] sm:$0xff]   ;;  %v15723_v21 = vld [vmem:[#allocation2 + $0xb00] sm:$0xff]   ;;  %v15725_v23 = vld [vmem:[#allocation2 + $0xb48] sm:$0xff]  }
 0x14f   :  { %14183 = vmatprep.subr.bf16.mxu1 %v15678_v24  ;;  %v15724_v22 = vld [vmem:[#allocation2 + $0xb80] sm:$0xff]   ;;  %v15726_v24 = vld [vmem:[#allocation2 + $0xbc8] sm:$0xff]  }
 0x151   :  { %14162 = vmatpush3.bf16.msra.mxu0 %v15679_v25  ;;  %v15727_v25 = vld [vmem:[#allocation2 + $0xb08] sm:$0xff]  }
 0x152   :  { %14184 = vmatpush3.bf16.msra.mxu1 %v15680_v26  ;;  %14191 = vmatprep.subr.bf16.mxu0 %v15685_v32  ;;  %v15728_v26 = vld [vmem:[#allocation2 + $0xb88] sm:$0xff]   ;;  %v15734_v32 = vld [vmem:[#allocation2 + $0xbd8] sm:$0xff]  }
 0x153   :  { %14213 = vmatprep.subr.bf16.mxu1 %v15686_v34  ;;  %v15736_v34 = vld [vmem:[#allocation2 + $0xb98] sm:$0xff]  }
 0x154   :  { %10315 = vmatmul.mubr.bf16.vlgmr.msra.gmra.mrb[36].mxu0 %v12518_v29  ;;  %v15731_v29 = vld [vmem:[#allocation2 + $0xb10] sm:$0xff]  }
 0x155   :  { %10355 = vmatmul.mubr.bf16.vlgmr.msra.gmra.mrb[36].mxu1 %v12520_v31  ;;  %14192 = vmatpush3.bf16.msra.mxu0 %v15687_v35  ;;  %v15733_v31 = vld [vmem:[#allocation2 + $0xb58] sm:$0xff]   ;;  %v15737_v35 = vld [vmem:[#allocation2 + $0xb60] sm:$0xff]  }
 0x156   :  { %14214 = vmatpush3.bf16.msra.mxu1 %v15688_v36  ;;  %14193 = vmatprep.subr.bf16.mxu0 %v15689_v37  ;;  %v15738_v36 = vld [vmem:[#allocation2 + $0xbe0] sm:$0xff]  }
 0x157   :  { %14215 = vmatprep.subr.bf16.mxu1 %v15690_v38  ;;  %10394 = vmatprep.mubr.bf16.mxu0 %v12523_v15  ;;  %v15739_v38 = vld [vmem:[#allocation2 + $0xb20] sm:$0xff]   ;;  %v15767_v15 = vld [vmem:[#allocation2 + $0xc10] sm:$0xff]  }
 0x158   :  { %10434 = vmatprep.mubr.bf16.mxu1 %v12525_v18  ;;  %v15770_v18 = vld [vmem:[#allocation2 + $0xcd8] sm:$0xff]  }
 0x159   :  { %14194 = vmatpush3.bf16.msra.mxu0 %v15691_v39 }
 0x15a   :  { %14216 = vmatpush3.bf16.msra.mxu1 %v15692_v40  ;;  %14195 = vmatprep.subr.bf16.mxu0 %v15693_v41  ;;  %v15740_v40 = vld [vmem:[#allocation2 + $0xba0] sm:$0xff]  }
 0x15b   :  { %14217 = vmatprep.subr.bf16.mxu1 %v15694_v42 }
 0x15d   :  { %14196 = vmatpush3.bf16.msra.mxu0 %v15695_v43  ;;  %v15741_v43 = vld [vmem:[#allocation2 + $0xb68] sm:$0xff]  }
 0x15e   :  { %14218 = vmatpush3.bf16.msra.mxu1 %v15696_v44  ;;  %14197 = vmatprep.subr.bf16.mxu0 %v15697_v45 }
 0x15f   :  { %14219 = vmatprep.subr.bf16.mxu1 %v15698_v46  ;;  %v15742_v46 = vld [vmem:[#allocation2 + $0xbe8] sm:$0xff]  }
 0x161   :  { %14198 = vmatpush3.bf16.msra.mxu0 %v15699_v47 }
 0x162   :  { %14220 = vmatpush3.bf16.msra.mxu1 %v15700_v48  ;;  %14199 = vmatprep.subr.bf16.mxu0 %v15701_v49  ;;  %v15743_v49 = vld [vmem:[#allocation2 + $0xb28] sm:$0xff]  }
 0x163   :  { %14221 = vmatprep.subr.bf16.mxu1 %v15702_v50 }
 0x165   :  { %14200 = vmatpush3.bf16.msra.mxu0 %v15703_v52 }
 0x166   :  { %14222 = vmatpush3.bf16.msra.mxu1 %v15704_v54  ;;  %14201 = vmatprep.subr.bf16.mxu0 %v15705_v57  ;;  %v15745_v54 = vld [vmem:[#allocation2 + $0xb70] sm:$0xff]  }
 0x167   :  { %v13899_v51 = vpop.f32.mrb[12].mxu0  ;;  %14223 = vmatprep.subr.bf16.mxu1 %v15706_v60  ;;  %v15747_v57 = vld [vmem:[#allocation2 + $0xb30] sm:$0xff]   ;;  %v15750_v60 = vld [vmem:[#allocation2 + $0xbf8] sm:$0xff]  }
 0x168   :  { %v13921_v53 = vpop.f32.mrb[12].mxu1  ;;  %v13900_v55 = vpop.f32.mrb[13].mxu0 }
 0x169   :  { %v13922_v56 = vpop.f32.mrb[13].mxu1  ;;  %v13901_v58 = vadd.f32 %v13900_v55, %v13899_v51  ;;  %v13902_v61 = vpop.f32.mrb[14].mxu0  ;;  %14202 = vmatpush3.bf16.msra.mxu0 %v15707_v63  ;;  %v15744_v51 = vld [vmem:[#allocation2 + $0xba8] sm:$0xff]   ;;  %v57_v63 = vld [vmem:[%s16988_s0 + $0xb0] sm:$0xff] }
 0x16a   :  { %v13923_v59 = vadd.f32 %v13922_v56, %v13921_v53  ;;  %v13924_v62 = vpop.f32.mrb[14].mxu1  ;;  %v13903_v2 = vpop.f32.mrb[15].mxu0  ;;  %14224 = vmatpush3.bf16.msra.mxu1 %v15708_v1  ;;  %14203 = vmatprep.subr.bf16.mxu0 %v15709_v4  ;;  %v15746_v56 = vld [vmem:[#allocation2 + $0xbf0] sm:$0xff]   ;;  %v15751_v61 = vld [vmem:[#allocation2 + $0xb38] sm:$0xff]   ;;  %v12526_v1 = vcombine.low %v57_v63, %v57_v63 }
 0x16b   :  { %v9837_v0 = vadd.f32 %v13901_v58, %v16727_v17  ;;  %v13925_v3 = vpop.f32.mrb[15].mxu1  ;;  %14225 = vmatprep.subr.bf16.mxu1 %v15710_v6  ;;  %v12524_v17 = vcombine.low %v56_v16, %v56_v16  ;;  %v15748_v58 = vld [vmem:[#allocation2 + $0xbb0] sm:$0xff]   ;;  %v15752_v62 = vld [vmem:[#allocation2 + $0xbb8] sm:$0xff]   ;;  %v12527_v2 = vcombine.high %v57_v63, %v57_v63  ;;  %v15758_v6 = vld [vmem:[#allocation2 + $0xcc0] sm:$0xff]  }
 0x16c   :  { %v15768_v16 = vld [vmem:[#allocation2 + $0xc90] sm:$0xff]  }
 0x16d   :  { %v16736_v5 = vadd.f32 %v13923_v59, %v9837_v0  ;;  %14204 = vmatpush3.bf16.msra.mxu0 %v15711_v7  ;;  %v15749_v59 = vld [vmem:[#allocation2 + $0xb78] sm:$0xff]   ;;  %v15759_v7 = vld [vmem:[#allocation2 + $0xc00] sm:$0xff]   ;;  %v15801_v63 = vld [vmem:[#allocation2 + $0xd50] sm:$0xff]  }
 0x16e   :  { %14226 = vmatpush3.bf16.msra.mxu1 %v15712_v8  ;;  %14205 = vmatprep.subr.bf16.mxu0 %v15713_v9  ;;  %v58_v0 = vld [vmem:[%s16988_s0 + $0xb8] sm:$0xff]  ;;  %v15760_v8 = vld [vmem:[#allocation2 + $0xc80] sm:$0xff]   ;;  %v15761_v9 = vld [vmem:[#allocation2 + $0xc48] sm:$0xff]  }
 0x16f   :  { %14227 = vmatprep.subr.bf16.mxu1 %v15714_v10  ;;  %v12528_v3 = vcombine.low %v58_v0, %v58_v0  ;;  %v12529_v4 = vcombine.high %v58_v0, %v58_v0  ;;  %v15762_v10 = vld [vmem:[#allocation2 + $0xcc8] sm:$0xff]   ;;  %v15802_v0 = vld [vmem:[#allocation2 + $0xdd0] sm:$0xff]  }
 0x171   :  { %14206 = vmatpush3.bf16.msra.mxu0 %v15715_v11  ;;  %v15763_v11 = vld [vmem:[#allocation2 + $0xc08] sm:$0xff]  }
 0x172   :  { %14228 = vmatpush3.bf16.msra.mxu1 %v15716_v12  ;;  %14235 = vmatprep.subr.bf16.mxu0 %v15721_v19  ;;  %v15764_v12 = vld [vmem:[#allocation2 + $0xc88] sm:$0xff]   ;;  %v15771_v19 = vld [vmem:[#allocation2 + $0xc18] sm:$0xff]  }
 0x173   :  { %14257 = vmatprep.subr.bf16.mxu1 %v15722_v20  ;;  %v15772_v20 = vld [vmem:[#allocation2 + $0xc98] sm:$0xff]  }
 0x174   :  { %10395 = vmatmul.mubr.bf16.vlgmr.msra.gmra.mrb[40].mxu0 %v12522_v14  ;;  %v15766_v14 = vld [vmem:[#allocation2 + $0xcd0] sm:$0xff]  }
 0x175   :  { %10435 = vmatmul.mubr.bf16.vlgmr.msra.gmra.mrb[40].mxu1 %v12524_v17  ;;  %14236 = vmatpush3.bf16.msra.mxu0 %v15723_v21  ;;  %v15769_v17 = vld [vmem:[#allocation2 + $0xc58] sm:$0xff]   ;;  %v15773_v21 = vld [vmem:[#allocation2 + $0xc60] sm:$0xff]  }
 0x176   :  { %14258 = vmatpush3.bf16.msra.mxu1 %v15724_v22  ;;  %14237 = vmatprep.subr.bf16.mxu0 %v15725_v23  ;;  %v15774_v22 = vld [vmem:[#allocation2 + $0xce0] sm:$0xff]  }
 0x177   :  { %14259 = vmatprep.subr.bf16.mxu1 %v15726_v24  ;;  %10474 = vmatprep.mubr.bf16.mxu0 %v12527_v2  ;;  %v15775_v24 = vld [vmem:[#allocation2 + $0xc20] sm:$0xff]   ;;  %v15804_v2 = vld [vmem:[#allocation2 + $0xd90] sm:$0xff]  }
 0x178   :  { %10514 = vmatprep.mubr.bf16.mxu1 %v12529_v4  ;;  %v15806_v4 = vld [vmem:[#allocation2 + $0xdd8] sm:$0xff]  }
 0x179   :  { %14238 = vmatpush3.bf16.msra.mxu0 %v15727_v25 }
 0x17a   :  { %14260 = vmatpush3.bf16.msra.mxu1 %v15728_v26  ;;  %14239 = vmatprep.subr.bf16.mxu0 %v15729_v27  ;;  %v15776_v26 = vld [vmem:[#allocation2 + $0xca0] sm:$0xff]  }
 0x17b   :  { %14261 = vmatprep.subr.bf16.mxu1 %v15730_v28 }
 0x17d   :  { %14240 = vmatpush3.bf16.msra.mxu0 %v15731_v29 }
 0x17e   :  { %14262 = vmatpush3.bf16.msra.mxu1 %v15732_v30  ;;  %14241 = vmatprep.subr.bf16.mxu0 %v15733_v31  ;;  %v15777_v30 = vld [vmem:[#allocation2 + $0xc68] sm:$0xff]  }
 0x17f   :  { %14263 = vmatprep.subr.bf16.mxu1 %v15734_v32  ;;  %v15778_v32 = vld [vmem:[#allocation2 + $0xce8] sm:$0xff]  }
 0x181   :  { %14242 = vmatpush3.bf16.msra.mxu0 %v15735_v33 }
 0x182   :  { %14264 = vmatpush3.bf16.msra.mxu1 %v15736_v34  ;;  %14243 = vmatprep.subr.bf16.mxu0 %v15737_v35 }
 0x183   :  { %14265 = vmatprep.subr.bf16.mxu1 %v15738_v36  ;;  %v15779_v36 = vld [vmem:[#allocation2 + $0xc28] sm:$0xff]  }
 0x185   :  { %14244 = vmatpush3.bf16.msra.mxu0 %v15739_v38 }
 0x186   :  { %14266 = vmatpush3.bf16.msra.mxu1 %v15740_v40  ;;  %14245 = vmatprep.subr.bf16.mxu0 %v15741_v43  ;;  %v15783_v43 = vld [vmem:[#allocation2 + $0xc30] sm:$0xff]  }
 0x187   :  { %v13943_v37 = vpop.f32.mrb[16].mxu0  ;;  %14267 = vmatprep.subr.bf16.mxu1 %v15742_v46  ;;  %v15786_v46 = vld [vmem:[#allocation2 + $0xcf8] sm:$0xff]  }
 0x188   :  { %v13965_v39 = vpop.f32.mrb[16].mxu1  ;;  %v13944_v41 = vpop.f32.mrb[17].mxu0 }
 0x189   :  { %v13966_v42 = vpop.f32.mrb[17].mxu1  ;;  %v13945_v44 = vadd.f32 %v13944_v41, %v13943_v37  ;;  %v13946_v47 = vpop.f32.mrb[18].mxu0  ;;  %14246 = vmatpush3.bf16.msra.mxu0 %v15743_v49  ;;  %v15780_v37 = vld [vmem:[#allocation2 + $0xca8] sm:$0xff]   ;;  %v15781_v41 = vld [vmem:[#allocation2 + $0xc70] sm:$0xff]   ;;  %v59_v49 = vld [vmem:[%s16988_s0 + $0xc0] sm:$0xff] }
 0x18a   :  { %v13967_v45 = vadd.f32 %v13966_v42, %v13965_v39  ;;  %v13968_v48 = vpop.f32.mrb[18].mxu1  ;;  %v13947_v52 = vpop.f32.mrb[19].mxu0  ;;  %14268 = vmatpush3.bf16.msra.mxu1 %v15744_v51  ;;  %14247 = vmatprep.subr.bf16.mxu0 %v15745_v54  ;;  %v15782_v42 = vld [vmem:[#allocation2 + $0xcf0] sm:$0xff]   ;;  %v15787_v47 = vld [vmem:[#allocation2 + $0xc38] sm:$0xff]   ;;  %v12530_v51 = vcombine.low %v59_v49, %v59_v49  ;;  %v15793_v54 = vld [vmem:[#allocation2 + $0xd40] sm:$0xff]  }
 0x18b   :  { %v9917_v50 = vadd.f32 %v13945_v44, %v16736_v5  ;;  %v13969_v53 = vpop.f32.mrb[19].mxu1  ;;  %14269 = vmatprep.subr.bf16.mxu1 %v15746_v56  ;;  %v15757_v5 = vld [vmem:[#allocation2 + $0xc40] sm:$0xff]   ;;  %v15784_v44 = vld [vmem:[#allocation2 + $0xcb0] sm:$0xff]   ;;  %v15788_v48 = vld [vmem:[#allocation2 + $0xcb8] sm:$0xff]   ;;  %v12531_v52 = vcombine.high %v59_v49, %v59_v49 }
 0x18c   :  { %v15794_v56 = vld [vmem:[#allocation2 + $0xdc0] sm:$0xff]   ;;  %v15837_v49 = vld [vmem:[#allocation2 + $0xe50] sm:$0xff]  }
 0x18d   :  { %v16745_v55 = vadd.f32 %v13967_v45, %v9917_v50  ;;  %14248 = vmatpush3.bf16.msra.mxu0 %v15747_v57  ;;  %v15785_v45 = vld [vmem:[#allocation2 + $0xc78] sm:$0xff]   ;;  %v60_v50 = vld [vmem:[%s16988_s0 + $0xc8] sm:$0xff]  ;;  %v15795_v57 = vld [vmem:[#allocation2 + $0xd00] sm:$0xff]  }
 0x18e   :  { %14270 = vmatpush3.bf16.msra.mxu1 %v15748_v58  ;;  %14249 = vmatprep.subr.bf16.mxu0 %v15749_v59  ;;  %v12532_v53 = vcombine.low %v60_v50, %v60_v50  ;;  %v15796_v58 = vld [vmem:[#allocation2 + $0xd80] sm:$0xff]   ;;  %v15797_v59 = vld [vmem:[#allocation2 + $0xd48] sm:$0xff]  }
 0x18f   :  { %14271 = vmatprep.subr.bf16.mxu1 %v15750_v60  ;;  %v15798_v60 = vld [vmem:[#allocation2 + $0xdc8] sm:$0xff]  }
 0x191   :  { %14250 = vmatpush3.bf16.msra.mxu0 %v15751_v61  ;;  %v15799_v61 = vld [vmem:[#allocation2 + $0xd08] sm:$0xff]  }
 0x192   :  { %14272 = vmatpush3.bf16.msra.mxu1 %v15752_v62  ;;  %14279 = vmatprep.subr.bf16.mxu0 %v15757_v5  ;;  %v15800_v62 = vld [vmem:[#allocation2 + $0xd88] sm:$0xff]   ;;  %v15807_v5 = vld [vmem:[#allocation2 + $0xd18] sm:$0xff]  }
 0x193   :  { %14301 = vmatprep.subr.bf16.mxu1 %v15758_v6  ;;  %v15808_v6 = vld [vmem:[#allocation2 + $0xd98] sm:$0xff]  }
 0x194   :  { %10475 = vmatmul.mubr.bf16.vlgmr.msra.gmra.mrb[44].mxu0 %v12526_v1  ;;  %v15803_v1 = vld [vmem:[#allocation2 + $0xd10] sm:$0xff]  }
 0x195   :  { %10515 = vmatmul.mubr.bf16.vlgmr.msra.gmra.mrb[44].mxu1 %v12528_v3  ;;  %14280 = vmatpush3.bf16.msra.mxu0 %v15759_v7  ;;  %v15805_v3 = vld [vmem:[#allocation2 + $0xd58] sm:$0xff]   ;;  %v15809_v7 = vld [vmem:[#allocation2 + $0xd60] sm:$0xff]  }
 0x196   :  { %14302 = vmatpush3.bf16.msra.mxu1 %v15760_v8  ;;  %14281 = vmatprep.subr.bf16.mxu0 %v15761_v9  ;;  %v15810_v8 = vld [vmem:[#allocation2 + $0xde0] sm:$0xff]  }
 0x197   :  { %14303 = vmatprep.subr.bf16.mxu1 %v15762_v10  ;;  %10554 = vmatprep.mubr.bf16.mxu0 %v12531_v52  ;;  %v15811_v10 = vld [vmem:[#allocation2 + $0xd20] sm:$0xff]   ;;  %v15840_v52 = vld [vmem:[#allocation2 + $0xe90] sm:$0xff]  }
 0x199   :  { %14282 = vmatpush3.bf16.msra.mxu0 %v15763_v11 }
 0x19a   :  { %14304 = vmatpush3.bf16.msra.mxu1 %v15764_v12  ;;  %14283 = vmatprep.subr.bf16.mxu0 %v15765_v13  ;;  %v15812_v12 = vld [vmem:[#allocation2 + $0xda0] sm:$0xff]  }
 0x19b   :  { %14305 = vmatprep.subr.bf16.mxu1 %v15766_v14 }
 0x19d   :  { %14284 = vmatpush3.bf16.msra.mxu0 %v15767_v15  ;;  %v15813_v15 = vld [vmem:[#allocation2 + $0xd68] sm:$0xff]  }
 0x19e   :  { %14306 = vmatpush3.bf16.msra.mxu1 %v15768_v16  ;;  %14285 = vmatprep.subr.bf16.mxu0 %v15769_v17 }
 0x19f   :  { %14307 = vmatprep.subr.bf16.mxu1 %v15770_v18  ;;  %v15814_v18 = vld [vmem:[#allocation2 + $0xde8] sm:$0xff]  }
 0x1a1   :  { %14286 = vmatpush3.bf16.msra.mxu0 %v15771_v19 }
 0x1a2   :  { %14308 = vmatpush3.bf16.msra.mxu1 %v15772_v20  ;;  %14287 = vmatprep.subr.bf16.mxu0 %v15773_v21  ;;  %v15815_v21 = vld [vmem:[#allocation2 + $0xd28] sm:$0xff]  }
 0x1a3   :  { %14309 = vmatprep.subr.bf16.mxu1 %v15774_v22 }
 0x1a5   :  { %14288 = vmatpush3.bf16.msra.mxu0 %v15775_v24 }
 0x1a6   :  { %14310 = vmatpush3.bf16.msra.mxu1 %v15776_v26  ;;  %14289 = vmatprep.subr.bf16.mxu0 %v15777_v30  ;;  %v15817_v26 = vld [vmem:[#allocation2 + $0xd70] sm:$0xff]  }
 0x1a7   :  { %v13987_v23 = vpop.f32.mrb[20].mxu0  ;;  %14311 = vmatprep.subr.bf16.mxu1 %v15778_v32  ;;  %v15820_v30 = vld [vmem:[#allocation2 + $0xdb0] sm:$0xff]   ;;  %v15822_v32 = vld [vmem:[#allocation2 + $0xdf8] sm:$0xff]  }
 0x1a8   :  { %v14009_v25 = vpop.f32.mrb[20].mxu1  ;;  %v13988_v27 = vpop.f32.mrb[21].mxu0 }
 0x1a9   :  { %v13989_v28 = vadd.f32 %v13988_v27, %v13987_v23  ;;  %v14010_v29 = vpop.f32.mrb[21].mxu1  ;;  %v13990_v33 = vpop.f32.mrb[22].mxu0  ;;  %14290 = vmatpush3.bf16.msra.mxu0 %v15779_v36  ;;  %v15816_v23 = vld [vmem:[#allocation2 + $0xda8] sm:$0xff]  }
 0x1aa   :  { %v14011_v31 = vadd.f32 %v14010_v29, %v14009_v25  ;;  %v14012_v35 = vpop.f32.mrb[22].mxu1  ;;  %v13991_v38 = vpop.f32.mrb[23].mxu0  ;;  %14312 = vmatpush3.bf16.msra.mxu1 %v15780_v37  ;;  %14291 = vmatprep.subr.bf16.mxu0 %v15781_v41  ;;  %v15819_v29 = vld [vmem:[#allocation2 + $0xd30] sm:$0xff]   ;;  %v15823_v33 = vld [vmem:[#allocation2 + $0xd38] sm:$0xff]   ;;  %v15829_v41 = vld [vmem:[#allocation2 + $0xe40] sm:$0xff]  }
 0x1ab   :  { %v9997_v34 = vadd.f32 %v13989_v28, %v16745_v55  ;;  %v14013_v40 = vpop.f32.mrb[23].mxu1  ;;  %14313 = vmatprep.subr.bf16.mxu1 %v15782_v42  ;;  %v12533_v55 = vcombine.high %v60_v50, %v60_v50  ;;  %v15818_v28 = vld [vmem:[#allocation2 + $0xdf0] sm:$0xff]   ;;  %v62_v38 = vld [vmem:[%s16988_s0 + $0xd8] sm:$0xff]  ;;  %v15830_v42 = vld [vmem:[#allocation2 + $0xec0] sm:$0xff]  }
 0x1ac   :  { %v61_v35 = vld [vmem:[%s16988_s0 + $0xd0] sm:$0xff]  ;;  %v12537_v40 = vcombine.high %v62_v38, %v62_v38 }
 0x1ad   :  { %v16754_v39 = vadd.f32 %v14011_v31, %v9997_v34  ;;  %14292 = vmatpush3.bf16.msra.mxu0 %v15783_v43  ;;  %10594 = vmatprep.mubr.bf16.mxu1 %v12533_v55  ;;  %v15821_v31 = vld [vmem:[#allocation2 + $0xd78] sm:$0xff]   ;;  %v12534_v36 = vcombine.low %v61_v35, %v61_v35  ;;  %v12535_v37 = vcombine.high %v61_v35, %v61_v35  ;;  %v15831_v43 = vld [vmem:[#allocation2 + $0xe00] sm:$0xff]   ;;  %v15838_v50 = vld [vmem:[#allocation2 + $0xed0] sm:$0xff]  }
 0x1ae   :  { %14314 = vmatpush3.bf16.msra.mxu1 %v15784_v44  ;;  %14293 = vmatprep.subr.bf16.mxu0 %v15785_v45  ;;  %v15824_v34 = vld [vmem:[#allocation2 + $0xdb8] sm:$0xff]   ;;  %v15832_v44 = vld [vmem:[#allocation2 + $0xe80] sm:$0xff]   ;;  %v15833_v45 = vld [vmem:[#allocation2 + $0xe48] sm:$0xff]  }
 0x1af   :  { %14315 = vmatprep.subr.bf16.mxu1 %v15786_v46  ;;  %v15834_v46 = vld [vmem:[#allocation2 + $0xec8] sm:$0xff]   ;;  %v15843_v55 = vld [vmem:[#allocation2 + $0xe18] sm:$0xff]   ;;  %v15873_v35 = vld [vmem:[#allocation2 + $0xf50] sm:$0xff]  }
 0x1b1   :  { %14294 = vmatpush3.bf16.msra.mxu0 %v15787_v47  ;;  %v15835_v47 = vld [vmem:[#allocation2 + $0xe08] sm:$0xff]  }
 0x1b2   :  { %14316 = vmatpush3.bf16.msra.mxu1 %v15788_v48  ;;  %14323 = vmatprep.subr.bf16.mxu0 %v15793_v54  ;;  %v15836_v48 = vld [vmem:[#allocation2 + $0xe88] sm:$0xff]   ;;  %v15842_v54 = vld [vmem:[#allocation2 + $0xed8] sm:$0xff]  }
 0x1b3   :  { %14345 = vmatprep.subr.bf16.mxu1 %v15794_v56  ;;  %v15844_v56 = vld [vmem:[#allocation2 + $0xe98] sm:$0xff]  }
 0x1b4   :  { %10555 = vmatmul.mubr.bf16.vlgmr.msra.gmra.mrb[48].mxu0 %v12530_v51  ;;  %v15839_v51 = vld [vmem:[#allocation2 + $0xe10] sm:$0xff]  }
 0x1b5   :  { %10595 = vmatmul.mubr.bf16.vlgmr.msra.gmra.mrb[48].mxu1 %v12532_v53  ;;  %14324 = vmatpush3.bf16.msra.mxu0 %v15795_v57  ;;  %v15841_v53 = vld [vmem:[#allocation2 + $0xe58] sm:$0xff]   ;;  %v15845_v57 = vld [vmem:[#allocation2 + $0xe60] sm:$0xff]  }
 0x1b6   :  { %14346 = vmatpush3.bf16.msra.mxu1 %v15796_v58  ;;  %14325 = vmatprep.subr.bf16.mxu0 %v15797_v59  ;;  %v15846_v58 = vld [vmem:[#allocation2 + $0xee0] sm:$0xff]  }
 0x1b7   :  { %14347 = vmatprep.subr.bf16.mxu1 %v15798_v60  ;;  %10634 = vmatprep.mubr.bf16.mxu0 %v12535_v37  ;;  %v15847_v60 = vld [vmem:[#allocation2 + $0xe20] sm:$0xff]   ;;  %v15875_v37 = vld [vmem:[#allocation2 + $0xf10] sm:$0xff]  }
 0x1b8   :  { %10674 = vmatprep.mubr.bf16.mxu1 %v12537_v40  ;;  %v15878_v40 = vld [vmem:[#allocation2 + $0xfd8] sm:$0xff]  }
 0x1b9   :  { %14326 = vmatpush3.bf16.msra.mxu0 %v15799_v61 }
 0x1ba   :  { %14348 = vmatpush3.bf16.msra.mxu1 %v15800_v62  ;;  %14327 = vmatprep.subr.bf16.mxu0 %v15801_v63  ;;  %v15848_v62 = vld [vmem:[#allocation2 + $0xea0] sm:$0xff]  }
 0x1bb   :  { %14349 = vmatprep.subr.bf16.mxu1 %v15802_v0 }
 0x1bd   :  { %14328 = vmatpush3.bf16.msra.mxu0 %v15803_v1  ;;  %v15849_v1 = vld [vmem:[#allocation2 + $0xe68] sm:$0xff]  }
 0x1be   :  { %14350 = vmatpush3.bf16.msra.mxu1 %v15804_v2  ;;  %14329 = vmatprep.subr.bf16.mxu0 %v15805_v3 }
 0x1bf   :  { %14351 = vmatprep.subr.bf16.mxu1 %v15806_v4  ;;  %v15850_v4 = vld [vmem:[#allocation2 + $0xee8] sm:$0xff]  }
 0x1c1   :  { %14330 = vmatpush3.bf16.msra.mxu0 %v15807_v5 }
 0x1c2   :  { %14352 = vmatpush3.bf16.msra.mxu1 %v15808_v6  ;;  %14331 = vmatprep.subr.bf16.mxu0 %v15809_v7  ;;  %v15851_v7 = vld [vmem:[#allocation2 + $0xe28] sm:$0xff]  }
 0x1c3   :  { %14353 = vmatprep.subr.bf16.mxu1 %v15810_v8 }
 0x1c5   :  { %14332 = vmatpush3.bf16.msra.mxu0 %v15811_v10 }
 0x1c6   :  { %14354 = vmatpush3.bf16.msra.mxu1 %v15812_v12  ;;  %14333 = vmatprep.subr.bf16.mxu0 %v15813_v15  ;;  %v15853_v12 = vld [vmem:[#allocation2 + $0xe70] sm:$0xff]  }
 0x1c7   :  { %v14031_v9 = vpop.f32.mrb[24].mxu0  ;;  %14355 = vmatprep.subr.bf16.mxu1 %v15814_v18  ;;  %v15855_v15 = vld [vmem:[#allocation2 + $0xe30] sm:$0xff]   ;;  %v15858_v18 = vld [vmem:[#allocation2 + $0xef8] sm:$0xff]  }
 0x1c8   :  { %v14053_v11 = vpop.f32.mrb[24].mxu1  ;;  %v14032_v13 = vpop.f32.mrb[25].mxu0 }
 0x1c9   :  { %v14054_v14 = vpop.f32.mrb[25].mxu1  ;;  %v14033_v16 = vadd.f32 %v14032_v13, %v14031_v9  ;;  %v14034_v19 = vpop.f32.mrb[26].mxu0  ;;  %14334 = vmatpush3.bf16.msra.mxu0 %v15815_v21  ;;  %v15852_v9 = vld [vmem:[#allocation2 + $0xea8] sm:$0xff]   ;;  %v63_v21 = vld [vmem:[%s16988_s0 + $0xe0] sm:$0xff] }
 0x1ca   :  { %v14055_v17 = vadd.f32 %v14054_v14, %v14053_v11  ;;  %v14056_v20 = vpop.f32.mrb[26].mxu1  ;;  %v14035_v24 = vpop.f32.mrb[27].mxu0  ;;  %14356 = vmatpush3.bf16.msra.mxu1 %v15816_v23  ;;  %14335 = vmatprep.subr.bf16.mxu0 %v15817_v26  ;;  %v15854_v14 = vld [vmem:[#allocation2 + $0xef0] sm:$0xff]   ;;  %v15859_v19 = vld [vmem:[#allocation2 + $0xe38] sm:$0xff]   ;;  %v12538_v23 = vcombine.low %v63_v21, %v63_v21 }
 0x1cb   :  { %v10077_v22 = vadd.f32 %v14033_v16, %v16754_v39  ;;  %v14057_v25 = vpop.f32.mrb[27].mxu1  ;;  %14357 = vmatprep.subr.bf16.mxu1 %v15818_v28  ;;  %v12536_v39 = vcombine.low %v62_v38, %v62_v38  ;;  %v15856_v16 = vld [vmem:[#allocation2 + $0xeb0] sm:$0xff]   ;;  %v15860_v20 = vld [vmem:[#allocation2 + $0xeb8] sm:$0xff]   ;;  %v12539_v24 = vcombine.high %v63_v21, %v63_v21  ;;  %v15866_v28 = vld [vmem:[#allocation2 + $0xfc0] sm:$0xff]  }
 0x1cc   :  { %v15876_v38 = vld [vmem:[#allocation2 + $0xf90] sm:$0xff]  }
 0x1cd   :  { %v16763_v27 = vadd.f32 %v14055_v17, %v10077_v22  ;;  %14336 = vmatpush3.bf16.msra.mxu0 %v15819_v29  ;;  %v15857_v17 = vld [vmem:[#allocation2 + $0xe78] sm:$0xff]   ;;  %v64_v22 = vld [vmem:[%s16988_s0 + $0xe8] sm:$0xff]  ;;  %v15867_v29 = vld [vmem:[#allocation2 + $0xf00] sm:$0xff]  }
 0x1ce   :  { %14358 = vmatpush3.bf16.msra.mxu1 %v15820_v30  ;;  %14337 = vmatprep.subr.bf16.mxu0 %v15821_v31  ;;  %v12540_v25 = vcombine.low %v64_v22, %v64_v22  ;;  %v12541_v26 = vcombine.high %v64_v22, %v64_v22  ;;  %v15868_v30 = vld [vmem:[#allocation2 + $0xf80] sm:$0xff]   ;;  %v15869_v31 = vld [vmem:[#allocation2 + $0xf48] sm:$0xff]   ;;  %v15909_v21 = vld [vmem:[#allocation2 + $0x1050] sm:$0xff]  }
 0x1cf   :  { %14359 = vmatprep.subr.bf16.mxu1 %v15822_v32  ;;  %v15870_v32 = vld [vmem:[#allocation2 + $0xfc8] sm:$0xff]   ;;  %v15910_v22 = vld [vmem:[#allocation2 + $0x10d0] sm:$0xff]  }
 0x1d1   :  { %14338 = vmatpush3.bf16.msra.mxu0 %v15823_v33  ;;  %v15871_v33 = vld [vmem:[#allocation2 + $0xf08] sm:$0xff]  }
 0x1d2   :  { %14360 = vmatpush3.bf16.msra.mxu1 %v15824_v34  ;;  %14367 = vmatprep.subr.bf16.mxu0 %v15829_v41  ;;  %v15872_v34 = vld [vmem:[#allocation2 + $0xf88] sm:$0xff]   ;;  %v15879_v41 = vld [vmem:[#allocation2 + $0xf18] sm:$0xff]  }
 0x1d3   :  { %14389 = vmatprep.subr.bf16.mxu1 %v15830_v42  ;;  %v15880_v42 = vld [vmem:[#allocation2 + $0xf98] sm:$0xff]  }
 0x1d4   :  { %10635 = vmatmul.mubr.bf16.vlgmr.msra.gmra.mrb[52].mxu0 %v12534_v36  ;;  %v15874_v36 = vld [vmem:[#allocation2 + $0xfd0] sm:$0xff]  }
 0x1d5   :  { %10675 = vmatmul.mubr.bf16.vlgmr.msra.gmra.mrb[52].mxu1 %v12536_v39  ;;  %14368 = vmatpush3.bf16.msra.mxu0 %v15831_v43  ;;  %v15877_v39 = vld [vmem:[#allocation2 + $0xf58] sm:$0xff]   ;;  %v15881_v43 = vld [vmem:[#allocation2 + $0xf60] sm:$0xff]  }
 0x1d6   :  { %14390 = vmatpush3.bf16.msra.mxu1 %v15832_v44  ;;  %14369 = vmatprep.subr.bf16.mxu0 %v15833_v45  ;;  %v15882_v44 = vld [vmem:[#allocation2 + $0xfe0] sm:$0xff]  }
 0x1d7   :  { %14391 = vmatprep.subr.bf16.mxu1 %v15834_v46  ;;  %10714 = vmatprep.mubr.bf16.mxu0 %v12539_v24  ;;  %v15883_v45 = vld [vmem:[#allocation2 + $0xf20] sm:$0xff]   ;;  %v15912_v24 = vld [vmem:[#allocation2 + $0x1090] sm:$0xff]  }
 0x1d8   :  { %10754 = vmatprep.mubr.bf16.mxu1 %v12541_v26  ;;  %v15914_v26 = vld [vmem:[#allocation2 + $0x10d8] sm:$0xff]  }
 0x1d9   :  { %14370 = vmatpush3.bf16.msra.mxu0 %v15835_v47  ;;  %v15884_v47 = vld [vmem:[#allocation2 + $0xfa0] sm:$0xff]  }
 0x1da   :  { %14392 = vmatpush3.bf16.msra.mxu1 %v15836_v48  ;;  %14371 = vmatprep.subr.bf16.mxu0 %v15837_v49 }
 0x1db   :  { %14393 = vmatprep.subr.bf16.mxu1 %v15838_v50 }
 0x1dd   :  { %14372 = vmatpush3.bf16.msra.mxu0 %v15839_v51 }
 0x1de   :  { %14394 = vmatpush3.bf16.msra.mxu1 %v15840_v52  ;;  %14373 = vmatprep.subr.bf16.mxu0 %v15841_v53  ;;  %v15885_v53 = vld [vmem:[#allocation2 + $0xf68] sm:$0xff]  }
 0x1df   :  { %14395 = vmatprep.subr.bf16.mxu1 %v15842_v54 }
 0x1e1   :  { %14374 = vmatpush3.bf16.msra.mxu0 %v15843_v55  ;;  %v15886_v55 = vld [vmem:[#allocation2 + $0xfe8] sm:$0xff]  }
 0x1e2   :  { %14396 = vmatpush3.bf16.msra.mxu1 %v15844_v56  ;;  %14375 = vmatprep.subr.bf16.mxu0 %v15845_v57 }
 0x1e3   :  { %14397 = vmatprep.subr.bf16.mxu1 %v15846_v58  ;;  %v15887_v58 = vld [vmem:[#allocation2 + $0xf28] sm:$0xff]  }
 0x1e5   :  { %14376 = vmatpush3.bf16.msra.mxu0 %v15847_v60  ;;  %v15888_v60 = vld [vmem:[#allocation2 + $0xfa8] sm:$0xff]  }
 0x1e6   :  { %14398 = vmatpush3.bf16.msra.mxu1 %v15848_v62  ;;  %14377 = vmatprep.subr.bf16.mxu0 %v15849_v1  ;;  %v15891_v1 = vld [vmem:[#allocation2 + $0xf30] sm:$0xff]  }
 0x1e7   :  { %v14075_v59 = vpop.f32.mrb[28].mxu0  ;;  %14399 = vmatprep.subr.bf16.mxu1 %v15850_v4  ;;  %v15894_v4 = vld [vmem:[#allocation2 + $0xff8] sm:$0xff]  }
 0x1e8   :  { %v14097_v61 = vpop.f32.mrb[28].mxu1  ;;  %v14076_v63 = vpop.f32.mrb[29].mxu0 }
 0x1e9   :  { %v14098_v0 = vpop.f32.mrb[29].mxu1  ;;  %v14077_v2 = vadd.f32 %v14076_v63, %v14075_v59  ;;  %v14078_v5 = vpop.f32.mrb[30].mxu0  ;;  %14378 = vmatpush3.bf16.msra.mxu0 %v15851_v7  ;;  %v15889_v63 = vld [vmem:[#allocation2 + $0xf70] sm:$0xff]  }
 0x1ea   :  { %v14099_v3 = vadd.f32 %v14098_v0, %v14097_v61  ;;  %v14100_v6 = vpop.f32.mrb[30].mxu1  ;;  %v14079_v10 = vpop.f32.mrb[31].mxu0  ;;  %14400 = vmatpush3.bf16.msra.mxu1 %v15852_v9  ;;  %14379 = vmatprep.subr.bf16.mxu0 %v15853_v12  ;;  %v15890_v0 = vld [vmem:[#allocation2 + $0xff0] sm:$0xff]   ;;  %v15895_v5 = vld [vmem:[#allocation2 + $0xf38] sm:$0xff]  }
 0x1eb   :  { %v10157_v8 = vadd.f32 %v14077_v2, %v16763_v27  ;;  %v14101_v11 = vpop.f32.mrb[31].mxu1  ;;  %14401 = vmatprep.subr.bf16.mxu1 %v15854_v14  ;;  %v15865_v27 = vld [vmem:[#allocation2 + $0xf40] sm:$0xff]   ;;  %v15892_v2 = vld [vmem:[#allocation2 + $0xfb0] sm:$0xff]   ;;  %v15896_v6 = vld [vmem:[#allocation2 + $0xfb8] sm:$0xff]  }
 0x1ec   :  { %v65_v7 = vld [vmem:[%s16988_s0 + $0xf0] sm:$0xff]  ;;  %v15902_v14 = vld [vmem:[#allocation2 + $0x10c0] sm:$0xff]  }
 0x1ed   :  { %v16772_v13 = vadd.f32 %v14099_v3, %v10157_v8  ;;  %14380 = vmatpush3.bf16.msra.mxu0 %v15855_v15  ;;  %v15893_v3 = vld [vmem:[#allocation2 + $0xf78] sm:$0xff]   ;;  %v12542_v9 = vcombine.low %v65_v7, %v65_v7  ;;  %v12543_v10 = vcombine.high %v65_v7, %v65_v7  ;;  %v15903_v15 = vld [vmem:[#allocation2 + $0x1000] sm:$0xff]   ;;  %v15945_v7 = vld [vmem:[#allocation2 + $0x1150] sm:$0xff]  }
 0x1ee   :  { %14402 = vmatpush3.bf16.msra.mxu1 %v15856_v16  ;;  %14381 = vmatprep.subr.bf16.mxu0 %v15857_v17  ;;  %v66_v8 = vld [vmem:[%s16988_s0 + $0xf8] sm:$0xff]  ;;  %v15904_v16 = vld [vmem:[#allocation2 + $0x1080] sm:$0xff]   ;;  %v15905_v17 = vld [vmem:[#allocation2 + $0x1048] sm:$0xff]  }
 0x1ef   :  { %14403 = vmatprep.subr.bf16.mxu1 %v15858_v18  ;;  %v12544_v11 = vcombine.low %v66_v8, %v66_v8  ;;  %v12545_v12 = vcombine.high %v66_v8, %v66_v8  ;;  %v15906_v18 = vld [vmem:[#allocation2 + $0x10c8] sm:$0xff]   ;;  %v15946_v8 = vld [vmem:[#allocation2 + $0x11d0] sm:$0xff]  }
 0x1f1   :  { %14382 = vmatpush3.bf16.msra.mxu0 %v15859_v19  ;;  %v15907_v19 = vld [vmem:[#allocation2 + $0x1008] sm:$0xff]  }
 0x1f2   :  { %14404 = vmatpush3.bf16.msra.mxu1 %v15860_v20  ;;  %14411 = vmatprep.subr.bf16.mxu0 %v15865_v27  ;;  %v15908_v20 = vld [vmem:[#allocation2 + $0x1088] sm:$0xff]   ;;  %v15915_v27 = vld [vmem:[#allocation2 + $0x1018] sm:$0xff]  }
 0x1f3   :  { %14433 = vmatprep.subr.bf16.mxu1 %v15866_v28  ;;  %v15916_v28 = vld [vmem:[#allocation2 + $0x1098] sm:$0xff]  }
 0x1f4   :  { %10715 = vmatmul.mubr.bf16.vlgmr.msra.gmra.mrb[56].mxu0 %v12538_v23  ;;  %v15911_v23 = vld [vmem:[#allocation2 + $0x1010] sm:$0xff]  }
 0x1f5   :  { %10755 = vmatmul.mubr.bf16.vlgmr.msra.gmra.mrb[56].mxu1 %v12540_v25  ;;  %14412 = vmatpush3.bf16.msra.mxu0 %v15867_v29  ;;  %v15913_v25 = vld [vmem:[#allocation2 + $0x1058] sm:$0xff]   ;;  %v15917_v29 = vld [vmem:[#allocation2 + $0x1060] sm:$0xff]  }
 0x1f6   :  { %14434 = vmatpush3.bf16.msra.mxu1 %v15868_v30  ;;  %14413 = vmatprep.subr.bf16.mxu0 %v15869_v31  ;;  %v15918_v30 = vld [vmem:[#allocation2 + $0x10e0] sm:$0xff]  }
 0x1f7   :  { %14435 = vmatprep.subr.bf16.mxu1 %v15870_v32  ;;  %10794 = vmatprep.mubr.bf16.mxu0 %v12543_v10  ;;  %v15919_v31 = vld [vmem:[#allocation2 + $0x1020] sm:$0xff]   ;;  %v15948_v10 = vld [vmem:[#allocation2 + $0x1190] sm:$0xff]  }
 0x1f8   :  { %10834 = vmatprep.mubr.bf16.mxu1 %v12545_v12  ;;  %v15950_v12 = vld [vmem:[#allocation2 + $0x11d8] sm:$0xff]  }
 0x1f9   :  { %14414 = vmatpush3.bf16.msra.mxu0 %v15871_v33  ;;  %v15920_v33 = vld [vmem:[#allocation2 + $0x10a0] sm:$0xff]  }
 0x1fa   :  { %14436 = vmatpush3.bf16.msra.mxu1 %v15872_v34  ;;  %14415 = vmatprep.subr.bf16.mxu0 %v15873_v35 }
 0x1fb   :  { %14437 = vmatprep.subr.bf16.mxu1 %v15874_v36 }
 0x1fd   :  { %14416 = vmatpush3.bf16.msra.mxu0 %v15875_v37 }
 0x1fe   :  { %14438 = vmatpush3.bf16.msra.mxu1 %v15876_v38  ;;  %14417 = vmatprep.subr.bf16.mxu0 %v15877_v39  ;;  %v15921_v39 = vld [vmem:[#allocation2 + $0x1068] sm:$0xff]  }
 0x1ff   :  { %14439 = vmatprep.subr.bf16.mxu1 %v15878_v40 }
 0x201   :  { %14418 = vmatpush3.bf16.msra.mxu0 %v15879_v41  ;;  %v15922_v41 = vld [vmem:[#allocation2 + $0x10e8] sm:$0xff]  }
 0x202   :  { %14440 = vmatpush3.bf16.msra.mxu1 %v15880_v42  ;;  %14419 = vmatprep.subr.bf16.mxu0 %v15881_v43 }
 0x203   :  { %14441 = vmatprep.subr.bf16.mxu1 %v15882_v44  ;;  %v15923_v44 = vld [vmem:[#allocation2 + $0x1028] sm:$0xff]  }
 0x205   :  { %14420 = vmatpush3.bf16.msra.mxu0 %v15883_v45 }
 0x206   :  { %14442 = vmatpush3.bf16.msra.mxu1 %v15884_v47  ;;  %14421 = vmatprep.subr.bf16.mxu0 %v15885_v53  ;;  %v15929_v53 = vld [vmem:[#allocation2 + $0x1078] sm:$0xff]  }
 0x207   :  { %v14119_v46 = vpop.f32.mrb[32].mxu0  ;;  %14443 = vmatprep.subr.bf16.mxu1 %v15886_v55  ;;  %v15931_v55 = vld [vmem:[#allocation2 + $0x1038] sm:$0xff]  }
 0x208   :  { %v14141_v48 = vpop.f32.mrb[32].mxu1  ;;  %v14120_v49 = vpop.f32.mrb[33].mxu0 }
 0x209   :  { %v14142_v50 = vpop.f32.mrb[33].mxu1  ;;  %v14121_v51 = vadd.f32 %v14120_v49, %v14119_v46  ;;  %v14122_v54 = vpop.f32.mrb[34].mxu0  ;;  %14422 = vmatpush3.bf16.msra.mxu0 %v15887_v58  ;;  %v15924_v46 = vld [vmem:[#allocation2 + $0x10a8] sm:$0xff]   ;;  %v15925_v49 = vld [vmem:[#allocation2 + $0x1070] sm:$0xff]  }
 0x20a   :  { %v14143_v52 = vadd.f32 %v14142_v50, %v14141_v48  ;;  %v14144_v56 = vpop.f32.mrb[34].mxu1  ;;  %v14123_v59 = vpop.f32.mrb[35].mxu0  ;;  %14444 = vmatpush3.bf16.msra.mxu1 %v15888_v60  ;;  %14423 = vmatprep.subr.bf16.mxu0 %v15889_v63  ;;  %v15926_v50 = vld [vmem:[#allocation2 + $0x10f0] sm:$0xff]   ;;  %v15930_v54 = vld [vmem:[#allocation2 + $0x10f8] sm:$0xff]   ;;  %v68_v58 = vld [vmem:[%s16988_s0 + $0x108] sm:$0xff] }
 0x20b   :  { %v10237_v57 = vadd.f32 %v14121_v51, %v16772_v13  ;;  %v14145_v61 = vpop.f32.mrb[35].mxu1  ;;  %14445 = vmatprep.subr.bf16.mxu1 %v15890_v0  ;;  %v15901_v13 = vld [vmem:[#allocation2 + $0x1040] sm:$0xff]   ;;  %v15927_v51 = vld [vmem:[#allocation2 + $0x1030] sm:$0xff]   ;;  %v15932_v56 = vld [vmem:[#allocation2 + $0x10b8] sm:$0xff]  }
 0x20c   :  { %v12548_v61 = vcombine.low %v68_v58, %v68_v58  ;;  %v15937_v63 = vld [vmem:[#allocation2 + $0x1140] sm:$0xff]  }
 0x20d   :  { %v16781_v62 = vadd.f32 %v14143_v52, %v10237_v57  ;;  %14424 = vmatpush3.bf16.msra.mxu0 %v15891_v1  ;;  %v15928_v52 = vld [vmem:[#allocation2 + $0x10b0] sm:$0xff]   ;;  %v67_v57 = vld [vmem:[%s16988_s0 + $0x100] sm:$0xff] }
 0x20e   :  { %14446 = vmatpush3.bf16.msra.mxu1 %v15892_v2  ;;  %14425 = vmatprep.subr.bf16.mxu0 %v15893_v3  ;;  %v12546_v59 = vcombine.low %v67_v57, %v67_v57  ;;  %v12547_v60 = vcombine.high %v67_v57, %v67_v57  ;;  %v15938_v0 = vld [vmem:[#allocation2 + $0x11c0] sm:$0xff]   ;;  %v15941_v3 = vld [vmem:[#allocation2 + $0x1148] sm:$0xff]   ;;  %v15981_v57 = vld [vmem:[#allocation2 + $0x1250] sm:$0xff]  }
 0x20f   :  { %14447 = vmatprep.subr.bf16.mxu1 %v15894_v4  ;;  %v15939_v1 = vld [vmem:[#allocation2 + $0x1100] sm:$0xff]   ;;  %v15942_v4 = vld [vmem:[#allocation2 + $0x11c8] sm:$0xff]  }
 0x210   :  { %v15940_v2 = vld [vmem:[#allocation2 + $0x1180] sm:$0xff]  }
 0x211   :  { %14426 = vmatpush3.bf16.msra.mxu0 %v15895_v5  ;;  %v15943_v5 = vld [vmem:[#allocation2 + $0x1108] sm:$0xff]  }
 0x212   :  { %14448 = vmatpush3.bf16.msra.mxu1 %v15896_v6  ;;  %14455 = vmatprep.subr.bf16.mxu0 %v15901_v13  ;;  %v15944_v6 = vld [vmem:[#allocation2 + $0x1188] sm:$0xff]   ;;  %v15951_v13 = vld [vmem:[#allocation2 + $0x1118] sm:$0xff]  }
 0x213   :  { %14477 = vmatprep.subr.bf16.mxu1 %v15902_v14  ;;  %v15952_v14 = vld [vmem:[#allocation2 + $0x1198] sm:$0xff]  }
 0x214   :  { %10795 = vmatmul.mubr.bf16.vlgmr.msra.gmra.mrb[60].mxu0 %v12542_v9  ;;  %v15947_v9 = vld [vmem:[#allocation2 + $0x1110] sm:$0xff]  }
 0x215   :  { %10835 = vmatmul.mubr.bf16.vlgmr.msra.gmra.mrb[60].mxu1 %v12544_v11  ;;  %14456 = vmatpush3.bf16.msra.mxu0 %v15903_v15  ;;  %v15949_v11 = vld [vmem:[#allocation2 + $0x1158] sm:$0xff]   ;;  %v15953_v15 = vld [vmem:[#allocation2 + $0x1160] sm:$0xff]  }
 0x216   :  { %14478 = vmatpush3.bf16.msra.mxu1 %v15904_v16  ;;  %14457 = vmatprep.subr.bf16.mxu0 %v15905_v17  ;;  %v15954_v16 = vld [vmem:[#allocation2 + $0x11e0] sm:$0xff]  }
 0x217   :  { %14479 = vmatprep.subr.bf16.mxu1 %v15906_v18  ;;  %10874 = vmatprep.mubr.bf16.mxu0 %v12547_v60  ;;  %v15955_v17 = vld [vmem:[#allocation2 + $0x1120] sm:$0xff]   ;;  %v15984_v60 = vld [vmem:[#allocation2 + $0x1290] sm:$0xff]  }
 0x219   :  { %14458 = vmatpush3.bf16.msra.mxu0 %v15907_v19  ;;  %v15956_v19 = vld [vmem:[#allocation2 + $0x11a0] sm:$0xff]  }
 0x21a   :  { %14480 = vmatpush3.bf16.msra.mxu1 %v15908_v20  ;;  %14459 = vmatprep.subr.bf16.mxu0 %v15909_v21 }
 0x21b   :  { %14481 = vmatprep.subr.bf16.mxu1 %v15910_v22 }
 0x21d   :  { %14460 = vmatpush3.bf16.msra.mxu0 %v15911_v23 }
 0x21e   :  { %14482 = vmatpush3.bf16.msra.mxu1 %v15912_v24  ;;  %14461 = vmatprep.subr.bf16.mxu0 %v15913_v25  ;;  %v15957_v25 = vld [vmem:[#allocation2 + $0x1168] sm:$0xff]  }
 0x21f   :  { %14483 = vmatprep.subr.bf16.mxu1 %v15914_v26 }
 0x221   :  { %14462 = vmatpush3.bf16.msra.mxu0 %v15915_v27  ;;  %v15958_v27 = vld [vmem:[#allocation2 + $0x11e8] sm:$0xff]  }
 0x222   :  { %14484 = vmatpush3.bf16.msra.mxu1 %v15916_v28  ;;  %14463 = vmatprep.subr.bf16.mxu0 %v15917_v29 }
 0x223   :  { %14485 = vmatprep.subr.bf16.mxu1 %v15918_v30  ;;  %v15959_v30 = vld [vmem:[#allocation2 + $0x1128] sm:$0xff]  }
 0x225   :  { %14464 = vmatpush3.bf16.msra.mxu0 %v15919_v31 }
 0x226   :  { %14486 = vmatpush3.bf16.msra.mxu1 %v15920_v33  ;;  %14465 = vmatprep.subr.bf16.mxu0 %v15921_v39  ;;  %v15965_v39 = vld [vmem:[#allocation2 + $0x1178] sm:$0xff]  }
 0x227   :  { %v14163_v32 = vpop.f32.mrb[36].mxu0  ;;  %14487 = vmatprep.subr.bf16.mxu1 %v15922_v41  ;;  %v15967_v41 = vld [vmem:[#allocation2 + $0x1138] sm:$0xff]  }
 0x228   :  { %v14185_v34 = vpop.f32.mrb[36].mxu1  ;;  %v14164_v35 = vpop.f32.mrb[37].mxu0 }
 0x229   :  { %v14186_v36 = vpop.f32.mrb[37].mxu1  ;;  %v14165_v37 = vadd.f32 %v14164_v35, %v14163_v32  ;;  %v14166_v40 = vpop.f32.mrb[38].mxu0  ;;  %14466 = vmatpush3.bf16.msra.mxu0 %v15923_v44  ;;  %v15960_v32 = vld [vmem:[#allocation2 + $0x11a8] sm:$0xff]   ;;  %v15961_v35 = vld [vmem:[#allocation2 + $0x1170] sm:$0xff]   ;;  %v70_v44 = vld [vmem:[%s16988_s0 + $0x118] sm:$0xff] }
 0x22a   :  { %v14187_v38 = vadd.f32 %v14186_v36, %v14185_v34  ;;  %v14188_v42 = vpop.f32.mrb[38].mxu1  ;;  %v14167_v45 = vpop.f32.mrb[39].mxu0  ;;  %14488 = vmatpush3.bf16.msra.mxu1 %v15924_v46  ;;  %14467 = vmatprep.subr.bf16.mxu0 %v15925_v49  ;;  %v15962_v36 = vld [vmem:[#allocation2 + $0x11f0] sm:$0xff]   ;;  %v15966_v40 = vld [vmem:[#allocation2 + $0x11f8] sm:$0xff]   ;;  %v15973_v49 = vld [vmem:[#allocation2 + $0x1240] sm:$0xff]  }
 0x22b   :  { %v10317_v43 = vadd.f32 %v14165_v37, %v16781_v62  ;;  %v14189_v47 = vpop.f32.mrb[39].mxu1  ;;  %14489 = vmatprep.subr.bf16.mxu1 %v15926_v50  ;;  %v12549_v62 = vcombine.high %v68_v58, %v68_v58  ;;  %v15963_v37 = vld [vmem:[#allocation2 + $0x1130] sm:$0xff]   ;;  %v15968_v42 = vld [vmem:[#allocation2 + $0x11b8] sm:$0xff]   ;;  %v15974_v50 = vld [vmem:[#allocation2 + $0x12c0] sm:$0xff]  }
 0x22c   :  { %v12552_v47 = vcombine.low %v70_v44, %v70_v44  ;;  %v15982_v58 = vld [vmem:[#allocation2 + $0x12d0] sm:$0xff]  }
 0x22d   :  { %v16790_v48 = vadd.f32 %v14187_v38, %v10317_v43  ;;  %14468 = vmatpush3.bf16.msra.mxu0 %v15927_v51  ;;  %10914 = vmatprep.mubr.bf16.mxu1 %v12549_v62  ;;  %v15964_v38 = vld [vmem:[#allocation2 + $0x11b0] sm:$0xff]   ;;  %v15975_v51 = vld [vmem:[#allocation2 + $0x1200] sm:$0xff]   ;;  %v15986_v62 = vld [vmem:[#allocation2 + $0x12d8] sm:$0xff]  }
 0x22e   :  { %14490 = vmatpush3.bf16.msra.mxu1 %v15928_v52  ;;  %14469 = vmatprep.subr.bf16.mxu0 %v15929_v53  ;;  %v69_v43 = vld [vmem:[%s16988_s0 + $0x110] sm:$0xff]  ;;  %v15976_v52 = vld [vmem:[#allocation2 + $0x1280] sm:$0xff]   ;;  %v15977_v53 = vld [vmem:[#allocation2 + $0x1248] sm:$0xff]  }
 0x22f   :  { %14491 = vmatprep.subr.bf16.mxu1 %v15930_v54  ;;  %v12550_v45 = vcombine.low %v69_v43, %v69_v43  ;;  %v12551_v46 = vcombine.high %v69_v43, %v69_v43  ;;  %v15978_v54 = vld [vmem:[#allocation2 + $0x12c8] sm:$0xff]   ;;  %v16017_v43 = vld [vmem:[#allocation2 + $0x1350] sm:$0xff]  }
 0x231   :  { %14470 = vmatpush3.bf16.msra.mxu0 %v15931_v55  ;;  %v15979_v55 = vld [vmem:[#allocation2 + $0x1208] sm:$0xff]  }
 0x232   :  { %14492 = vmatpush3.bf16.msra.mxu1 %v15932_v56  ;;  %14499 = vmatprep.subr.bf16.mxu0 %v15937_v63  ;;  %v15980_v56 = vld [vmem:[#allocation2 + $0x1288] sm:$0xff]   ;;  %v15987_v63 = vld [vmem:[#allocation2 + $0x1218] sm:$0xff]  }
 0x233   :  { %14521 = vmatprep.subr.bf16.mxu1 %v15938_v0  ;;  %v15988_v0 = vld [vmem:[#allocation2 + $0x1298] sm:$0xff]  }
 0x234   :  { %10875 = vmatmul.mubr.bf16.vlgmr.msra.gmra.mrb[64].mxu0 %v12546_v59  ;;  %v15983_v59 = vld [vmem:[#allocation2 + $0x1210] sm:$0xff]  }
 0x235   :  { %10915 = vmatmul.mubr.bf16.vlgmr.msra.gmra.mrb[64].mxu1 %v12548_v61  ;;  %14500 = vmatpush3.bf16.msra.mxu0 %v15939_v1  ;;  %v15985_v61 = vld [vmem:[#allocation2 + $0x1258] sm:$0xff]   ;;  %v15989_v1 = vld [vmem:[#allocation2 + $0x1260] sm:$0xff]  }
 0x236   :  { %14522 = vmatpush3.bf16.msra.mxu1 %v15940_v2  ;;  %14501 = vmatprep.subr.bf16.mxu0 %v15941_v3  ;;  %v15990_v2 = vld [vmem:[#allocation2 + $0x12e0] sm:$0xff]  }
 0x237   :  { %14523 = vmatprep.subr.bf16.mxu1 %v15942_v4  ;;  %10954 = vmatprep.mubr.bf16.mxu0 %v12551_v46  ;;  %v15991_v4 = vld [vmem:[#allocation2 + $0x1220] sm:$0xff]   ;;  %v16020_v46 = vld [vmem:[#allocation2 + $0x1390] sm:$0xff]  }
 0x239   :  { %14502 = vmatpush3.bf16.msra.mxu0 %v15943_v5 }
 0x23a   :  { %14524 = vmatpush3.bf16.msra.mxu1 %v15944_v6  ;;  %14503 = vmatprep.subr.bf16.mxu0 %v15945_v7  ;;  %v15992_v6 = vld [vmem:[#allocation2 + $0x12a0] sm:$0xff]  }
 0x23b   :  { %14525 = vmatprep.subr.bf16.mxu1 %v15946_v8 }
 0x23d   :  { %14504 = vmatpush3.bf16.msra.mxu0 %v15947_v9 }
 0x23e   :  { %14526 = vmatpush3.bf16.msra.mxu1 %v15948_v10  ;;  %14505 = vmatprep.subr.bf16.mxu0 %v15949_v11  ;;  %v15993_v10 = vld [vmem:[#allocation2 + $0x1268] sm:$0xff]  }
 0x23f   :  { %14527 = vmatprep.subr.bf16.mxu1 %v15950_v12  ;;  %v15994_v12 = vld [vmem:[#allocation2 + $0x12e8] sm:$0xff]  }
 0x241   :  { %14506 = vmatpush3.bf16.msra.mxu0 %v15951_v13 }
 0x242   :  { %14528 = vmatpush3.bf16.msra.mxu1 %v15952_v14  ;;  %14507 = vmatprep.subr.bf16.mxu0 %v15953_v15 }
 0x243   :  { %14529 = vmatprep.subr.bf16.mxu1 %v15954_v16  ;;  %v15995_v16 = vld [vmem:[#allocation2 + $0x1228] sm:$0xff]  }
 0x245   :  { %14508 = vmatpush3.bf16.msra.mxu0 %v15955_v17  ;;  %v15996_v17 = vld [vmem:[#allocation2 + $0x12a8] sm:$0xff]  }
 0x246   :  { %14530 = vmatpush3.bf16.msra.mxu1 %v15956_v19  ;;  %14509 = vmatprep.subr.bf16.mxu0 %v15957_v25  ;;  %v16001_v25 = vld [vmem:[#allocation2 + $0x1278] sm:$0xff]  }
 0x247   :  { %v14207_v18 = vpop.f32.mrb[40].mxu0  ;;  %14531 = vmatprep.subr.bf16.mxu1 %v15958_v27  ;;  %v16003_v27 = vld [vmem:[#allocation2 + $0x1238] sm:$0xff]  }
 0x248   :  { %v14229_v20 = vpop.f32.mrb[40].mxu1  ;;  %v14208_v21 = vpop.f32.mrb[41].mxu0 }
 0x249   :  { %v14230_v22 = vpop.f32.mrb[41].mxu1  ;;  %v14209_v23 = vadd.f32 %v14208_v21, %v14207_v18  ;;  %v14210_v26 = vpop.f32.mrb[42].mxu0  ;;  %14510 = vmatpush3.bf16.msra.mxu0 %v15959_v30  ;;  %v15997_v21 = vld [vmem:[#allocation2 + $0x1270] sm:$0xff]   ;;  %v72_v30 = vld [vmem:[%s16988_s0 + $0x128] sm:$0xff] }
 0x24a   :  { %v14231_v24 = vadd.f32 %v14230_v22, %v14229_v20  ;;  %v14232_v28 = vpop.f32.mrb[42].mxu1  ;;  %v14211_v31 = vpop.f32.mrb[43].mxu0  ;;  %14532 = vmatpush3.bf16.msra.mxu1 %v15960_v32  ;;  %14511 = vmatprep.subr.bf16.mxu0 %v15961_v35  ;;  %v15998_v22 = vld [vmem:[#allocation2 + $0x12f0] sm:$0xff]   ;;  %v16002_v26 = vld [vmem:[#allocation2 + $0x12f8] sm:$0xff]   ;;  %v12557_v35 = vcombine.high %v72_v30, %v72_v30 }
 0x24b   :  { %v10397_v29 = vadd.f32 %v14209_v23, %v16790_v48  ;;  %v14233_v33 = vpop.f32.mrb[43].mxu1  ;;  %14533 = vmatprep.subr.bf16.mxu1 %v15962_v36  ;;  %v12553_v48 = vcombine.high %v70_v44, %v70_v44  ;;  %v15999_v23 = vld [vmem:[#allocation2 + $0x1230] sm:$0xff]   ;;  %v16004_v28 = vld [vmem:[#allocation2 + $0x12b8] sm:$0xff]   ;;  %v16010_v36 = vld [vmem:[#allocation2 + $0x13c0] sm:$0xff]  }
 0x24c   :  { %v12556_v33 = vcombine.low %v72_v30, %v72_v30  ;;  %v16018_v44 = vld [vmem:[#allocation2 + $0x13d0] sm:$0xff]  }
 0x24d   :  { %v16799_v34 = vadd.f32 %v14231_v24, %v10397_v29  ;;  %14512 = vmatpush3.bf16.msra.mxu0 %v15963_v37  ;;  %10994 = vmatprep.mubr.bf16.mxu1 %v12553_v48  ;;  %v16000_v24 = vld [vmem:[#allocation2 + $0x12b0] sm:$0xff]   ;;  %v71_v29 = vld [vmem:[%s16988_s0 + $0x120] sm:$0xff]  ;;  %v16022_v48 = vld [vmem:[#allocation2 + $0x13d8] sm:$0xff]  }
 0x24e   :  { %14534 = vmatpush3.bf16.msra.mxu1 %v15964_v38  ;;  %14513 = vmatprep.subr.bf16.mxu0 %v15965_v39  ;;  %v12554_v31 = vcombine.low %v71_v29, %v71_v29  ;;  %v12555_v32 = vcombine.high %v71_v29, %v71_v29  ;;  %v16011_v37 = vld [vmem:[#allocation2 + $0x1300] sm:$0xff]   ;;  %v16013_v39 = vld [vmem:[#allocation2 + $0x1348] sm:$0xff]   ;;  %v16053_v29 = vld [vmem:[#allocation2 + $0x1450] sm:$0xff]  }
 0x24f   :  { %14535 = vmatprep.subr.bf16.mxu1 %v15966_v40  ;;  %v16012_v38 = vld [vmem:[#allocation2 + $0x1380] sm:$0xff]   ;;  %v16014_v40 = vld [vmem:[#allocation2 + $0x13c8] sm:$0xff]   ;;  %v16054_v30 = vld [vmem:[#allocation2 + $0x14d0] sm:$0xff]  }
 0x251   :  { %14514 = vmatpush3.bf16.msra.mxu0 %v15967_v41  ;;  %v16015_v41 = vld [vmem:[#allocation2 + $0x1308] sm:$0xff]  }
 0x252   :  { %14536 = vmatpush3.bf16.msra.mxu1 %v15968_v42  ;;  %14543 = vmatprep.subr.bf16.mxu0 %v15973_v49  ;;  %v16016_v42 = vld [vmem:[#allocation2 + $0x1388] sm:$0xff]   ;;  %v16023_v49 = vld [vmem:[#allocation2 + $0x1318] sm:$0xff]  }
 0x253   :  { %14565 = vmatprep.subr.bf16.mxu1 %v15974_v50  ;;  %v16024_v50 = vld [vmem:[#allocation2 + $0x1398] sm:$0xff]  }
 0x254   :  { %10955 = vmatmul.mubr.bf16.vlgmr.msra.gmra.mrb[68].mxu0 %v12550_v45  ;;  %v16019_v45 = vld [vmem:[#allocation2 + $0x1310] sm:$0xff]  }
 0x255   :  { %10995 = vmatmul.mubr.bf16.vlgmr.msra.gmra.mrb[68].mxu1 %v12552_v47  ;;  %14544 = vmatpush3.bf16.msra.mxu0 %v15975_v51  ;;  %v16021_v47 = vld [vmem:[#allocation2 + $0x1358] sm:$0xff]   ;;  %v16025_v51 = vld [vmem:[#allocation2 + $0x1360] sm:$0xff]  }
 0x256   :  { %14566 = vmatpush3.bf16.msra.mxu1 %v15976_v52  ;;  %14545 = vmatprep.subr.bf16.mxu0 %v15977_v53  ;;  %v16026_v52 = vld [vmem:[#allocation2 + $0x13e0] sm:$0xff]  }
 0x257   :  { %14567 = vmatprep.subr.bf16.mxu1 %v15978_v54  ;;  %11034 = vmatprep.mubr.bf16.mxu0 %v12555_v32  ;;  %v16027_v54 = vld [vmem:[#allocation2 + $0x1320] sm:$0xff]   ;;  %v16056_v32 = vld [vmem:[#allocation2 + $0x1490] sm:$0xff]  }
 0x258   :  { %11074 = vmatprep.mubr.bf16.mxu1 %v12557_v35  ;;  %v16059_v35 = vld [vmem:[#allocation2 + $0x1418] sm:$0xff]  }
 0x259   :  { %14546 = vmatpush3.bf16.msra.mxu0 %v15979_v55 }
 0x25a   :  { %14568 = vmatpush3.bf16.msra.mxu1 %v15980_v56  ;;  %14547 = vmatprep.subr.bf16.mxu0 %v15981_v57  ;;  %v16028_v56 = vld [vmem:[#allocation2 + $0x13a0] sm:$0xff]  }
 0x25b   :  { %14569 = vmatprep.subr.bf16.mxu1 %v15982_v58 }
 0x25d   :  { %14548 = vmatpush3.bf16.msra.mxu0 %v15983_v59  ;;  %v16029_v59 = vld [vmem:[#allocation2 + $0x1368] sm:$0xff]  }
 0x25e   :  { %14570 = vmatpush3.bf16.msra.mxu1 %v15984_v60  ;;  %14549 = vmatprep.subr.bf16.mxu0 %v15985_v61 }
 0x25f   :  { %14571 = vmatprep.subr.bf16.mxu1 %v15986_v62  ;;  %v16030_v62 = vld [vmem:[#allocation2 + $0x13e8] sm:$0xff]  }
 0x261   :  { %14550 = vmatpush3.bf16.msra.mxu0 %v15987_v63 }
 0x262   :  { %14572 = vmatpush3.bf16.msra.mxu1 %v15988_v0  ;;  %14551 = vmatprep.subr.bf16.mxu0 %v15989_v1  ;;  %v16031_v1 = vld [vmem:[#allocation2 + $0x1328] sm:$0xff]  }
 0x263   :  { %14573 = vmatprep.subr.bf16.mxu1 %v15990_v2 }
 0x265   :  { %14552 = vmatpush3.bf16.msra.mxu0 %v15991_v4 }
 0x266   :  { %14574 = vmatpush3.bf16.msra.mxu1 %v15992_v6  ;;  %14553 = vmatprep.subr.bf16.mxu0 %v15993_v10  ;;  %v16033_v6 = vld [vmem:[#allocation2 + $0x1370] sm:$0xff]  }
 0x267   :  { %v14251_v3 = vpop.f32.mrb[44].mxu0  ;;  %14575 = vmatprep.subr.bf16.mxu1 %v15994_v12  ;;  %v16036_v10 = vld [vmem:[#allocation2 + $0x13b0] sm:$0xff]   ;;  %v16038_v12 = vld [vmem:[#allocation2 + $0x13f8] sm:$0xff]  }
 0x268   :  { %v14273_v5 = vpop.f32.mrb[44].mxu1  ;;  %v14252_v7 = vpop.f32.mrb[45].mxu0 }
 0x269   :  { %v14253_v8 = vadd.f32 %v14252_v7, %v14251_v3  ;;  %v14274_v9 = vpop.f32.mrb[45].mxu1  ;;  %v14254_v13 = vpop.f32.mrb[46].mxu0  ;;  %14554 = vmatpush3.bf16.msra.mxu0 %v15995_v16  ;;  %v16032_v3 = vld [vmem:[#allocation2 + $0x13a8] sm:$0xff]  }
 0x26a   :  { %v14275_v11 = vadd.f32 %v14274_v9, %v14273_v5  ;;  %v14276_v15 = vpop.f32.mrb[46].mxu1  ;;  %v14255_v18 = vpop.f32.mrb[47].mxu0  ;;  %14576 = vmatpush3.bf16.msra.mxu1 %v15996_v17  ;;  %14555 = vmatprep.subr.bf16.mxu0 %v15997_v21  ;;  %v16035_v9 = vld [vmem:[#allocation2 + $0x1330] sm:$0xff]   ;;  %v16039_v13 = vld [vmem:[#allocation2 + $0x1338] sm:$0xff]   ;;  %v16045_v21 = vld [vmem:[#allocation2 + $0x1440] sm:$0xff]  }
 0x26b   :  { %v10477_v14 = vadd.f32 %v14253_v8, %v16799_v34  ;;  %v14277_v20 = vpop.f32.mrb[47].mxu1  ;;  %14577 = vmatprep.subr.bf16.mxu1 %v15998_v22  ;;  %v16009_v34 = vld [vmem:[#allocation2 + $0x1340] sm:$0xff]   ;;  %v16034_v8 = vld [vmem:[#allocation2 + $0x13f0] sm:$0xff]   ;;  %v74_v18 = vld [vmem:[%s16988_s0 + $0x138] sm:$0xff] }
 0x26c   :  { %v73_v15 = vld [vmem:[%s16988_s0 + $0x130] sm:$0xff]  ;;  %v12561_v20 = vcombine.high %v74_v18, %v74_v18  ;;  %v16046_v22 = vld [vmem:[#allocation2 + $0x14c0] sm:$0xff]  }
 0x26d   :  { %v16808_v19 = vadd.f32 %v14275_v11, %v10477_v14  ;;  %14556 = vmatpush3.bf16.msra.mxu0 %v15999_v23  ;;  %v16037_v11 = vld [vmem:[#allocation2 + $0x1378] sm:$0xff]   ;;  %v12558_v16 = vcombine.low %v73_v15, %v73_v15  ;;  %v12559_v17 = vcombine.high %v73_v15, %v73_v15  ;;  %v16047_v23 = vld [vmem:[#allocation2 + $0x1400] sm:$0xff]   ;;  %v16089_v15 = vld [vmem:[#allocation2 + $0x1550] sm:$0xff]  }
 0x26e   :  { %14578 = vmatpush3.bf16.msra.mxu1 %v16000_v24  ;;  %14557 = vmatprep.subr.bf16.mxu0 %v16001_v25  ;;  %v16040_v14 = vld [vmem:[#allocation2 + $0x13b8] sm:$0xff]   ;;  %v16048_v24 = vld [vmem:[#allocation2 + $0x1480] sm:$0xff]   ;;  %v16049_v25 = vld [vmem:[#allocation2 + $0x1448] sm:$0xff]  }
 0x26f   :  { %14579 = vmatprep.subr.bf16.mxu1 %v16002_v26  ;;  %v16050_v26 = vld [vmem:[#allocation2 + $0x14c8] sm:$0xff]  }
 0x271   :  { %14558 = vmatpush3.bf16.msra.mxu0 %v16003_v27  ;;  %v16051_v27 = vld [vmem:[#allocation2 + $0x1408] sm:$0xff]  }
 0x272   :  { %14580 = vmatpush3.bf16.msra.mxu1 %v16004_v28  ;;  %14587 = vmatprep.subr.bf16.mxu0 %v16009_v34  ;;  %v16052_v28 = vld [vmem:[#allocation2 + $0x1488] sm:$0xff]   ;;  %v16058_v34 = vld [vmem:[#allocation2 + $0x14d8] sm:$0xff]  }
 0x273   :  { %14609 = vmatprep.subr.bf16.mxu1 %v16010_v36  ;;  %v16060_v36 = vld [vmem:[#allocation2 + $0x1498] sm:$0xff]  }
 0x274   :  { %11035 = vmatmul.mubr.bf16.vlgmr.msra.gmra.mrb[72].mxu0 %v12554_v31  ;;  %v16055_v31 = vld [vmem:[#allocation2 + $0x1410] sm:$0xff]  }
 0x275   :  { %11075 = vmatmul.mubr.bf16.vlgmr.msra.gmra.mrb[72].mxu1 %v12556_v33  ;;  %14588 = vmatpush3.bf16.msra.mxu0 %v16011_v37  ;;  %v16057_v33 = vld [vmem:[#allocation2 + $0x1458] sm:$0xff]   ;;  %v16061_v37 = vld [vmem:[#allocation2 + $0x1460] sm:$0xff]  }
 0x276   :  { %14610 = vmatpush3.bf16.msra.mxu1 %v16012_v38  ;;  %14589 = vmatprep.subr.bf16.mxu0 %v16013_v39  ;;  %v16062_v38 = vld [vmem:[#allocation2 + $0x14e0] sm:$0xff]  }
 0x277   :  { %14611 = vmatprep.subr.bf16.mxu1 %v16014_v40  ;;  %11114 = vmatprep.mubr.bf16.mxu0 %v12559_v17  ;;  %v16063_v40 = vld [vmem:[#allocation2 + $0x1420] sm:$0xff]   ;;  %v16091_v17 = vld [vmem:[#allocation2 + $0x1510] sm:$0xff]  }
 0x278   :  { %11154 = vmatprep.mubr.bf16.mxu1 %v12561_v20  ;;  %v16094_v20 = vld [vmem:[#allocation2 + $0x15d8] sm:$0xff]  }
 0x279   :  { %14590 = vmatpush3.bf16.msra.mxu0 %v16015_v41 }
 0x27a   :  { %14612 = vmatpush3.bf16.msra.mxu1 %v16016_v42  ;;  %14591 = vmatprep.subr.bf16.mxu0 %v16017_v43  ;;  %v16064_v42 = vld [vmem:[#allocation2 + $0x14a0] sm:$0xff]  }
 0x27b   :  { %14613 = vmatprep.subr.bf16.mxu1 %v16018_v44 }
 0x27d   :  { %14592 = vmatpush3.bf16.msra.mxu0 %v16019_v45  ;;  %v16065_v45 = vld [vmem:[#allocation2 + $0x1468] sm:$0xff]  }
 0x27e   :  { %14614 = vmatpush3.bf16.msra.mxu1 %v16020_v46  ;;  %14593 = vmatprep.subr.bf16.mxu0 %v16021_v47 }
 0x27f   :  { %14615 = vmatprep.subr.bf16.mxu1 %v16022_v48  ;;  %v16066_v48 = vld [vmem:[#allocation2 + $0x14e8] sm:$0xff]  }
 0x281   :  { %14594 = vmatpush3.bf16.msra.mxu0 %v16023_v49 }
 0x282   :  { %14616 = vmatpush3.bf16.msra.mxu1 %v16024_v50  ;;  %14595 = vmatprep.subr.bf16.mxu0 %v16025_v51  ;;  %v16067_v51 = vld [vmem:[#allocation2 + $0x1428] sm:$0xff]  }
 0x283   :  { %14617 = vmatprep.subr.bf16.mxu1 %v16026_v52 }
 0x285   :  { %14596 = vmatpush3.bf16.msra.mxu0 %v16027_v54 }
 0x286   :  { %14618 = vmatpush3.bf16.msra.mxu1 %v16028_v56  ;;  %14597 = vmatprep.subr.bf16.mxu0 %v16029_v59  ;;  %v16069_v56 = vld [vmem:[#allocation2 + $0x1470] sm:$0xff]  }
 0x287   :  { %v14295_v53 = vpop.f32.mrb[48].mxu0  ;;  %14619 = vmatprep.subr.bf16.mxu1 %v16030_v62  ;;  %v16071_v59 = vld [vmem:[#allocation2 + $0x1430] sm:$0xff]   ;;  %v16074_v62 = vld [vmem:[#allocation2 + $0x14f8] sm:$0xff]  }
 0x288   :  { %v14317_v55 = vpop.f32.mrb[48].mxu1  ;;  %v14296_v57 = vpop.f32.mrb[49].mxu0 }
 0x289   :  { %v14318_v58 = vpop.f32.mrb[49].mxu1  ;;  %v14297_v60 = vadd.f32 %v14296_v57, %v14295_v53  ;;  %v14298_v63 = vpop.f32.mrb[50].mxu0  ;;  %14598 = vmatpush3.bf16.msra.mxu0 %v16031_v1  ;;  %v16068_v53 = vld [vmem:[#allocation2 + $0x14a8] sm:$0xff]   ;;  %v75_v1 = vld [vmem:[%s16988_s0 + $0x140] sm:$0xff] }
 0x28a   :  { %v14319_v61 = vadd.f32 %v14318_v58, %v14317_v55  ;;  %v14320_v0 = vpop.f32.mrb[50].mxu1  ;;  %v14299_v4 = vpop.f32.mrb[51].mxu0  ;;  %14620 = vmatpush3.bf16.msra.mxu1 %v16032_v3  ;;  %14599 = vmatprep.subr.bf16.mxu0 %v16033_v6  ;;  %v16070_v58 = vld [vmem:[#allocation2 + $0x14f0] sm:$0xff]   ;;  %v16075_v63 = vld [vmem:[#allocation2 + $0x1438] sm:$0xff]   ;;  %v12562_v3 = vcombine.low %v75_v1, %v75_v1 }
 0x28b   :  { %v10557_v2 = vadd.f32 %v14297_v60, %v16808_v19  ;;  %v14321_v5 = vpop.f32.mrb[51].mxu1  ;;  %14621 = vmatprep.subr.bf16.mxu1 %v16034_v8  ;;  %v12560_v19 = vcombine.low %v74_v18, %v74_v18  ;;  %v16072_v60 = vld [vmem:[#allocation2 + $0x14b0] sm:$0xff]   ;;  %v16076_v0 = vld [vmem:[#allocation2 + $0x14b8] sm:$0xff]   ;;  %v12563_v4 = vcombine.high %v75_v1, %v75_v1  ;;  %v16082_v8 = vld [vmem:[#allocation2 + $0x15c0] sm:$0xff]  }
 0x28c   :  { %v16092_v18 = vld [vmem:[#allocation2 + $0x1590] sm:$0xff]  }
 0x28d   :  { %v16817_v7 = vadd.f32 %v14319_v61, %v10557_v2  ;;  %14600 = vmatpush3.bf16.msra.mxu0 %v16035_v9  ;;  %v16073_v61 = vld [vmem:[#allocation2 + $0x1478] sm:$0xff]   ;;  %v76_v2 = vld [vmem:[%s16988_s0 + $0x148] sm:$0xff]  ;;  %v16083_v9 = vld [vmem:[#allocation2 + $0x1500] sm:$0xff]  }
 0x28e   :  { %14622 = vmatpush3.bf16.msra.mxu1 %v16036_v10  ;;  %14601 = vmatprep.subr.bf16.mxu0 %v16037_v11  ;;  %v12564_v5 = vcombine.low %v76_v2, %v76_v2  ;;  %v12565_v6 = vcombine.high %v76_v2, %v76_v2  ;;  %v16084_v10 = vld [vmem:[#allocation2 + $0x1580] sm:$0xff]   ;;  %v16085_v11 = vld [vmem:[#allocation2 + $0x1548] sm:$0xff]   ;;  %v16125_v1 = vld [vmem:[#allocation2 + $0x1650] sm:$0xff]  }
 0x28f   :  { %14623 = vmatprep.subr.bf16.mxu1 %v16038_v12  ;;  %v16086_v12 = vld [vmem:[#allocation2 + $0x15c8] sm:$0xff]   ;;  %v16126_v2 = vld [vmem:[#allocation2 + $0x16d0] sm:$0xff]  }
 0x291   :  { %14602 = vmatpush3.bf16.msra.mxu0 %v16039_v13  ;;  %v16087_v13 = vld [vmem:[#allocation2 + $0x1508] sm:$0xff]  }
 0x292   :  { %14624 = vmatpush3.bf16.msra.mxu1 %v16040_v14  ;;  %14631 = vmatprep.subr.bf16.mxu0 %v16045_v21  ;;  %v16088_v14 = vld [vmem:[#allocation2 + $0x1588] sm:$0xff]   ;;  %v16095_v21 = vld [vmem:[#allocation2 + $0x1518] sm:$0xff]  }
 0x293   :  { %14653 = vmatprep.subr.bf16.mxu1 %v16046_v22  ;;  %v16096_v22 = vld [vmem:[#allocation2 + $0x1598] sm:$0xff]  }
 0x294   :  { %11115 = vmatmul.mubr.bf16.vlgmr.msra.gmra.mrb[76].mxu0 %v12558_v16  ;;  %v16090_v16 = vld [vmem:[#allocation2 + $0x15d0] sm:$0xff]  }
 0x295   :  { %11155 = vmatmul.mubr.bf16.vlgmr.msra.gmra.mrb[76].mxu1 %v12560_v19  ;;  %14632 = vmatpush3.bf16.msra.mxu0 %v16047_v23  ;;  %v16093_v19 = vld [vmem:[#allocation2 + $0x1558] sm:$0xff]   ;;  %v16097_v23 = vld [vmem:[#allocation2 + $0x1560] sm:$0xff]  }
 0x296   :  { %14654 = vmatpush3.bf16.msra.mxu1 %v16048_v24  ;;  %14633 = vmatprep.subr.bf16.mxu0 %v16049_v25  ;;  %v16098_v24 = vld [vmem:[#allocation2 + $0x15e0] sm:$0xff]  }
 0x297   :  { %14655 = vmatprep.subr.bf16.mxu1 %v16050_v26  ;;  %11194 = vmatprep.mubr.bf16.mxu0 %v12563_v4  ;;  %v16099_v26 = vld [vmem:[#allocation2 + $0x1520] sm:$0xff]   ;;  %v16128_v4 = vld [vmem:[#allocation2 + $0x1690] sm:$0xff]  }
 0x298   :  { %11234 = vmatprep.mubr.bf16.mxu1 %v12565_v6  ;;  %v16130_v6 = vld [vmem:[#allocation2 + $0x16d8] sm:$0xff]  }
 0x299   :  { %14634 = vmatpush3.bf16.msra.mxu0 %v16051_v27 }
 0x29a   :  { %14656 = vmatpush3.bf16.msra.mxu1 %v16052_v28  ;;  %14635 = vmatprep.subr.bf16.mxu0 %v16053_v29  ;;  %v16100_v28 = vld [vmem:[#allocation2 + $0x15a0] sm:$0xff]  }
 0x29b   :  { %14657 = vmatprep.subr.bf16.mxu1 %v16054_v30 }
 0x29d   :  { %14636 = vmatpush3.bf16.msra.mxu0 %v16055_v31 }
 0x29e   :  { %14658 = vmatpush3.bf16.msra.mxu1 %v16056_v32  ;;  %14637 = vmatprep.subr.bf16.mxu0 %v16057_v33  ;;  %v16101_v32 = vld [vmem:[#allocation2 + $0x1568] sm:$0xff]  }
 0x29f   :  { %14659 = vmatprep.subr.bf16.mxu1 %v16058_v34  ;;  %v16102_v34 = vld [vmem:[#allocation2 + $0x15e8] sm:$0xff]  }
 0x2a1   :  { %14638 = vmatpush3.bf16.msra.mxu0 %v16059_v35 }
 0x2a2   :  { %14660 = vmatpush3.bf16.msra.mxu1 %v16060_v36  ;;  %14639 = vmatprep.subr.bf16.mxu0 %v16061_v37 }
 0x2a3   :  { %14661 = vmatprep.subr.bf16.mxu1 %v16062_v38  ;;  %v16103_v38 = vld [vmem:[#allocation2 + $0x1528] sm:$0xff]  }
 0x2a5   :  { %14640 = vmatpush3.bf16.msra.mxu0 %v16063_v40 }
 0x2a6   :  { %14662 = vmatpush3.bf16.msra.mxu1 %v16064_v42  ;;  %14641 = vmatprep.subr.bf16.mxu0 %v16065_v45  ;;  %v16107_v45 = vld [vmem:[#allocation2 + $0x1530] sm:$0xff]  }
 0x2a7   :  { %v14339_v39 = vpop.f32.mrb[52].mxu0  ;;  %14663 = vmatprep.subr.bf16.mxu1 %v16066_v48  ;;  %v16110_v48 = vld [vmem:[#allocation2 + $0x15f8] sm:$0xff]  }
 0x2a8   :  { %v14361_v41 = vpop.f32.mrb[52].mxu1  ;;  %v14340_v43 = vpop.f32.mrb[53].mxu0 }
 0x2a9   :  { %v14362_v44 = vpop.f32.mrb[53].mxu1  ;;  %v14341_v46 = vadd.f32 %v14340_v43, %v14339_v39  ;;  %v14342_v49 = vpop.f32.mrb[54].mxu0  ;;  %14642 = vmatpush3.bf16.msra.mxu0 %v16067_v51  ;;  %v16104_v39 = vld [vmem:[#allocation2 + $0x15a8] sm:$0xff]   ;;  %v16105_v43 = vld [vmem:[#allocation2 + $0x1570] sm:$0xff]  }
 0x2aa   :  { %v14363_v47 = vadd.f32 %v14362_v44, %v14361_v41  ;;  %v14364_v50 = vpop.f32.mrb[54].mxu1  ;;  %v14343_v54 = vpop.f32.mrb[55].mxu0  ;;  %14664 = vmatpush3.bf16.msra.mxu1 %v16068_v53  ;;  %14643 = vmatprep.subr.bf16.mxu0 %v16069_v56  ;;  %v16106_v44 = vld [vmem:[#allocation2 + $0x15f0] sm:$0xff]   ;;  %v16111_v49 = vld [vmem:[#allocation2 + $0x1538] sm:$0xff]   ;;  %v16117_v56 = vld [vmem:[#allocation2 + $0x1640] sm:$0xff]  }
 0x2ab   :  { %v10637_v52 = vadd.f32 %v14341_v46, %v16817_v7  ;;  %v14365_v55 = vpop.f32.mrb[55].mxu1  ;;  %14665 = vmatprep.subr.bf16.mxu1 %v16070_v58  ;;  %v16081_v7 = vld [vmem:[#allocation2 + $0x1540] sm:$0xff]   ;;  %v16108_v46 = vld [vmem:[#allocation2 + $0x15b0] sm:$0xff]   ;;  %v16112_v50 = vld [vmem:[#allocation2 + $0x15b8] sm:$0xff]  }
 0x2ac   :  { %v77_v51 = vld [vmem:[%s16988_s0 + $0x150] sm:$0xff]  ;;  %v16118_v58 = vld [vmem:[#allocation2 + $0x16c0] sm:$0xff]  }
 0x2ad   :  { %v16826_v57 = vadd.f32 %v14363_v47, %v10637_v52  ;;  %14644 = vmatpush3.bf16.msra.mxu0 %v16071_v59  ;;  %v16109_v47 = vld [vmem:[#allocation2 + $0x1578] sm:$0xff]   ;;  %v12566_v53 = vcombine.low %v77_v51, %v77_v51  ;;  %v12567_v54 = vcombine.high %v77_v51, %v77_v51  ;;  %v16119_v59 = vld [vmem:[#allocation2 + $0x1600] sm:$0xff]   ;;  %v16161_v51 = vld [vmem:[#allocation2 + $0x1750] sm:$0xff]  }
 0x2ae   :  { %14666 = vmatpush3.bf16.msra.mxu1 %v16072_v60  ;;  %14645 = vmatprep.subr.bf16.mxu0 %v16073_v61  ;;  %v78_v52 = vld [vmem:[%s16988_s0 + $0x158] sm:$0xff]  ;;  %v16120_v60 = vld [vmem:[#allocation2 + $0x1680] sm:$0xff]   ;;  %v16121_v61 = vld [vmem:[#allocation2 + $0x1648] sm:$0xff]  }
 0x2af   :  { %14667 = vmatprep.subr.bf16.mxu1 %v16074_v62  ;;  %v12568_v55 = vcombine.low %v78_v52, %v78_v52  ;;  %v16122_v62 = vld [vmem:[#allocation2 + $0x16c8] sm:$0xff]  }
 0x2b1   :  { %14646 = vmatpush3.bf16.msra.mxu0 %v16075_v63  ;;  %v16123_v63 = vld [vmem:[#allocation2 + $0x1608] sm:$0xff]  }
 0x2b2   :  { %14668 = vmatpush3.bf16.msra.mxu1 %v16076_v0  ;;  %14675 = vmatprep.subr.bf16.mxu0 %v16081_v7  ;;  %v16124_v0 = vld [vmem:[#allocation2 + $0x1688] sm:$0xff]   ;;  %v16131_v7 = vld [vmem:[#allocation2 + $0x1618] sm:$0xff]  }
 0x2b3   :  { %14697 = vmatprep.subr.bf16.mxu1 %v16082_v8  ;;  %v16132_v8 = vld [vmem:[#allocation2 + $0x1698] sm:$0xff]  }
 0x2b4   :  { %11195 = vmatmul.mubr.bf16.vlgmr.msra.gmra.mrb[80].mxu0 %v12562_v3  ;;  %v16127_v3 = vld [vmem:[#allocation2 + $0x1610] sm:$0xff]  }
 0x2b5   :  { %11235 = vmatmul.mubr.bf16.vlgmr.msra.gmra.mrb[80].mxu1 %v12564_v5  ;;  %14676 = vmatpush3.bf16.msra.mxu0 %v16083_v9  ;;  %v16129_v5 = vld [vmem:[#allocation2 + $0x1658] sm:$0xff]   ;;  %v16133_v9 = vld [vmem:[#allocation2 + $0x1660] sm:$0xff]  }
 0x2b6   :  { %14698 = vmatpush3.bf16.msra.mxu1 %v16084_v10  ;;  %14677 = vmatprep.subr.bf16.mxu0 %v16085_v11  ;;  %v16134_v10 = vld [vmem:[#allocation2 + $0x16e0] sm:$0xff]  }
 0x2b7   :  { %14699 = vmatprep.subr.bf16.mxu1 %v16086_v12  ;;  %11274 = vmatprep.mubr.bf16.mxu0 %v12567_v54  ;;  %v16135_v12 = vld [vmem:[#allocation2 + $0x1620] sm:$0xff]   ;;  %v16164_v54 = vld [vmem:[#allocation2 + $0x1790] sm:$0xff]  }
 0x2b9   :  { %14678 = vmatpush3.bf16.msra.mxu0 %v16087_v13 }
 0x2ba   :  { %14700 = vmatpush3.bf16.msra.mxu1 %v16088_v14  ;;  %14679 = vmatprep.subr.bf16.mxu0 %v16089_v15  ;;  %v16136_v14 = vld [vmem:[#allocation2 + $0x16a0] sm:$0xff]  }
 0x2bb   :  { %14701 = vmatprep.subr.bf16.mxu1 %v16090_v16 }
 0x2bd   :  { %14680 = vmatpush3.bf16.msra.mxu0 %v16091_v17  ;;  %v16137_v17 = vld [vmem:[#allocation2 + $0x1668] sm:$0xff]  }
 0x2be   :  { %14702 = vmatpush3.bf16.msra.mxu1 %v16092_v18  ;;  %14681 = vmatprep.subr.bf16.mxu0 %v16093_v19 }
 0x2bf   :  { %14703 = vmatprep.subr.bf16.mxu1 %v16094_v20  ;;  %v16138_v20 = vld [vmem:[#allocation2 + $0x16e8] sm:$0xff]  }
 0x2c1   :  { %14682 = vmatpush3.bf16.msra.mxu0 %v16095_v21 }
 0x2c2   :  { %14704 = vmatpush3.bf16.msra.mxu1 %v16096_v22  ;;  %14683 = vmatprep.subr.bf16.mxu0 %v16097_v23  ;;  %v16139_v23 = vld [vmem:[#allocation2 + $0x1628] sm:$0xff]  }
 0x2c3   :  { %14705 = vmatprep.subr.bf16.mxu1 %v16098_v24 }
 0x2c5   :  { %14684 = vmatpush3.bf16.msra.mxu0 %v16099_v26 }
 0x2c6   :  { %14706 = vmatpush3.bf16.msra.mxu1 %v16100_v28  ;;  %14685 = vmatprep.subr.bf16.mxu0 %v16101_v32  ;;  %v16141_v28 = vld [vmem:[#allocation2 + $0x1670] sm:$0xff]  }
 0x2c7   :  { %v14383_v25 = vpop.f32.mrb[56].mxu0  ;;  %14707 = vmatprep.subr.bf16.mxu1 %v16102_v34  ;;  %v16144_v32 = vld [vmem:[#allocation2 + $0x16b0] sm:$0xff]   ;;  %v16146_v34 = vld [vmem:[#allocation2 + $0x16f8] sm:$0xff]  }
 0x2c8   :  { %v14405_v27 = vpop.f32.mrb[56].mxu1  ;;  %v14384_v29 = vpop.f32.mrb[57].mxu0 }
 0x2c9   :  { %v14385_v30 = vadd.f32 %v14384_v29, %v14383_v25  ;;  %v14406_v31 = vpop.f32.mrb[57].mxu1  ;;  %v14386_v35 = vpop.f32.mrb[58].mxu0  ;;  %14686 = vmatpush3.bf16.msra.mxu0 %v16103_v38  ;;  %v16140_v25 = vld [vmem:[#allocation2 + $0x16a8] sm:$0xff]  }
 0x2ca   :  { %v14407_v33 = vadd.f32 %v14406_v31, %v14405_v27  ;;  %v14408_v37 = vpop.f32.mrb[58].mxu1  ;;  %v14387_v40 = vpop.f32.mrb[59].mxu0  ;;  %14708 = vmatpush3.bf16.msra.mxu1 %v16104_v39  ;;  %14687 = vmatprep.subr.bf16.mxu0 %v16105_v43  ;;  %v16143_v31 = vld [vmem:[#allocation2 + $0x1630] sm:$0xff]   ;;  %v16147_v35 = vld [vmem:[#allocation2 + $0x1638] sm:$0xff]   ;;  %v16153_v43 = vld [vmem:[#allocation2 + $0x1740] sm:$0xff]  }
 0x2cb   :  { %v10717_v36 = vadd.f32 %v14385_v30, %v16826_v57  ;;  %v14409_v42 = vpop.f32.mrb[59].mxu1  ;;  %14709 = vmatprep.subr.bf16.mxu1 %v16106_v44  ;;  %v12569_v57 = vcombine.high %v78_v52, %v78_v52  ;;  %v16142_v30 = vld [vmem:[#allocation2 + $0x16f0] sm:$0xff]   ;;  %v79_v37 = vld [vmem:[%s16988_s0 + $0x160] sm:$0xff]  ;;  %v80_v40 = vld [vmem:[%s16988_s0 + $0x168] sm:$0xff] }
 0x2cc   :  { %v12570_v38 = vcombine.low %v79_v37, %v79_v37  ;;  %v12571_v39 = vcombine.high %v79_v37, %v79_v37  ;;  %v12573_v42 = vcombine.high %v80_v40, %v80_v40  ;;  %v16154_v44 = vld [vmem:[#allocation2 + $0x17c0] sm:$0xff]   ;;  %v16162_v52 = vld [vmem:[#allocation2 + $0x17d0] sm:$0xff]  }
 0x2cd   :  { %v16835_v41 = vadd.f32 %v14407_v33, %v10717_v36  ;;  %14688 = vmatpush3.bf16.msra.mxu0 %v16107_v45  ;;  %11314 = vmatprep.mubr.bf16.mxu1 %v12569_v57  ;;  %v16145_v33 = vld [vmem:[#allocation2 + $0x1678] sm:$0xff]   ;;  %v16155_v45 = vld [vmem:[#allocation2 + $0x1700] sm:$0xff]   ;;  %v16197_v37 = vld [vmem:[#allocation2 + $0x1850] sm:$0xff]  }
 0x2ce   :  { %14710 = vmatpush3.bf16.msra.mxu1 %v16108_v46  ;;  %14689 = vmatprep.subr.bf16.mxu0 %v16109_v47  ;;  %v16148_v36 = vld [vmem:[#allocation2 + $0x16b8] sm:$0xff]   ;;  %v16156_v46 = vld [vmem:[#allocation2 + $0x1780] sm:$0xff]   ;;  %v16157_v47 = vld [vmem:[#allocation2 + $0x1748] sm:$0xff]  }
 0x2cf   :  { %14711 = vmatprep.subr.bf16.mxu1 %v16110_v48  ;;  %v16158_v48 = vld [vmem:[#allocation2 + $0x17c8] sm:$0xff]   ;;  %v16167_v57 = vld [vmem:[#allocation2 + $0x1718] sm:$0xff]  }
 0x2d1   :  { %14690 = vmatpush3.bf16.msra.mxu0 %v16111_v49  ;;  %v16159_v49 = vld [vmem:[#allocation2 + $0x1708] sm:$0xff]  }
 0x2d2   :  { %14712 = vmatpush3.bf16.msra.mxu1 %v16112_v50  ;;  %14719 = vmatprep.subr.bf16.mxu0 %v16117_v56  ;;  %v16160_v50 = vld [vmem:[#allocation2 + $0x1788] sm:$0xff]   ;;  %v16166_v56 = vld [vmem:[#allocation2 + $0x17d8] sm:$0xff]  }
 0x2d3   :  { %14741 = vmatprep.subr.bf16.mxu1 %v16118_v58  ;;  %v16168_v58 = vld [vmem:[#allocation2 + $0x1798] sm:$0xff]  }
 0x2d4   :  { %11275 = vmatmul.mubr.bf16.vlgmr.msra.gmra.mrb[84].mxu0 %v12566_v53  ;;  %v16163_v53 = vld [vmem:[#allocation2 + $0x1710] sm:$0xff]  }
 0x2d5   :  { %11315 = vmatmul.mubr.bf16.vlgmr.msra.gmra.mrb[84].mxu1 %v12568_v55  ;;  %14720 = vmatpush3.bf16.msra.mxu0 %v16119_v59  ;;  %v16165_v55 = vld [vmem:[#allocation2 + $0x1758] sm:$0xff]   ;;  %v16169_v59 = vld [vmem:[#allocation2 + $0x1760] sm:$0xff]  }
 0x2d6   :  { %14742 = vmatpush3.bf16.msra.mxu1 %v16120_v60  ;;  %14721 = vmatprep.subr.bf16.mxu0 %v16121_v61  ;;  %v16170_v60 = vld [vmem:[#allocation2 + $0x17e0] sm:$0xff]  }
 0x2d7   :  { %14743 = vmatprep.subr.bf16.mxu1 %v16122_v62  ;;  %11354 = vmatprep.mubr.bf16.mxu0 %v12571_v39  ;;  %v16171_v62 = vld [vmem:[#allocation2 + $0x1720] sm:$0xff]   ;;  %v16199_v39 = vld [vmem:[#allocation2 + $0x1810] sm:$0xff]  }
 0x2d8   :  { %11394 = vmatprep.mubr.bf16.mxu1 %v12573_v42  ;;  %v16202_v42 = vld [vmem:[#allocation2 + $0x18d8] sm:$0xff]  }
 0x2d9   :  { %14722 = vmatpush3.bf16.msra.mxu0 %v16123_v63 }
 0x2da   :  { %14744 = vmatpush3.bf16.msra.mxu1 %v16124_v0  ;;  %14723 = vmatprep.subr.bf16.mxu0 %v16125_v1  ;;  %v16172_v0 = vld [vmem:[#allocation2 + $0x17a0] sm:$0xff]  }
 0x2db   :  { %14745 = vmatprep.subr.bf16.mxu1 %v16126_v2 }
 0x2dd   :  { %14724 = vmatpush3.bf16.msra.mxu0 %v16127_v3  ;;  %v16173_v3 = vld [vmem:[#allocation2 + $0x1768] sm:$0xff]  }
 0x2de   :  { %14746 = vmatpush3.bf16.msra.mxu1 %v16128_v4  ;;  %14725 = vmatprep.subr.bf16.mxu0 %v16129_v5 }
 0x2df   :  { %14747 = vmatprep.subr.bf16.mxu1 %v16130_v6  ;;  %v16174_v6 = vld [vmem:[#allocation2 + $0x17e8] sm:$0xff]  }
 0x2e1   :  { %14726 = vmatpush3.bf16.msra.mxu0 %v16131_v7 }
 0x2e2   :  { %14748 = vmatpush3.bf16.msra.mxu1 %v16132_v8  ;;  %14727 = vmatprep.subr.bf16.mxu0 %v16133_v9  ;;  %v16175_v9 = vld [vmem:[#allocation2 + $0x1728] sm:$0xff]  }
 0x2e3   :  { %14749 = vmatprep.subr.bf16.mxu1 %v16134_v10 }
 0x2e5   :  { %14728 = vmatpush3.bf16.msra.mxu0 %v16135_v12 }
 0x2e6   :  { %14750 = vmatpush3.bf16.msra.mxu1 %v16136_v14  ;;  %14729 = vmatprep.subr.bf16.mxu0 %v16137_v17  ;;  %v16177_v14 = vld [vmem:[#allocation2 + $0x1770] sm:$0xff]  }
 0x2e7   :  { %v14427_v11 = vpop.f32.mrb[60].mxu0  ;;  %14751 = vmatprep.subr.bf16.mxu1 %v16138_v20  ;;  %v16179_v17 = vld [vmem:[#allocation2 + $0x1730] sm:$0xff]   ;;  %v16182_v20 = vld [vmem:[#allocation2 + $0x17f8] sm:$0xff]  }
 0x2e8   :  { %v14449_v13 = vpop.f32.mrb[60].mxu1  ;;  %v14428_v15 = vpop.f32.mrb[61].mxu0 }
 0x2e9   :  { %v14450_v16 = vpop.f32.mrb[61].mxu1  ;;  %v14429_v18 = vadd.f32 %v14428_v15, %v14427_v11  ;;  %v14430_v21 = vpop.f32.mrb[62].mxu0  ;;  %14730 = vmatpush3.bf16.msra.mxu0 %v16139_v23  ;;  %v16176_v11 = vld [vmem:[#allocation2 + $0x17a8] sm:$0xff]   ;;  %v81_v23 = vld [vmem:[%s16988_s0 + $0x170] sm:$0xff] }
 0x2ea   :  { %v14451_v19 = vadd.f32 %v14450_v16, %v14449_v13  ;;  %v14452_v22 = vpop.f32.mrb[62].mxu1  ;;  %v14431_v26 = vpop.f32.mrb[63].mxu0  ;;  %14752 = vmatpush3.bf16.msra.mxu1 %v16140_v25  ;;  %14731 = vmatprep.subr.bf16.mxu0 %v16141_v28  ;;  %v16178_v16 = vld [vmem:[#allocation2 + $0x17f0] sm:$0xff]   ;;  %v16183_v21 = vld [vmem:[#allocation2 + $0x1738] sm:$0xff]   ;;  %v12574_v25 = vcombine.low %v81_v23, %v81_v23 }
 0x2eb   :  { %v10797_v24 = vadd.f32 %v14429_v18, %v16835_v41  ;;  %v14453_v27 = vpop.f32.mrb[63].mxu1  ;;  %14753 = vmatprep.subr.bf16.mxu1 %v16142_v30  ;;  %v12572_v41 = vcombine.low %v80_v40, %v80_v40  ;;  %v16180_v18 = vld [vmem:[#allocation2 + $0x17b0] sm:$0xff]   ;;  %v16184_v22 = vld [vmem:[#allocation2 + $0x17b8] sm:$0xff]   ;;  %v12575_v26 = vcombine.high %v81_v23, %v81_v23  ;;  %v16190_v30 = vld [vmem:[#allocation2 + $0x18c0] sm:$0xff]  }
 0x2ec   :  { %v16200_v40 = vld [vmem:[#allocation2 + $0x1890] sm:$0xff]  }
 0x2ed   :  { %v16844_v29 = vadd.f32 %v14451_v19, %v10797_v24  ;;  %14732 = vmatpush3.bf16.msra.mxu0 %v16143_v31  ;;  %v16181_v19 = vld [vmem:[#allocation2 + $0x1778] sm:$0xff]   ;;  %v16191_v31 = vld [vmem:[#allocation2 + $0x1800] sm:$0xff]   ;;  %v16233_v23 = vld [vmem:[#allocation2 + $0x1950] sm:$0xff]  }
 0x2ee   :  { %14754 = vmatpush3.bf16.msra.mxu1 %v16144_v32  ;;  %14733 = vmatprep.subr.bf16.mxu0 %v16145_v33  ;;  %v82_v24 = vld [vmem:[%s16988_s0 + $0x178] sm:$0xff]  ;;  %v16192_v32 = vld [vmem:[#allocation2 + $0x1880] sm:$0xff]   ;;  %v16193_v33 = vld [vmem:[#allocation2 + $0x1848] sm:$0xff]  }
 0x2ef   :  { %14755 = vmatprep.subr.bf16.mxu1 %v16146_v34  ;;  %v12576_v27 = vcombine.low %v82_v24, %v82_v24  ;;  %v12577_v28 = vcombine.high %v82_v24, %v82_v24  ;;  %v16194_v34 = vld [vmem:[#allocation2 + $0x18c8] sm:$0xff]   ;;  %v16234_v24 = vld [vmem:[#allocation2 + $0x19d0] sm:$0xff]  }
 0x2f1   :  { %14734 = vmatpush3.bf16.msra.mxu0 %v16147_v35  ;;  %v16195_v35 = vld [vmem:[#allocation2 + $0x1808] sm:$0xff]  }
 0x2f2   :  { %14756 = vmatpush3.bf16.msra.mxu1 %v16148_v36  ;;  %14763 = vmatprep.subr.bf16.mxu0 %v16153_v43  ;;  %v16196_v36 = vld [vmem:[#allocation2 + $0x1888] sm:$0xff]   ;;  %v16203_v43 = vld [vmem:[#allocation2 + $0x1818] sm:$0xff]  }
 0x2f3   :  { %14785 = vmatprep.subr.bf16.mxu1 %v16154_v44  ;;  %v16204_v44 = vld [vmem:[#allocation2 + $0x1898] sm:$0xff]  }
 0x2f4   :  { %11355 = vmatmul.mubr.bf16.vlgmr.msra.gmra.mrb[88].mxu0 %v12570_v38  ;;  %v16198_v38 = vld [vmem:[#allocation2 + $0x18d0] sm:$0xff]  }
 0x2f5   :  { %11395 = vmatmul.mubr.bf16.vlgmr.msra.gmra.mrb[88].mxu1 %v12572_v41  ;;  %14764 = vmatpush3.bf16.msra.mxu0 %v16155_v45  ;;  %v16201_v41 = vld [vmem:[#allocation2 + $0x1858] sm:$0xff]   ;;  %v16205_v45 = vld [vmem:[#allocation2 + $0x1860] sm:$0xff]  }
 0x2f6   :  { %14786 = vmatpush3.bf16.msra.mxu1 %v16156_v46  ;;  %14765 = vmatprep.subr.bf16.mxu0 %v16157_v47  ;;  %v16206_v46 = vld [vmem:[#allocation2 + $0x18e0] sm:$0xff]  }
 0x2f7   :  { %14787 = vmatprep.subr.bf16.mxu1 %v16158_v48  ;;  %11434 = vmatprep.mubr.bf16.mxu0 %v12575_v26  ;;  %v16207_v47 = vld [vmem:[#allocation2 + $0x1820] sm:$0xff]   ;;  %v16236_v26 = vld [vmem:[#allocation2 + $0x1990] sm:$0xff]  }
 0x2f8   :  { %11474 = vmatprep.mubr.bf16.mxu1 %v12577_v28  ;;  %v16238_v28 = vld [vmem:[#allocation2 + $0x19d8] sm:$0xff]  }
 0x2f9   :  { %14766 = vmatpush3.bf16.msra.mxu0 %v16159_v49  ;;  %v16208_v49 = vld [vmem:[#allocation2 + $0x18a0] sm:$0xff]  }
 0x2fa   :  { %14788 = vmatpush3.bf16.msra.mxu1 %v16160_v50  ;;  %14767 = vmatprep.subr.bf16.mxu0 %v16161_v51 }
 0x2fb   :  { %14789 = vmatprep.subr.bf16.mxu1 %v16162_v52 }
 0x2fd   :  { %14768 = vmatpush3.bf16.msra.mxu0 %v16163_v53 }
 0x2fe   :  { %14790 = vmatpush3.bf16.msra.mxu1 %v16164_v54  ;;  %14769 = vmatprep.subr.bf16.mxu0 %v16165_v55  ;;  %v16209_v55 = vld [vmem:[#allocation2 + $0x1868] sm:$0xff]  }
 0x2ff   :  { %14791 = vmatprep.subr.bf16.mxu1 %v16166_v56 }
 0x301   :  { %14770 = vmatpush3.bf16.msra.mxu0 %v16167_v57  ;;  %v16210_v57 = vld [vmem:[#allocation2 + $0x18e8] sm:$0xff]  }
 0x302   :  { %14792 = vmatpush3.bf16.msra.mxu1 %v16168_v58  ;;  %14771 = vmatprep.subr.bf16.mxu0 %v16169_v59 }
 0x303   :  { %14793 = vmatprep.subr.bf16.mxu1 %v16170_v60  ;;  %v16211_v60 = vld [vmem:[#allocation2 + $0x1828] sm:$0xff]  }
 0x305   :  { %14772 = vmatpush3.bf16.msra.mxu0 %v16171_v62  ;;  %v16212_v62 = vld [vmem:[#allocation2 + $0x18a8] sm:$0xff]  }
 0x306   :  { %14794 = vmatpush3.bf16.msra.mxu1 %v16172_v0  ;;  %14773 = vmatprep.subr.bf16.mxu0 %v16173_v3  ;;  %v16215_v3 = vld [vmem:[#allocation2 + $0x1830] sm:$0xff]  }
 0x307   :  { %v14471_v61 = vpop.f32.mrb[64].mxu0  ;;  %14795 = vmatprep.subr.bf16.mxu1 %v16174_v6  ;;  %v16218_v6 = vld [vmem:[#allocation2 + $0x18f8] sm:$0xff]  }
 0x308   :  { %v14493_v63 = vpop.f32.mrb[64].mxu1  ;;  %v14472_v1 = vpop.f32.mrb[65].mxu0 }
 0x309   :  { %v14494_v2 = vpop.f32.mrb[65].mxu1  ;;  %v14473_v4 = vadd.f32 %v14472_v1, %v14471_v61  ;;  %v14474_v7 = vpop.f32.mrb[66].mxu0  ;;  %14774 = vmatpush3.bf16.msra.mxu0 %v16175_v9  ;;  %v16213_v1 = vld [vmem:[#allocation2 + $0x1870] sm:$0xff]   ;;  %v83_v9 = vld [vmem:[%s16988_s0 + $0x180] sm:$0xff] }
 0x30a   :  { %v14495_v5 = vadd.f32 %v14494_v2, %v14493_v63  ;;  %v14496_v8 = vpop.f32.mrb[66].mxu1  ;;  %v14475_v12 = vpop.f32.mrb[67].mxu0  ;;  %14796 = vmatpush3.bf16.msra.mxu1 %v16176_v11  ;;  %14775 = vmatprep.subr.bf16.mxu0 %v16177_v14  ;;  %v16214_v2 = vld [vmem:[#allocation2 + $0x18f0] sm:$0xff]   ;;  %v16219_v7 = vld [vmem:[#allocation2 + $0x1838] sm:$0xff]   ;;  %v12578_v11 = vcombine.low %v83_v9, %v83_v9 }
 0x30b   :  { %v10877_v10 = vadd.f32 %v14473_v4, %v16844_v29  ;;  %v14497_v13 = vpop.f32.mrb[67].mxu1  ;;  %14797 = vmatprep.subr.bf16.mxu1 %v16178_v16  ;;  %v16189_v29 = vld [vmem:[#allocation2 + $0x1840] sm:$0xff]   ;;  %v16216_v4 = vld [vmem:[#allocation2 + $0x18b0] sm:$0xff]   ;;  %v16220_v8 = vld [vmem:[#allocation2 + $0x18b8] sm:$0xff]   ;;  %v12579_v12 = vcombine.high %v83_v9, %v83_v9 }
 0x30c   :  { %v16226_v16 = vld [vmem:[#allocation2 + $0x19c0] sm:$0xff]   ;;  %v16269_v9 = vld [vmem:[#allocation2 + $0x1a50] sm:$0xff]  }
 0x30d   :  { %v16853_v15 = vadd.f32 %v14495_v5, %v10877_v10  ;;  %14776 = vmatpush3.bf16.msra.mxu0 %v16179_v17  ;;  %v16217_v5 = vld [vmem:[#allocation2 + $0x1878] sm:$0xff]   ;;  %v84_v10 = vld [vmem:[%s16988_s0 + $0x188] sm:$0xff]  ;;  %v16227_v17 = vld [vmem:[#allocation2 + $0x1900] sm:$0xff]  }
 0x30e   :  { %14798 = vmatpush3.bf16.msra.mxu1 %v16180_v18  ;;  %14777 = vmatprep.subr.bf16.mxu0 %v16181_v19  ;;  %v12580_v13 = vcombine.low %v84_v10, %v84_v10  ;;  %v12581_v14 = vcombine.high %v84_v10, %v84_v10  ;;  %v16228_v18 = vld [vmem:[#allocation2 + $0x1980] sm:$0xff]   ;;  %v16229_v19 = vld [vmem:[#allocation2 + $0x1948] sm:$0xff]   ;;  %v16270_v10 = vld [vmem:[#allocation2 + $0x1ad0] sm:$0xff]  }
 0x30f   :  { %14799 = vmatprep.subr.bf16.mxu1 %v16182_v20  ;;  %v16230_v20 = vld [vmem:[#allocation2 + $0x19c8] sm:$0xff]  }
 0x311   :  { %14778 = vmatpush3.bf16.msra.mxu0 %v16183_v21  ;;  %v16231_v21 = vld [vmem:[#allocation2 + $0x1908] sm:$0xff]  }
 0x312   :  { %14800 = vmatpush3.bf16.msra.mxu1 %v16184_v22  ;;  %14807 = vmatprep.subr.bf16.mxu0 %v16189_v29  ;;  %v16232_v22 = vld [vmem:[#allocation2 + $0x1988] sm:$0xff]   ;;  %v16239_v29 = vld [vmem:[#allocation2 + $0x1918] sm:$0xff]  }
 0x313   :  { %14829 = vmatprep.subr.bf16.mxu1 %v16190_v30  ;;  %v16240_v30 = vld [vmem:[#allocation2 + $0x1998] sm:$0xff]  }
 0x314   :  { %11435 = vmatmul.mubr.bf16.vlgmr.msra.gmra.mrb[92].mxu0 %v12574_v25  ;;  %v16235_v25 = vld [vmem:[#allocation2 + $0x1910] sm:$0xff]  }
 0x315   :  { %11475 = vmatmul.mubr.bf16.vlgmr.msra.gmra.mrb[92].mxu1 %v12576_v27  ;;  %14808 = vmatpush3.bf16.msra.mxu0 %v16191_v31  ;;  %v16237_v27 = vld [vmem:[#allocation2 + $0x1958] sm:$0xff]   ;;  %v16241_v31 = vld [vmem:[#allocation2 + $0x1960] sm:$0xff]  }
 0x316   :  { %14830 = vmatpush3.bf16.msra.mxu1 %v16192_v32  ;;  %14809 = vmatprep.subr.bf16.mxu0 %v16193_v33  ;;  %v16242_v32 = vld [vmem:[#allocation2 + $0x19e0] sm:$0xff]  }
 0x317   :  { %14831 = vmatprep.subr.bf16.mxu1 %v16194_v34  ;;  %11514 = vmatprep.mubr.bf16.mxu0 %v12579_v12  ;;  %v16243_v33 = vld [vmem:[#allocation2 + $0x1920] sm:$0xff]   ;;  %v16272_v12 = vld [vmem:[#allocation2 + $0x1a90] sm:$0xff]  }
 0x318   :  { %11554 = vmatprep.mubr.bf16.mxu1 %v12581_v14  ;;  %v16274_v14 = vld [vmem:[#allocation2 + $0x1ad8] sm:$0xff]  }
 0x319   :  { %14810 = vmatpush3.bf16.msra.mxu0 %v16195_v35  ;;  %v16244_v35 = vld [vmem:[#allocation2 + $0x19a0] sm:$0xff]  }
 0x31a   :  { %14832 = vmatpush3.bf16.msra.mxu1 %v16196_v36  ;;  %14811 = vmatprep.subr.bf16.mxu0 %v16197_v37 }
 0x31b   :  { %14833 = vmatprep.subr.bf16.mxu1 %v16198_v38 }
 0x31d   :  { %14812 = vmatpush3.bf16.msra.mxu0 %v16199_v39 }
 0x31e   :  { %14834 = vmatpush3.bf16.msra.mxu1 %v16200_v40  ;;  %14813 = vmatprep.subr.bf16.mxu0 %v16201_v41  ;;  %v16245_v41 = vld [vmem:[#allocation2 + $0x1968] sm:$0xff]  }
 0x31f   :  { %14835 = vmatprep.subr.bf16.mxu1 %v16202_v42 }
 0x321   :  { %14814 = vmatpush3.bf16.msra.mxu0 %v16203_v43  ;;  %v16246_v43 = vld [vmem:[#allocation2 + $0x19e8] sm:$0xff]  }
 0x322   :  { %14836 = vmatpush3.bf16.msra.mxu1 %v16204_v44  ;;  %14815 = vmatprep.subr.bf16.mxu0 %v16205_v45 }
 0x323   :  { %14837 = vmatprep.subr.bf16.mxu1 %v16206_v46  ;;  %v16247_v46 = vld [vmem:[#allocation2 + $0x1928] sm:$0xff]  }
 0x325   :  { %14816 = vmatpush3.bf16.msra.mxu0 %v16207_v47 }
 0x326   :  { %14838 = vmatpush3.bf16.msra.mxu1 %v16208_v49  ;;  %14817 = vmatprep.subr.bf16.mxu0 %v16209_v55  ;;  %v16253_v55 = vld [vmem:[#allocation2 + $0x1978] sm:$0xff]  }
 0x327   :  { %v14515_v48 = vpop.f32.mrb[68].mxu0  ;;  %14839 = vmatprep.subr.bf16.mxu1 %v16210_v57  ;;  %v16255_v57 = vld [vmem:[#allocation2 + $0x1938] sm:$0xff]  }
 0x328   :  { %v14537_v50 = vpop.f32.mrb[68].mxu1  ;;  %v14516_v51 = vpop.f32.mrb[69].mxu0 }
 0x329   :  { %v14538_v52 = vpop.f32.mrb[69].mxu1  ;;  %v14517_v53 = vadd.f32 %v14516_v51, %v14515_v48  ;;  %v14518_v56 = vpop.f32.mrb[70].mxu0  ;;  %14818 = vmatpush3.bf16.msra.mxu0 %v16211_v60  ;;  %v16248_v48 = vld [vmem:[#allocation2 + $0x19a8] sm:$0xff]   ;;  %v16249_v51 = vld [vmem:[#allocation2 + $0x1970] sm:$0xff]   ;;  %v86_v60 = vld [vmem:[%s16988_s0 + $0x198] sm:$0xff] }
 0x32a   :  { %v14539_v54 = vadd.f32 %v14538_v52, %v14537_v50  ;;  %v14540_v58 = vpop.f32.mrb[70].mxu1  ;;  %v14519_v61 = vpop.f32.mrb[71].mxu0  ;;  %14840 = vmatpush3.bf16.msra.mxu1 %v16212_v62  ;;  %14819 = vmatprep.subr.bf16.mxu0 %v16213_v1  ;;  %v16250_v52 = vld [vmem:[#allocation2 + $0x19f0] sm:$0xff]   ;;  %v16254_v56 = vld [vmem:[#allocation2 + $0x19f8] sm:$0xff]   ;;  %v16261_v1 = vld [vmem:[#allocation2 + $0x1a40] sm:$0xff]  }
 0x32b   :  { %v10957_v59 = vadd.f32 %v14517_v53, %v16853_v15  ;;  %v14541_v63 = vpop.f32.mrb[71].mxu1  ;;  %14841 = vmatprep.subr.bf16.mxu1 %v16214_v2  ;;  %v16225_v15 = vld [vmem:[#allocation2 + $0x1940] sm:$0xff]   ;;  %v16251_v53 = vld [vmem:[#allocation2 + $0x1930] sm:$0xff]   ;;  %v16256_v58 = vld [vmem:[#allocation2 + $0x19b8] sm:$0xff]  }
 0x32c   :  { %v12584_v63 = vcombine.low %v86_v60, %v86_v60  ;;  %v16262_v2 = vld [vmem:[#allocation2 + $0x1ac0] sm:$0xff]  }
 0x32d   :  { %v16862_v0 = vadd.f32 %v14539_v54, %v10957_v59  ;;  %14820 = vmatpush3.bf16.msra.mxu0 %v16215_v3  ;;  %v16252_v54 = vld [vmem:[#allocation2 + $0x19b0] sm:$0xff]   ;;  %v16263_v3 = vld [vmem:[#allocation2 + $0x1a00] sm:$0xff]  }
 0x32e   :  { %14842 = vmatpush3.bf16.msra.mxu1 %v16216_v4  ;;  %14821 = vmatprep.subr.bf16.mxu0 %v16217_v5  ;;  %v85_v59 = vld [vmem:[%s16988_s0 + $0x190] sm:$0xff]  ;;  %v16264_v4 = vld [vmem:[#allocation2 + $0x1a80] sm:$0xff]   ;;  %v16265_v5 = vld [vmem:[#allocation2 + $0x1a48] sm:$0xff]  }
 0x32f   :  { %14843 = vmatprep.subr.bf16.mxu1 %v16218_v6  ;;  %v12582_v61 = vcombine.low %v85_v59, %v85_v59  ;;  %v12583_v62 = vcombine.high %v85_v59, %v85_v59  ;;  %v16266_v6 = vld [vmem:[#allocation2 + $0x1ac8] sm:$0xff]   ;;  %v16305_v59 = vld [vmem:[#allocation2 + $0x1b50] sm:$0xff]  }
 0x331   :  { %14822 = vmatpush3.bf16.msra.mxu0 %v16219_v7  ;;  %v16267_v7 = vld [vmem:[#allocation2 + $0x1a08] sm:$0xff]  }
 0x332   :  { %14844 = vmatpush3.bf16.msra.mxu1 %v16220_v8  ;;  %14851 = vmatprep.subr.bf16.mxu0 %v16225_v15  ;;  %v16268_v8 = vld [vmem:[#allocation2 + $0x1a88] sm:$0xff]   ;;  %v16275_v15 = vld [vmem:[#allocation2 + $0x1a18] sm:$0xff]  }
 0x333   :  { %14873 = vmatprep.subr.bf16.mxu1 %v16226_v16  ;;  %v16276_v16 = vld [vmem:[#allocation2 + $0x1a98] sm:$0xff]  }
 0x334   :  { %11515 = vmatmul.mubr.bf16.vlgmr.msra.gmra.mrb[96].mxu0 %v12578_v11  ;;  %v16271_v11 = vld [vmem:[#allocation2 + $0x1a10] sm:$0xff]  }
 0x335   :  { %11555 = vmatmul.mubr.bf16.vlgmr.msra.gmra.mrb[96].mxu1 %v12580_v13  ;;  %14852 = vmatpush3.bf16.msra.mxu0 %v16227_v17  ;;  %v16273_v13 = vld [vmem:[#allocation2 + $0x1a58] sm:$0xff]   ;;  %v16277_v17 = vld [vmem:[#allocation2 + $0x1a60] sm:$0xff]  }
 0x336   :  { %14874 = vmatpush3.bf16.msra.mxu1 %v16228_v18  ;;  %14853 = vmatprep.subr.bf16.mxu0 %v16229_v19  ;;  %v16278_v18 = vld [vmem:[#allocation2 + $0x1ae0] sm:$0xff]  }
 0x337   :  { %14875 = vmatprep.subr.bf16.mxu1 %v16230_v20  ;;  %11594 = vmatprep.mubr.bf16.mxu0 %v12583_v62  ;;  %v16279_v19 = vld [vmem:[#allocation2 + $0x1a20] sm:$0xff]   ;;  %v16308_v62 = vld [vmem:[#allocation2 + $0x1b90] sm:$0xff]  }
 0x339   :  { %14854 = vmatpush3.bf16.msra.mxu0 %v16231_v21  ;;  %v16280_v21 = vld [vmem:[#allocation2 + $0x1aa0] sm:$0xff]  }
 0x33a   :  { %14876 = vmatpush3.bf16.msra.mxu1 %v16232_v22  ;;  %14855 = vmatprep.subr.bf16.mxu0 %v16233_v23 }
 0x33b   :  { %14877 = vmatprep.subr.bf16.mxu1 %v16234_v24 }
 0x33d   :  { %14856 = vmatpush3.bf16.msra.mxu0 %v16235_v25 }
 0x33e   :  { %14878 = vmatpush3.bf16.msra.mxu1 %v16236_v26  ;;  %14857 = vmatprep.subr.bf16.mxu0 %v16237_v27  ;;  %v16281_v27 = vld [vmem:[#allocation2 + $0x1a68] sm:$0xff]  }
 0x33f   :  { %14879 = vmatprep.subr.bf16.mxu1 %v16238_v28 }
 0x341   :  { %14858 = vmatpush3.bf16.msra.mxu0 %v16239_v29  ;;  %v16282_v29 = vld [vmem:[#allocation2 + $0x1ae8] sm:$0xff]  }
 0x342   :  { %14880 = vmatpush3.bf16.msra.mxu1 %v16240_v30  ;;  %14859 = vmatprep.subr.bf16.mxu0 %v16241_v31 }
 0x343   :  { %14881 = vmatprep.subr.bf16.mxu1 %v16242_v32  ;;  %v16283_v32 = vld [vmem:[#allocation2 + $0x1a28] sm:$0xff]  }
 0x345   :  { %14860 = vmatpush3.bf16.msra.mxu0 %v16243_v33 }
 0x346   :  { %14882 = vmatpush3.bf16.msra.mxu1 %v16244_v35  ;;  %14861 = vmatprep.subr.bf16.mxu0 %v16245_v41  ;;  %v16289_v41 = vld [vmem:[#allocation2 + $0x1a78] sm:$0xff]  }
 0x347   :  { %v14559_v34 = vpop.f32.mrb[72].mxu0  ;;  %14883 = vmatprep.subr.bf16.mxu1 %v16246_v43  ;;  %v16291_v43 = vld [vmem:[#allocation2 + $0x1a38] sm:$0xff]  }
 0x348   :  { %v14581_v36 = vpop.f32.mrb[72].mxu1  ;;  %v14560_v37 = vpop.f32.mrb[73].mxu0 }
 0x349   :  { %v14582_v38 = vpop.f32.mrb[73].mxu1  ;;  %v14561_v39 = vadd.f32 %v14560_v37, %v14559_v34  ;;  %v14562_v42 = vpop.f32.mrb[74].mxu0  ;;  %14862 = vmatpush3.bf16.msra.mxu0 %v16247_v46  ;;  %v16284_v34 = vld [vmem:[#allocation2 + $0x1aa8] sm:$0xff]   ;;  %v16285_v37 = vld [vmem:[#allocation2 + $0x1a70] sm:$0xff]  }
 0x34a   :  { %v14583_v40 = vadd.f32 %v14582_v38, %v14581_v36  ;;  %v14584_v44 = vpop.f32.mrb[74].mxu1  ;;  %v14563_v47 = vpop.f32.mrb[75].mxu0  ;;  %14884 = vmatpush3.bf16.msra.mxu1 %v16248_v48  ;;  %14863 = vmatprep.subr.bf16.mxu0 %v16249_v51  ;;  %v16286_v38 = vld [vmem:[#allocation2 + $0x1af0] sm:$0xff]   ;;  %v16290_v42 = vld [vmem:[#allocation2 + $0x1af8] sm:$0xff]   ;;  %v88_v46 = vld [vmem:[%s16988_s0 + $0x1a8] sm:$0xff] }
 0x34b   :  { %v11037_v45 = vadd.f32 %v14561_v39, %v16862_v0  ;;  %v14585_v49 = vpop.f32.mrb[75].mxu1  ;;  %14885 = vmatprep.subr.bf16.mxu1 %v16250_v52  ;;  %v12585_v0 = vcombine.high %v86_v60, %v86_v60  ;;  %v16287_v39 = vld [vmem:[#allocation2 + $0x1a30] sm:$0xff]   ;;  %v16292_v44 = vld [vmem:[#allocation2 + $0x1ab8] sm:$0xff]   ;;  %v16297_v51 = vld [vmem:[#allocation2 + $0x1b40] sm:$0xff]  }
 0x34c   :  { %v12588_v49 = vcombine.low %v88_v46, %v88_v46  ;;  %v16298_v52 = vld [vmem:[#allocation2 + $0x1bc0] sm:$0xff]   ;;  %v16306_v60 = vld [vmem:[#allocation2 + $0x1bd0] sm:$0xff]  }
 0x34d   :  { %v16871_v50 = vadd.f32 %v14583_v40, %v11037_v45  ;;  %14864 = vmatpush3.bf16.msra.mxu0 %v16251_v53  ;;  %11634 = vmatprep.mubr.bf16.mxu1 %v12585_v0  ;;  %v16288_v40 = vld [vmem:[#allocation2 + $0x1ab0] sm:$0xff]   ;;  %v87_v45 = vld [vmem:[%s16988_s0 + $0x1a0] sm:$0xff]  ;;  %v16310_v0 = vld [vmem:[#allocation2 + $0x1bd8] sm:$0xff]  }
 0x34e   :  { %14886 = vmatpush3.bf16.msra.mxu1 %v16252_v54  ;;  %14865 = vmatprep.subr.bf16.mxu0 %v16253_v55  ;;  %v12586_v47 = vcombine.low %v87_v45, %v87_v45  ;;  %v12587_v48 = vcombine.high %v87_v45, %v87_v45  ;;  %v16299_v53 = vld [vmem:[#allocation2 + $0x1b00] sm:$0xff]   ;;  %v16301_v55 = vld [vmem:[#allocation2 + $0x1b48] sm:$0xff]   ;;  %v16341_v45 = vld [vmem:[#allocation2 + $0x1c50] sm:$0xff]  }
 0x34f   :  { %14887 = vmatprep.subr.bf16.mxu1 %v16254_v56  ;;  %v16300_v54 = vld [vmem:[#allocation2 + $0x1b80] sm:$0xff]   ;;  %v16302_v56 = vld [vmem:[#allocation2 + $0x1bc8] sm:$0xff]  }
 0x351   :  { %14866 = vmatpush3.bf16.msra.mxu0 %v16255_v57  ;;  %v16303_v57 = vld [vmem:[#allocation2 + $0x1b08] sm:$0xff]  }
 0x352   :  { %14888 = vmatpush3.bf16.msra.mxu1 %v16256_v58  ;;  %14895 = vmatprep.subr.bf16.mxu0 %v16261_v1  ;;  %v16304_v58 = vld [vmem:[#allocation2 + $0x1b88] sm:$0xff]   ;;  %v16311_v1 = vld [vmem:[#allocation2 + $0x1b18] sm:$0xff]  }
 0x353   :  { %14917 = vmatprep.subr.bf16.mxu1 %v16262_v2  ;;  %v16312_v2 = vld [vmem:[#allocation2 + $0x1b98] sm:$0xff]  }
 0x354   :  { %11595 = vmatmul.mubr.bf16.vlgmr.msra.gmra.mrb[100].mxu0 %v12582_v61  ;;  %v16307_v61 = vld [vmem:[#allocation2 + $0x1b10] sm:$0xff]  }
 0x355   :  { %11635 = vmatmul.mubr.bf16.vlgmr.msra.gmra.mrb[100].mxu1 %v12584_v63  ;;  %14896 = vmatpush3.bf16.msra.mxu0 %v16263_v3  ;;  %v16309_v63 = vld [vmem:[#allocation2 + $0x1b58] sm:$0xff]   ;;  %v16313_v3 = vld [vmem:[#allocation2 + $0x1b60] sm:$0xff]  }
 0x356   :  { %14918 = vmatpush3.bf16.msra.mxu1 %v16264_v4  ;;  %14897 = vmatprep.subr.bf16.mxu0 %v16265_v5  ;;  %v16314_v4 = vld [vmem:[#allocation2 + $0x1be0] sm:$0xff]  }
 0x357   :  { %14919 = vmatprep.subr.bf16.mxu1 %v16266_v6  ;;  %11674 = vmatprep.mubr.bf16.mxu0 %v12587_v48  ;;  %v16315_v6 = vld [vmem:[#allocation2 + $0x1b20] sm:$0xff]   ;;  %v16344_v48 = vld [vmem:[#allocation2 + $0x1c90] sm:$0xff]  }
 0x359   :  { %14898 = vmatpush3.bf16.msra.mxu0 %v16267_v7 }
 0x35a   :  { %14920 = vmatpush3.bf16.msra.mxu1 %v16268_v8  ;;  %14899 = vmatprep.subr.bf16.mxu0 %v16269_v9  ;;  %v16316_v8 = vld [vmem:[#allocation2 + $0x1ba0] sm:$0xff]  }
 0x35b   :  { %14921 = vmatprep.subr.bf16.mxu1 %v16270_v10 }
 0x35d   :  { %14900 = vmatpush3.bf16.msra.mxu0 %v16271_v11 }
 0x35e   :  { %14922 = vmatpush3.bf16.msra.mxu1 %v16272_v12  ;;  %14901 = vmatprep.subr.bf16.mxu0 %v16273_v13  ;;  %v16317_v12 = vld [vmem:[#allocation2 + $0x1b68] sm:$0xff]  }
 0x35f   :  { %14923 = vmatprep.subr.bf16.mxu1 %v16274_v14  ;;  %v16318_v14 = vld [vmem:[#allocation2 + $0x1be8] sm:$0xff]  }
 0x361   :  { %14902 = vmatpush3.bf16.msra.mxu0 %v16275_v15 }
 0x362   :  { %14924 = vmatpush3.bf16.msra.mxu1 %v16276_v16  ;;  %14903 = vmatprep.subr.bf16.mxu0 %v16277_v17 }
 0x363   :  { %14925 = vmatprep.subr.bf16.mxu1 %v16278_v18  ;;  %v16319_v18 = vld [vmem:[#allocation2 + $0x1b28] sm:$0xff]  }
 0x365   :  { %14904 = vmatpush3.bf16.msra.mxu0 %v16279_v19  ;;  %v16320_v19 = vld [vmem:[#allocation2 + $0x1ba8] sm:$0xff]  }
 0x366   :  { %14926 = vmatpush3.bf16.msra.mxu1 %v16280_v21  ;;  %14905 = vmatprep.subr.bf16.mxu0 %v16281_v27  ;;  %v16325_v27 = vld [vmem:[#allocation2 + $0x1b78] sm:$0xff]  }
 0x367   :  { %v14603_v20 = vpop.f32.mrb[76].mxu0  ;;  %14927 = vmatprep.subr.bf16.mxu1 %v16282_v29  ;;  %v16327_v29 = vld [vmem:[#allocation2 + $0x1b38] sm:$0xff]  }
 0x368   :  { %v14625_v22 = vpop.f32.mrb[76].mxu1  ;;  %v14604_v23 = vpop.f32.mrb[77].mxu0 }
 0x369   :  { %v14626_v24 = vpop.f32.mrb[77].mxu1  ;;  %v14605_v25 = vadd.f32 %v14604_v23, %v14603_v20  ;;  %v14606_v28 = vpop.f32.mrb[78].mxu0  ;;  %14906 = vmatpush3.bf16.msra.mxu0 %v16283_v32  ;;  %v16321_v23 = vld [vmem:[#allocation2 + $0x1b70] sm:$0xff]   ;;  %v90_v32 = vld [vmem:[%s16988_s0 + $0x1b8] sm:$0xff] }
 0x36a   :  { %v14627_v26 = vadd.f32 %v14626_v24, %v14625_v22  ;;  %v14628_v30 = vpop.f32.mrb[78].mxu1  ;;  %v14607_v33 = vpop.f32.mrb[79].mxu0  ;;  %14928 = vmatpush3.bf16.msra.mxu1 %v16284_v34  ;;  %14907 = vmatprep.subr.bf16.mxu0 %v16285_v37  ;;  %v16322_v24 = vld [vmem:[#allocation2 + $0x1bf0] sm:$0xff]   ;;  %v16326_v28 = vld [vmem:[#allocation2 + $0x1bf8] sm:$0xff]   ;;  %v12593_v37 = vcombine.high %v90_v32, %v90_v32 }
 0x36b   :  { %v11117_v31 = vadd.f32 %v14605_v25, %v16871_v50  ;;  %v14629_v35 = vpop.f32.mrb[79].mxu1  ;;  %14929 = vmatprep.subr.bf16.mxu1 %v16286_v38  ;;  %v12589_v50 = vcombine.high %v88_v46, %v88_v46  ;;  %v16323_v25 = vld [vmem:[#allocation2 + $0x1b30] sm:$0xff]   ;;  %v16328_v30 = vld [vmem:[#allocation2 + $0x1bb8] sm:$0xff]   ;;  %v16334_v38 = vld [vmem:[#allocation2 + $0x1cc0] sm:$0xff]  }
 0x36c   :  { %v12592_v35 = vcombine.low %v90_v32, %v90_v32  ;;  %v16342_v46 = vld [vmem:[#allocation2 + $0x1cd0] sm:$0xff]  }
 0x36d   :  { %v16880_v36 = vadd.f32 %v14627_v26, %v11117_v31  ;;  %14908 = vmatpush3.bf16.msra.mxu0 %v16287_v39  ;;  %11714 = vmatprep.mubr.bf16.mxu1 %v12589_v50  ;;  %v16324_v26 = vld [vmem:[#allocation2 + $0x1bb0] sm:$0xff]   ;;  %v16335_v39 = vld [vmem:[#allocation2 + $0x1c00] sm:$0xff]   ;;  %v16346_v50 = vld [vmem:[#allocation2 + $0x1cd8] sm:$0xff]  }
 0x36e   :  { %14930 = vmatpush3.bf16.msra.mxu1 %v16288_v40  ;;  %14909 = vmatprep.subr.bf16.mxu0 %v16289_v41  ;;  %v89_v31 = vld [vmem:[%s16988_s0 + $0x1b0] sm:$0xff]  ;;  %v16336_v40 = vld [vmem:[#allocation2 + $0x1c80] sm:$0xff]   ;;  %v16337_v41 = vld [vmem:[#allocation2 + $0x1c48] sm:$0xff]  }
 0x36f   :  { %14931 = vmatprep.subr.bf16.mxu1 %v16290_v42  ;;  %v12590_v33 = vcombine.low %v89_v31, %v89_v31  ;;  %v12591_v34 = vcombine.high %v89_v31, %v89_v31  ;;  %v16338_v42 = vld [vmem:[#allocation2 + $0x1cc8] sm:$0xff]   ;;  %v16377_v31 = vld [vmem:[#allocation2 + $0x1d50] sm:$0xff]  }
 0x370   :  { %v16378_v32 = vld [vmem:[#allocation2 + $0x1dd0] sm:$0xff]  }
 0x371   :  { %14910 = vmatpush3.bf16.msra.mxu0 %v16291_v43  ;;  %v16339_v43 = vld [vmem:[#allocation2 + $0x1c08] sm:$0xff]  }
 0x372   :  { %14932 = vmatpush3.bf16.msra.mxu1 %v16292_v44  ;;  %14939 = vmatprep.subr.bf16.mxu0 %v16297_v51  ;;  %v16340_v44 = vld [vmem:[#allocation2 + $0x1c88] sm:$0xff]   ;;  %v16347_v51 = vld [vmem:[#allocation2 + $0x1c18] sm:$0xff]  }
 0x373   :  { %14961 = vmatprep.subr.bf16.mxu1 %v16298_v52  ;;  %v16348_v52 = vld [vmem:[#allocation2 + $0x1c98] sm:$0xff]  }
 0x374   :  { %11675 = vmatmul.mubr.bf16.vlgmr.msra.gmra.mrb[104].mxu0 %v12586_v47  ;;  %v16343_v47 = vld [vmem:[#allocation2 + $0x1c10] sm:$0xff]  }
 0x375   :  { %11715 = vmatmul.mubr.bf16.vlgmr.msra.gmra.mrb[104].mxu1 %v12588_v49  ;;  %14940 = vmatpush3.bf16.msra.mxu0 %v16299_v53  ;;  %v16345_v49 = vld [vmem:[#allocation2 + $0x1c58] sm:$0xff]   ;;  %v16349_v53 = vld [vmem:[#allocation2 + $0x1c60] sm:$0xff]  }
 0x376   :  { %14962 = vmatpush3.bf16.msra.mxu1 %v16300_v54  ;;  %14941 = vmatprep.subr.bf16.mxu0 %v16301_v55  ;;  %v16350_v54 = vld [vmem:[#allocation2 + $0x1ce0] sm:$0xff]  }
 0x377   :  { %14963 = vmatprep.subr.bf16.mxu1 %v16302_v56  ;;  %11754 = vmatprep.mubr.bf16.mxu0 %v12591_v34  ;;  %v16351_v56 = vld [vmem:[#allocation2 + $0x1c20] sm:$0xff]   ;;  %v16380_v34 = vld [vmem:[#allocation2 + $0x1d90] sm:$0xff]  }
 0x378   :  { %11794 = vmatprep.mubr.bf16.mxu1 %v12593_v37  ;;  %v16383_v37 = vld [vmem:[#allocation2 + $0x1d18] sm:$0xff]  }
 0x379   :  { %14942 = vmatpush3.bf16.msra.mxu0 %v16303_v57 }
 0x37a   :  { %14964 = vmatpush3.bf16.msra.mxu1 %v16304_v58  ;;  %14943 = vmatprep.subr.bf16.mxu0 %v16305_v59  ;;  %v16352_v58 = vld [vmem:[#allocation2 + $0x1ca0] sm:$0xff]  }
 0x37b   :  { %14965 = vmatprep.subr.bf16.mxu1 %v16306_v60 }
 0x37d   :  { %14944 = vmatpush3.bf16.msra.mxu0 %v16307_v61  ;;  %v16353_v61 = vld [vmem:[#allocation2 + $0x1c68] sm:$0xff]  }
 0x37e   :  { %14966 = vmatpush3.bf16.msra.mxu1 %v16308_v62  ;;  %14945 = vmatprep.subr.bf16.mxu0 %v16309_v63 }
 0x37f   :  { %14967 = vmatprep.subr.bf16.mxu1 %v16310_v0  ;;  %v16354_v0 = vld [vmem:[#allocation2 + $0x1ce8] sm:$0xff]  }
 0x381   :  { %14946 = vmatpush3.bf16.msra.mxu0 %v16311_v1 }
 0x382   :  { %14968 = vmatpush3.bf16.msra.mxu1 %v16312_v2  ;;  %14947 = vmatprep.subr.bf16.mxu0 %v16313_v3  ;;  %v16355_v3 = vld [vmem:[#allocation2 + $0x1c28] sm:$0xff]  }
 0x383   :  { %14969 = vmatprep.subr.bf16.mxu1 %v16314_v4 }
 0x385   :  { %14948 = vmatpush3.bf16.msra.mxu0 %v16315_v6 }
 0x386   :  { %14970 = vmatpush3.bf16.msra.mxu1 %v16316_v8  ;;  %14949 = vmatprep.subr.bf16.mxu0 %v16317_v12  ;;  %v16357_v8 = vld [vmem:[#allocation2 + $0x1c70] sm:$0xff]  }
 0x387   :  { %v14647_v5 = vpop.f32.mrb[80].mxu0  ;;  %14971 = vmatprep.subr.bf16.mxu1 %v16318_v14  ;;  %v16360_v12 = vld [vmem:[#allocation2 + $0x1cb0] sm:$0xff]   ;;  %v16362_v14 = vld [vmem:[#allocation2 + $0x1cf8] sm:$0xff]  }
 0x388   :  { %v14669_v7 = vpop.f32.mrb[80].mxu1  ;;  %v14648_v9 = vpop.f32.mrb[81].mxu0 }
 0x389   :  { %v14649_v10 = vadd.f32 %v14648_v9, %v14647_v5  ;;  %v14670_v11 = vpop.f32.mrb[81].mxu1  ;;  %v14650_v15 = vpop.f32.mrb[82].mxu0  ;;  %14950 = vmatpush3.bf16.msra.mxu0 %v16319_v18  ;;  %v16356_v5 = vld [vmem:[#allocation2 + $0x1ca8] sm:$0xff]  }
 0x38a   :  { %v14671_v13 = vadd.f32 %v14670_v11, %v14669_v7  ;;  %v14672_v17 = vpop.f32.mrb[82].mxu1  ;;  %v14651_v20 = vpop.f32.mrb[83].mxu0  ;;  %14972 = vmatpush3.bf16.msra.mxu1 %v16320_v19  ;;  %14951 = vmatprep.subr.bf16.mxu0 %v16321_v23  ;;  %v16359_v11 = vld [vmem:[#allocation2 + $0x1c30] sm:$0xff]   ;;  %v16363_v15 = vld [vmem:[#allocation2 + $0x1c38] sm:$0xff]   ;;  %v16369_v23 = vld [vmem:[#allocation2 + $0x1d40] sm:$0xff]  }
 0x38b   :  { %v11197_v16 = vadd.f32 %v14649_v10, %v16880_v36  ;;  %v14673_v22 = vpop.f32.mrb[83].mxu1  ;;  %14973 = vmatprep.subr.bf16.mxu1 %v16322_v24  ;;  %v16333_v36 = vld [vmem:[#allocation2 + $0x1c40] sm:$0xff]   ;;  %v16358_v10 = vld [vmem:[#allocation2 + $0x1cf0] sm:$0xff]   ;;  %v92_v20 = vld [vmem:[%s16988_s0 + $0x1c8] sm:$0xff] }
 0x38c   :  { %v91_v17 = vld [vmem:[%s16988_s0 + $0x1c0] sm:$0xff]  ;;  %v12597_v22 = vcombine.high %v92_v20, %v92_v20 }
 0x38d   :  { %v16889_v21 = vadd.f32 %v14671_v13, %v11197_v16  ;;  %14952 = vmatpush3.bf16.msra.mxu0 %v16323_v25  ;;  %v16361_v13 = vld [vmem:[#allocation2 + $0x1c78] sm:$0xff]   ;;  %v12594_v18 = vcombine.low %v91_v17, %v91_v17  ;;  %v12595_v19 = vcombine.high %v91_v17, %v91_v17  ;;  %v16370_v24 = vld [vmem:[#allocation2 + $0x1dc0] sm:$0xff]   ;;  %v16413_v17 = vld [vmem:[#allocation2 + $0x1e50] sm:$0xff]  }
 0x38e   :  { %14974 = vmatpush3.bf16.msra.mxu1 %v16324_v26  ;;  %14953 = vmatprep.subr.bf16.mxu0 %v16325_v27  ;;  %v16364_v16 = vld [vmem:[#allocation2 + $0x1cb8] sm:$0xff]   ;;  %v16371_v25 = vld [vmem:[#allocation2 + $0x1d00] sm:$0xff]   ;;  %v16373_v27 = vld [vmem:[#allocation2 + $0x1d48] sm:$0xff]  }
 0x38f   :  { %14975 = vmatprep.subr.bf16.mxu1 %v16326_v28  ;;  %v16372_v26 = vld [vmem:[#allocation2 + $0x1d80] sm:$0xff]   ;;  %v16374_v28 = vld [vmem:[#allocation2 + $0x1dc8] sm:$0xff]  }
 0x391   :  { %14954 = vmatpush3.bf16.msra.mxu0 %v16327_v29  ;;  %v16375_v29 = vld [vmem:[#allocation2 + $0x1d08] sm:$0xff]  }
 0x392   :  { %14976 = vmatpush3.bf16.msra.mxu1 %v16328_v30  ;;  %14983 = vmatprep.subr.bf16.mxu0 %v16333_v36  ;;  %v16376_v30 = vld [vmem:[#allocation2 + $0x1d88] sm:$0xff]   ;;  %v16382_v36 = vld [vmem:[#allocation2 + $0x1dd8] sm:$0xff]  }
 0x393   :  { %15005 = vmatprep.subr.bf16.mxu1 %v16334_v38  ;;  %v16384_v38 = vld [vmem:[#allocation2 + $0x1d98] sm:$0xff]  }
 0x394   :  { %11755 = vmatmul.mubr.bf16.vlgmr.msra.gmra.mrb[108].mxu0 %v12590_v33  ;;  %v16379_v33 = vld [vmem:[#allocation2 + $0x1d10] sm:$0xff]  }
 0x395   :  { %11795 = vmatmul.mubr.bf16.vlgmr.msra.gmra.mrb[108].mxu1 %v12592_v35  ;;  %14984 = vmatpush3.bf16.msra.mxu0 %v16335_v39  ;;  %v16381_v35 = vld [vmem:[#allocation2 + $0x1d58] sm:$0xff]   ;;  %v16385_v39 = vld [vmem:[#allocation2 + $0x1d60] sm:$0xff]  }
 0x396   :  { %15006 = vmatpush3.bf16.msra.mxu1 %v16336_v40  ;;  %14985 = vmatprep.subr.bf16.mxu0 %v16337_v41  ;;  %v16386_v40 = vld [vmem:[#allocation2 + $0x1de0] sm:$0xff]  }
 0x397   :  { %15007 = vmatprep.subr.bf16.mxu1 %v16338_v42  ;;  %11834 = vmatprep.mubr.bf16.mxu0 %v12595_v19  ;;  %v16387_v42 = vld [vmem:[#allocation2 + $0x1d20] sm:$0xff]   ;;  %v16415_v19 = vld [vmem:[#allocation2 + $0x1e10] sm:$0xff]  }
 0x398   :  { %11874 = vmatprep.mubr.bf16.mxu1 %v12597_v22  ;;  %v16418_v22 = vld [vmem:[#allocation2 + $0x1ed8] sm:$0xff]  }
 0x399   :  { %14986 = vmatpush3.bf16.msra.mxu0 %v16339_v43 }
 0x39a   :  { %15008 = vmatpush3.bf16.msra.mxu1 %v16340_v44  ;;  %14987 = vmatprep.subr.bf16.mxu0 %v16341_v45  ;;  %v16388_v44 = vld [vmem:[#allocation2 + $0x1da0] sm:$0xff]  }
 0x39b   :  { %15009 = vmatprep.subr.bf16.mxu1 %v16342_v46 }
 0x39d   :  { %14988 = vmatpush3.bf16.msra.mxu0 %v16343_v47  ;;  %v16389_v47 = vld [vmem:[#allocation2 + $0x1d68] sm:$0xff]  }
 0x39e   :  { %15010 = vmatpush3.bf16.msra.mxu1 %v16344_v48  ;;  %14989 = vmatprep.subr.bf16.mxu0 %v16345_v49 }
 0x39f   :  { %15011 = vmatprep.subr.bf16.mxu1 %v16346_v50  ;;  %v16390_v50 = vld [vmem:[#allocation2 + $0x1de8] sm:$0xff]  }
 0x3a1   :  { %14990 = vmatpush3.bf16.msra.mxu0 %v16347_v51 }
 0x3a2   :  { %15012 = vmatpush3.bf16.msra.mxu1 %v16348_v52  ;;  %14991 = vmatprep.subr.bf16.mxu0 %v16349_v53  ;;  %v16391_v53 = vld [vmem:[#allocation2 + $0x1d28] sm:$0xff]  }
 0x3a3   :  { %15013 = vmatprep.subr.bf16.mxu1 %v16350_v54 }
 0x3a5   :  { %14992 = vmatpush3.bf16.msra.mxu0 %v16351_v56 }
 0x3a6   :  { %15014 = vmatpush3.bf16.msra.mxu1 %v16352_v58  ;;  %14993 = vmatprep.subr.bf16.mxu0 %v16353_v61  ;;  %v16393_v58 = vld [vmem:[#allocation2 + $0x1d70] sm:$0xff]  }
 0x3a7   :  { %v14691_v55 = vpop.f32.mrb[84].mxu0  ;;  %15015 = vmatprep.subr.bf16.mxu1 %v16354_v0  ;;  %v16395_v61 = vld [vmem:[#allocation2 + $0x1d30] sm:$0xff]   ;;  %v16398_v0 = vld [vmem:[#allocation2 + $0x1df8] sm:$0xff]  }
 0x3a8   :  { %v14713_v57 = vpop.f32.mrb[84].mxu1  ;;  %v14692_v59 = vpop.f32.mrb[85].mxu0 }
 0x3a9   :  { %v14714_v60 = vpop.f32.mrb[85].mxu1  ;;  %v14693_v62 = vadd.f32 %v14692_v59, %v14691_v55  ;;  %v14694_v1 = vpop.f32.mrb[86].mxu0  ;;  %14994 = vmatpush3.bf16.msra.mxu0 %v16355_v3  ;;  %v16392_v55 = vld [vmem:[#allocation2 + $0x1da8] sm:$0xff]   ;;  %v93_v3 = vld [vmem:[%s16988_s0 + $0x1d0] sm:$0xff] }
 0x3aa   :  { %v14715_v63 = vadd.f32 %v14714_v60, %v14713_v57  ;;  %v14716_v2 = vpop.f32.mrb[86].mxu1  ;;  %v14695_v6 = vpop.f32.mrb[87].mxu0  ;;  %15016 = vmatpush3.bf16.msra.mxu1 %v16356_v5  ;;  %14995 = vmatprep.subr.bf16.mxu0 %v16357_v8  ;;  %v16394_v60 = vld [vmem:[#allocation2 + $0x1df0] sm:$0xff]   ;;  %v16399_v1 = vld [vmem:[#allocation2 + $0x1d38] sm:$0xff]   ;;  %v12598_v5 = vcombine.low %v93_v3, %v93_v3 }
 0x3ab   :  { %v11277_v4 = vadd.f32 %v14693_v62, %v16889_v21  ;;  %v14717_v7 = vpop.f32.mrb[87].mxu1  ;;  %15017 = vmatprep.subr.bf16.mxu1 %v16358_v10  ;;  %v12596_v21 = vcombine.low %v92_v20, %v92_v20  ;;  %v16396_v62 = vld [vmem:[#allocation2 + $0x1db0] sm:$0xff]   ;;  %v16400_v2 = vld [vmem:[#allocation2 + $0x1db8] sm:$0xff]   ;;  %v12599_v6 = vcombine.high %v93_v3, %v93_v3  ;;  %v16406_v10 = vld [vmem:[#allocation2 + $0x1ec0] sm:$0xff]  }
 0x3ac   :  { %v16416_v20 = vld [vmem:[#allocation2 + $0x1e90] sm:$0xff]  }
 0x3ad   :  { %v16898_v9 = vadd.f32 %v14715_v63, %v11277_v4  ;;  %14996 = vmatpush3.bf16.msra.mxu0 %v16359_v11  ;;  %v16397_v63 = vld [vmem:[#allocation2 + $0x1d78] sm:$0xff]   ;;  %v16407_v11 = vld [vmem:[#allocation2 + $0x1e00] sm:$0xff]   ;;  %v16449_v3 = vld [vmem:[#allocation2 + $0x1f50] sm:$0xff]  }
 0x3ae   :  { %15018 = vmatpush3.bf16.msra.mxu1 %v16360_v12  ;;  %14997 = vmatprep.subr.bf16.mxu0 %v16361_v13  ;;  %v94_v4 = vld [vmem:[%s16988_s0 + $0x1d8] sm:$0xff]  ;;  %v16408_v12 = vld [vmem:[#allocation2 + $0x1e80] sm:$0xff]   ;;  %v16409_v13 = vld [vmem:[#allocation2 + $0x1e48] sm:$0xff]  }
 0x3af   :  { %15019 = vmatprep.subr.bf16.mxu1 %v16362_v14  ;;  %v12600_v7 = vcombine.low %v94_v4, %v94_v4  ;;  %v12601_v8 = vcombine.high %v94_v4, %v94_v4  ;;  %v16410_v14 = vld [vmem:[#allocation2 + $0x1ec8] sm:$0xff]   ;;  %v16450_v4 = vld [vmem:[#allocation2 + $0x1fd0] sm:$0xff]  }
 0x3b1   :  { %14998 = vmatpush3.bf16.msra.mxu0 %v16363_v15  ;;  %v16411_v15 = vld [vmem:[#allocation2 + $0x1e08] sm:$0xff]  }
 0x3b2   :  { %15020 = vmatpush3.bf16.msra.mxu1 %v16364_v16  ;;  %15027 = vmatprep.subr.bf16.mxu0 %v16369_v23  ;;  %v16412_v16 = vld [vmem:[#allocation2 + $0x1e88] sm:$0xff]   ;;  %v16419_v23 = vld [vmem:[#allocation2 + $0x1e18] sm:$0xff]  }
 0x3b3   :  { %15049 = vmatprep.subr.bf16.mxu1 %v16370_v24  ;;  %v16420_v24 = vld [vmem:[#allocation2 + $0x1e98] sm:$0xff]  }
 0x3b4   :  { %11835 = vmatmul.mubr.bf16.vlgmr.msra.gmra.mrb[112].mxu0 %v12594_v18  ;;  %v16414_v18 = vld [vmem:[#allocation2 + $0x1ed0] sm:$0xff]  }
 0x3b5   :  { %11875 = vmatmul.mubr.bf16.vlgmr.msra.gmra.mrb[112].mxu1 %v12596_v21  ;;  %15028 = vmatpush3.bf16.msra.mxu0 %v16371_v25  ;;  %v16417_v21 = vld [vmem:[#allocation2 + $0x1e58] sm:$0xff]   ;;  %v16421_v25 = vld [vmem:[#allocation2 + $0x1e60] sm:$0xff]  }
 0x3b6   :  { %15050 = vmatpush3.bf16.msra.mxu1 %v16372_v26  ;;  %15029 = vmatprep.subr.bf16.mxu0 %v16373_v27  ;;  %v16422_v26 = vld [vmem:[#allocation2 + $0x1ee0] sm:$0xff]  }
 0x3b7   :  { %15051 = vmatprep.subr.bf16.mxu1 %v16374_v28  ;;  %11914 = vmatprep.mubr.bf16.mxu0 %v12599_v6  ;;  %v16423_v28 = vld [vmem:[#allocation2 + $0x1e20] sm:$0xff]   ;;  %v16452_v6 = vld [vmem:[#allocation2 + $0x1f90] sm:$0xff]  }
 0x3b8   :  { %11954 = vmatprep.mubr.bf16.mxu1 %v12601_v8  ;;  %v16454_v8 = vld [vmem:[#allocation2 + $0x1fd8] sm:$0xff]  }
 0x3b9   :  { %15030 = vmatpush3.bf16.msra.mxu0 %v16375_v29 }
 0x3ba   :  { %15052 = vmatpush3.bf16.msra.mxu1 %v16376_v30  ;;  %15031 = vmatprep.subr.bf16.mxu0 %v16377_v31  ;;  %v16424_v30 = vld [vmem:[#allocation2 + $0x1ea0] sm:$0xff]  }
 0x3bb   :  { %15053 = vmatprep.subr.bf16.mxu1 %v16378_v32 }
 0x3bd   :  { %15032 = vmatpush3.bf16.msra.mxu0 %v16379_v33 }
 0x3be   :  { %15054 = vmatpush3.bf16.msra.mxu1 %v16380_v34  ;;  %15033 = vmatprep.subr.bf16.mxu0 %v16381_v35  ;;  %v16425_v34 = vld [vmem:[#allocation2 + $0x1e68] sm:$0xff]  }
 0x3bf   :  { %15055 = vmatprep.subr.bf16.mxu1 %v16382_v36  ;;  %v16426_v36 = vld [vmem:[#allocation2 + $0x1ee8] sm:$0xff]  }
 0x3c1   :  { %15034 = vmatpush3.bf16.msra.mxu0 %v16383_v37 }
 0x3c2   :  { %15056 = vmatpush3.bf16.msra.mxu1 %v16384_v38  ;;  %15035 = vmatprep.subr.bf16.mxu0 %v16385_v39 }
 0x3c3   :  { %15057 = vmatprep.subr.bf16.mxu1 %v16386_v40  ;;  %v16427_v40 = vld [vmem:[#allocation2 + $0x1e28] sm:$0xff]  }
 0x3c5   :  { %15036 = vmatpush3.bf16.msra.mxu0 %v16387_v42 }
 0x3c6   :  { %15058 = vmatpush3.bf16.msra.mxu1 %v16388_v44  ;;  %15037 = vmatprep.subr.bf16.mxu0 %v16389_v47  ;;  %v16431_v47 = vld [vmem:[#allocation2 + $0x1e30] sm:$0xff]  }
 0x3c7   :  { %v14735_v41 = vpop.f32.mrb[88].mxu0  ;;  %15059 = vmatprep.subr.bf16.mxu1 %v16390_v50  ;;  %v16434_v50 = vld [vmem:[#allocation2 + $0x1ef8] sm:$0xff]  }
 0x3c8   :  { %v14757_v43 = vpop.f32.mrb[88].mxu1  ;;  %v14736_v45 = vpop.f32.mrb[89].mxu0 }
 0x3c9   :  { %v14758_v46 = vpop.f32.mrb[89].mxu1  ;;  %v14737_v48 = vadd.f32 %v14736_v45, %v14735_v41  ;;  %v14738_v51 = vpop.f32.mrb[90].mxu0  ;;  %15038 = vmatpush3.bf16.msra.mxu0 %v16391_v53  ;;  %v16428_v41 = vld [vmem:[#allocation2 + $0x1ea8] sm:$0xff]   ;;  %v16429_v45 = vld [vmem:[#allocation2 + $0x1e70] sm:$0xff]   ;;  %v95_v53 = vld [vmem:[%s16988_s0 + $0x1e0] sm:$0xff] }
 0x3ca   :  { %v14759_v49 = vadd.f32 %v14758_v46, %v14757_v43  ;;  %v14760_v52 = vpop.f32.mrb[90].mxu1  ;;  %v14739_v56 = vpop.f32.mrb[91].mxu0  ;;  %15060 = vmatpush3.bf16.msra.mxu1 %v16392_v55  ;;  %15039 = vmatprep.subr.bf16.mxu0 %v16393_v58  ;;  %v16430_v46 = vld [vmem:[#allocation2 + $0x1ef0] sm:$0xff]   ;;  %v16435_v51 = vld [vmem:[#allocation2 + $0x1e38] sm:$0xff]   ;;  %v12602_v55 = vcombine.low %v95_v53, %v95_v53  ;;  %v16441_v58 = vld [vmem:[#allocation2 + $0x1f40] sm:$0xff]  }
 0x3cb   :  { %v11357_v54 = vadd.f32 %v14737_v48, %v16898_v9  ;;  %v14761_v57 = vpop.f32.mrb[91].mxu1  ;;  %15061 = vmatprep.subr.bf16.mxu1 %v16394_v60  ;;  %v16405_v9 = vld [vmem:[#allocation2 + $0x1e40] sm:$0xff]   ;;  %v16432_v48 = vld [vmem:[#allocation2 + $0x1eb0] sm:$0xff]   ;;  %v16436_v52 = vld [vmem:[#allocation2 + $0x1eb8] sm:$0xff]   ;;  %v12603_v56 = vcombine.high %v95_v53, %v95_v53 }
 0x3cc   :  { %v16442_v60 = vld [vmem:[#allocation2 + $0x1fc0] sm:$0xff]   ;;  %v16485_v53 = vld [vmem:[#allocation2 + $0x2050] sm:$0xff]  }
 0x3cd   :  { %v16907_v59 = vadd.f32 %v14759_v49, %v11357_v54  ;;  %15040 = vmatpush3.bf16.msra.mxu0 %v16395_v61  ;;  %v16433_v49 = vld [vmem:[#allocation2 + $0x1e78] sm:$0xff]   ;;  %v96_v54 = vld [vmem:[%s16988_s0 + $0x1e8] sm:$0xff]  ;;  %v16443_v61 = vld [vmem:[#allocation2 + $0x1f00] sm:$0xff]  }
 0x3ce   :  { %15062 = vmatpush3.bf16.msra.mxu1 %v16396_v62  ;;  %15041 = vmatprep.subr.bf16.mxu0 %v16397_v63  ;;  %v12604_v57 = vcombine.low %v96_v54, %v96_v54  ;;  %v16444_v62 = vld [vmem:[#allocation2 + $0x1f80] sm:$0xff]   ;;  %v16445_v63 = vld [vmem:[#allocation2 + $0x1f48] sm:$0xff]  }
 0x3cf   :  { %15063 = vmatprep.subr.bf16.mxu1 %v16398_v0  ;;  %v16446_v0 = vld [vmem:[#allocation2 + $0x1fc8] sm:$0xff]  }
 0x3d1   :  { %15042 = vmatpush3.bf16.msra.mxu0 %v16399_v1  ;;  %v16447_v1 = vld [vmem:[#allocation2 + $0x1f08] sm:$0xff]  }
 0x3d2   :  { %15064 = vmatpush3.bf16.msra.mxu1 %v16400_v2  ;;  %15071 = vmatprep.subr.bf16.mxu0 %v16405_v9  ;;  %v16448_v2 = vld [vmem:[#allocation2 + $0x1f88] sm:$0xff]   ;;  %v16455_v9 = vld [vmem:[#allocation2 + $0x1f18] sm:$0xff]  }
 0x3d3   :  { %15093 = vmatprep.subr.bf16.mxu1 %v16406_v10  ;;  %v16456_v10 = vld [vmem:[#allocation2 + $0x1f98] sm:$0xff]  }
 0x3d4   :  { %11915 = vmatmul.mubr.bf16.vlgmr.msra.gmra.mrb[116].mxu0 %v12598_v5  ;;  %v16451_v5 = vld [vmem:[#allocation2 + $0x1f10] sm:$0xff]  }
 0x3d5   :  { %11955 = vmatmul.mubr.bf16.vlgmr.msra.gmra.mrb[116].mxu1 %v12600_v7  ;;  %15072 = vmatpush3.bf16.msra.mxu0 %v16407_v11  ;;  %v16453_v7 = vld [vmem:[#allocation2 + $0x1f58] sm:$0xff]   ;;  %v16457_v11 = vld [vmem:[#allocation2 + $0x1f60] sm:$0xff]  }
 0x3d6   :  { %15094 = vmatpush3.bf16.msra.mxu1 %v16408_v12  ;;  %15073 = vmatprep.subr.bf16.mxu0 %v16409_v13  ;;  %v16458_v12 = vld [vmem:[#allocation2 + $0x1fe0] sm:$0xff]  }
 0x3d7   :  { %15095 = vmatprep.subr.bf16.mxu1 %v16410_v14  ;;  %11994 = vmatprep.mubr.bf16.mxu0 %v12603_v56  ;;  %v16459_v14 = vld [vmem:[#allocation2 + $0x1f20] sm:$0xff]   ;;  %v16488_v56 = vld [vmem:[#allocation2 + $0x2090] sm:$0xff]  }
 0x3d9   :  { %15074 = vmatpush3.bf16.msra.mxu0 %v16411_v15 }
 0x3da   :  { %15096 = vmatpush3.bf16.msra.mxu1 %v16412_v16  ;;  %15075 = vmatprep.subr.bf16.mxu0 %v16413_v17  ;;  %v16460_v16 = vld [vmem:[#allocation2 + $0x1fa0] sm:$0xff]  }
 0x3db   :  { %15097 = vmatprep.subr.bf16.mxu1 %v16414_v18 }
 0x3dd   :  { %15076 = vmatpush3.bf16.msra.mxu0 %v16415_v19  ;;  %v16461_v19 = vld [vmem:[#allocation2 + $0x1f68] sm:$0xff]  }
 0x3de   :  { %15098 = vmatpush3.bf16.msra.mxu1 %v16416_v20  ;;  %15077 = vmatprep.subr.bf16.mxu0 %v16417_v21 }
 0x3df   :  { %15099 = vmatprep.subr.bf16.mxu1 %v16418_v22  ;;  %v16462_v22 = vld [vmem:[#allocation2 + $0x1fe8] sm:$0xff]  }
 0x3e1   :  { %15078 = vmatpush3.bf16.msra.mxu0 %v16419_v23 }
 0x3e2   :  { %15100 = vmatpush3.bf16.msra.mxu1 %v16420_v24  ;;  %15079 = vmatprep.subr.bf16.mxu0 %v16421_v25  ;;  %v16463_v25 = vld [vmem:[#allocation2 + $0x1f28] sm:$0xff]  }
 0x3e3   :  { %15101 = vmatprep.subr.bf16.mxu1 %v16422_v26 }
 0x3e5   :  { %15080 = vmatpush3.bf16.msra.mxu0 %v16423_v28 }
 0x3e6   :  { %15102 = vmatpush3.bf16.msra.mxu1 %v16424_v30  ;;  %15081 = vmatprep.subr.bf16.mxu0 %v16425_v34  ;;  %v16465_v30 = vld [vmem:[#allocation2 + $0x1f70] sm:$0xff]  }
 0x3e7   :  { %v14779_v27 = vpop.f32.mrb[92].mxu0  ;;  %15103 = vmatprep.subr.bf16.mxu1 %v16426_v36  ;;  %v16468_v34 = vld [vmem:[#allocation2 + $0x1fb0] sm:$0xff]   ;;  %v16470_v36 = vld [vmem:[#allocation2 + $0x1ff8] sm:$0xff]  }
 0x3e8   :  { %v14801_v29 = vpop.f32.mrb[92].mxu1  ;;  %v14780_v31 = vpop.f32.mrb[93].mxu0 }
 0x3e9   :  { %v14781_v32 = vadd.f32 %v14780_v31, %v14779_v27  ;;  %v14802_v33 = vpop.f32.mrb[93].mxu1  ;;  %v14782_v37 = vpop.f32.mrb[94].mxu0  ;;  %15082 = vmatpush3.bf16.msra.mxu0 %v16427_v40  ;;  %v16464_v27 = vld [vmem:[#allocation2 + $0x1fa8] sm:$0xff]  }
 0x3ea   :  { %v14803_v35 = vadd.f32 %v14802_v33, %v14801_v29  ;;  %v14804_v39 = vpop.f32.mrb[94].mxu1  ;;  %v14783_v42 = vpop.f32.mrb[95].mxu0  ;;  %15104 = vmatpush3.bf16.msra.mxu1 %v16428_v41  ;;  %15083 = vmatprep.subr.bf16.mxu0 %v16429_v45  ;;  %v16467_v33 = vld [vmem:[#allocation2 + $0x1f30] sm:$0xff]   ;;  %v16471_v37 = vld [vmem:[#allocation2 + $0x1f38] sm:$0xff]   ;;  %v16477_v45 = vld [vmem:[#allocation2 + $0x2040] sm:$0xff]  }
 0x3eb   :  { %v11437_v38 = vadd.f32 %v14781_v32, %v16907_v59  ;;  %v14805_v44 = vpop.f32.mrb[95].mxu1  ;;  %15105 = vmatprep.subr.bf16.mxu1 %v16430_v46  ;;  %v12605_v59 = vcombine.high %v96_v54, %v96_v54  ;;  %v16466_v32 = vld [vmem:[#allocation2 + $0x1ff0] sm:$0xff]   ;;  %v98_v42 = vld [vmem:[%s16988_s0 + $0x1f8] sm:$0xff]  ;;  %v16478_v46 = vld [vmem:[#allocation2 + $0x20c0] sm:$0xff]  }
 0x3ec   :  { %v97_v39 = vld [vmem:[%s16988_s0 + $0x1f0] sm:$0xff]  ;;  %v12609_v44 = vcombine.high %v98_v42, %v98_v42 }
 0x3ed   :  { %v16916_v43 = vadd.f32 %v14803_v35, %v11437_v38  ;;  %15084 = vmatpush3.bf16.msra.mxu0 %v16431_v47  ;;  %12034 = vmatprep.mubr.bf16.mxu1 %v12605_v59  ;;  %v16469_v35 = vld [vmem:[#allocation2 + $0x1f78] sm:$0xff]   ;;  %v12606_v40 = vcombine.low %v97_v39, %v97_v39  ;;  %v12607_v41 = vcombine.high %v97_v39, %v97_v39  ;;  %v16479_v47 = vld [vmem:[#allocation2 + $0x2000] sm:$0xff]   ;;  %v16486_v54 = vld [vmem:[#allocation2 + $0x20d0] sm:$0xff]  }
 0x3ee   :  { %15106 = vmatpush3.bf16.msra.mxu1 %v16432_v48  ;;  %15085 = vmatprep.subr.bf16.mxu0 %v16433_v49  ;;  %v16472_v38 = vld [vmem:[#allocation2 + $0x1fb8] sm:$0xff]   ;;  %v16480_v48 = vld [vmem:[#allocation2 + $0x2080] sm:$0xff]   ;;  %v16481_v49 = vld [vmem:[#allocation2 + $0x2048] sm:$0xff]  }
 0x3ef   :  { %15107 = vmatprep.subr.bf16.mxu1 %v16434_v50  ;;  %v16482_v50 = vld [vmem:[#allocation2 + $0x20c8] sm:$0xff]   ;;  %v16491_v59 = vld [vmem:[#allocation2 + $0x2018] sm:$0xff]   ;;  %v16521_v39 = vld [vmem:[#allocation2 + $0x2150] sm:$0xff]  }
 0x3f1   :  { %15086 = vmatpush3.bf16.msra.mxu0 %v16435_v51  ;;  %v16483_v51 = vld [vmem:[#allocation2 + $0x2008] sm:$0xff]  }
 0x3f2   :  { %15108 = vmatpush3.bf16.msra.mxu1 %v16436_v52  ;;  %15115 = vmatprep.subr.bf16.mxu0 %v16441_v58  ;;  %v16484_v52 = vld [vmem:[#allocation2 + $0x2088] sm:$0xff]   ;;  %v16490_v58 = vld [vmem:[#allocation2 + $0x20d8] sm:$0xff]  }
 0x3f3   :  { %15137 = vmatprep.subr.bf16.mxu1 %v16442_v60  ;;  %v16492_v60 = vld [vmem:[#allocation2 + $0x2098] sm:$0xff]  }
 0x3f4   :  { %11995 = vmatmul.mubr.bf16.vlgmr.msra.gmra.mrb[120].mxu0 %v12602_v55  ;;  %v16487_v55 = vld [vmem:[#allocation2 + $0x2010] sm:$0xff]  }
 0x3f5   :  { %12035 = vmatmul.mubr.bf16.vlgmr.msra.gmra.mrb[120].mxu1 %v12604_v57  ;;  %15116 = vmatpush3.bf16.msra.mxu0 %v16443_v61  ;;  %v16489_v57 = vld [vmem:[#allocation2 + $0x2058] sm:$0xff]   ;;  %v16493_v61 = vld [vmem:[#allocation2 + $0x2060] sm:$0xff]  }
 0x3f6   :  { %15138 = vmatpush3.bf16.msra.mxu1 %v16444_v62  ;;  %15117 = vmatprep.subr.bf16.mxu0 %v16445_v63  ;;  %v16494_v62 = vld [vmem:[#allocation2 + $0x20e0] sm:$0xff]  }
 0x3f7   :  { %15139 = vmatprep.subr.bf16.mxu1 %v16446_v0  ;;  %12074 = vmatprep.mubr.bf16.mxu0 %v12607_v41  ;;  %v16495_v0 = vld [vmem:[#allocation2 + $0x2020] sm:$0xff]   ;;  %v16523_v41 = vld [vmem:[#allocation2 + $0x2110] sm:$0xff]  }
 0x3f8   :  { %12114 = vmatprep.mubr.bf16.mxu1 %v12609_v44  ;;  %v16526_v44 = vld [vmem:[#allocation2 + $0x21d8] sm:$0xff]  }
 0x3f9   :  { %15118 = vmatpush3.bf16.msra.mxu0 %v16447_v1 }
 0x3fa   :  { %15140 = vmatpush3.bf16.msra.mxu1 %v16448_v2  ;;  %15119 = vmatprep.subr.bf16.mxu0 %v16449_v3  ;;  %v16496_v2 = vld [vmem:[#allocation2 + $0x20a0] sm:$0xff]  }
 0x3fb   :  { %15141 = vmatprep.subr.bf16.mxu1 %v16450_v4 }
 0x3fd   :  { %15120 = vmatpush3.bf16.msra.mxu0 %v16451_v5  ;;  %v16497_v5 = vld [vmem:[#allocation2 + $0x2068] sm:$0xff]  }
 0x3fe   :  { %15142 = vmatpush3.bf16.msra.mxu1 %v16452_v6  ;;  %15121 = vmatprep.subr.bf16.mxu0 %v16453_v7 }
 0x3ff   :  { %15143 = vmatprep.subr.bf16.mxu1 %v16454_v8  ;;  %v16498_v8 = vld [vmem:[#allocation2 + $0x20e8] sm:$0xff]  }
 0x401   :  { %15122 = vmatpush3.bf16.msra.mxu0 %v16455_v9 }
 0x402   :  { %15144 = vmatpush3.bf16.msra.mxu1 %v16456_v10  ;;  %15123 = vmatprep.subr.bf16.mxu0 %v16457_v11  ;;  %v16499_v11 = vld [vmem:[#allocation2 + $0x2028] sm:$0xff]  }
 0x403   :  { %15145 = vmatprep.subr.bf16.mxu1 %v16458_v12 }
 0x405   :  { %15124 = vmatpush3.bf16.msra.mxu0 %v16459_v14 }
 0x406   :  { %15146 = vmatpush3.bf16.msra.mxu1 %v16460_v16  ;;  %15125 = vmatprep.subr.bf16.mxu0 %v16461_v19  ;;  %v16501_v16 = vld [vmem:[#allocation2 + $0x2070] sm:$0xff]  }
 0x407   :  { %v14823_v13 = vpop.f32.mrb[96].mxu0  ;;  %15147 = vmatprep.subr.bf16.mxu1 %v16462_v22  ;;  %v16503_v19 = vld [vmem:[#allocation2 + $0x2030] sm:$0xff]   ;;  %v16506_v22 = vld [vmem:[#allocation2 + $0x20f8] sm:$0xff]  }
 0x408   :  { %v14845_v15 = vpop.f32.mrb[96].mxu1  ;;  %v14824_v17 = vpop.f32.mrb[97].mxu0 }
 0x409   :  { %v14846_v18 = vpop.f32.mrb[97].mxu1  ;;  %v14825_v20 = vadd.f32 %v14824_v17, %v14823_v13  ;;  %v14826_v23 = vpop.f32.mrb[98].mxu0  ;;  %15126 = vmatpush3.bf16.msra.mxu0 %v16463_v25  ;;  %v16500_v13 = vld [vmem:[#allocation2 + $0x20a8] sm:$0xff]   ;;  %v99_v25 = vld [vmem:[%s16988_s0 + $0x200] sm:$0xff] }
 0x40a   :  { %v14847_v21 = vadd.f32 %v14846_v18, %v14845_v15  ;;  %v14848_v24 = vpop.f32.mrb[98].mxu1  ;;  %v14827_v28 = vpop.f32.mrb[99].mxu0  ;;  %15148 = vmatpush3.bf16.msra.mxu1 %v16464_v27  ;;  %15127 = vmatprep.subr.bf16.mxu0 %v16465_v30  ;;  %v16502_v18 = vld [vmem:[#allocation2 + $0x20f0] sm:$0xff]   ;;  %v16507_v23 = vld [vmem:[#allocation2 + $0x2038] sm:$0xff]   ;;  %v12610_v27 = vcombine.low %v99_v25, %v99_v25 }
 0x40b   :  { %v11517_v26 = vadd.f32 %v14825_v20, %v16916_v43  ;;  %v14849_v29 = vpop.f32.mrb[99].mxu1  ;;  %15149 = vmatprep.subr.bf16.mxu1 %v16466_v32  ;;  %v12608_v43 = vcombine.low %v98_v42, %v98_v42  ;;  %v16504_v20 = vld [vmem:[#allocation2 + $0x20b0] sm:$0xff]   ;;  %v16508_v24 = vld [vmem:[#allocation2 + $0x20b8] sm:$0xff]   ;;  %v12611_v28 = vcombine.high %v99_v25, %v99_v25  ;;  %v16514_v32 = vld [vmem:[#allocation2 + $0x21c0] sm:$0xff]  }
 0x40c   :  { %v16524_v42 = vld [vmem:[#allocation2 + $0x2190] sm:$0xff]  }
 0x40d   :  { %v16925_v31 = vadd.f32 %v14847_v21, %v11517_v26  ;;  %15128 = vmatpush3.bf16.msra.mxu0 %v16467_v33  ;;  %v16505_v21 = vld [vmem:[#allocation2 + $0x2078] sm:$0xff]   ;;  %v100_v26 = vld [vmem:[%s16988_s0 + $0x208] sm:$0xff]  ;;  %v16515_v33 = vld [vmem:[#allocation2 + $0x2100] sm:$0xff]  }
 0x40e   :  { %15150 = vmatpush3.bf16.msra.mxu1 %v16468_v34  ;;  %15129 = vmatprep.subr.bf16.mxu0 %v16469_v35  ;;  %v12612_v29 = vcombine.low %v100_v26, %v100_v26  ;;  %v12613_v30 = vcombine.high %v100_v26, %v100_v26  ;;  %v16516_v34 = vld [vmem:[#allocation2 + $0x2180] sm:$0xff]   ;;  %v16517_v35 = vld [vmem:[#allocation2 + $0x2148] sm:$0xff]   ;;  %v16557_v25 = vld [vmem:[#allocation2 + $0x2250] sm:$0xff]  }
 0x40f   :  { %15151 = vmatprep.subr.bf16.mxu1 %v16470_v36  ;;  %v16518_v36 = vld [vmem:[#allocation2 + $0x21c8] sm:$0xff]   ;;  %v16558_v26 = vld [vmem:[#allocation2 + $0x22d0] sm:$0xff]  }
 0x411   :  { %15130 = vmatpush3.bf16.msra.mxu0 %v16471_v37  ;;  %v16519_v37 = vld [vmem:[#allocation2 + $0x2108] sm:$0xff]  }
 0x412   :  { %15152 = vmatpush3.bf16.msra.mxu1 %v16472_v38  ;;  %15159 = vmatprep.subr.bf16.mxu0 %v16477_v45  ;;  %v16520_v38 = vld [vmem:[#allocation2 + $0x2188] sm:$0xff]   ;;  %v16527_v45 = vld [vmem:[#allocation2 + $0x2118] sm:$0xff]  }
 0x413   :  { %15181 = vmatprep.subr.bf16.mxu1 %v16478_v46  ;;  %v16528_v46 = vld [vmem:[#allocation2 + $0x2198] sm:$0xff]  }
 0x414   :  { %12075 = vmatmul.mubr.bf16.vlgmr.msra.gmra.mrb[124].mxu0 %v12606_v40  ;;  %v16522_v40 = vld [vmem:[#allocation2 + $0x21d0] sm:$0xff]  }
 0x415   :  { %12115 = vmatmul.mubr.bf16.vlgmr.msra.gmra.mrb[124].mxu1 %v12608_v43  ;;  %15160 = vmatpush3.bf16.msra.mxu0 %v16479_v47  ;;  %v16525_v43 = vld [vmem:[#allocation2 + $0x2158] sm:$0xff]   ;;  %v16529_v47 = vld [vmem:[#allocation2 + $0x2160] sm:$0xff]  }
 0x416   :  { %15182 = vmatpush3.bf16.msra.mxu1 %v16480_v48  ;;  %15161 = vmatprep.subr.bf16.mxu0 %v16481_v49  ;;  %v16530_v48 = vld [vmem:[#allocation2 + $0x21e0] sm:$0xff]  }
 0x417   :  { %15183 = vmatprep.subr.bf16.mxu1 %v16482_v50  ;;  %12154 = vmatprep.mubr.bf16.mxu0 %v12611_v28  ;;  %v16531_v49 = vld [vmem:[#allocation2 + $0x2120] sm:$0xff]   ;;  %v16560_v28 = vld [vmem:[#allocation2 + $0x2290] sm:$0xff]  }
 0x418   :  { %12194 = vmatprep.mubr.bf16.mxu1 %v12613_v30  ;;  %v16562_v30 = vld [vmem:[#allocation2 + $0x22d8] sm:$0xff]  }
 0x419   :  { %15162 = vmatpush3.bf16.msra.mxu0 %v16483_v51  ;;  %v16532_v51 = vld [vmem:[#allocation2 + $0x21a0] sm:$0xff]  }
 0x41a   :  { %15184 = vmatpush3.bf16.msra.mxu1 %v16484_v52  ;;  %15163 = vmatprep.subr.bf16.mxu0 %v16485_v53 }
 0x41b   :  { %15185 = vmatprep.subr.bf16.mxu1 %v16486_v54 }
 0x41d   :  { %15164 = vmatpush3.bf16.msra.mxu0 %v16487_v55 }
 0x41e   :  { %15186 = vmatpush3.bf16.msra.mxu1 %v16488_v56  ;;  %15165 = vmatprep.subr.bf16.mxu0 %v16489_v57  ;;  %v16533_v57 = vld [vmem:[#allocation2 + $0x2168] sm:$0xff]  }
 0x41f   :  { %15187 = vmatprep.subr.bf16.mxu1 %v16490_v58 }
 0x421   :  { %15166 = vmatpush3.bf16.msra.mxu0 %v16491_v59  ;;  %v16534_v59 = vld [vmem:[#allocation2 + $0x21e8] sm:$0xff]  }
 0x422   :  { %15188 = vmatpush3.bf16.msra.mxu1 %v16492_v60  ;;  %15167 = vmatprep.subr.bf16.mxu0 %v16493_v61 }
 0x423   :  { %15189 = vmatprep.subr.bf16.mxu1 %v16494_v62  ;;  %v16535_v62 = vld [vmem:[#allocation2 + $0x2128] sm:$0xff]  }
 0x425   :  { %15168 = vmatpush3.bf16.msra.mxu0 %v16495_v0  ;;  %v16536_v0 = vld [vmem:[#allocation2 + $0x21a8] sm:$0xff]  }
 0x426   :  { %15190 = vmatpush3.bf16.msra.mxu1 %v16496_v2  ;;  %15169 = vmatprep.subr.bf16.mxu0 %v16497_v5  ;;  %v16539_v5 = vld [vmem:[#allocation2 + $0x2130] sm:$0xff]  }
 0x427   :  { %v14867_v63 = vpop.f32.mrb[100].mxu0  ;;  %15191 = vmatprep.subr.bf16.mxu1 %v16498_v8  ;;  %v16542_v8 = vld [vmem:[#allocation2 + $0x21f8] sm:$0xff]  }
 0x428   :  { %v14889_v1 = vpop.f32.mrb[100].mxu1  ;;  %v14868_v3 = vpop.f32.mrb[101].mxu0 }
 0x429   :  { %v14890_v4 = vpop.f32.mrb[101].mxu1  ;;  %v14869_v6 = vadd.f32 %v14868_v3, %v14867_v63  ;;  %v14870_v9 = vpop.f32.mrb[102].mxu0  ;;  %15170 = vmatpush3.bf16.msra.mxu0 %v16499_v11  ;;  %v16537_v3 = vld [vmem:[#allocation2 + $0x2170] sm:$0xff]  }
 0x42a   :  { %v14891_v7 = vadd.f32 %v14890_v4, %v14889_v1  ;;  %v14892_v10 = vpop.f32.mrb[102].mxu1  ;;  %v14871_v14 = vpop.f32.mrb[103].mxu0  ;;  %15192 = vmatpush3.bf16.msra.mxu1 %v16500_v13  ;;  %15171 = vmatprep.subr.bf16.mxu0 %v16501_v16  ;;  %v16538_v4 = vld [vmem:[#allocation2 + $0x21f0] sm:$0xff]   ;;  %v16543_v9 = vld [vmem:[#allocation2 + $0x2138] sm:$0xff]  }
 0x42b   :  { %v11597_v12 = vadd.f32 %v14869_v6, %v16925_v31  ;;  %v14893_v15 = vpop.f32.mrb[103].mxu1  ;;  %15193 = vmatprep.subr.bf16.mxu1 %v16502_v18  ;;  %v16513_v31 = vld [vmem:[#allocation2 + $0x2140] sm:$0xff]   ;;  %v16540_v6 = vld [vmem:[#allocation2 + $0x21b0] sm:$0xff]   ;;  %v16544_v10 = vld [vmem:[#allocation2 + $0x21b8] sm:$0xff]  }
 0x42c   :  { %v101_v11 = vld [vmem:[%s16988_s0 + $0x210] sm:$0xff]  ;;  %v16550_v18 = vld [vmem:[#allocation2 + $0x22c0] sm:$0xff]  }
 0x42d   :  { %v16934_v17 = vadd.f32 %v14891_v7, %v11597_v12  ;;  %15172 = vmatpush3.bf16.msra.mxu0 %v16503_v19  ;;  %v16541_v7 = vld [vmem:[#allocation2 + $0x2178] sm:$0xff]   ;;  %v12614_v13 = vcombine.low %v101_v11, %v101_v11  ;;  %v12615_v14 = vcombine.high %v101_v11, %v101_v11  ;;  %v16551_v19 = vld [vmem:[#allocation2 + $0x2200] sm:$0xff]  }
 0x42e   :  { %15194 = vmatpush3.bf16.msra.mxu1 %v16504_v20  ;;  %15173 = vmatprep.subr.bf16.mxu0 %v16505_v21  ;;  %v102_v12 = vld [vmem:[%s16988_s0 + $0x218] sm:$0xff]  ;;  %v16552_v20 = vld [vmem:[#allocation2 + $0x2280] sm:$0xff]   ;;  %v16553_v21 = vld [vmem:[#allocation2 + $0x2248] sm:$0xff]  }
 0x42f   :  { %15195 = vmatprep.subr.bf16.mxu1 %v16506_v22  ;;  %v12616_v15 = vcombine.low %v102_v12, %v102_v12  ;;  %v12617_v16 = vcombine.high %v102_v12, %v102_v12  ;;  %v16554_v22 = vld [vmem:[#allocation2 + $0x22c8] sm:$0xff]  }
 0x431   :  { %15174 = vmatpush3.bf16.msra.mxu0 %v16507_v23  ;;  %v16555_v23 = vld [vmem:[#allocation2 + $0x2208] sm:$0xff]  }
 0x432   :  { %15196 = vmatpush3.bf16.msra.mxu1 %v16508_v24  ;;  %15203 = vmatprep.subr.bf16.mxu0 %v16513_v31  ;;  %v16556_v24 = vld [vmem:[#allocation2 + $0x2288] sm:$0xff]   ;;  %v16563_v31 = vld [vmem:[#allocation2 + $0x2218] sm:$0xff]  }
 0x433   :  { %15225 = vmatprep.subr.bf16.mxu1 %v16514_v32  ;;  %v16564_v32 = vld [vmem:[#allocation2 + $0x2298] sm:$0xff]  }
 0x434   :  { %12155 = vmatmul.mubr.bf16.vlgmr.msra.gmra.mrb[128].mxu0 %v12610_v27  ;;  %v16559_v27 = vld [vmem:[#allocation2 + $0x2210] sm:$0xff]  }
 0x435   :  { %12195 = vmatmul.mubr.bf16.vlgmr.msra.gmra.mrb[128].mxu1 %v12612_v29  ;;  %15204 = vmatpush3.bf16.msra.mxu0 %v16515_v33  ;;  %v16561_v29 = vld [vmem:[#allocation2 + $0x2258] sm:$0xff]   ;;  %v16565_v33 = vld [vmem:[#allocation2 + $0x2260] sm:$0xff]  }
 0x436   :  { %15226 = vmatpush3.bf16.msra.mxu1 %v16516_v34  ;;  %15205 = vmatprep.subr.bf16.mxu0 %v16517_v35  ;;  %v16566_v34 = vld [vmem:[#allocation2 + $0x22e0] sm:$0xff]  }
 0x437   :  { %15227 = vmatprep.subr.bf16.mxu1 %v16518_v36  ;;  %12234 = vmatprep.mubr.bf16.mxu0 %v12615_v14  ;;  %v16567_v35 = vld [vmem:[#allocation2 + $0x2220] sm:$0xff]  }
 0x438   :  { %12274 = vmatprep.mubr.bf16.mxu1 %v12617_v16 }
 0x439   :  { %15206 = vmatpush3.bf16.msra.mxu0 %v16519_v37  ;;  %v16568_v37 = vld [vmem:[#allocation2 + $0x22a0] sm:$0xff]  }
 0x43a   :  { %15228 = vmatpush3.bf16.msra.mxu1 %v16520_v38  ;;  %15207 = vmatprep.subr.bf16.mxu0 %v16521_v39 }
 0x43b   :  { %15229 = vmatprep.subr.bf16.mxu1 %v16522_v40 }
 0x43d   :  { %15208 = vmatpush3.bf16.msra.mxu0 %v16523_v41 }
 0x43e   :  { %15230 = vmatpush3.bf16.msra.mxu1 %v16524_v42  ;;  %15209 = vmatprep.subr.bf16.mxu0 %v16525_v43  ;;  %v16569_v43 = vld [vmem:[#allocation2 + $0x2268] sm:$0xff]  }
 0x43f   :  { %15231 = vmatprep.subr.bf16.mxu1 %v16526_v44 }
 0x441   :  { %15210 = vmatpush3.bf16.msra.mxu0 %v16527_v45  ;;  %v16570_v45 = vld [vmem:[#allocation2 + $0x22e8] sm:$0xff]  }
 0x442   :  { %15232 = vmatpush3.bf16.msra.mxu1 %v16528_v46  ;;  %15211 = vmatprep.subr.bf16.mxu0 %v16529_v47 }
 0x443   :  { %15233 = vmatprep.subr.bf16.mxu1 %v16530_v48  ;;  %v16571_v48 = vld [vmem:[#allocation2 + $0x2228] sm:$0xff]  }
 0x445   :  { %15212 = vmatpush3.bf16.msra.mxu0 %v16531_v49 }
 0x446   :  { %15234 = vmatpush3.bf16.msra.mxu1 %v16532_v51  ;;  %15213 = vmatprep.subr.bf16.mxu0 %v16533_v57  ;;  %v16577_v57 = vld [vmem:[#allocation2 + $0x2278] sm:$0xff]  }
 0x447   :  { %v14911_v50 = vpop.f32.mrb[104].mxu0  ;;  %15235 = vmatprep.subr.bf16.mxu1 %v16534_v59  ;;  %v16579_v59 = vld [vmem:[#allocation2 + $0x2238] sm:$0xff]  }
 0x448   :  { %v14933_v52 = vpop.f32.mrb[104].mxu1  ;;  %v14912_v53 = vpop.f32.mrb[105].mxu0 }
 0x449   :  { %v14934_v54 = vpop.f32.mrb[105].mxu1  ;;  %v14913_v55 = vadd.f32 %v14912_v53, %v14911_v50  ;;  %v14914_v58 = vpop.f32.mrb[106].mxu0  ;;  %15214 = vmatpush3.bf16.msra.mxu0 %v16535_v62  ;;  %v16572_v50 = vld [vmem:[#allocation2 + $0x22a8] sm:$0xff]   ;;  %v16573_v53 = vld [vmem:[#allocation2 + $0x2270] sm:$0xff]  }
 0x44a   :  { %v14935_v56 = vadd.f32 %v14934_v54, %v14933_v52  ;;  %v14936_v60 = vpop.f32.mrb[106].mxu1  ;;  %v14915_v63 = vpop.f32.mrb[107].mxu0  ;;  %15236 = vmatpush3.bf16.msra.mxu1 %v16536_v0  ;;  %15215 = vmatprep.subr.bf16.mxu0 %v16537_v3  ;;  %v16574_v54 = vld [vmem:[#allocation2 + $0x22f0] sm:$0xff]   ;;  %v16578_v58 = vld [vmem:[#allocation2 + $0x22f8] sm:$0xff]   ;;  %v104_v62 = vld [vmem:[%s16988_s0 + $0x228] sm:$0xff] }
 0x44b   :  { %v11677_v61 = vadd.f32 %v14913_v55, %v16934_v17  ;;  %v14937_v1 = vpop.f32.mrb[107].mxu1  ;;  %15237 = vmatprep.subr.bf16.mxu1 %v16538_v4  ;;  %v16549_v17 = vld [vmem:[#allocation2 + $0x2240] sm:$0xff]   ;;  %v16575_v55 = vld [vmem:[#allocation2 + $0x2230] sm:$0xff]   ;;  %v16580_v60 = vld [vmem:[#allocation2 + $0x22b8] sm:$0xff]  }
 0x44c   :  { %v12620_v1 = vcombine.low %v104_v62, %v104_v62 }
 0x44d   :  { %v16943_v2 = vadd.f32 %v14935_v56, %v11677_v61  ;;  %15216 = vmatpush3.bf16.msra.mxu0 %v16539_v5  ;;  %v16576_v56 = vld [vmem:[#allocation2 + $0x22b0] sm:$0xff]   ;;  %v103_v61 = vld [vmem:[%s16988_s0 + $0x220] sm:$0xff] }
 0x44e   :  { %15238 = vmatpush3.bf16.msra.mxu1 %v16540_v6  ;;  %15217 = vmatprep.subr.bf16.mxu0 %v16541_v7  ;;  %v12618_v63 = vcombine.low %v103_v61, %v103_v61  ;;  %v12619_v0 = vcombine.high %v103_v61, %v103_v61 }
 0x44f   :  { %15239 = vmatprep.subr.bf16.mxu1 %v16542_v8 }
 0x451   :  { %15218 = vmatpush3.bf16.msra.mxu0 %v16543_v9 }
 0x452   :  { %15240 = vmatpush3.bf16.msra.mxu1 %v16544_v10  ;;  %15247 = vmatprep.subr.bf16.mxu0 %v16549_v17 }
 0x453   :  { %15269 = vmatprep.subr.bf16.mxu1 %v16550_v18 }
 0x454   :  { %12235 = vmatmul.mubr.bf16.vlgmr.msra.gmra.mrb[132].mxu0 %v12614_v13 }
 0x455   :  { %12275 = vmatmul.mubr.bf16.vlgmr.msra.gmra.mrb[132].mxu1 %v12616_v15  ;;  %15248 = vmatpush3.bf16.msra.mxu0 %v16551_v19 }
 0x456   :  { %15270 = vmatpush3.bf16.msra.mxu1 %v16552_v20  ;;  %15249 = vmatprep.subr.bf16.mxu0 %v16553_v21 }
 0x457   :  { %15271 = vmatprep.subr.bf16.mxu1 %v16554_v22  ;;  %12314 = vmatprep.mubr.bf16.mxu0 %v12619_v0 }
 0x459   :  { %15250 = vmatpush3.bf16.msra.mxu0 %v16555_v23 }
 0x45a   :  { %15272 = vmatpush3.bf16.msra.mxu1 %v16556_v24  ;;  %15251 = vmatprep.subr.bf16.mxu0 %v16557_v25 }
 0x45b   :  { %15273 = vmatprep.subr.bf16.mxu1 %v16558_v26 }
 0x45d   :  { %15252 = vmatpush3.bf16.msra.mxu0 %v16559_v27  ;;  %v16585_v27 = vld [vmem:[%s16991_s3] sm:$0xff]  }
 0x45e   :  { %15274 = vmatpush3.bf16.msra.mxu1 %v16560_v28  ;;  %15253 = vmatprep.subr.bf16.mxu0 %v16561_v29  ;;  %v16620_v28 = vmov 0.0   ;;  %v16586_v29 = vld [vmem:[%s16991_s3 + $0x8] sm:$0xff]  }
 0x45f   :  { %15275 = vmatprep.subr.bf16.mxu1 %v16562_v30  ;;  %v16587_v30 = vld [vmem:[%s16991_s3 + $0x10] sm:$0xff]  }
 0x461   :  { %15254 = vmatpush3.bf16.msra.mxu0 %v16563_v31  ;;  %v16588_v31 = vld [vmem:[%s16991_s3 + $0x18] sm:$0xff]  }
 0x462   :  { %15276 = vmatpush3.bf16.msra.mxu1 %v16564_v32  ;;  %15255 = vmatprep.subr.bf16.mxu0 %v16565_v33  ;;  %v16589_v32 = vld [vmem:[%s16991_s3 + $0x20] sm:$0xff]  }
 0x463   :  { %15277 = vmatprep.subr.bf16.mxu1 %v16566_v34 }
 0x465   :  { %15256 = vmatpush3.bf16.msra.mxu0 %v16567_v35 }
 0x466   :  { %15278 = vmatpush3.bf16.msra.mxu1 %v16568_v37  ;;  %15257 = vmatprep.subr.bf16.mxu0 %v16569_v43 }
 0x467   :  { %v14955_v36 = vpop.f32.mrb[108].mxu0  ;;  %15279 = vmatprep.subr.bf16.mxu1 %v16570_v45 }
 0x468   :  { %v14977_v38 = vpop.f32.mrb[108].mxu1  ;;  %v14956_v39 = vpop.f32.mrb[109].mxu0 }
 0x469   :  { %v14978_v40 = vpop.f32.mrb[109].mxu1  ;;  %v14957_v41 = vadd.f32 %v14956_v39, %v14955_v36  ;;  %v14958_v44 = vpop.f32.mrb[110].mxu0  ;;  %15258 = vmatpush3.bf16.msra.mxu0 %v16571_v48 }
 0x46a   :  { %v14979_v42 = vadd.f32 %v14978_v40, %v14977_v38  ;;  %v14980_v46 = vpop.f32.mrb[110].mxu1  ;;  %v14959_v49 = vpop.f32.mrb[111].mxu0  ;;  %15280 = vmatpush3.bf16.msra.mxu1 %v16572_v50  ;;  %15259 = vmatprep.subr.bf16.mxu0 %v16573_v53 }
 0x46b   :  { %v11757_v47 = vadd.f32 %v14957_v41, %v16943_v2  ;;  %v14981_v51 = vpop.f32.mrb[111].mxu1  ;;  %15281 = vmatprep.subr.bf16.mxu1 %v16574_v54  ;;  %v12621_v2 = vcombine.high %v104_v62, %v104_v62  ;;  %v16591_v46 = vld [vmem:[%s16991_s3 + $0x30] sm:$0xff]  }
 0x46d   :  { %v11797_v52 = vadd.f32 %v14979_v42, %v11757_v47  ;;  %15260 = vmatpush3.bf16.msra.mxu0 %v16575_v55  ;;  %12354 = vmatprep.mubr.bf16.mxu1 %v12621_v2  ;;  %v16590_v42 = vld [vmem:[%s16991_s3 + $0x28] sm:$0xff]   ;;  %v16592_v47 = vld [vmem:[%s16991_s3 + $0x38] sm:$0xff]  }
 0x46e   :  { %15282 = vmatpush3.bf16.msra.mxu1 %v16576_v56  ;;  %15261 = vmatprep.subr.bf16.mxu0 %v16577_v57 }
 0x46f   :  { %15283 = vmatprep.subr.bf16.mxu1 %v16578_v58 }
 0x471   :  { %15262 = vmatpush3.bf16.msra.mxu0 %v16579_v59 }
 0x472   :  { %15284 = vmatpush3.bf16.msra.mxu1 %v16580_v60  ;;  %15300 = vmatprep.subr.bf16.mxu0 %v16620_v28 }
 0x474   :  { %12315 = vmatmul.mubr.bf16.vlgmr.msra.gmra.mrb[136].mxu0 %v12618_v63 }
 0x475   :  { %12355 = vmatmul.mubr.bf16.vlgmr.msra.gmra.mrb[136].mxu1 %v12620_v1  ;;  %15301 = vmatpush3.bf16.msra.mxu0 %v16585_v27 }
 0x476   :  { %15302 = vmatprep.subr.bf16.mxu0 %v16620_v28  ;;  %15316 = vmatprep.mubr.msk.bf16.mxu0 %vm16621_vm0, %v16620_v28 }
 0x479   :  { %15303 = vmatpush3.bf16.msra.mxu0 %v16586_v29 }
 0x47a   :  { %15304 = vmatprep.subr.bf16.mxu0 %v16620_v28 }
 0x47d   :  { %15305 = vmatpush3.bf16.msra.mxu0 %v16587_v30 }
 0x47e   :  { %15306 = vmatprep.subr.bf16.mxu0 %v16620_v28 }
 0x481   :  { %15307 = vmatpush3.bf16.msra.mxu0 %v16588_v31 }
 0x482   :  { %15308 = vmatprep.subr.bf16.mxu0 %v16620_v28 }
 0x485   :  { %15309 = vmatpush3.bf16.msra.mxu0 %v16589_v32 }
 0x486   :  { %15310 = vmatprep.subr.bf16.mxu0 %v16620_v28 }
 0x487   :  { %v14999_v3 = vpop.f32.mrb[112].mxu0 }
 0x488   :  { %v15021_v4 = vpop.f32.mrb[112].mxu1  ;;  %v15000_v5 = vpop.f32.mrb[113].mxu0 }
 0x489   :  { %v15022_v6 = vpop.f32.mrb[113].mxu1  ;;  %v15001_v7 = vadd.f32 %v15000_v5, %v14999_v3  ;;  %v15002_v9 = vpop.f32.mrb[114].mxu0  ;;  %15311 = vmatpush3.bf16.msra.mxu0 %v16590_v42 }
 0x48a   :  { %v15023_v8 = vadd.f32 %v15022_v6, %v15021_v4  ;;  %v15024_v10 = vpop.f32.mrb[114].mxu1  ;;  %v15003_v11 = vpop.f32.mrb[115].mxu0  ;;  %15312 = vmatprep.subr.bf16.mxu0 %v16620_v28 }
 0x48b   :  { %v15025_v12 = vpop.f32.mrb[115].mxu1  ;;  %v11837_v13 = vadd.f32 %v15001_v7, %v11797_v52 }
 0x48d   :  { %v11877_v14 = vadd.f32 %v15023_v8, %v11837_v13  ;;  %15313 = vmatpush3.bf16.msra.mxu0 %v16591_v46 }
 0x48e   :  { %15314 = vmatprep.subr.bf16.mxu0 %v16620_v28 }
 0x491   :  { %15315 = vmatpush3.bf16.msra.mxu0 %v16592_v47 }
 0x4a7   :  { %v15043_v15 = vpop.f32.mrb[116].mxu0 }
 0x4a8   :  { %v15065_v16 = vpop.f32.mrb[116].mxu1  ;;  %v15044_v17 = vpop.f32.mrb[117].mxu0 }
 0x4a9   :  { %v15045_v18 = vadd.f32 %v15044_v17, %v15043_v15  ;;  %v15066_v19 = vpop.f32.mrb[117].mxu1  ;;  %v15046_v20 = vpop.f32.mrb[118].mxu0 }
 0x4aa   :  { %v15067_v21 = vadd.f32 %v15066_v19, %v15065_v16  ;;  %v15068_v22 = vpop.f32.mrb[118].mxu1  ;;  %v15047_v23 = vpop.f32.mrb[119].mxu0 }
 0x4ab   :  { %v11917_v24 = vadd.f32 %v15045_v18, %v11877_v14  ;;  %v15069_v25 = vpop.f32.mrb[119].mxu1 }
 0x4ad   :  { %v11957_v26 = vadd.f32 %v15067_v21, %v11917_v24 }
 0x4c7   :  { %v15087_v33 = vpop.f32.mrb[120].mxu0 }
 0x4c8   :  { %v15109_v34 = vpop.f32.mrb[120].mxu1  ;;  %v15088_v35 = vpop.f32.mrb[121].mxu0 }
 0x4c9   :  { %v15089_v36 = vadd.f32 %v15088_v35, %v15087_v33  ;;  %v15110_v37 = vpop.f32.mrb[121].mxu1  ;;  %v15090_v38 = vpop.f32.mrb[122].mxu0 }
 0x4ca   :  { %v15111_v39 = vadd.f32 %v15110_v37, %v15109_v34  ;;  %v15112_v40 = vpop.f32.mrb[122].mxu1  ;;  %v15091_v41 = vpop.f32.mrb[123].mxu0  ;;  %v13742_v34 = vld [vmem:[%s16992_s4] ss:$0 sm:$0xff] }
 0x4cb   :  { %v11997_v43 = vadd.f32 %v15089_v36, %v11957_v26  ;;  %v15113_v44 = vpop.f32.mrb[123].mxu1 }
 0x4cd   :  { %v12037_v45 = vadd.f32 %v15111_v39, %v11997_v43 }
 0x4e7   :  { %v15131_v48 = vpop.f32.mrb[124].mxu0 }
 0x4e8   :  { %v15153_v49 = vpop.f32.mrb[124].mxu1  ;;  %v15132_v50 = vpop.f32.mrb[125].mxu0 }
 0x4e9   :  { %v15154_v51 = vpop.f32.mrb[125].mxu1  ;;  %v15133_v52 = vadd.f32 %v15132_v50, %v15131_v48  ;;  %v15134_v54 = vpop.f32.mrb[126].mxu0 }
 0x4ea   :  { %v15155_v53 = vadd.f32 %v15154_v51, %v15153_v49  ;;  %v15156_v55 = vpop.f32.mrb[126].mxu1  ;;  %v15135_v56 = vpop.f32.mrb[127].mxu0 }
 0x4eb   :  { %v15157_v57 = vpop.f32.mrb[127].mxu1  ;;  %v12077_v58 = vadd.f32 %v15133_v52, %v12037_v45 }
 0x4ed   :  { %v12117_v59 = vadd.f32 %v15155_v53, %v12077_v58 }
 0x507   :  { %v15175_v60 = vpop.f32.mrb[128].mxu0 }
 0x508   :  { %v15197_v61 = vpop.f32.mrb[128].mxu1  ;;  %v15176_v62 = vpop.f32.mrb[129].mxu0 }
 0x509   :  { %v15177_v63 = vadd.f32 %v15176_v62, %v15175_v60  ;;  %v15198_v0 = vpop.f32.mrb[129].mxu1  ;;  %v15178_v1 = vpop.f32.mrb[130].mxu0 }
 0x50a   :  { %v15199_v2 = vadd.f32 %v15198_v0, %v15197_v61  ;;  %v15200_v3 = vpop.f32.mrb[130].mxu1  ;;  %v15179_v4 = vpop.f32.mrb[131].mxu0 }
 0x50b   :  { %v12157_v5 = vadd.f32 %v15177_v63, %v12117_v59  ;;  %v15201_v6 = vpop.f32.mrb[131].mxu1 }
 0x50d   :  { %v12197_v7 = vadd.f32 %v15199_v2, %v12157_v5 }
 0x527   :  { %v15219_v8 = vpop.f32.mrb[132].mxu0 }
 0x528   :  { %v15241_v9 = vpop.f32.mrb[132].mxu1  ;;  %v15220_v10 = vpop.f32.mrb[133].mxu0 }
 0x529   :  { %v15221_v11 = vadd.f32 %v15220_v10, %v15219_v8  ;;  %v15242_v12 = vpop.f32.mrb[133].mxu1  ;;  %v15222_v13 = vpop.f32.mrb[134].mxu0 }
 0x52a   :  { %v15243_v14 = vadd.f32 %v15242_v12, %v15241_v9  ;;  %v15244_v15 = vpop.f32.mrb[134].mxu1  ;;  %v15223_v16 = vpop.f32.mrb[135].mxu0 }
 0x52b   :  { %v12237_v17 = vadd.f32 %v15221_v11, %v12197_v7  ;;  %v15245_v18 = vpop.f32.mrb[135].mxu1 }
 0x52d   :  { %v12277_v19 = vadd.f32 %v15243_v14, %v12237_v17 }
 0x547   :  { %v15263_v20 = vpop.f32.mrb[136].mxu0 }
 0x548   :  { %v15285_v21 = vpop.f32.mrb[136].mxu1  ;;  %v15264_v22 = vpop.f32.mrb[137].mxu0 }
 0x549   :  { %v15265_v23 = vadd.f32 %v15264_v22, %v15263_v20  ;;  %v15286_v24 = vpop.f32.mrb[137].mxu1  ;;  %v15266_v25 = vpop.f32.mrb[138].mxu0 }
 0x54a   :  { %v15287_v26 = vadd.f32 %v15286_v24, %v15285_v21  ;;  %v15288_v27 = vpop.f32.mrb[138].mxu1  ;;  %v15267_v28 = vpop.f32.mrb[139].mxu0 }
 0x54b   :  { %v12317_v29 = vadd.f32 %v15265_v23, %v12277_v19  ;;  %v15289_v30 = vpop.f32.mrb[139].mxu1 }
 0x54d   :  { %v12357_v31 = vadd.f32 %v15287_v26, %v12317_v29 }
 0x54f   :  { %v12362_v32 = vmax.f32 %v12357_v31, 0.0 }
 0x551   :  { %v12363_v33 = vpack.c.bf16 %v12362_v32, %v12362_v32 }
 0x553   :  { %15317 = vmatmul.mubr.bf16.vlgmr.msra.gmra.mrb[140].mxu0 %v12363_v33 }
 0x626   :  { %v12469_v35 = vpop.f32.mrb[140].mxu0 }
 0x627   :  { %v12470_v36 = vadd.f32 %v13742_v34, %v12469_v35  ;;  %v15318_v37 = vpop.f32.mrb[141].mxu0 }
 0x628   :  { %v12472_v38 = vpop.f32.mrb[142].mxu0 }
 0x629   :  { %12475 = vst [vmem:[%s16993_s5] sm:$0xff] %v12470_v36  ;;  %v15319_v39 = vpop.f32.mrb[143].mxu0 }
 0x62a   :  { %12480 = vsyncpa [#allocation3], 1 }

</bundles_post_ra>
